<compile_context>
chip_gen: v7x
topology: tpu7x:2x2x1
jax: 0.10.0
libtpu: 0.0.40
codegen_flags: <defaults>
</compile_context>

<pallas_src>
import functools
import math

import jax
import jax.numpy as jnp
from jax.experimental import pallas as pl
from jax.experimental.pallas import tpu as pltpu


# ----------------------------------------------------------------------------
# Helpers
# ----------------------------------------------------------------------------
def _layernorm(v, eps=1e-5):
    m = jnp.mean(v, axis=-1, keepdims=True)
    var = jnp.mean(jnp.square(v - m), axis=-1, keepdims=True)
    return (v - m) * jax.lax.rsqrt(var + eps)


# ----------------------------------------------------------------------------
# Fused SiT kernel: conditioning + patch embed + all blocks + final norm/proj
# grid = (B, depth); one batch element per parallel grid row, depth serial.
# ----------------------------------------------------------------------------
def _sit_kernel(
    # conditioning inputs
    t_sc_ref, pool_ref,
    tw1_ref, tb1_ref, tw2_ref, tb2_ref,
    xw1_ref, xb1_ref, xw2_ref, xb2_ref,
    aw_ref, ab_ref,
    # token path
    patches_ref, patch_w_ref, patch_b_ref, pos_ref,
    cos_ref, sin_e_ref, sin_o_ref,
    # per-depth block weights
    qkv_w_ref, qkv_b_ref, p_w_ref, p_b_ref,
    f1_w_ref, f1_b_ref, f2_w_ref, f2_b_ref,
    # output head
    g_out_ref, b_out_ref, w_out_ref, b2_out_ref,
    # output
    o_ref,
    # scratch
    x_scr, mod_scr,
    *, N, D, H, depth, use_text,
):
    d = pl.program_id(1)
    hd = D // H

    # ---- step d == 0: patch embedding + full conditioning for this batch row
    @pl.when(d == 0)
    def _init():
        tok = jnp.dot(patches_ref[...].astype(jnp.bfloat16), patch_w_ref[...],
                      preferred_element_type=jnp.float32) + patch_b_ref[...]
        x_scr[...] = tok + pos_ref[...]

        # timestep MLP: Linear -> SiLU -> Linear
        h = jnp.dot(t_sc_ref[0].astype(jnp.bfloat16), tw1_ref[...],
                    preferred_element_type=jnp.float32) + tb1_ref[...]
        h = h * jax.nn.sigmoid(h)
        emb = jnp.dot(h.astype(jnp.bfloat16), tw2_ref[...],
                      preferred_element_type=jnp.float32) + tb2_ref[...]
        if use_text:
            g = jnp.dot(pool_ref[0].astype(jnp.bfloat16), xw1_ref[...],
                        preferred_element_type=jnp.float32) + xb1_ref[...]
            g = g * jax.nn.sigmoid(g)
            emb = emb + jnp.dot(g.astype(jnp.bfloat16), xw2_ref[...],
                                preferred_element_type=jnp.float32) + xb2_ref[...]
        # adaLN for every block: Linear(SiLU(emb)), columns packed depth-major
        # in (shift_msa, scale_msa, gate_msa, shift_mlp, scale_mlp, gate_mlp)
        # order (self-consistent with the synthetic ada_w packing below).
        se = emb * jax.nn.sigmoid(emb)
        modul = jnp.dot(se.astype(jnp.bfloat16), aw_ref[...],
                        preferred_element_type=jnp.float32) + ab_ref[...]   # (1, depth*6*D)
        for dd in range(depth):
            for ii in range(6):
                base = (dd * 6 + ii) * D
                mod_scr[dd, ii] = modul[:, base:base + D]

    x = x_scr[...]                      # (N, D) f32, resident across depth steps
    mod = mod_scr[d]                    # (6, 1, D) -> leading-index slices
    shift_msa, scale_msa, gate_msa = mod[0], mod[1], mod[2]
    shift_mlp, scale_mlp, gate_mlp = mod[3], mod[4], mod[5]

    # ---- attention branch: fused QKV projection ------------------------------
    xm = _layernorm(x) * (1.0 + scale_msa) + shift_msa
    qkv = jnp.dot(xm.astype(jnp.bfloat16), qkv_w_ref[0],
                  preferred_element_type=jnp.float32) + qkv_b_ref[0]        # (N, 3D)
    q = qkv[:, :D]                      # softmax scale pre-folded into Q columns
    k = qkv[:, D:2 * D]
    v = qkv[:, 2 * D:]

    # interleaved RoPE with pre-signed / masked sin tables (rolls -> XLU slot)
    cosf = cos_ref[...]
    sine = sin_e_ref[...]
    sino = sin_o_ref[...]

    def rope(u):
        return (u * cosf
                + pltpu.roll(u, D - 1, axis=1) * sine
                + pltpu.roll(u, 1, axis=1) * sino)

    q = rope(q)
    k = rope(k)

    # head split (H static lane slices per tensor) + batched 3-D contractions
    qz = jnp.stack([q[:, h_i * hd:(h_i + 1) * hd] for h_i in range(H)],
                   axis=0).astype(jnp.bfloat16)                             # (H, N, hd)
    kz = jnp.stack([k[:, h_i * hd:(h_i + 1) * hd] for h_i in range(H)],
                   axis=0).astype(jnp.bfloat16)
    vz = jnp.stack([v[:, h_i * hd:(h_i + 1) * hd] for h_i in range(H)],
                   axis=0).astype(jnp.bfloat16)

    s = jnp.einsum("hqd,hkd->hqk", qz, kz, preferred_element_type=jnp.float32)
    s = s - jnp.max(s, axis=-1, keepdims=True)
    p = jnp.exp(s)
    p = p * pl.reciprocal(jnp.sum(p, axis=-1, keepdims=True), approx=True)
    oz = jnp.einsum("hqk,hkd->hqd", p.astype(jnp.bfloat16), vz,
                    preferred_element_type=jnp.float32)                     # (H, N, hd)
    attn = jnp.concatenate([oz[h_i] for h_i in range(H)], axis=-1)          # (N, D)

    y = jnp.dot(attn.astype(jnp.bfloat16), p_w_ref[0],
                preferred_element_type=jnp.float32) + p_b_ref[0]
    x = x + gate_msa * y

    # ---- MLP branch -----------------------------------------------------------
    xm = _layernorm(x) * (1.0 + scale_mlp) + shift_mlp
    h1 = jnp.dot(xm.astype(jnp.bfloat16), f1_w_ref[0],
                 preferred_element_type=jnp.float32) + f1_b_ref[0]
    # tanh GELU -> EUP slot (small numerical deviation vs. exact-erf nn.GELU()).
    h1 = jax.nn.gelu(h1, approximate=True)
    h2 = jnp.dot(h1.astype(jnp.bfloat16), f2_w_ref[0],
                 preferred_element_type=jnp.float32) + f2_b_ref[0]
    x = x + gate_mlp * h2

    @pl.when(d < depth - 1)
    def _stash():
        x_scr[...] = x

    # ---- final LayerNorm(affine) + proj_out (lane-dense padded output) -------
    @pl.when(d == depth - 1)
    def _final():
        xn = _layernorm(x) * g_out_ref[...] + b_out_ref[...]
        o_ref[...] = jnp.dot(xn.astype(jnp.bfloat16), w_out_ref[...],
                             preferred_element_type=jnp.float32) + b2_out_ref[...]


def run_sit_stack(params, cfg, patches, t_sc, pool, pos, cos_f, sin_e, sin_o,
                  w_out, b_out, use_text):
    depth, D, H = cfg.depth, cfg.dim, cfg.num_heads
    B = t_sc.shape[0]
    N = pos.shape[0]
    CPP = patches.shape[-1]
    TE = params["time_w1"].shape[1]
    TXD = params["text_w1"].shape[0]
    HID = params["f1_w"].shape[-1]
    DoutP = w_out.shape[-1]
    M6 = depth * 6 * D

    def full(shape):
        return pl.BlockSpec(shape, lambda b, d, _r=len(shape): (0,) * _r)

    def per_b(tail):
        return pl.BlockSpec((1,) + tail, lambda b, d, _t=len(tail): (b,) + (0,) * _t)

    def per_d(tail):
        return pl.BlockSpec((1,) + tail, lambda b, d, _t=len(tail): (d,) + (0,) * _t)

    kernel = functools.partial(_sit_kernel, N=N, D=D, H=H, depth=depth,
                               use_text=use_text)

    return pl.pallas_call(
        kernel,
        out_shape=jax.ShapeDtypeStruct((B * N, DoutP), jnp.float32),
        grid=(B, depth),
        in_specs=[
            per_b((1, D)),                                   # t_sc  (B,1,D)
            per_b((1, TXD)),                                 # pool  (B,1,TXD)
            full((D, TE)), full((1, TE)), full((TE, TE)), full((1, TE)),
            full((TXD, TE)), full((1, TE)), full((TE, TE)), full((1, TE)),
            full((TE, M6)), full((1, M6)),
            pl.BlockSpec((N, CPP), lambda b, d: (b, 0)),     # patches (B*N, CPP)
            full((CPP, D)), full((1, D)), full((N, D)),      # patch_w/b, pos
            full((N, D)), full((N, D)), full((N, D)),        # cos, sin_e, sin_o
            per_d((D, 3 * D)), per_d((1, 3 * D)),
            per_d((D, D)), per_d((1, D)),
            per_d((D, HID)), per_d((1, HID)),
            per_d((HID, D)), per_d((1, D)),
            full((1, D)), full((1, D)),                      # norm_out g/b
            full((D, DoutP)), full((1, DoutP)),              # proj_out (padded)
        ],
        out_specs=pl.BlockSpec((N, DoutP), lambda b, d: (b, 0)),
        scratch_shapes=[pltpu.VMEM((N, D), jnp.float32),
                        pltpu.VMEM((depth, 6, 1, D), jnp.float32)],
        compiler_params=pltpu.CompilerParams(
            dimension_semantics=("parallel", "arbitrary")),
    )(
        t_sc.reshape(B, 1, D), pool.reshape(B, 1, TXD),
        params["time_w1"], params["time_b1"], params["time_w2"], params["time_b2"],
        params["text_w1"], params["text_b1"], params["text_w2"], params["text_b2"],
        params["ada_w"], params["ada_b"],
        patches, params["patch_w"], params["patch_b"], pos,
        cos_f, sin_e, sin_o,
        params["qkv_w"], params["qkv_b"], params["p_w"], params["p_b"],
        params["f1_w"], params["f1_b"], params["f2_w"], params["f2_b"],
        params["norm_out_g"], params["norm_out_b"], w_out, b_out,
    )


# ----------------------------------------------------------------------------
# Model config / synthetic params (deterministic)
# ----------------------------------------------------------------------------
class Cfg:
    in_channels = 4
    out_channels = 4
    patch_size = 2
    dim = 64
    depth = 2
    num_heads = 4
    mlp_ratio = 4.0
    text_embed_dim = 768 + 1280
    max_patches = 64


def _xavier(key, shape):
    fan_in, fan_out = shape[-2], shape[-1]
    lim = math.sqrt(6.0 / (fan_in + fan_out))
    return jax.random.uniform(key, shape, jnp.float32, -lim, lim)


def init_params(key, cfg: Cfg):
    D = cfg.dim
    TE = 4 * D
    HID = int(D * cfg.mlp_ratio)
    P = cfg.patch_size
    CPP = cfg.in_channels * P * P
    depth = cfg.depth
    TXD = cfg.text_embed_dim
    Dout = P * P * cfg.out_channels
    scale = (D // cfg.num_heads) ** -0.5
    bf16 = jnp.bfloat16

    keys = iter(jax.random.split(key, 40))
    nk = lambda: next(keys)
    bias = lambda k, n: (0.01 * jax.random.normal(k, (n,), jnp.float32)).reshape(1, n)
    biasd = lambda k, n: 0.01 * jax.random.normal(k, (depth, 1, n), jnp.float32)

    p = {}
    # patch_embed (Conv2d k=P s=P) expressed as (C*P*P, D) matmul
    p["patch_w"] = _xavier(nk(), (CPP, D)).astype(bf16)
    p["patch_b"] = bias(nk(), D)
    p["pos_embed"] = 0.02 * jax.random.normal(nk(), (1, cfg.max_patches, D), jnp.float32)

    # timestep / text embedding MLPs
    p["time_w1"] = _xavier(nk(), (D, TE)).astype(bf16); p["time_b1"] = bias(nk(), TE)
    p["time_w2"] = _xavier(nk(), (TE, TE)).astype(bf16); p["time_b2"] = bias(nk(), TE)
    p["text_w1"] = _xavier(nk(), (TXD, TE)).astype(bf16); p["text_b1"] = bias(nk(), TE)
    p["text_w2"] = _xavier(nk(), (TE, TE)).astype(bf16); p["text_b2"] = bias(nk(), TE)

    # adaLN Linear of every block packed depth-major along output columns
    p["ada_w"] = (0.1 * _xavier(nk(), (TE, depth * 6 * D))).astype(bf16)
    p["ada_b"] = bias(nk(), depth * 6 * D)

    # transformer blocks (stacked along depth); fused QKV with the softmax
    # scale hd**-0.5 folded into the Q columns / bias.
    q_w = _xavier(nk(), (depth, D, D)) * scale
    k_w = _xavier(nk(), (depth, D, D))
    v_w = _xavier(nk(), (depth, D, D))
    q_b = biasd(nk(), D) * scale
    k_b = biasd(nk(), D)
    v_b = biasd(nk(), D)
    p["qkv_w"] = jnp.concatenate([q_w, k_w, v_w], axis=-1).astype(bf16)   # (depth, D, 3D)
    p["qkv_b"] = jnp.concatenate([q_b, k_b, v_b], axis=-1)                # (depth, 1, 3D)

    p["p_w"] = _xavier(nk(), (depth, D, D)).astype(bf16); p["p_b"] = biasd(nk(), D)
    p["f1_w"] = _xavier(nk(), (depth, D, HID)).astype(bf16); p["f1_b"] = biasd(nk(), HID)
    p["f2_w"] = _xavier(nk(), (depth, HID, D)).astype(bf16); p["f2_b"] = biasd(nk(), D)

    # output head
    p["norm_out_g"] = jnp.ones((1, D), jnp.float32)
    p["norm_out_b"] = jnp.zeros((1, D), jnp.float32)
    p["proj_out_w"] = _xavier(nk(), (D, Dout)).astype(bf16)
    p["proj_out_b"] = bias(nk(), Dout)
    return p


# ----------------------------------------------------------------------------
# Forward pass
# ----------------------------------------------------------------------------
def sit_xl_forward(params, cfg: Cfg, x, t, text_embeddings, text_embeddings_pool):
    del text_embeddings  # reference forward only conditions on the pooled embedding
    B, C, Himg, Wimg = x.shape
    P, D, H = cfg.patch_size, cfg.dim, cfg.num_heads
    hg, wg = Himg // P, Wimg // P
    N = hg * wg
    hd = D // H
    Dout = P * P * cfg.out_channels

    # ---- patch-embed im2col (the matmul itself runs inside the fused kernel) --
    patches = x.reshape(B, C, hg, P, wg, P)
    patches = jnp.transpose(patches, (0, 2, 4, 1, 3, 5)).reshape(B * N, C * P * P)

    # ---- sinusoidal timestep features (tiny JAX glue) ----
    half = D // 2
    freqs = jnp.exp(-math.log(10000.0) * jnp.arange(half, dtype=jnp.float32) / half)
    args = t.astype(jnp.float32)[:, None] * freqs[None, :]
    t_sc = jnp.concatenate([jnp.cos(args), jnp.sin(args)], axis=-1)       # (B, D)

    use_text = text_embeddings_pool is not None
    pool = (text_embeddings_pool if use_text
            else jnp.zeros((B, cfg.text_embed_dim), jnp.float32))
    # TODO(synk): class_embed (nn.Embedding) omitted — num_classes=None in the reference config.

    # ---- RoPE tables: pair-expanded, tiled over heads, pre-signed/masked sin --
    rfreqs = 1.0 / (10000.0 ** (jnp.arange(0, hd, 2, dtype=jnp.float32)[: hd // 2] / hd))
    ang = jnp.arange(N, dtype=jnp.float32)[:, None] * rfreqs[None, :]
    cos_f = jnp.tile(jnp.repeat(jnp.cos(ang), 2, axis=1), (1, H))         # (N, D)
    sin_f = jnp.tile(jnp.repeat(jnp.sin(ang), 2, axis=1), (1, H))
    even = (jnp.arange(D) % 2) == 0
    sin_e = jnp.where(even[None, :], -sin_f, 0.0)   # multiplies roll(u, D-1)
    sin_o = jnp.where(even[None, :], 0.0, sin_f)    # multiplies roll(u, 1)

    pos = params["pos_embed"][0, :N, :]                                   # (N, D)

    # ---- pad proj_out to a lane-dense 128-wide output slab ----
    DoutP = -(-Dout // 128) * 128
    w_out = jnp.pad(params["proj_out_w"], ((0, 0), (0, DoutP - Dout)))
    b_out = jnp.pad(params["proj_out_b"], ((0, 0), (0, DoutP - Dout)))

    # ---- one fused kernel: conditioning + patch embed + blocks + head ----
    out = run_sit_stack(params, cfg, patches, t_sc, pool, pos, cos_f, sin_e, sin_o,
                        w_out, b_out, use_text)
    out = out.reshape(B, N, DoutP)[:, :, :Dout]                           # (B, N, P*P*Cout)

    # ---- unpatchify (JAX glue) ----
    out = out.reshape(B, hg, wg, P, P, cfg.out_channels)
    out = jnp.einsum("bhwpqc->bchpwq", out)
    return out.reshape(B, cfg.out_channels, Himg, Wimg)


# ----------------------------------------------------------------------------
if __name__ == "__main__":
    cfg = Cfg()
    B, C, Himg, Wimg = 2, cfg.in_channels, 16, 16

    key = jax.random.PRNGKey(0)
    kp, kx, kt, kte, ktp = jax.random.split(key, 5)

    params = init_params(kp, cfg)
    x = jax.random.normal(kx, (B, C, Himg, Wimg), jnp.float32)
    t = jax.random.uniform(kt, (B,), jnp.float32) * 999.0
    text_embeddings = jax.random.normal(kte, (B, 8, cfg.text_embed_dim), jnp.float32)
    text_pool = jax.random.normal(ktp, (B, cfg.text_embed_dim), jnp.float32)

    fwd = jax.jit(lambda xi, ti, tei, tpi: sit_xl_forward(params, cfg, xi, ti, tei, tpi))
    out = fwd(x, t, text_embeddings, text_pool)
    out = jax.block_until_ready(out)

    assert out.shape == (B, cfg.out_channels, Himg, Wimg), out.shape
    assert bool(jnp.all(jnp.isfinite(out)))
    print("KERNEL_OK")
</pallas_src>

<mosaic_0001>
module attributes {stable_mosaic.version = 11 : i64} {
  func.func @_sit_kernel(%arg0: i32, %arg1: i32, %arg2: memref<1x1x64xf32, #tpu.memory_space<vmem>>, %arg3: memref<1x1x2048xf32, #tpu.memory_space<vmem>>, %arg4: memref<64x256xbf16, #tpu.memory_space<vmem>>, %arg5: memref<1x256xf32, #tpu.memory_space<vmem>>, %arg6: memref<256x256xbf16, #tpu.memory_space<vmem>>, %arg7: memref<1x256xf32, #tpu.memory_space<vmem>>, %arg8: memref<2048x256xbf16, #tpu.memory_space<vmem>>, %arg9: memref<1x256xf32, #tpu.memory_space<vmem>>, %arg10: memref<256x256xbf16, #tpu.memory_space<vmem>>, %arg11: memref<1x256xf32, #tpu.memory_space<vmem>>, %arg12: memref<256x768xbf16, #tpu.memory_space<vmem>>, %arg13: memref<1x768xf32, #tpu.memory_space<vmem>>, %arg14: memref<64x16xf32, #tpu.memory_space<vmem>>, %arg15: memref<16x64xbf16, #tpu.memory_space<vmem>>, %arg16: memref<1x64xf32, #tpu.memory_space<vmem>>, %arg17: memref<64x64xf32, #tpu.memory_space<vmem>>, %arg18: memref<64x64xf32, #tpu.memory_space<vmem>>, %arg19: memref<64x64xf32, #tpu.memory_space<vmem>>, %arg20: memref<64x64xf32, #tpu.memory_space<vmem>>, %arg21: memref<1x64x192xbf16, #tpu.memory_space<vmem>>, %arg22: memref<1x1x192xf32, #tpu.memory_space<vmem>>, %arg23: memref<1x64x64xbf16, #tpu.memory_space<vmem>>, %arg24: memref<1x1x64xf32, #tpu.memory_space<vmem>>, %arg25: memref<1x64x256xbf16, #tpu.memory_space<vmem>>, %arg26: memref<1x1x256xf32, #tpu.memory_space<vmem>>, %arg27: memref<1x256x64xbf16, #tpu.memory_space<vmem>>, %arg28: memref<1x1x64xf32, #tpu.memory_space<vmem>>, %arg29: memref<1x64xf32, #tpu.memory_space<vmem>>, %arg30: memref<1x64xf32, #tpu.memory_space<vmem>>, %arg31: memref<64x128xbf16, #tpu.memory_space<vmem>>, %arg32: memref<1x128xf32, #tpu.memory_space<vmem>>, %arg33: memref<64x128xf32, #tpu.memory_space<vmem>>, %arg34: memref<64x64xf32, #tpu.memory_space<vmem>>, %arg35: memref<2x6x1x64xf32, #tpu.memory_space<vmem>>) attributes {dimension_semantics = [#tpu.dimension_semantics<parallel>, #tpu.dimension_semantics<arbitrary>], iteration_bounds = array<i64: 2, 2>, scalar_prefetch = 0 : i64, scratch_operands = 2 : i64, tpu.core_type = #tpu.core_type<tc>, window_params = [{transform_indices = @transform_0, window_bounds = array<i64: 1, 1, 64>}, {transform_indices = @transform_1, window_bounds = array<i64: 1, 1, 2048>}, {pipeline_mode = #tpu.pipeline_mode<synchronous>, transform_indices = @transform_2, window_bounds = array<i64: 64, 256>}, {pipeline_mode = #tpu.pipeline_mode<synchronous>, transform_indices = @transform_3, window_bounds = array<i64: 1, 256>}, {pipeline_mode = #tpu.pipeline_mode<synchronous>, transform_indices = @transform_4, window_bounds = array<i64: 256, 256>}, {pipeline_mode = #tpu.pipeline_mode<synchronous>, transform_indices = @transform_5, window_bounds = array<i64: 1, 256>}, {pipeline_mode = #tpu.pipeline_mode<synchronous>, transform_indices = @transform_6, window_bounds = array<i64: 2048, 256>}, {pipeline_mode = #tpu.pipeline_mode<synchronous>, transform_indices = @transform_7, window_bounds = array<i64: 1, 256>}, {pipeline_mode = #tpu.pipeline_mode<synchronous>, transform_indices = @transform_8, window_bounds = array<i64: 256, 256>}, {pipeline_mode = #tpu.pipeline_mode<synchronous>, transform_indices = @transform_9, window_bounds = array<i64: 1, 256>}, {pipeline_mode = #tpu.pipeline_mode<synchronous>, transform_indices = @transform_10, window_bounds = array<i64: 256, 768>}, {pipeline_mode = #tpu.pipeline_mode<synchronous>, transform_indices = @transform_11, window_bounds = array<i64: 1, 768>}, {transform_indices = @transform_12, window_bounds = array<i64: 64, 16>}, {pipeline_mode = #tpu.pipeline_mode<synchronous>, transform_indices = @transform_13, window_bounds = array<i64: 16, 64>}, {pipeline_mode = #tpu.pipeline_mode<synchronous>, transform_indices = @transform_14, window_bounds = array<i64: 1, 64>}, {pipeline_mode = #tpu.pipeline_mode<synchronous>, transform_indices = @transform_15, window_bounds = array<i64: 64, 64>}, {pipeline_mode = #tpu.pipeline_mode<synchronous>, transform_indices = @transform_16, window_bounds = array<i64: 64, 64>}, {pipeline_mode = #tpu.pipeline_mode<synchronous>, transform_indices = @transform_17, window_bounds = array<i64: 64, 64>}, {pipeline_mode = #tpu.pipeline_mode<synchronous>, transform_indices = @transform_18, window_bounds = array<i64: 64, 64>}, {transform_indices = @transform_19, window_bounds = array<i64: 1, 64, 192>}, {transform_indices = @transform_20, window_bounds = array<i64: 1, 1, 192>}, {transform_indices = @transform_21, window_bounds = array<i64: 1, 64, 64>}, {transform_indices = @transform_22, window_bounds = array<i64: 1, 1, 64>}, {transform_indices = @transform_23, window_bounds = array<i64: 1, 64, 256>}, {transform_indices = @transform_24, window_bounds = array<i64: 1, 1, 256>}, {transform_indices = @transform_25, window_bounds = array<i64: 1, 256, 64>}, {transform_indices = @transform_26, window_bounds = array<i64: 1, 1, 64>}, {pipeline_mode = #tpu.pipeline_mode<synchronous>, transform_indices = @transform_27, window_bounds = array<i64: 1, 64>}, {pipeline_mode = #tpu.pipeline_mode<synchronous>, transform_indices = @transform_28, window_bounds = array<i64: 1, 64>}, {pipeline_mode = #tpu.pipeline_mode<synchronous>, transform_indices = @transform_29, window_bounds = array<i64: 64, 128>}, {pipeline_mode = #tpu.pipeline_mode<synchronous>, transform_indices = @transform_30, window_bounds = array<i64: 1, 128>}, {transform_indices = @transform_31, window_bounds = array<i64: 64, 128>}]} {
    %c0_i32 = arith.constant 0 : i32
    %0 = arith.cmpi eq, %arg1, %c0_i32 : i32
    %1 = arith.extui %0 : i1 to i32
    %c0_i32_0 = arith.constant 0 : i32
    %2 = arith.cmpi ne, %1, %c0_i32_0 : i32
    scf.if %2 {
      %c0_64 = arith.constant 0 : index
      %c0_65 = arith.constant 0 : index
      %196 = vector.load %arg14[%c0_64, %c0_65] : memref<64x16xf32, #tpu.memory_space<vmem>>, vector<64x16xf32>
      %197 = arith.truncf %196 : vector<64x16xf32> to vector<64x16xbf16>
      %c0_66 = arith.constant 0 : index
      %c0_67 = arith.constant 0 : index
      %198 = vector.load %arg15[%c0_66, %c0_67] : memref<16x64xbf16, #tpu.memory_space<vmem>>, vector<16x64xbf16>
      %cst_68 = arith.constant dense<0.000000e+00> : vector<64x64xf32>
      %199 = tpu.matmul %197, %198, %cst_68 {dimension_numbers = #tpu.dot_dimension_numbers<[1], [0], [0], [1], [0, 0, 1, 1], [], []>} : vector<64x16xbf16>, vector<16x64xbf16>, vector<64x64xf32> -> vector<64x64xf32>
      %c0_69 = arith.constant 0 : index
      %c0_70 = arith.constant 0 : index
      %200 = vector.load %arg16[%c0_69, %c0_70] : memref<1x64xf32, #tpu.memory_space<vmem>>, vector<1x64xf32>
      %201 = vector.broadcast %200 : vector<1x64xf32> to vector<64x64xf32>
      %202 = arith.addf %199, %201 : vector<64x64xf32>
      %c0_71 = arith.constant 0 : index
      %c0_72 = arith.constant 0 : index
      %203 = vector.load %arg17[%c0_71, %c0_72] : memref<64x64xf32, #tpu.memory_space<vmem>>, vector<64x64xf32>
      %204 = arith.addf %202, %203 : vector<64x64xf32>
      %c0_73 = arith.constant 0 : index
      %c0_74 = arith.constant 0 : index
      %205 = vector.load %arg34[%c0_73, %c0_74] : memref<64x64xf32, #tpu.memory_space<vmem>>, vector<64x64xf32>
      tpu.vector_store %arg34[%c0_73, %c0_74], %204 {strides = array<i32>} : memref<64x64xf32, #tpu.memory_space<vmem>>, vector<64x64xf32>,
      %c0_75 = arith.constant 0 : index
      %c0_76 = arith.constant 0 : index
      %c0_77 = arith.constant 0 : index
      %206 = vector.load %arg2[%c0_75, %c0_76, %c0_77] : memref<1x1x64xf32, #tpu.memory_space<vmem>>, vector<1x1x64xf32>
      %207 = vector.shape_cast %206 : vector<1x1x64xf32> to vector<1x64xf32>
      %208 = arith.truncf %207 : vector<1x64xf32> to vector<1x64xbf16>
      %c0_78 = arith.constant 0 : index
      %c0_79 = arith.constant 0 : index
      %209 = vector.load %arg4[%c0_78, %c0_79] : memref<64x256xbf16, #tpu.memory_space<vmem>>, vector<64x256xbf16>
      %cst_80 = arith.constant dense<0.000000e+00> : vector<1x256xf32>
      %210 = tpu.matmul %208, %209, %cst_80 {dimension_numbers = #tpu.dot_dimension_numbers<[1], [0], [0], [1], [0, 0, 1, 1], [], []>} : vector<1x64xbf16>, vector<64x256xbf16>, vector<1x256xf32> -> vector<1x256xf32>
      %c0_81 = arith.constant 0 : index
      %c0_82 = arith.constant 0 : index
      %211 = vector.load %arg5[%c0_81, %c0_82] : memref<1x256xf32, #tpu.memory_space<vmem>>, vector<1x256xf32>
      %212 = arith.addf %210, %211 : vector<1x256xf32>
      %213 = arith.negf %212 : vector<1x256xf32>
      %214 = math.exp %213 : vector<1x256xf32>
      %cst_83 = arith.constant 1.000000e+00 : f32
      %215 = vector.broadcast %cst_83 : f32 to vector<1x256xf32>
      %216 = arith.addf %215, %214 : vector<1x256xf32>
      %217 = arith.divf %215, %216 : vector<1x256xf32>
      %218 = arith.mulf %212, %217 : vector<1x256xf32>
      %219 = arith.truncf %218 : vector<1x256xf32> to vector<1x256xbf16>
      %c0_84 = arith.constant 0 : index
      %c0_85 = arith.constant 0 : index
      %220 = vector.load %arg6[%c0_84, %c0_85] : memref<256x256xbf16, #tpu.memory_space<vmem>>, vector<256x256xbf16>
      %cst_86 = arith.constant dense<0.000000e+00> : vector<1x256xf32>
      %221 = tpu.matmul %219, %220, %cst_86 {dimension_numbers = #tpu.dot_dimension_numbers<[1], [0], [0], [1], [0, 0, 1, 1], [], []>} : vector<1x256xbf16>, vector<256x256xbf16>, vector<1x256xf32> -> vector<1x256xf32>
      %c0_87 = arith.constant 0 : index
      %c0_88 = arith.constant 0 : index
      %222 = vector.load %arg7[%c0_87, %c0_88] : memref<1x256xf32, #tpu.memory_space<vmem>>, vector<1x256xf32>
      %223 = arith.addf %221, %222 : vector<1x256xf32>
      %c0_89 = arith.constant 0 : index
      %c0_90 = arith.constant 0 : index
      %c0_91 = arith.constant 0 : index
      %224 = vector.load %arg3[%c0_89, %c0_90, %c0_91] : memref<1x1x2048xf32, #tpu.memory_space<vmem>>, vector<1x1x2048xf32>
      %225 = vector.shape_cast %224 : vector<1x1x2048xf32> to vector<1x2048xf32>
      %226 = arith.truncf %225 : vector<1x2048xf32> to vector<1x2048xbf16>
      %c0_92 = arith.constant 0 : index
      %c0_93 = arith.constant 0 : index
      %227 = vector.load %arg8[%c0_92, %c0_93] : memref<2048x256xbf16, #tpu.memory_space<vmem>>, vector<2048x256xbf16>
      %cst_94 = arith.constant dense<0.000000e+00> : vector<1x256xf32>
      %228 = tpu.matmul %226, %227, %cst_94 {dimension_numbers = #tpu.dot_dimension_numbers<[1], [0], [0], [1], [0, 0, 1, 1], [], []>} : vector<1x2048xbf16>, vector<2048x256xbf16>, vector<1x256xf32> -> vector<1x256xf32>
      %c0_95 = arith.constant 0 : index
      %c0_96 = arith.constant 0 : index
      %229 = vector.load %arg9[%c0_95, %c0_96] : memref<1x256xf32, #tpu.memory_space<vmem>>, vector<1x256xf32>
      %230 = arith.addf %228, %229 : vector<1x256xf32>
      %231 = arith.negf %230 : vector<1x256xf32>
      %232 = math.exp %231 : vector<1x256xf32>
      %cst_97 = arith.constant 1.000000e+00 : f32
      %233 = vector.broadcast %cst_97 : f32 to vector<1x256xf32>
      %234 = arith.addf %233, %232 : vector<1x256xf32>
      %235 = arith.divf %233, %234 : vector<1x256xf32>
      %236 = arith.mulf %230, %235 : vector<1x256xf32>
      %237 = arith.truncf %236 : vector<1x256xf32> to vector<1x256xbf16>
      %c0_98 = arith.constant 0 : index
      %c0_99 = arith.constant 0 : index
      %238 = vector.load %arg10[%c0_98, %c0_99] : memref<256x256xbf16, #tpu.memory_space<vmem>>, vector<256x256xbf16>
      %cst_100 = arith.constant dense<0.000000e+00> : vector<1x256xf32>
      %239 = tpu.matmul %237, %238, %cst_100 {dimension_numbers = #tpu.dot_dimension_numbers<[1], [0], [0], [1], [0, 0, 1, 1], [], []>} : vector<1x256xbf16>, vector<256x256xbf16>, vector<1x256xf32> -> vector<1x256xf32>
      %240 = arith.addf %223, %239 : vector<1x256xf32>
      %c0_101 = arith.constant 0 : index
      %c0_102 = arith.constant 0 : index
      %241 = vector.load %arg11[%c0_101, %c0_102] : memref<1x256xf32, #tpu.memory_space<vmem>>, vector<1x256xf32>
      %242 = arith.addf %240, %241 : vector<1x256xf32>
      %243 = arith.negf %242 : vector<1x256xf32>
      %244 = math.exp %243 : vector<1x256xf32>
      %cst_103 = arith.constant 1.000000e+00 : f32
      %245 = vector.broadcast %cst_103 : f32 to vector<1x256xf32>
      %246 = arith.addf %245, %244 : vector<1x256xf32>
      %247 = arith.divf %245, %246 : vector<1x256xf32>
      %248 = arith.mulf %242, %247 : vector<1x256xf32>
      %249 = arith.truncf %248 : vector<1x256xf32> to vector<1x256xbf16>
      %c0_104 = arith.constant 0 : index
      %c0_105 = arith.constant 0 : index
      %250 = vector.load %arg12[%c0_104, %c0_105] : memref<256x768xbf16, #tpu.memory_space<vmem>>, vector<256x768xbf16>
      %cst_106 = arith.constant dense<0.000000e+00> : vector<1x768xf32>
      %251 = tpu.matmul %249, %250, %cst_106 {dimension_numbers = #tpu.dot_dimension_numbers<[1], [0], [0], [1], [0, 0, 1, 1], [], []>} : vector<1x256xbf16>, vector<256x768xbf16>, vector<1x768xf32> -> vector<1x768xf32>
      %c0_107 = arith.constant 0 : index
      %c0_108 = arith.constant 0 : index
      %252 = vector.load %arg13[%c0_107, %c0_108] : memref<1x768xf32, #tpu.memory_space<vmem>>, vector<1x768xf32>
      %253 = arith.addf %251, %252 : vector<1x768xf32>
      %254 = vector.extract_strided_slice %253 {offsets = [0, 0], sizes = [1, 64], strides = [1, 1]} : vector<1x768xf32> to vector<1x64xf32>
      %c0_109 = arith.constant 0 : index
      %c0_110 = arith.constant 0 : index
      %c0_111 = arith.constant 0 : index
      %c0_112 = arith.constant 0 : index
      %255 = vector.load %arg35[%c0_109, %c0_110, %c0_111, %c0_112] : memref<2x6x1x64xf32, #tpu.memory_space<vmem>>, vector<1x1x1x64xf32>
      %256 = vector.shape_cast %255 : vector<1x1x1x64xf32> to vector<1x64xf32>
      %257 = vector.shape_cast %254 : vector<1x64xf32> to vector<1x1x1x64xf32>
      tpu.vector_store %arg35[%c0_109, %c0_110, %c0_111, %c0_112], %257 {strides = array<i32>} : memref<2x6x1x64xf32, #tpu.memory_space<vmem>>, vector<1x1x1x64xf32>,
      %258 = vector.extract_strided_slice %253 {offsets = [0, 64], sizes = [1, 64], strides = [1, 1]} : vector<1x768xf32> to vector<1x64xf32>
      %c0_113 = arith.constant 0 : index
      %c1 = arith.constant 1 : index
      %c0_114 = arith.constant 0 : index
      %c0_115 = arith.constant 0 : index
      %259 = vector.load %arg35[%c0_113, %c1, %c0_114, %c0_115] : memref<2x6x1x64xf32, #tpu.memory_space<vmem>>, vector<1x1x1x64xf32>
      %260 = vector.shape_cast %259 : vector<1x1x1x64xf32> to vector<1x64xf32>
      %261 = vector.shape_cast %258 : vector<1x64xf32> to vector<1x1x1x64xf32>
      tpu.vector_store %arg35[%c0_113, %c1, %c0_114, %c0_115], %261 {strides = array<i32>} : memref<2x6x1x64xf32, #tpu.memory_space<vmem>>, vector<1x1x1x64xf32>,
      %262 = vector.extract_strided_slice %253 {offsets = [0, 128], sizes = [1, 64], strides = [1, 1]} : vector<1x768xf32> to vector<1x64xf32>
      %c0_116 = arith.constant 0 : index
      %c2 = arith.constant 2 : index
      %c0_117 = arith.constant 0 : index
      %c0_118 = arith.constant 0 : index
      %263 = vector.load %arg35[%c0_116, %c2, %c0_117, %c0_118] : memref<2x6x1x64xf32, #tpu.memory_space<vmem>>, vector<1x1x1x64xf32>
      %264 = vector.shape_cast %263 : vector<1x1x1x64xf32> to vector<1x64xf32>
      %265 = vector.shape_cast %262 : vector<1x64xf32> to vector<1x1x1x64xf32>
      tpu.vector_store %arg35[%c0_116, %c2, %c0_117, %c0_118], %265 {strides = array<i32>} : memref<2x6x1x64xf32, #tpu.memory_space<vmem>>, vector<1x1x1x64xf32>,
      %266 = vector.extract_strided_slice %253 {offsets = [0, 192], sizes = [1, 64], strides = [1, 1]} : vector<1x768xf32> to vector<1x64xf32>
      %c0_119 = arith.constant 0 : index
      %c3 = arith.constant 3 : index
      %c0_120 = arith.constant 0 : index
      %c0_121 = arith.constant 0 : index
      %267 = vector.load %arg35[%c0_119, %c3, %c0_120, %c0_121] : memref<2x6x1x64xf32, #tpu.memory_space<vmem>>, vector<1x1x1x64xf32>
      %268 = vector.shape_cast %267 : vector<1x1x1x64xf32> to vector<1x64xf32>
      %269 = vector.shape_cast %266 : vector<1x64xf32> to vector<1x1x1x64xf32>
      tpu.vector_store %arg35[%c0_119, %c3, %c0_120, %c0_121], %269 {strides = array<i32>} : memref<2x6x1x64xf32, #tpu.memory_space<vmem>>, vector<1x1x1x64xf32>,
      %270 = vector.extract_strided_slice %253 {offsets = [0, 256], sizes = [1, 64], strides = [1, 1]} : vector<1x768xf32> to vector<1x64xf32>
      %c0_122 = arith.constant 0 : index
      %c4 = arith.constant 4 : index
      %c0_123 = arith.constant 0 : index
      %c0_124 = arith.constant 0 : index
      %271 = vector.load %arg35[%c0_122, %c4, %c0_123, %c0_124] : memref<2x6x1x64xf32, #tpu.memory_space<vmem>>, vector<1x1x1x64xf32>
      %272 = vector.shape_cast %271 : vector<1x1x1x64xf32> to vector<1x64xf32>
      %273 = vector.shape_cast %270 : vector<1x64xf32> to vector<1x1x1x64xf32>
      tpu.vector_store %arg35[%c0_122, %c4, %c0_123, %c0_124], %273 {strides = array<i32>} : memref<2x6x1x64xf32, #tpu.memory_space<vmem>>, vector<1x1x1x64xf32>,
      %274 = vector.extract_strided_slice %253 {offsets = [0, 320], sizes = [1, 64], strides = [1, 1]} : vector<1x768xf32> to vector<1x64xf32>
      %c0_125 = arith.constant 0 : index
      %c5 = arith.constant 5 : index
      %c0_126 = arith.constant 0 : index
      %c0_127 = arith.constant 0 : index
      %275 = vector.load %arg35[%c0_125, %c5, %c0_126, %c0_127] : memref<2x6x1x64xf32, #tpu.memory_space<vmem>>, vector<1x1x1x64xf32>
      %276 = vector.shape_cast %275 : vector<1x1x1x64xf32> to vector<1x64xf32>
      %277 = vector.shape_cast %274 : vector<1x64xf32> to vector<1x1x1x64xf32>
      tpu.vector_store %arg35[%c0_125, %c5, %c0_126, %c0_127], %277 {strides = array<i32>} : memref<2x6x1x64xf32, #tpu.memory_space<vmem>>, vector<1x1x1x64xf32>,
      %278 = vector.extract_strided_slice %253 {offsets = [0, 384], sizes = [1, 64], strides = [1, 1]} : vector<1x768xf32> to vector<1x64xf32>
      %c1_128 = arith.constant 1 : index
      %c0_129 = arith.constant 0 : index
      %c0_130 = arith.constant 0 : index
      %c0_131 = arith.constant 0 : index
      %279 = vector.load %arg35[%c1_128, %c0_129, %c0_130, %c0_131] : memref<2x6x1x64xf32, #tpu.memory_space<vmem>>, vector<1x1x1x64xf32>
      %280 = vector.shape_cast %279 : vector<1x1x1x64xf32> to vector<1x64xf32>
      %281 = vector.shape_cast %278 : vector<1x64xf32> to vector<1x1x1x64xf32>
      tpu.vector_store %arg35[%c1_128, %c0_129, %c0_130, %c0_131], %281 {strides = array<i32>} : memref<2x6x1x64xf32, #tpu.memory_space<vmem>>, vector<1x1x1x64xf32>,
      %282 = vector.extract_strided_slice %253 {offsets = [0, 448], sizes = [1, 64], strides = [1, 1]} : vector<1x768xf32> to vector<1x64xf32>
      %c1_132 = arith.constant 1 : index
      %c1_133 = arith.constant 1 : index
      %c0_134 = arith.constant 0 : index
      %c0_135 = arith.constant 0 : index
      %283 = vector.load %arg35[%c1_132, %c1_133, %c0_134, %c0_135] : memref<2x6x1x64xf32, #tpu.memory_space<vmem>>, vector<1x1x1x64xf32>
      %284 = vector.shape_cast %283 : vector<1x1x1x64xf32> to vector<1x64xf32>
      %285 = vector.shape_cast %282 : vector<1x64xf32> to vector<1x1x1x64xf32>
      tpu.vector_store %arg35[%c1_132, %c1_133, %c0_134, %c0_135], %285 {strides = array<i32>} : memref<2x6x1x64xf32, #tpu.memory_space<vmem>>, vector<1x1x1x64xf32>,
      %286 = vector.extract_strided_slice %253 {offsets = [0, 512], sizes = [1, 64], strides = [1, 1]} : vector<1x768xf32> to vector<1x64xf32>
      %c1_136 = arith.constant 1 : index
      %c2_137 = arith.constant 2 : index
      %c0_138 = arith.constant 0 : index
      %c0_139 = arith.constant 0 : index
      %287 = vector.load %arg35[%c1_136, %c2_137, %c0_138, %c0_139] : memref<2x6x1x64xf32, #tpu.memory_space<vmem>>, vector<1x1x1x64xf32>
      %288 = vector.shape_cast %287 : vector<1x1x1x64xf32> to vector<1x64xf32>
      %289 = vector.shape_cast %286 : vector<1x64xf32> to vector<1x1x1x64xf32>
      tpu.vector_store %arg35[%c1_136, %c2_137, %c0_138, %c0_139], %289 {strides = array<i32>} : memref<2x6x1x64xf32, #tpu.memory_space<vmem>>, vector<1x1x1x64xf32>,
      %290 = vector.extract_strided_slice %253 {offsets = [0, 576], sizes = [1, 64], strides = [1, 1]} : vector<1x768xf32> to vector<1x64xf32>
      %c1_140 = arith.constant 1 : index
      %c3_141 = arith.constant 3 : index
      %c0_142 = arith.constant 0 : index
      %c0_143 = arith.constant 0 : index
      %291 = vector.load %arg35[%c1_140, %c3_141, %c0_142, %c0_143] : memref<2x6x1x64xf32, #tpu.memory_space<vmem>>, vector<1x1x1x64xf32>
      %292 = vector.shape_cast %291 : vector<1x1x1x64xf32> to vector<1x64xf32>
      %293 = vector.shape_cast %290 : vector<1x64xf32> to vector<1x1x1x64xf32>
      tpu.vector_store %arg35[%c1_140, %c3_141, %c0_142, %c0_143], %293 {strides = array<i32>} : memref<2x6x1x64xf32, #tpu.memory_space<vmem>>, vector<1x1x1x64xf32>,
      %294 = vector.extract_strided_slice %253 {offsets = [0, 640], sizes = [1, 64], strides = [1, 1]} : vector<1x768xf32> to vector<1x64xf32>
      %c1_144 = arith.constant 1 : index
      %c4_145 = arith.constant 4 : index
      %c0_146 = arith.constant 0 : index
      %c0_147 = arith.constant 0 : index
      %295 = vector.load %arg35[%c1_144, %c4_145, %c0_146, %c0_147] : memref<2x6x1x64xf32, #tpu.memory_space<vmem>>, vector<1x1x1x64xf32>
      %296 = vector.shape_cast %295 : vector<1x1x1x64xf32> to vector<1x64xf32>
      %297 = vector.shape_cast %294 : vector<1x64xf32> to vector<1x1x1x64xf32>
      tpu.vector_store %arg35[%c1_144, %c4_145, %c0_146, %c0_147], %297 {strides = array<i32>} : memref<2x6x1x64xf32, #tpu.memory_space<vmem>>, vector<1x1x1x64xf32>,
      %298 = vector.extract_strided_slice %253 {offsets = [0, 704], sizes = [1, 64], strides = [1, 1]} : vector<1x768xf32> to vector<1x64xf32>
      %c1_148 = arith.constant 1 : index
      %c5_149 = arith.constant 5 : index
      %c0_150 = arith.constant 0 : index
      %c0_151 = arith.constant 0 : index
      %299 = vector.load %arg35[%c1_148, %c5_149, %c0_150, %c0_151] : memref<2x6x1x64xf32, #tpu.memory_space<vmem>>, vector<1x1x1x64xf32>
      %300 = vector.shape_cast %299 : vector<1x1x1x64xf32> to vector<1x64xf32>
      %301 = vector.shape_cast %298 : vector<1x64xf32> to vector<1x1x1x64xf32>
      tpu.vector_store %arg35[%c1_148, %c5_149, %c0_150, %c0_151], %301 {strides = array<i32>} : memref<2x6x1x64xf32, #tpu.memory_space<vmem>>, vector<1x1x1x64xf32>,
    } else {
    }
    %c0 = arith.constant 0 : index
    %c0_1 = arith.constant 0 : index
    %3 = vector.load %arg34[%c0, %c0_1] : memref<64x64xf32, #tpu.memory_space<vmem>>, vector<64x64xf32>
    %4 = arith.index_cast %arg1 : i32 to index
    %c0_2 = arith.constant 0 : index
    %c0_3 = arith.constant 0 : index
    %c0_4 = arith.constant 0 : index
    %5 = vector.load %arg35[%4, %c0_2, %c0_3, %c0_4] : memref<2x6x1x64xf32, #tpu.memory_space<vmem>>, vector<1x6x1x64xf32>
    %6 = vector.shape_cast %5 : vector<1x6x1x64xf32> to vector<6x1x64xf32>
    %7 = vector.extract_strided_slice %6 {offsets = [0, 0, 0], sizes = [1, 1, 64], strides = [1, 1, 1]} : vector<6x1x64xf32> to vector<1x1x64xf32>
    %8 = vector.shape_cast %7 : vector<1x1x64xf32> to vector<1x64xf32>
    %9 = vector.extract_strided_slice %6 {offsets = [1, 0, 0], sizes = [1, 1, 64], strides = [1, 1, 1]} : vector<6x1x64xf32> to vector<1x1x64xf32>
    %10 = vector.shape_cast %9 : vector<1x1x64xf32> to vector<1x64xf32>
    %11 = vector.extract_strided_slice %6 {offsets = [2, 0, 0], sizes = [1, 1, 64], strides = [1, 1, 1]} : vector<6x1x64xf32> to vector<1x1x64xf32>
    %12 = vector.shape_cast %11 : vector<1x1x64xf32> to vector<1x64xf32>
    %13 = vector.extract_strided_slice %6 {offsets = [3, 0, 0], sizes = [1, 1, 64], strides = [1, 1, 1]} : vector<6x1x64xf32> to vector<1x1x64xf32>
    %14 = vector.shape_cast %13 : vector<1x1x64xf32> to vector<1x64xf32>
    %15 = vector.extract_strided_slice %6 {offsets = [4, 0, 0], sizes = [1, 1, 64], strides = [1, 1, 1]} : vector<6x1x64xf32> to vector<1x1x64xf32>
    %16 = vector.shape_cast %15 : vector<1x1x64xf32> to vector<1x64xf32>
    %17 = vector.extract_strided_slice %6 {offsets = [5, 0, 0], sizes = [1, 1, 64], strides = [1, 1, 1]} : vector<6x1x64xf32> to vector<1x1x64xf32>
    %18 = vector.shape_cast %17 : vector<1x1x64xf32> to vector<1x64xf32>
    %cst = arith.constant dense<0.000000e+00> : vector<64xf32>
    %19 = vector.multi_reduction <add>, %3, %cst [1] : vector<64x64xf32> to vector<64xf32>
    %20 = vector.shape_cast %19 : vector<64xf32> to vector<64x1xf32>
    %cst_5 = arith.constant 6.400000e+01 : f32
    %21 = vector.broadcast %cst_5 : f32 to vector<64x1xf32>
    %22 = arith.divf %20, %21 : vector<64x1xf32>
    %23 = vector.broadcast %22 : vector<64x1xf32> to vector<64x64xf32>
    %24 = arith.subf %3, %23 : vector<64x64xf32>
    %25 = arith.mulf %24, %24 : vector<64x64xf32>
    %cst_6 = arith.constant dense<0.000000e+00> : vector<64xf32>
    %26 = vector.multi_reduction <add>, %25, %cst_6 [1] : vector<64x64xf32> to vector<64xf32>
    %27 = vector.shape_cast %26 : vector<64xf32> to vector<64x1xf32>
    %cst_7 = arith.constant 6.400000e+01 : f32
    %28 = vector.broadcast %cst_7 : f32 to vector<64x1xf32>
    %29 = arith.divf %27, %28 : vector<64x1xf32>
    %30 = vector.broadcast %22 : vector<64x1xf32> to vector<64x64xf32>
    %31 = arith.subf %3, %30 : vector<64x64xf32>
    %cst_8 = arith.constant 9.99999974E-6 : f32
    %32 = vector.broadcast %cst_8 : f32 to vector<64x1xf32>
    %33 = arith.addf %29, %32 : vector<64x1xf32>
    %34 = math.rsqrt %33 : vector<64x1xf32>
    %35 = vector.broadcast %34 : vector<64x1xf32> to vector<64x64xf32>
    %36 = arith.mulf %31, %35 : vector<64x64xf32>
    %cst_9 = arith.constant 1.000000e+00 : f32
    %37 = vector.broadcast %cst_9 : f32 to vector<1x64xf32>
    %38 = arith.addf %37, %10 : vector<1x64xf32>
    %39 = vector.broadcast %38 : vector<1x64xf32> to vector<64x64xf32>
    %40 = arith.mulf %36, %39 : vector<64x64xf32>
    %41 = vector.broadcast %8 : vector<1x64xf32> to vector<64x64xf32>
    %42 = arith.addf %40, %41 : vector<64x64xf32>
    %43 = arith.truncf %42 : vector<64x64xf32> to vector<64x64xbf16>
    %c0_10 = arith.constant 0 : index
    %c0_11 = arith.constant 0 : index
    %c0_12 = arith.constant 0 : index
    %44 = vector.load %arg21[%c0_10, %c0_11, %c0_12] : memref<1x64x192xbf16, #tpu.memory_space<vmem>>, vector<1x64x192xbf16>
    %45 = vector.shape_cast %44 : vector<1x64x192xbf16> to vector<64x192xbf16>
    %cst_13 = arith.constant dense<0.000000e+00> : vector<64x192xf32>
    %46 = tpu.matmul %43, %45, %cst_13 {dimension_numbers = #tpu.dot_dimension_numbers<[1], [0], [0], [1], [0, 0, 1, 1], [], []>} : vector<64x64xbf16>, vector<64x192xbf16>, vector<64x192xf32> -> vector<64x192xf32>
    %c0_14 = arith.constant 0 : index
    %c0_15 = arith.constant 0 : index
    %c0_16 = arith.constant 0 : index
    %47 = vector.load %arg22[%c0_14, %c0_15, %c0_16] : memref<1x1x192xf32, #tpu.memory_space<vmem>>, vector<1x1x192xf32>
    %48 = vector.shape_cast %47 : vector<1x1x192xf32> to vector<1x192xf32>
    %49 = vector.broadcast %48 : vector<1x192xf32> to vector<64x192xf32>
    %50 = arith.addf %46, %49 : vector<64x192xf32>
    %51 = vector.extract_strided_slice %50 {offsets = [0, 0], sizes = [64, 64], strides = [1, 1]} : vector<64x192xf32> to vector<64x64xf32>
    %52 = vector.extract_strided_slice %50 {offsets = [0, 64], sizes = [64, 64], strides = [1, 1]} : vector<64x192xf32> to vector<64x64xf32>
    %53 = vector.extract_strided_slice %50 {offsets = [0, 128], sizes = [64, 64], strides = [1, 1]} : vector<64x192xf32> to vector<64x64xf32>
    %c0_17 = arith.constant 0 : index
    %c0_18 = arith.constant 0 : index
    %54 = vector.load %arg18[%c0_17, %c0_18] : memref<64x64xf32, #tpu.memory_space<vmem>>, vector<64x64xf32>
    %c0_19 = arith.constant 0 : index
    %c0_20 = arith.constant 0 : index
    %55 = vector.load %arg19[%c0_19, %c0_20] : memref<64x64xf32, #tpu.memory_space<vmem>>, vector<64x64xf32>
    %c0_21 = arith.constant 0 : index
    %c0_22 = arith.constant 0 : index
    %56 = vector.load %arg20[%c0_21, %c0_22] : memref<64x64xf32, #tpu.memory_space<vmem>>, vector<64x64xf32>
    %57 = arith.mulf %51, %54 : vector<64x64xf32>
    %c63_i32 = arith.constant 63 : i32
    %58 = tpu.dynamic_rotate %51 by %c63_i32 dim 1 : vector<64x64xf32>, i32 -> vector<64x64xf32>
    %59 = arith.mulf %58, %55 : vector<64x64xf32>
    %60 = arith.addf %57, %59 : vector<64x64xf32>
    %c1_i32 = arith.constant 1 : i32
    %61 = tpu.dynamic_rotate %51 by %c1_i32 dim 1 : vector<64x64xf32>, i32 -> vector<64x64xf32>
    %62 = arith.mulf %61, %56 : vector<64x64xf32>
    %63 = arith.addf %60, %62 : vector<64x64xf32>
    %64 = arith.mulf %52, %54 : vector<64x64xf32>
    %c63_i32_23 = arith.constant 63 : i32
    %65 = tpu.dynamic_rotate %52 by %c63_i32_23 dim 1 : vector<64x64xf32>, i32 -> vector<64x64xf32>
    %66 = arith.mulf %65, %55 : vector<64x64xf32>
    %67 = arith.addf %64, %66 : vector<64x64xf32>
    %c1_i32_24 = arith.constant 1 : i32
    %68 = tpu.dynamic_rotate %52 by %c1_i32_24 dim 1 : vector<64x64xf32>, i32 -> vector<64x64xf32>
    %69 = arith.mulf %68, %56 : vector<64x64xf32>
    %70 = arith.addf %67, %69 : vector<64x64xf32>
    %71 = vector.extract_strided_slice %63 {offsets = [0, 0], sizes = [64, 16], strides = [1, 1]} : vector<64x64xf32> to vector<64x16xf32>
    %72 = vector.extract_strided_slice %63 {offsets = [0, 16], sizes = [64, 16], strides = [1, 1]} : vector<64x64xf32> to vector<64x16xf32>
    %73 = vector.extract_strided_slice %63 {offsets = [0, 32], sizes = [64, 16], strides = [1, 1]} : vector<64x64xf32> to vector<64x16xf32>
    %74 = vector.extract_strided_slice %63 {offsets = [0, 48], sizes = [64, 16], strides = [1, 1]} : vector<64x64xf32> to vector<64x16xf32>
    %75 = vector.shape_cast %71 : vector<64x16xf32> to vector<1x64x16xf32>
    %76 = vector.shape_cast %72 : vector<64x16xf32> to vector<1x64x16xf32>
    %77 = vector.shape_cast %73 : vector<64x16xf32> to vector<1x64x16xf32>
    %78 = vector.shape_cast %74 : vector<64x16xf32> to vector<1x64x16xf32>
    %79 = tpu.concatenate %75, %76, %77, %78 in 0 : vector<1x64x16xf32>, vector<1x64x16xf32>, vector<1x64x16xf32>, vector<1x64x16xf32> -> vector<4x64x16xf32>
    %80 = arith.truncf %79 : vector<4x64x16xf32> to vector<4x64x16xbf16>
    %81 = vector.extract_strided_slice %70 {offsets = [0, 0], sizes = [64, 16], strides = [1, 1]} : vector<64x64xf32> to vector<64x16xf32>
    %82 = vector.extract_strided_slice %70 {offsets = [0, 16], sizes = [64, 16], strides = [1, 1]} : vector<64x64xf32> to vector<64x16xf32>
    %83 = vector.extract_strided_slice %70 {offsets = [0, 32], sizes = [64, 16], strides = [1, 1]} : vector<64x64xf32> to vector<64x16xf32>
    %84 = vector.extract_strided_slice %70 {offsets = [0, 48], sizes = [64, 16], strides = [1, 1]} : vector<64x64xf32> to vector<64x16xf32>
    %85 = vector.shape_cast %81 : vector<64x16xf32> to vector<1x64x16xf32>
    %86 = vector.shape_cast %82 : vector<64x16xf32> to vector<1x64x16xf32>
    %87 = vector.shape_cast %83 : vector<64x16xf32> to vector<1x64x16xf32>
    %88 = vector.shape_cast %84 : vector<64x16xf32> to vector<1x64x16xf32>
    %89 = tpu.concatenate %85, %86, %87, %88 in 0 : vector<1x64x16xf32>, vector<1x64x16xf32>, vector<1x64x16xf32>, vector<1x64x16xf32> -> vector<4x64x16xf32>
    %90 = arith.truncf %89 : vector<4x64x16xf32> to vector<4x64x16xbf16>
    %91 = vector.extract_strided_slice %53 {offsets = [0, 0], sizes = [64, 16], strides = [1, 1]} : vector<64x64xf32> to vector<64x16xf32>
    %92 = vector.extract_strided_slice %53 {offsets = [0, 16], sizes = [64, 16], strides = [1, 1]} : vector<64x64xf32> to vector<64x16xf32>
    %93 = vector.extract_strided_slice %53 {offsets = [0, 32], sizes = [64, 16], strides = [1, 1]} : vector<64x64xf32> to vector<64x16xf32>
    %94 = vector.extract_strided_slice %53 {offsets = [0, 48], sizes = [64, 16], strides = [1, 1]} : vector<64x64xf32> to vector<64x16xf32>
    %95 = vector.shape_cast %91 : vector<64x16xf32> to vector<1x64x16xf32>
    %96 = vector.shape_cast %92 : vector<64x16xf32> to vector<1x64x16xf32>
    %97 = vector.shape_cast %93 : vector<64x16xf32> to vector<1x64x16xf32>
    %98 = vector.shape_cast %94 : vector<64x16xf32> to vector<1x64x16xf32>
    %99 = tpu.concatenate %95, %96, %97, %98 in 0 : vector<1x64x16xf32>, vector<1x64x16xf32>, vector<1x64x16xf32>, vector<1x64x16xf32> -> vector<4x64x16xf32>
    %100 = arith.truncf %99 : vector<4x64x16xf32> to vector<4x64x16xbf16>
    "tpu.trace_start"() <{level = 10 : i32, message = "hqd,hkd->hqk"}> : () -> ()
    %cst_25 = arith.constant dense<0.000000e+00> : vector<4x64x64xf32>
    %101 = tpu.matmul %80, %90, %cst_25 {dimension_numbers = #tpu.dot_dimension_numbers<[2], [2], [1], [1], [0, 0, 0, 1, 1, 1], [0], [0]>} : vector<4x64x16xbf16>, vector<4x64x16xbf16>, vector<4x64x64xf32> -> vector<4x64x64xf32>
    "tpu.trace_stop"() : () -> ()
    %cst_26 = arith.constant dense<0xFF800000> : vector<4x64xf32>
    %102 = vector.multi_reduction <maximumf>, %101, %cst_26 [2] : vector<4x64x64xf32> to vector<4x64xf32>
    %103 = vector.shape_cast %102 : vector<4x64xf32> to vector<4x64x1xf32>
    %104 = vector.broadcast %103 : vector<4x64x1xf32> to vector<4x64x64xf32>
    %105 = arith.subf %101, %104 : vector<4x64x64xf32>
    %106 = math.exp %105 : vector<4x64x64xf32>
    %cst_27 = arith.constant dense<0.000000e+00> : vector<4x64xf32>
    %107 = vector.multi_reduction <add>, %106, %cst_27 [2] : vector<4x64x64xf32> to vector<4x64xf32>
    %108 = vector.shape_cast %107 : vector<4x64xf32> to vector<4x64x1xf32>
    %109 = tpu.reciprocal %108 {approx = true} : vector<4x64x1xf32> -> vector<4x64x1xf32>
    %110 = vector.broadcast %109 : vector<4x64x1xf32> to vector<4x64x64xf32>
    %111 = arith.mulf %106, %110 : vector<4x64x64xf32>
    %112 = arith.truncf %111 : vector<4x64x64xf32> to vector<4x64x64xbf16>
    "tpu.trace_start"() <{level = 10 : i32, message = "hqk,hkd->hqd"}> : () -> ()
    %cst_28 = arith.constant dense<0.000000e+00> : vector<4x64x16xf32>
    %113 = tpu.matmul %112, %100, %cst_28 {dimension_numbers = #tpu.dot_dimension_numbers<[2], [1], [1], [2], [0, 0, 0, 1, 1, 2], [0], [0]>} : vector<4x64x64xbf16>, vector<4x64x16xbf16>, vector<4x64x16xf32> -> vector<4x64x16xf32>
    "tpu.trace_stop"() : () -> ()
    %114 = vector.extract_strided_slice %113 {offsets = [0, 0, 0], sizes = [1, 64, 16], strides = [1, 1, 1]} : vector<4x64x16xf32> to vector<1x64x16xf32>
    %115 = vector.shape_cast %114 : vector<1x64x16xf32> to vector<64x16xf32>
    %116 = vector.extract_strided_slice %113 {offsets = [1, 0, 0], sizes = [1, 64, 16], strides = [1, 1, 1]} : vector<4x64x16xf32> to vector<1x64x16xf32>
    %117 = vector.shape_cast %116 : vector<1x64x16xf32> to vector<64x16xf32>
    %118 = vector.extract_strided_slice %113 {offsets = [2, 0, 0], sizes = [1, 64, 16], strides = [1, 1, 1]} : vector<4x64x16xf32> to vector<1x64x16xf32>
    %119 = vector.shape_cast %118 : vector<1x64x16xf32> to vector<64x16xf32>
    %120 = vector.extract_strided_slice %113 {offsets = [3, 0, 0], sizes = [1, 64, 16], strides = [1, 1, 1]} : vector<4x64x16xf32> to vector<1x64x16xf32>
    %121 = vector.shape_cast %120 : vector<1x64x16xf32> to vector<64x16xf32>
    %122 = tpu.concatenate %115, %117, %119, %121 in 1 : vector<64x16xf32>, vector<64x16xf32>, vector<64x16xf32>, vector<64x16xf32> -> vector<64x64xf32>
    %123 = arith.truncf %122 : vector<64x64xf32> to vector<64x64xbf16>
    %c0_29 = arith.constant 0 : index
    %c0_30 = arith.constant 0 : index
    %c0_31 = arith.constant 0 : index
    %124 = vector.load %arg23[%c0_29, %c0_30, %c0_31] : memref<1x64x64xbf16, #tpu.memory_space<vmem>>, vector<1x64x64xbf16>
    %125 = vector.shape_cast %124 : vector<1x64x64xbf16> to vector<64x64xbf16>
    %cst_32 = arith.constant dense<0.000000e+00> : vector<64x64xf32>
    %126 = tpu.matmul %123, %125, %cst_32 {dimension_numbers = #tpu.dot_dimension_numbers<[1], [0], [0], [1], [0, 0, 1, 1], [], []>} : vector<64x64xbf16>, vector<64x64xbf16>, vector<64x64xf32> -> vector<64x64xf32>
    %c0_33 = arith.constant 0 : index
    %c0_34 = arith.constant 0 : index
    %c0_35 = arith.constant 0 : index
    %127 = vector.load %arg24[%c0_33, %c0_34, %c0_35] : memref<1x1x64xf32, #tpu.memory_space<vmem>>, vector<1x1x64xf32>
    %128 = vector.shape_cast %127 : vector<1x1x64xf32> to vector<1x64xf32>
    %129 = vector.broadcast %128 : vector<1x64xf32> to vector<64x64xf32>
    %130 = arith.addf %126, %129 : vector<64x64xf32>
    %131 = vector.broadcast %12 : vector<1x64xf32> to vector<64x64xf32>
    %132 = arith.mulf %131, %130 : vector<64x64xf32>
    %133 = arith.addf %3, %132 : vector<64x64xf32>
    %cst_36 = arith.constant dense<0.000000e+00> : vector<64xf32>
    %134 = vector.multi_reduction <add>, %133, %cst_36 [1] : vector<64x64xf32> to vector<64xf32>
    %135 = vector.shape_cast %134 : vector<64xf32> to vector<64x1xf32>
    %cst_37 = arith.constant 6.400000e+01 : f32
    %136 = vector.broadcast %cst_37 : f32 to vector<64x1xf32>
    %137 = arith.divf %135, %136 : vector<64x1xf32>
    %138 = vector.broadcast %137 : vector<64x1xf32> to vector<64x64xf32>
    %139 = arith.subf %133, %138 : vector<64x64xf32>
    %140 = arith.mulf %139, %139 : vector<64x64xf32>
    %cst_38 = arith.constant dense<0.000000e+00> : vector<64xf32>
    %141 = vector.multi_reduction <add>, %140, %cst_38 [1] : vector<64x64xf32> to vector<64xf32>
    %142 = vector.shape_cast %141 : vector<64xf32> to vector<64x1xf32>
    %cst_39 = arith.constant 6.400000e+01 : f32
    %143 = vector.broadcast %cst_39 : f32 to vector<64x1xf32>
    %144 = arith.divf %142, %143 : vector<64x1xf32>
    %145 = vector.broadcast %137 : vector<64x1xf32> to vector<64x64xf32>
    %146 = arith.subf %133, %145 : vector<64x64xf32>
    %cst_40 = arith.constant 9.99999974E-6 : f32
    %147 = vector.broadcast %cst_40 : f32 to vector<64x1xf32>
    %148 = arith.addf %144, %147 : vector<64x1xf32>
    %149 = math.rsqrt %148 : vector<64x1xf32>
    %150 = vector.broadcast %149 : vector<64x1xf32> to vector<64x64xf32>
    %151 = arith.mulf %146, %150 : vector<64x64xf32>
    %cst_41 = arith.constant 1.000000e+00 : f32
    %152 = vector.broadcast %cst_41 : f32 to vector<1x64xf32>
    %153 = arith.addf %152, %16 : vector<1x64xf32>
    %154 = vector.broadcast %153 : vector<1x64xf32> to vector<64x64xf32>
    %155 = arith.mulf %151, %154 : vector<64x64xf32>
    %156 = vector.broadcast %14 : vector<1x64xf32> to vector<64x64xf32>
    %157 = arith.addf %155, %156 : vector<64x64xf32>
    %158 = arith.truncf %157 : vector<64x64xf32> to vector<64x64xbf16>
    %c0_42 = arith.constant 0 : index
    %c0_43 = arith.constant 0 : index
    %c0_44 = arith.constant 0 : index
    %159 = vector.load %arg25[%c0_42, %c0_43, %c0_44] : memref<1x64x256xbf16, #tpu.memory_space<vmem>>, vector<1x64x256xbf16>
    %160 = vector.shape_cast %159 : vector<1x64x256xbf16> to vector<64x256xbf16>
    %cst_45 = arith.constant dense<0.000000e+00> : vector<64x256xf32>
    %161 = tpu.matmul %158, %160, %cst_45 {dimension_numbers = #tpu.dot_dimension_numbers<[1], [0], [0], [1], [0, 0, 1, 1], [], []>} : vector<64x64xbf16>, vector<64x256xbf16>, vector<64x256xf32> -> vector<64x256xf32>
    %c0_46 = arith.constant 0 : index
    %c0_47 = arith.constant 0 : index
    %c0_48 = arith.constant 0 : index
    %162 = vector.load %arg26[%c0_46, %c0_47, %c0_48] : memref<1x1x256xf32, #tpu.memory_space<vmem>>, vector<1x1x256xf32>
    %163 = vector.shape_cast %162 : vector<1x1x256xf32> to vector<1x256xf32>
    %164 = vector.broadcast %163 : vector<1x256xf32> to vector<64x256xf32>
    %165 = arith.addf %161, %164 : vector<64x256xf32>
    %166 = arith.mulf %165, %165 : vector<64x256xf32>
    %167 = arith.mulf %165, %166 : vector<64x256xf32>
    %cst_49 = arith.constant 4.471500e-02 : f32
    %168 = vector.broadcast %cst_49 : f32 to vector<64x256xf32>
    %169 = arith.mulf %168, %167 : vector<64x256xf32>
    %170 = arith.addf %165, %169 : vector<64x256xf32>
    %cst_50 = arith.constant 0.797884583 : f32
    %171 = vector.broadcast %cst_50 : f32 to vector<64x256xf32>
    %172 = arith.mulf %171, %170 : vector<64x256xf32>
    %173 = math.tanh %172 : vector<64x256xf32>
    %cst_51 = arith.constant 1.000000e+00 : f32
    %174 = vector.broadcast %cst_51 : f32 to vector<64x256xf32>
    %175 = arith.addf %174, %173 : vector<64x256xf32>
    %cst_52 = arith.constant 5.000000e-01 : f32
    %176 = vector.broadcast %cst_52 : f32 to vector<64x256xf32>
    %177 = arith.mulf %176, %175 : vector<64x256xf32>
    %178 = arith.mulf %165, %177 : vector<64x256xf32>
    %179 = arith.truncf %178 : vector<64x256xf32> to vector<64x256xbf16>
    %c0_53 = arith.constant 0 : index
    %c0_54 = arith.constant 0 : index
    %c0_55 = arith.constant 0 : index
    %180 = vector.load %arg27[%c0_53, %c0_54, %c0_55] : memref<1x256x64xbf16, #tpu.memory_space<vmem>>, vector<1x256x64xbf16>
    %181 = vector.shape_cast %180 : vector<1x256x64xbf16> to vector<256x64xbf16>
    %cst_56 = arith.constant dense<0.000000e+00> : vector<64x64xf32>
    %182 = tpu.matmul %179, %181, %cst_56 {dimension_numbers = #tpu.dot_dimension_numbers<[1], [0], [0], [1], [0, 0, 1, 1], [], []>} : vector<64x256xbf16>, vector<256x64xbf16>, vector<64x64xf32> -> vector<64x64xf32>
    %c0_57 = arith.constant 0 : index
    %c0_58 = arith.constant 0 : index
    %c0_59 = arith.constant 0 : index
    %183 = vector.load %arg28[%c0_57, %c0_58, %c0_59] : memref<1x1x64xf32, #tpu.memory_space<vmem>>, vector<1x1x64xf32>
    %184 = vector.shape_cast %183 : vector<1x1x64xf32> to vector<1x64xf32>
    %185 = vector.broadcast %184 : vector<1x64xf32> to vector<64x64xf32>
    %186 = arith.addf %182, %185 : vector<64x64xf32>
    %187 = vector.broadcast %18 : vector<1x64xf32> to vector<64x64xf32>
    %188 = arith.mulf %187, %186 : vector<64x64xf32>
    %189 = arith.addf %133, %188 : vector<64x64xf32>
    %c1_i32_60 = arith.constant 1 : i32
    %190 = arith.cmpi slt, %arg1, %c1_i32_60 : i32
    %191 = arith.extui %190 : i1 to i32
    %c0_i32_61 = arith.constant 0 : i32
    %192 = arith.cmpi ne, %191, %c0_i32_61 : i32
    scf.if %192 {
      %c0_64 = arith.constant 0 : index
      %c0_65 = arith.constant 0 : index
      %196 = vector.load %arg34[%c0_64, %c0_65] : memref<64x64xf32, #tpu.memory_space<vmem>>, vector<64x64xf32>
      tpu.vector_store %arg34[%c0_64, %c0_65], %189 {strides = array<i32>} : memref<64x64xf32, #tpu.memory_space<vmem>>, vector<64x64xf32>,
    } else {
    }
    %c1_i32_62 = arith.constant 1 : i32
    %193 = arith.cmpi eq, %arg1, %c1_i32_62 : i32
    %194 = arith.extui %193 : i1 to i32
    %c0_i32_63 = arith.constant 0 : i32
    %195 = arith.cmpi ne, %194, %c0_i32_63 : i32
    scf.if %195 {
      %cst_64 = arith.constant dense<0.000000e+00> : vector<64xf32>
      %196 = vector.multi_reduction <add>, %189, %cst_64 [1] : vector<64x64xf32> to vector<64xf32>
      %197 = vector.shape_cast %196 : vector<64xf32> to vector<64x1xf32>
      %cst_65 = arith.constant 6.400000e+01 : f32
      %198 = vector.broadcast %cst_65 : f32 to vector<64x1xf32>
      %199 = arith.divf %197, %198 : vector<64x1xf32>
      %200 = vector.broadcast %199 : vector<64x1xf32> to vector<64x64xf32>
      %201 = arith.subf %189, %200 : vector<64x64xf32>
      %202 = arith.mulf %201, %201 : vector<64x64xf32>
      %cst_66 = arith.constant dense<0.000000e+00> : vector<64xf32>
      %203 = vector.multi_reduction <add>, %202, %cst_66 [1] : vector<64x64xf32> to vector<64xf32>
      %204 = vector.shape_cast %203 : vector<64xf32> to vector<64x1xf32>
      %cst_67 = arith.constant 6.400000e+01 : f32
      %205 = vector.broadcast %cst_67 : f32 to vector<64x1xf32>
      %206 = arith.divf %204, %205 : vector<64x1xf32>
      %207 = vector.broadcast %199 : vector<64x1xf32> to vector<64x64xf32>
      %208 = arith.subf %189, %207 : vector<64x64xf32>
      %cst_68 = arith.constant 9.99999974E-6 : f32
      %209 = vector.broadcast %cst_68 : f32 to vector<64x1xf32>
      %210 = arith.addf %206, %209 : vector<64x1xf32>
      %211 = math.rsqrt %210 : vector<64x1xf32>
      %212 = vector.broadcast %211 : vector<64x1xf32> to vector<64x64xf32>
      %213 = arith.mulf %208, %212 : vector<64x64xf32>
      %c0_69 = arith.constant 0 : index
      %c0_70 = arith.constant 0 : index
      %214 = vector.load %arg29[%c0_69, %c0_70] : memref<1x64xf32, #tpu.memory_space<vmem>>, vector<1x64xf32>
      %215 = vector.broadcast %214 : vector<1x64xf32> to vector<64x64xf32>
      %216 = arith.mulf %213, %215 : vector<64x64xf32>
      %c0_71 = arith.constant 0 : index
      %c0_72 = arith.constant 0 : index
      %217 = vector.load %arg30[%c0_71, %c0_72] : memref<1x64xf32, #tpu.memory_space<vmem>>, vector<1x64xf32>
      %218 = vector.broadcast %217 : vector<1x64xf32> to vector<64x64xf32>
      %219 = arith.addf %216, %218 : vector<64x64xf32>
      %220 = arith.truncf %219 : vector<64x64xf32> to vector<64x64xbf16>
      %c0_73 = arith.constant 0 : index
      %c0_74 = arith.constant 0 : index
      %221 = vector.load %arg31[%c0_73, %c0_74] : memref<64x128xbf16, #tpu.memory_space<vmem>>, vector<64x128xbf16>
      %cst_75 = arith.constant dense<0.000000e+00> : vector<64x128xf32>
      %222 = tpu.matmul %220, %221, %cst_75 {dimension_numbers = #tpu.dot_dimension_numbers<[1], [0], [0], [1], [0, 0, 1, 1], [], []>} : vector<64x64xbf16>, vector<64x128xbf16>, vector<64x128xf32> -> vector<64x128xf32>
      %c0_76 = arith.constant 0 : index
      %c0_77 = arith.constant 0 : index
      %223 = vector.load %arg32[%c0_76, %c0_77] : memref<1x128xf32, #tpu.memory_space<vmem>>, vector<1x128xf32>
      %224 = vector.broadcast %223 : vector<1x128xf32> to vector<64x128xf32>
      %225 = arith.addf %222, %224 : vector<64x128xf32>
      %c0_78 = arith.constant 0 : index
      %c0_79 = arith.constant 0 : index
      %226 = vector.load %arg33[%c0_78, %c0_79] : memref<64x128xf32, #tpu.memory_space<vmem>>, vector<64x128xf32>
      tpu.vector_store %arg33[%c0_78, %c0_79], %225 {strides = array<i32>} : memref<64x128xf32, #tpu.memory_space<vmem>>, vector<64x128xf32>,
    } else {
    }
    return
  }
  func.func @transform_0(%arg0: i32, %arg1: i32) -> (i32, i32, i32) {
    %c0_i32 = arith.constant 0 : i32
    %c0_i32_0 = arith.constant 0 : i32
    %c0_i32_1 = arith.constant 0 : i32
    return %arg0, %c0_i32, %c0_i32_0 : i32, i32, i32
  }
  func.func @transform_1(%arg0: i32, %arg1: i32) -> (i32, i32, i32) {
    %c0_i32 = arith.constant 0 : i32
    %c0_i32_0 = arith.constant 0 : i32
    %c0_i32_1 = arith.constant 0 : i32
    return %arg0, %c0_i32, %c0_i32_0 : i32, i32, i32
  }
  func.func @transform_2(%arg0: i32, %arg1: i32) -> (i32, i32) {
    %c0_i32 = arith.constant 0 : i32
    %c0_i32_0 = arith.constant 0 : i32
    %c0_i32_1 = arith.constant 0 : i32
    return %c0_i32, %c0_i32_0 : i32, i32
  }
  func.func @transform_3(%arg0: i32, %arg1: i32) -> (i32, i32) {
    %c0_i32 = arith.constant 0 : i32
    %c0_i32_0 = arith.constant 0 : i32
    %c0_i32_1 = arith.constant 0 : i32
    return %c0_i32, %c0_i32_0 : i32, i32
  }
  func.func @transform_4(%arg0: i32, %arg1: i32) -> (i32, i32) {
    %c0_i32 = arith.constant 0 : i32
    %c0_i32_0 = arith.constant 0 : i32
    %c0_i32_1 = arith.constant 0 : i32
    return %c0_i32, %c0_i32_0 : i32, i32
  }
  func.func @transform_5(%arg0: i32, %arg1: i32) -> (i32, i32) {
    %c0_i32 = arith.constant 0 : i32
    %c0_i32_0 = arith.constant 0 : i32
    %c0_i32_1 = arith.constant 0 : i32
    return %c0_i32, %c0_i32_0 : i32, i32
  }
  func.func @transform_6(%arg0: i32, %arg1: i32) -> (i32, i32) {
    %c0_i32 = arith.constant 0 : i32
    %c0_i32_0 = arith.constant 0 : i32
    %c0_i32_1 = arith.constant 0 : i32
    return %c0_i32, %c0_i32_0 : i32, i32
  }
  func.func @transform_7(%arg0: i32, %arg1: i32) -> (i32, i32) {
    %c0_i32 = arith.constant 0 : i32
    %c0_i32_0 = arith.constant 0 : i32
    %c0_i32_1 = arith.constant 0 : i32
    return %c0_i32, %c0_i32_0 : i32, i32
  }
  func.func @transform_8(%arg0: i32, %arg1: i32) -> (i32, i32) {
    %c0_i32 = arith.constant 0 : i32
    %c0_i32_0 = arith.constant 0 : i32
    %c0_i32_1 = arith.constant 0 : i32
    return %c0_i32, %c0_i32_0 : i32, i32
  }
  func.func @transform_9(%arg0: i32, %arg1: i32) -> (i32, i32) {
    %c0_i32 = arith.constant 0 : i32
    %c0_i32_0 = arith.constant 0 : i32
    %c0_i32_1 = arith.constant 0 : i32
    return %c0_i32, %c0_i32_0 : i32, i32
  }
  func.func @transform_10(%arg0: i32, %arg1: i32) -> (i32, i32) {
    %c0_i32 = arith.constant 0 : i32
    %c0_i32_0 = arith.constant 0 : i32
    %c0_i32_1 = arith.constant 0 : i32
    return %c0_i32, %c0_i32_0 : i32, i32
  }
  func.func @transform_11(%arg0: i32, %arg1: i32) -> (i32, i32) {
    %c0_i32 = arith.constant 0 : i32
    %c0_i32_0 = arith.constant 0 : i32
    %c0_i32_1 = arith.constant 0 : i32
    return %c0_i32, %c0_i32_0 : i32, i32
  }
  func.func @transform_12(%arg0: i32, %arg1: i32) -> (i32, i32) {
    %c0_i32 = arith.constant 0 : i32
    %c0_i32_0 = arith.constant 0 : i32
    return %arg0, %c0_i32 : i32, i32
  }
  func.func @transform_13(%arg0: i32, %arg1: i32) -> (i32, i32) {
    %c0_i32 = arith.constant 0 : i32
    %c0_i32_0 = arith.constant 0 : i32
    %c0_i32_1 = arith.constant 0 : i32
    return %c0_i32, %c0_i32_0 : i32, i32
  }
  func.func @transform_14(%arg0: i32, %arg1: i32) -> (i32, i32) {
    %c0_i32 = arith.constant 0 : i32
    %c0_i32_0 = arith.constant 0 : i32
    %c0_i32_1 = arith.constant 0 : i32
    return %c0_i32, %c0_i32_0 : i32, i32
  }
  func.func @transform_15(%arg0: i32, %arg1: i32) -> (i32, i32) {
    %c0_i32 = arith.constant 0 : i32
    %c0_i32_0 = arith.constant 0 : i32
    %c0_i32_1 = arith.constant 0 : i32
    return %c0_i32, %c0_i32_0 : i32, i32
  }
  func.func @transform_16(%arg0: i32, %arg1: i32) -> (i32, i32) {
    %c0_i32 = arith.constant 0 : i32
    %c0_i32_0 = arith.constant 0 : i32
    %c0_i32_1 = arith.constant 0 : i32
    return %c0_i32, %c0_i32_0 : i32, i32
  }
  func.func @transform_17(%arg0: i32, %arg1: i32) -> (i32, i32) {
    %c0_i32 = arith.constant 0 : i32
    %c0_i32_0 = arith.constant 0 : i32
    %c0_i32_1 = arith.constant 0 : i32
    return %c0_i32, %c0_i32_0 : i32, i32
  }
  func.func @transform_18(%arg0: i32, %arg1: i32) -> (i32, i32) {
    %c0_i32 = arith.constant 0 : i32
    %c0_i32_0 = arith.constant 0 : i32
    %c0_i32_1 = arith.constant 0 : i32
    return %c0_i32, %c0_i32_0 : i32, i32
  }
  func.func @transform_19(%arg0: i32, %arg1: i32) -> (i32, i32, i32) {
    %c0_i32 = arith.constant 0 : i32
    %c0_i32_0 = arith.constant 0 : i32
    %c0_i32_1 = arith.constant 0 : i32
    return %arg1, %c0_i32, %c0_i32_0 : i32, i32, i32
  }
  func.func @transform_20(%arg0: i32, %arg1: i32) -> (i32, i32, i32) {
    %c0_i32 = arith.constant 0 : i32
    %c0_i32_0 = arith.constant 0 : i32
    %c0_i32_1 = arith.constant 0 : i32
    return %arg1, %c0_i32, %c0_i32_0 : i32, i32, i32
  }
  func.func @transform_21(%arg0: i32, %arg1: i32) -> (i32, i32, i32) {
    %c0_i32 = arith.constant 0 : i32
    %c0_i32_0 = arith.constant 0 : i32
    %c0_i32_1 = arith.constant 0 : i32
    return %arg1, %c0_i32, %c0_i32_0 : i32, i32, i32
  }
  func.func @transform_22(%arg0: i32, %arg1: i32) -> (i32, i32, i32) {
    %c0_i32 = arith.constant 0 : i32
    %c0_i32_0 = arith.constant 0 : i32
    %c0_i32_1 = arith.constant 0 : i32
    return %arg1, %c0_i32, %c0_i32_0 : i32, i32, i32
  }
  func.func @transform_23(%arg0: i32, %arg1: i32) -> (i32, i32, i32) {
    %c0_i32 = arith.constant 0 : i32
    %c0_i32_0 = arith.constant 0 : i32
    %c0_i32_1 = arith.constant 0 : i32
    return %arg1, %c0_i32, %c0_i32_0 : i32, i32, i32
  }
  func.func @transform_24(%arg0: i32, %arg1: i32) -> (i32, i32, i32) {
    %c0_i32 = arith.constant 0 : i32
    %c0_i32_0 = arith.constant 0 : i32
    %c0_i32_1 = arith.constant 0 : i32
    return %arg1, %c0_i32, %c0_i32_0 : i32, i32, i32
  }
  func.func @transform_25(%arg0: i32, %arg1: i32) -> (i32, i32, i32) {
    %c0_i32 = arith.constant 0 : i32
    %c0_i32_0 = arith.constant 0 : i32
    %c0_i32_1 = arith.constant 0 : i32
    return %arg1, %c0_i32, %c0_i32_0 : i32, i32, i32
  }
  func.func @transform_26(%arg0: i32, %arg1: i32) -> (i32, i32, i32) {
    %c0_i32 = arith.constant 0 : i32
    %c0_i32_0 = arith.constant 0 : i32
    %c0_i32_1 = arith.constant 0 : i32
    return %arg1, %c0_i32, %c0_i32_0 : i32, i32, i32
  }
  func.func @transform_27(%arg0: i32, %arg1: i32) -> (i32, i32) {
    %c0_i32 = arith.constant 0 : i32
    %c0_i32_0 = arith.constant 0 : i32
    %c0_i32_1 = arith.constant 0 : i32
    return %c0_i32, %c0_i32_0 : i32, i32
  }
  func.func @transform_28(%arg0: i32, %arg1: i32) -> (i32, i32) {
    %c0_i32 = arith.constant 0 : i32
    %c0_i32_0 = arith.constant 0 : i32
    %c0_i32_1 = arith.constant 0 : i32
    return %c0_i32, %c0_i32_0 : i32, i32
  }
  func.func @transform_29(%arg0: i32, %arg1: i32) -> (i32, i32) {
    %c0_i32 = arith.constant 0 : i32
    %c0_i32_0 = arith.constant 0 : i32
    %c0_i32_1 = arith.constant 0 : i32
    return %c0_i32, %c0_i32_0 : i32, i32
  }
  func.func @transform_30(%arg0: i32, %arg1: i32) -> (i32, i32) {
    %c0_i32 = arith.constant 0 : i32
    %c0_i32_0 = arith.constant 0 : i32
    %c0_i32_1 = arith.constant 0 : i32
    return %c0_i32, %c0_i32_0 : i32, i32
  }
  func.func @transform_31(%arg0: i32, %arg1: i32) -> (i32, i32) {
    %c0_i32 = arith.constant 0 : i32
    %c0_i32_0 = arith.constant 0 : i32
    return %arg0, %c0_i32 : i32, i32
  }
}

</mosaic_0001>

<bundles_post_ra>
// kernel: _lambda_.1
= control target key start
LH: loop header
LB: loop body
LE: loop exit
PB: predicated region body
PF: predicated region fallthrough
CT: control target
= control target key end

     0   :  { %s10439_s6 = smov 1   ;;  %s10440_s10 = smov 2   ;;  %s12776_s0 = inlined_call_operand.smem [shape: u32[32], index: -1, kind: input, shape index: {}] }
   0x1   :  { %s10492_s5 = sld [smem:[%s12776_s0]]   ;;  %s10441_s14 = smov 3  }
   0x2   :  { %s10497_s9 = sld [smem:[%s12776_s0 + %s10439_s6]]   ;;  %s10442_s18 = smov 4  }
   0x3   :  { %s10502_s13 = sld [smem:[%s12776_s0 + %s10440_s10]]   ;;  %s10443_s22 = smov 5  }
   0x4   :  { %s10507_s17 = sld [smem:[%s12776_s0 + %s10441_s14]]   ;;  %s10444_s26 = smov 6  }
   0x5   :  { %s10512_s21 = sld [smem:[%s12776_s0 + %s10442_s18]]   ;;  %s10445_s30 = smov 7  }
   0x6   :  { %s10517_s25 = sld [smem:[%s12776_s0 + %s10443_s22]]   ;;  %s10446_s4 = smov 8  }
   0x7   :  { %s10522_s29 = sld [smem:[%s12776_s0 + %s10444_s26]]   ;;  %s10447_s10 = smov 9  }
   0x8   :  { %12806 = sst [smem:[#allocation4_spill]] %s10497_s9  ;;  %s10448_s15 = smov 10  }
   0x9   :  { %s10527_s3 = sld [smem:[%s12776_s0 + %s10445_s30]]   ;;  %s10449_s20 = smov 11  }
   0xa   :  { %12807 = sst [smem:[#allocation5_spill]] %s10507_s17  ;;  %s10450_s26 = smov 12  }
   0xb   :  { %12808 = sst [smem:[#allocation6_spill]] %s10512_s21  ;;  %s10451_s1 = smov 13  }
   0xc   :  { %12809 = sst [smem:[#allocation7_spill]] %s10517_s25  ;;  %s10452_s7 = smov 14  }
   0xd   :  { %s10532_s8 = sld [smem:[%s12776_s0 + %s10446_s4]]   ;;  %s10454_s22 = smov 16  }
   0xe   :  { %s10537_s14 = sld [smem:[%s12776_s0 + %s10447_s10]]   ;;  %s10455_s28 = smov 17  }
   0xf   :  { %12810 = sst [smem:[#allocation8_spill]] %s10527_s3  ;;  %s10651_s23 = smov 0  }
  0x10   :  { %s10542_s19 = sld [smem:[%s12776_s0 + %s10448_s15]]   ;;  %s10453_s15 = smov 15  }
  0x11   :  { %s10547_s24 = sld [smem:[%s12776_s0 + %s10449_s20]]  }
  0x12   :  { %s10552_s30 = sld [smem:[%s12776_s0 + %s10450_s26]]   ;;  %s10653_s26 = smov 0  }
  0x13   :  { %12811 = sst [smem:[#allocation9_spill]] %s10532_s8 }
  0x14   :  { %12812 = sst [smem:[#allocation10_spill]] %s10537_s14 }
  0x15   :  { %s10557_s6 = sld [smem:[%s12776_s0 + %s10451_s1]]   ;;  %s10657_s1 = smov 0  }
  0x16   :  { %12813 = sst [smem:[#allocation11_spill]] %s10542_s19 }
  0x17   :  { %12814 = sst [smem:[#allocation12_spill]] %s10547_s24 }
  0x18   :  { %12815 = sst [smem:[#allocation13_spill]] %s10552_s30 }
  0x19   :  { %s10562_s12 = sld [smem:[%s12776_s0 + %s10452_s7]]   ;;  %s10456_s7 = smov 18  }
  0x1a   :  { %s10567_s20 = sld [smem:[%s12776_s0 + %s10453_s15]]   ;;  %s10457_s15 = smov 19  }
  0x1b   :  { %s10572_s27 = sld [smem:[%s12776_s0 + %s10454_s22]]   ;;  %s10458_s22 = smov 20  }
  0x1c   :  { %s10577_s4 = sld [smem:[%s12776_s0 + %s10455_s28]]   ;;  %s10459_s28 = smov 21  }
  0x1d   :  { %s10582_s24 = sld [smem:[%s12776_s0 + %s10456_s7]]   ;;  %s10460_s7 = smov 22  }
  0x1e   :  { %s10587_s14 = sld [smem:[%s12776_s0 + %s10457_s15]]   ;;  %s10461_s15 = smov 23  }
  0x1f   :  { %12816 = sst [smem:[#allocation14_spill]] %s10562_s12 }
  0x20   :  { %12817 = sst [smem:[#allocation15_spill]] %s10567_s20 }
  0x21   :  { %12818 = sst [smem:[#allocation16_spill]] %s10572_s27 }
  0x22   :  { %12819 = sst [smem:[#allocation17_spill]] %s10577_s4 }
  0x23   :  { %12820 = sst [smem:[#allocation18_spill]] %s10582_s24 }
  0x24   :  { %s10592_s27 = sld [smem:[%s12776_s0 + %s10458_s22]]   ;;  %s10462_s22 = smov 24  }
  0x25   :  { %s10597_s4 = sld [smem:[%s12776_s0 + %s10459_s28]]   ;;  %s10463_s28 = smov 25  }
  0x26   :  { %s10602_s24 = sld [smem:[%s12776_s0 + %s10460_s7]]   ;;  %s10464_s7 = smov 26  }
  0x27   :  { %s10607_s25 = sld [smem:[%s12776_s0 + %s10461_s15]]   ;;  %s10465_s15 = smov 27  }
  0x28   :  { %s10612_s3 = sld [smem:[%s12776_s0 + %s10462_s22]]   ;;  %s10466_s22 = smov 28  }
  0x29   :  { %s10617_s19 = sld [smem:[%s12776_s0 + %s10463_s28]]   ;;  %s10467_s28 = smov 29  }
  0x2a   :  { %s10622_s8 = sld [smem:[%s12776_s0 + %s10464_s7]]   ;;  %s10468_s7 = smov 30  }
  0x2b   :  { %12821 = sst [smem:[#allocation19_spill]] %s10597_s4 }
  0x2c   :  { %s10627_s17 = sld [smem:[%s12776_s0 + %s10465_s15]]   ;;  %s10469_s15 = smov 31  }
  0x2d   :  { %s10632_s20 = sld [smem:[%s12776_s0 + %s10466_s22]]   ;;  %s10649_s22 = smov 0  }
  0x2e   :  { %12822 = sst [smem:[#allocation20_spill]] %s10612_s3 }
  0x2f   :  { %s10637_s12 = sld [smem:[%s12776_s0 + %s10467_s28]]   ;;  %s10655_s28 = smov 0  }
  0x30   :  { %s10642_s21 = sld [smem:[%s12776_s0 + %s10468_s7]]  }
  0x31   :  { %12826 = sst [smem:[#allocation24_spill]] %s10651_s23 }
  0x32   :  { %12823 = sst [smem:[#allocation21_spill]] %s10627_s17 }
  0x33   :  { %s10647_s17 = sld [smem:[%s12776_s0 + %s10469_s15]]  }
  0x36   :  { %12824 = sst [smem:[#allocation22_spill]] %s10642_s21 }
  0x39   :  { %12825 = sst [smem:[#allocation23_spill]] %s10647_s17 }
  0x3a LB: > { %s12828_s23 = sld [smem:[#allocation24_spill]]  ;;  %12830 = sst [smem:[#allocation25_spill]] %s10433_s28  ;;  %s10437_s1 = sphi %s10657_s1, %s73_s1   ;;  %s10433_s28 = sphi %s10655_s28, %s12891_s28   ;;  %s10429_s26 = sphi %s10653_s26, %s12890_s26   ;;  %s10421_s22 = sphi %s10649_s22, %s12885_s22  }
  0x3b   : > { %12829 = sst [smem:[#allocation24_spill]] %s10429_s26  ;;  %s82_s0 = sadd.s32 1, %s10429_s26 }
  0x3c   : > { %12831 = sst [smem:[#allocation26_spill]] %s10437_s1  ;;  %s85_s2 = sadd.s32 1, %s10433_s28 }
  0x3d   : > { %p83_p0 = scmp.ge.s32.totalorder %s82_s0, 2  ;;  %p8225_p1 = scmp.ge.s32.totalorder %s10437_s1, 1 }
  0x3e   : > { %p973_p2 = scmp.lt.s32.totalorder %s10437_s1, 5 }
  0x3f   : > { %s12893_s0 = smov (%p83_p0, %s82_s0), 0  ;;  %s12895_s2 = smov (!%p83_p0, %s85_s2), %s10433_s28 }
  0x40   : > { %12832 = sst [smem:[#allocation27_spill]] %s12893_s0  ;;  %p974_p3 = pnand %p8225_p1, %p973_p2 }
  0x41   : > { %p87_p4 = scmp.ge.s32.totalorder %s12895_s2, 2 }
  0x42   : > { %977 = sbr.rel (%p974_p3) target bundleno = 5398 (0x1516), region = 144 }
  0x43   : > { %s12897_s2 = smov (%p87_p4, %s12895_s2), 0 }
  0x44   : > { %12833 = sst [smem:[#allocation28_spill]] %s12897_s2 }
  0x49   : > { %p1094_p5 = scmp.lt.s32.totalorder %s12828_s23, 1  ;;  %s12834_s9 = sld [smem:[#allocation4_spill]] }
  0x4a   : > { %s12835_s30 = sld [smem:[#allocation13_spill]]  ;;  %s12836_s17 = sld [smem:[#allocation23_spill]] }
  0x4b   : > { %s8227_s7 = sshll.u32 %s12828_s23, 3  ;;  %p1107_p7 = scmp.lt.s32.totalorder %s10421_s22, 1 }
  0x4c   : > { %p1102_p6 = scmp.lt.s32.totalorder %s8227_s7, 15  ;;  %s12837_s4 = sld [smem:[#allocation19_spill]] }
  0x4d   : > { %s12899_s23 = smov (!%p1094_p5, %s12828_s23), 1  ;;  %s12838_s3 = sld [smem:[#allocation20_spill]] }
  0x4e   : > { %s12901_s7 = smov (!%p1102_p6, %s8227_s7), 15  ;;  %s8226_s11 = sshll.u32 %s12899_s23, 4 }
  0x4f   : > { %s10688_s15 = scalar_lea.vmem %s12834_s9, %s8226_s11  ;;  %s8228_s16 = sshll.u32 %s12901_s7, 3 }
  0x50   : > { %s10691_s18 = scalar_lea.vmem %s12835_s30, %s8228_s16  ;;  %s10694_s2 = scalar_lea.vmem %s12836_s17, %s8228_s16 }
  0x51   : > { %12839 = sst [smem:[#allocation29_spill]] %s10694_s2  ;;  %p8241_p8 = scmp.ne.s32.totalorder %s10421_s22, 0 }
  0x52   : > { %s10697_s0 = scalar_select %p1107_p7, %s10421_s22, 1 }
  0x53   : > { %1151 = sbr.rel (%p8241_p8) target bundleno = 1485 (0x5cd), region = 148  ;;  %v9232_v0 = vld [vmem:[%s10522_s29 + $0x104] ss:$8 sps:$4 sm:$0xff] (!%p8241_p8)   ;;  %v9234_v1 = vld [vmem:[%s10522_s29 + $0x100] ss:$8 sps:$4 sm:$0xff] (!%p8241_p8)   ;;  %v1334_v7 = vlaneseq (!%p8241_p8)  ;;  %vm1179_vm0 = vcmask (!%p8241_p8), 130048  }
  0x54   : > { %s8780_s28 = sshll.u32 %s10697_s0, 6  ;;  %s8231_s10 = sshll.u32 %s10697_s0, 1  ;;  %3338 = vmatprep.subr.bf16.mxu1 (!%p8241_p8), %v9232_v0  ;;  %v9235_v2 = vld [vmem:[%s10522_s29 + $0x114] ss:$8 sps:$4 sm:$0xff] (!%p8241_p8)   ;;  %v9237_v3 = vld [vmem:[%s10522_s29 + $0x110] ss:$8 sps:$4 sm:$0xff] (!%p8241_p8)  }
  0x55   : > { %s10702_s26 = scalar_lea.vmem %s10587_s14, %s8780_s28  ;;  %s10705_s11 = scalar_lea.vmem %s10592_s27, %s8231_s10  ;;  %3339 = vmatpush1.bf16.msra.mxu1 (!%p8241_p8), %v9234_v1  ;;  %v9238_v4 = vld [vmem:[%s10522_s29 + $0x124] ss:$8 sps:$4 sm:$0xff] (!%p8241_p8)   ;;  %v9240_v5 = vld [vmem:[%s10522_s29 + $0x120] ss:$8 sps:$4 sm:$0xff] (!%p8241_p8)   ;;  %v9241_v6 = vld [vmem:[%s10522_s29 + $0x134] ss:$8 sps:$4 sm:$0xff] (!%p8241_p8)  }
  0x56   : > { %s8781_s9 = sshll.u32 %s10697_s0, 5  ;;  %s10714_s16 = scalar_lea.vmem %s10607_s25, %s8780_s28  ;;  %3340 = vmatprep.subr.bf16.mxu1 (!%p8241_p8), %v9235_v2  ;;  %v9243_v8 = vld [vmem:[%s10522_s29 + $0x130] ss:$8 sps:$4 sm:$0xff] (!%p8241_p8)   ;;  %v9244_v9 = vld [vmem:[%s10522_s29 + $0x144] ss:$8 sps:$4 sm:$0xff] (!%p8241_p8)   ;;  %v10735_v10 = vshrl.u32 (!%p8241_p8), %v1334_v7, 7 }
  0x57   : > { %s10711_s30 = scalar_lea.vmem %s12837_s4, %s8781_s9  ;;  %s10717_s17 = scalar_lea.vmem %s12838_s3, %s8231_s10  ;;  %v9246_v11 = vld [vmem:[%s10522_s29 + $0x140] ss:$8 sps:$4 sm:$0xff] (!%p8241_p8)   ;;  %v9247_v12 = vld [vmem:[%s10522_s29 + $0x154] ss:$8 sps:$4 sm:$0xff] (!%p8241_p8)   ;;  %v9249_v14 = vld [vmem:[%s10522_s29 + $0x150] ss:$8 sps:$4 sm:$0xff] (!%p8241_p8)  }
  0x58   : > { %s8783_s1 = sshll.u32 %s10697_s0, 7  ;;  %v10740_v13 = vsub.s32 (!%p8241_p8), 3, %v10735_v10  ;;  %v9250_v15 = vld [vmem:[%s10522_s29 + $0x164] ss:$8 sps:$4 sm:$0xff] (!%p8241_p8)   ;;  %v9252_v18 = vld [vmem:[%s10522_s29 + $0x160] ss:$8 sps:$4 sm:$0xff] (!%p8241_p8)   ;;  %s12840_s9 = scalar_lea.vmem (!%p8241_p8), %s10492_s5, %s12899_s23 }
  0x59   : > { %s10721_s2 = scalar_lea.vmem %s10617_s19, %s8783_s1  ;;  %3341 = vmatpush1.bf16.msra.mxu1 (!%p8241_p8), %v9237_v3  ;;  %v10745_v16 = vld [vmem:[%s10688_s15] sm:$0xff] (!%p8241_p8)  ;;  %v9253_v19 = vld [vmem:[%s10522_s29 + $0x174] ss:$8 sps:$4 sm:$0xff] (!%p8241_p8)   ;;  %v9255_v21 = vld [vmem:[%s10522_s29 + $0x170] ss:$8 sps:$4 sm:$0xff] (!%p8241_p8)   ;;  %v10470_v51 = vmov (!%p8241_p8), 0  }
  0x5a   : > { %3342 = vmatprep.subr.bf16.mxu1 %v9238_v4  ;;  %v1668_v17 = vrot.slane %v10745_v16, %v10740_v13  ;;  %v9256_v22 = vld [vmem:[%s10522_s29 + $0x184] ss:$8 sps:$4 sm:$0xff]   ;;  %v9258_v24 = vld [vmem:[%s10522_s29 + $0x180] ss:$8 sps:$4 sm:$0xff]   ;;  %v9259_v25 = vld [vmem:[%s10522_s29 + $0x194] ss:$8 sps:$4 sm:$0xff]  }
  0x5b   : > { %v9298_v23 = vld [vmem:[%s10557_s6] sm:$0xff]   ;;  %v1153_v27 = vld [vmem:[%s10691_s18 + $0x8] sm:$0xff]  ;;  %v1154_v28 = vld [vmem:[%s10691_s18 + $0x10] sm:$0xff]  ;;  %vm1273_vm1 = vcmask 523264   ;;  %v10791_v59 = vsub.s32 2, %v10735_v10  ;;  %v10795_v61 = vsub.s32 5, %v10735_v10 }
  0x5c   : > { %v1736_v20 = vpack.c.bf16 %v1668_v17, %v1668_v17  ;;  %8909 = vmatprep.subr.bf16.mxu0 %v9298_v23  ;;  %v1152_v26 = vld [vmem:[%s10691_s18] sm:$0xff]  ;;  %v1155_v30 = vld [vmem:[%s10691_s18 + $0x18] sm:$0xff]  ;;  %v1157_v40 = vld [vmem:[%s10691_s18 + $0x28] sm:$0xff]  ;;  %s12841_s23 = sld [smem:[#allocation6_spill]]  ;;  %s12844_s1 = sld [smem:[#allocation15_spill]]  ;;  %vm4637_vm2 = vcmask 516096  }
  0x5d   : > { %3343 = vmatpush1.bf16.msra.mxu1 %v9240_v5  ;;  %8910 = vmatpush3.bf16.msra.mxu0 %v9298_v23  ;;  %v1160_v29 = vpack.c.bf16 %v1153_v27, %v1152_v26  ;;  %v1161_v31 = vpack.c.bf16 %v1155_v30, %v1154_v28  ;;  %v9302_v32 = vld [vmem:[%s10502_s13] ss:$8 sps:$4 sm:$0xff]   ;;  %v9304_v33 = vld [vmem:[%s10502_s13 + $0x4] ss:$8 sps:$4 sm:$0xff]   ;;  %v9261_v34 = vld [vmem:[%s10522_s29 + $0x190] ss:$8 sps:$4 sm:$0xff]   ;;  %v1664_v63 = vrot.slane %v10745_v16, %v10791_v59 }
  0x5e   : > { %3344 = vmatprep.subr.bf16.mxu1 %v9241_v6  ;;  %3370 = vmatprep.mubr.bf16.mxu1 %v1736_v20  ;;  %v9262_v35 = vld [vmem:[%s10522_s29 + $0x1a4] ss:$8 sps:$4 sm:$0xff]   ;;  %v9310_v36 = vld [vmem:[%s10502_s13 + $0x14] ss:$8 sps:$4 sm:$0xff]   ;;  %v9264_v37 = vld [vmem:[%s10522_s29 + $0x1a0] ss:$8 sps:$4 sm:$0xff]   ;;  %v1676_v1 = vrot.slane %v10745_v16, %v10795_v61 }
  0x5f   : > { %8911 = vmatprep.mubr.msk.bf16.mxu0 %vm1179_vm0, %v1160_v29  ;;  %1347 = vmatprep.subr.bf16.mxu0 %v9304_v33  ;;  %v9308_v38 = vld [vmem:[%s10502_s13 + $0x10] ss:$8 sps:$4 sm:$0xff]   ;;  %v1156_v39 = vld [vmem:[%s10691_s18 + $0x20] sm:$0xff]  ;;  %v9265_v43 = vld [vmem:[%s10522_s29 + $0x1b4] ss:$8 sps:$4 sm:$0xff]   ;;  %v1735_v3 = vpack.c.bf16 %v1664_v63, %v1664_v63  ;;  %s12843_s28 = sld [smem:[#allocation14_spill]] }
  0x60   : > { %8912 = vmatmul.mubr.msk.bf16.vlgmr.msra.gmra.mrb[0].mxu0 %vm1179_vm0, %v1161_v31  ;;  %v1158_v41 = vld [vmem:[%s10691_s18 + $0x30] sm:$0xff]  ;;  %v1159_v42 = vld [vmem:[%s10691_s18 + $0x38] sm:$0xff]  ;;  %v1162_v44 = vpack.c.bf16 %v1157_v40, %v1156_v39  ;;  %v9316_v46 = vld [vmem:[%s10502_s13 + $0x24] ss:$8 sps:$4 sm:$0xff]   ;;  %v1738_v5 = vpack.c.bf16 %v1676_v1, %v1676_v1  ;;  %v1683_v39 = vsub.s32 7, %v10735_v10 }
  0x61   : > { %3345 = vmatpush1.bf16.msra.mxu1 %v9243_v8  ;;  %1348 = vmatpush1.bf16.msra.mxu0 %v9302_v32  ;;  %v1163_v45 = vpack.c.bf16 %v1159_v42, %v1158_v41  ;;  %v9314_v47 = vld [vmem:[%s10502_s13 + $0x20] ss:$8 sps:$4 sm:$0xff]   ;;  %v9267_v48 = vld [vmem:[%s10522_s29 + $0x1b0] ss:$8 sps:$4 sm:$0xff]   ;;  %v9322_v49 = vld [vmem:[%s10502_s13 + $0x34] ss:$8 sps:$4 sm:$0xff]  }
  0x62   : > { %3346 = vmatprep.subr.bf16.mxu1 %v9244_v9  ;;  %1349 = vmatprep.subr.bf16.mxu0 %v9310_v36  ;;  %v9268_v50 = vld [vmem:[%s10522_s29 + $0x1c4] ss:$8 sps:$4 sm:$0xff]   ;;  %v9320_v52 = vld [vmem:[%s10502_s13 + $0x30] ss:$8 sps:$4 sm:$0xff]   ;;  %v1282_v53 = vld [vmem:[%s12840_s9] sm:$0x1]  ;;  %s12842_s10 = smov %s12841_s23  ;;  %s12845_s18 = smov %s12844_s1 }
  0x63   : > { %8915 = vmatprep.mubr.msk.bf16.mxu0 %vm1179_vm0, %v1162_v44  ;;  %v9270_v54 = vld [vmem:[%s10522_s29 + $0x1c0] ss:$8 sps:$4 sm:$0xff]   ;;  %v9271_v55 = vld [vmem:[%s10522_s29 + $0x1d4] ss:$8 sps:$4 sm:$0xff]   ;;  %v1283_v56 = vpack.c.bf16 %v1282_v53, %v1282_v53  ;;  %v9273_v57 = vld [vmem:[%s10522_s29 + $0x1d0] ss:$8 sps:$4 sm:$0xff]  }
  0x64   : > { %v9274_v58 = vld [vmem:[%s10522_s29 + $0x1e4] ss:$8 sps:$4 sm:$0xff]   ;;  %v9276_v60 = vld [vmem:[%s10522_s29 + $0x1e0] ss:$8 sps:$4 sm:$0xff]   ;;  %v9277_v62 = vld [vmem:[%s10522_s29 + $0x1f4] ss:$8 sps:$4 sm:$0xff]  }
  0x65   : > { %3347 = vmatpush1.bf16.msra.mxu1 %v9246_v11  ;;  %1350 = vmatpush1.bf16.msra.mxu0 %v9308_v38  ;;  %v9279_v0 = vld [vmem:[%s10522_s29 + $0x1f0] ss:$8 sps:$4 sm:$0xff]   ;;  %v9282_v2 = vld [vmem:[%s10522_s29 + $0x204] ss:$8 sps:$4 sm:$0xff]   ;;  %v9280_v4 = vld [vmem:[%s10522_s29 + $0x200] ss:$8 sps:$4 sm:$0xff]  }
  0x66   : > { %3348 = vmatprep.subr.bf16.mxu1 %v9247_v12  ;;  %1351 = vmatprep.subr.bf16.mxu0 %v9316_v46  ;;  %v9285_v6 = vld [vmem:[%s10522_s29 + $0x214] ss:$8 sps:$4 sm:$0xff]   ;;  %v9283_v7 = vld [vmem:[%s10522_s29 + $0x210] ss:$8 sps:$4 sm:$0xff]   ;;  %v9288_v8 = vld [vmem:[%s10522_s29 + $0x224] ss:$8 sps:$4 sm:$0xff]  }
  0x67   : > { %v9286_v9 = vld [vmem:[%s10522_s29 + $0x220] ss:$8 sps:$4 sm:$0xff]   ;;  %v9291_v11 = vld [vmem:[%s10522_s29 + $0x234] ss:$8 sps:$4 sm:$0xff]   ;;  %v9289_v12 = vld [vmem:[%s10522_s29 + $0x230] ss:$8 sps:$4 sm:$0xff]  }
  0x68   : > { %8916 = vmatmul.mubr.msk.bf16.gmra.mrb[4].mxu0 %vm1179_vm0, %v1163_v45  ;;  %v9297_v17 = vld [vmem:[%s10522_s29 + $0x254] ss:$8 sps:$4 sm:$0xff]   ;;  %v9299_v20 = vld [vmem:[%s10522_s29 + $0x260] ss:$8 sps:$4 sm:$0xff]   ;;  %v9313_v23 = vld [vmem:[%s10522_s29 + $0x284] ss:$8 sps:$4 sm:$0xff]  }
  0x69   : > { %3349 = vmatpush1.bf16.msra.mxu1 %v9249_v14  ;;  %1379 = vmatprep.mubr.bf16.mxu0 %v10470_v51  ;;  %v9294_v14 = vld [vmem:[%s10522_s29 + $0x244] ss:$8 sps:$4 sm:$0xff]   ;;  %v9317_v26 = vld [vmem:[%s10522_s29 + $0x290] ss:$8 sps:$4 sm:$0xff]   ;;  %v9323_v28 = vld [vmem:[%s10522_s29 + $0x2a0] ss:$8 sps:$4 sm:$0xff]  }
  0x6a   : > { %3350 = vmatprep.subr.bf16.mxu1 %v9250_v15  ;;  %1352 = vmatpush1.bf16.msra.mxu0 %v9314_v47  ;;  %v9292_v15 = vld [vmem:[%s10522_s29 + $0x240] ss:$8 sps:$4 sm:$0xff]   ;;  %v9325_v27 = vld [vmem:[%s10522_s29 + $0x2a4] ss:$8 sps:$4 sm:$0xff]   ;;  %v9328_v29 = vld [vmem:[%s10522_s29 + $0x2b4] ss:$8 sps:$4 sm:$0xff]  }
  0x6b   : > { %1353 = vmatprep.subr.bf16.mxu0 %v9322_v49  ;;  %v9326_v30 = vld [vmem:[%s10522_s29 + $0x2b0] ss:$8 sps:$4 sm:$0xff]   ;;  %v9331_v31 = vld [vmem:[%s10522_s29 + $0x2c4] ss:$8 sps:$4 sm:$0xff]   ;;  %v9329_v32 = vld [vmem:[%s10522_s29 + $0x2c0] ss:$8 sps:$4 sm:$0xff]  }
  0x6c   : > { %v9334_v33 = vld [vmem:[%s10522_s29 + $0x2d4] ss:$8 sps:$4 sm:$0xff]   ;;  %v10833_v36 = vsub.s32 4, %v10735_v10  ;;  %v9338_v41 = vld [vmem:[%s10522_s29 + $0x2f0] ss:$8 sps:$4 sm:$0xff]   ;;  %s12846_s9 = sld [smem:[#allocation5_spill]] }
  0x6d   : > { %3351 = vmatpush1.bf16.msra.mxu1 %v9252_v18  ;;  %v9295_v18 = vld [vmem:[%s10522_s29 + $0x250] ss:$8 sps:$4 sm:$0xff]   ;;  %v9340_v38 = vld [vmem:[%s10522_s29 + $0x2f4] ss:$8 sps:$4 sm:$0xff]   ;;  %v9343_v42 = vld [vmem:[%s10522_s29 + $0x304] ss:$8 sps:$4 sm:$0xff]  }
  0x6e   : > { %3352 = vmatprep.subr.bf16.mxu1 %v9253_v19  ;;  %1354 = vmatpush1.bf16.msra.mxu0 %v9320_v52  ;;  %v9301_v19 = vld [vmem:[%s10522_s29 + $0x264] ss:$8 sps:$4 sm:$0xff]   ;;  %v1672_v40 = vrot.slane %v10745_v16, %v10833_v36  ;;  %v9341_v45 = vld [vmem:[%s10522_s29 + $0x300] ss:$8 sps:$4 sm:$0xff]   ;;  %v9346_v46 = vld [vmem:[%s10522_s29 + $0x314] ss:$8 sps:$4 sm:$0xff]  }
  0x6f   : > { %v9349_v49 = vld [vmem:[%s10522_s29 + $0x324] ss:$8 sps:$4 sm:$0xff]   ;;  %v9350_v51 = vld [vmem:[%s10522_s29 + $0x330] ss:$8 sps:$4 sm:$0xff]   ;;  %v9353_v53 = vld [vmem:[%s10522_s29 + $0x340] ss:$8 sps:$4 sm:$0xff]  }
  0x70   : > { %v1737_v44 = vpack.c.bf16 %v1672_v40, %v1672_v40  ;;  %v9355_v52 = vld [vmem:[%s10522_s29 + $0x344] ss:$8 sps:$4 sm:$0xff]   ;;  %v9365_v63 = vld [vmem:[%s10522_s29 + $0x380] ss:$8 sps:$4 sm:$0xff]   ;;  %v9503_v40 = vld [vmem:[%s12842_s10 + $0x70] ss:$8 sps:$4 sm:$0xff]  }
  0x71   : > { %3353 = vmatpush1.bf16.msra.mxu1 %v9255_v21  ;;  %8256 = vmatmul.mubr.msk.bf16.vlgmr.msra.gmra.mrb[8].mxu0 %vm1273_vm1, %v1283_v56  ;;  %v9307_v21 = vld [vmem:[%s10522_s29 + $0x274] ss:$8 sps:$4 sm:$0xff]   ;;  %v9361_v56 = vld [vmem:[%s10522_s29 + $0x364] ss:$8 sps:$4 sm:$0xff]  }
  0x72   : > { %3354 = vmatprep.subr.bf16.mxu1 %v9256_v22  ;;  %v9305_v22 = vld [vmem:[%s10522_s29 + $0x270] ss:$8 sps:$4 sm:$0xff]   ;;  %v9463_v1 = vld [vmem:[%s12842_s10 + $0x4] ss:$8 sps:$4 sm:$0xff]  }
  0x73   : > { %1608 = vmatprep.subr.bf16.mxu0 %v9463_v1  ;;  %v9404_v1 = vld [vmem:[%s10522_s29 + $0x450] ss:$8 sps:$4 sm:$0xff]  }
  0x75   : > { %3355 = vmatpush1.bf16.msra.mxu1 %v9258_v24  ;;  %v9311_v24 = vld [vmem:[%s10522_s29 + $0x280] ss:$8 sps:$4 sm:$0xff]  }
  0x76   : > { %3356 = vmatprep.subr.bf16.mxu1 %v9259_v25  ;;  %v9319_v25 = vld [vmem:[%s10522_s29 + $0x294] ss:$8 sps:$4 sm:$0xff]  }
  0x79   : > { %3357 = vmatpush1.bf16.msra.mxu1 %v9261_v34  ;;  %v9332_v34 = vld [vmem:[%s10522_s29 + $0x2d0] ss:$8 sps:$4 sm:$0xff]  }
  0x7a   : > { %3358 = vmatprep.subr.bf16.mxu1 %v9262_v35  ;;  %v9337_v35 = vld [vmem:[%s10522_s29 + $0x2e4] ss:$8 sps:$4 sm:$0xff]  }
  0x7d   : > { %3359 = vmatpush1.bf16.msra.mxu1 %v9264_v37  ;;  %v9335_v37 = vld [vmem:[%s10522_s29 + $0x2e0] ss:$8 sps:$4 sm:$0xff]  }
  0x7e   : > { %3360 = vmatprep.subr.bf16.mxu1 %v9265_v43  ;;  %v1684_v43 = vrot.slane %v10745_v16, %v1683_v39  ;;  %v9347_v16 = vld [vmem:[%s10522_s29 + $0x320] ss:$8 sps:$4 sm:$0xff]  }
  0x80   : > { %v1740_v47 = vpack.c.bf16 %v1684_v43, %v1684_v43  ;;  %v9389_v43 = vld [vmem:[%s10522_s29 + $0x400] ss:$8 sps:$4 sm:$0xff]  }
  0x81   : > { %3361 = vmatpush1.bf16.msra.mxu1 %v9267_v48  ;;  %v9344_v48 = vld [vmem:[%s10522_s29 + $0x310] ss:$8 sps:$4 sm:$0xff]  }
  0x82   : > { %3362 = vmatprep.subr.bf16.mxu1 %v9268_v50  ;;  %v9352_v50 = vld [vmem:[%s10522_s29 + $0x334] ss:$8 sps:$4 sm:$0xff]  }
  0x85   : > { %3363 = vmatpush1.bf16.msra.mxu1 %v9270_v54  ;;  %v9358_v54 = vld [vmem:[%s10522_s29 + $0x354] ss:$8 sps:$4 sm:$0xff]  }
  0x86   : > { %3364 = vmatprep.subr.bf16.mxu1 %v9271_v55  ;;  %v9356_v55 = vld [vmem:[%s10522_s29 + $0x350] ss:$8 sps:$4 sm:$0xff]  }
  0x89   : > { %3365 = vmatpush1.bf16.msra.mxu1 %v9273_v57  ;;  %v9359_v57 = vld [vmem:[%s10522_s29 + $0x360] ss:$8 sps:$4 sm:$0xff]  }
  0x8a   : > { %3366 = vmatprep.subr.bf16.mxu1 %v9274_v58  ;;  %v9364_v58 = vld [vmem:[%s10522_s29 + $0x374] ss:$8 sps:$4 sm:$0xff]  }
  0x8d   : > { %3367 = vmatpush1.bf16.msra.mxu1 %v9276_v60  ;;  %v9362_v60 = vld [vmem:[%s10522_s29 + $0x370] ss:$8 sps:$4 sm:$0xff]  }
  0x8e   : > { %3368 = vmatprep.subr.bf16.mxu1 %v9277_v62  ;;  %v9367_v62 = vld [vmem:[%s10522_s29 + $0x384] ss:$8 sps:$4 sm:$0xff]  }
  0x91   : > { %3369 = vmatpush1.bf16.msra.mxu1 %v9279_v0  ;;  %v9461_v0 = vld [vmem:[%s12841_s23] ss:$8 sps:$4 sm:$0xff]   ;;  %s12847_s23 = sld [smem:[#allocation9_spill]] }
  0x92   : > { %3379 = vmatprep.subr.bf16.mxu1 %v9282_v2  ;;  %v9370_v2 = vld [vmem:[%s10522_s29 + $0x394] ss:$8 sps:$4 sm:$0xff]   ;;  %1609 = vmatpush1.bf16.msra.mxu0 %v9461_v0  ;;  %v9533_v0 = vld [vmem:[%s12842_s10 + $0xc0] ss:$8 sps:$4 sm:$0xff]  }
  0x94   : > { %3371 = vmatmul.mubr.bf16.vlgmr.msra.gmra.mrb[0].mxu1 %v1735_v3  ;;  %v9368_v3 = vld [vmem:[%s10522_s29 + $0x390] ss:$8 sps:$4 sm:$0xff]  }
  0x95   : > { %3380 = vmatpush1.bf16.msra.mxu1 %v9280_v4  ;;  %3411 = vmatprep.mubr.bf16.mxu1 %v1738_v5  ;;  %v9467_v4 = vld [vmem:[%s12842_s10 + $0x10] ss:$8 sps:$4 sm:$0xff]   ;;  %v9469_v5 = vld [vmem:[%s12842_s10 + $0x14] ss:$8 sps:$4 sm:$0xff]  }
  0x96   : > { %3381 = vmatprep.subr.bf16.mxu1 %v9285_v6  ;;  %v9373_v6 = vld [vmem:[%s10522_s29 + $0x3a4] ss:$8 sps:$4 sm:$0xff]   ;;  %1610 = vmatprep.subr.bf16.mxu0 %v9469_v5  ;;  %v9407_v5 = vld [vmem:[%s10522_s29 + $0x460] ss:$8 sps:$4 sm:$0xff]  }
  0x97   : > { %1611 = vmatpush1.bf16.msra.mxu0 %v9467_v4  ;;  %v9539_v4 = vld [vmem:[%s12842_s10 + $0xd0] ss:$8 sps:$4 sm:$0xff]  }
  0x99   : > { %3382 = vmatpush1.bf16.msra.mxu1 %v9283_v7  ;;  %v9371_v7 = vld [vmem:[%s10522_s29 + $0x3a0] ss:$8 sps:$4 sm:$0xff]  }
  0x9a   : > { %3383 = vmatprep.subr.bf16.mxu1 %v9288_v8  ;;  %v9473_v8 = vld [vmem:[%s12842_s10 + $0x20] ss:$8 sps:$4 sm:$0xff]  }
  0x9d   : > { %3384 = vmatpush1.bf16.msra.mxu1 %v9286_v9  ;;  %v9475_v9 = vld [vmem:[%s12842_s10 + $0x24] ss:$8 sps:$4 sm:$0xff]  }
  0x9e   : > { %3385 = vmatprep.subr.bf16.mxu1 %v9291_v11  ;;  %v9376_v11 = vld [vmem:[%s10522_s29 + $0x3b4] ss:$8 sps:$4 sm:$0xff]   ;;  %1612 = vmatprep.subr.bf16.mxu0 %v9475_v9  ;;  %v9410_v9 = vld [vmem:[%s10522_s29 + $0x470] ss:$8 sps:$4 sm:$0xff]  }
  0x9f   : > { %1613 = vmatpush1.bf16.msra.mxu0 %v9473_v8  ;;  %v9545_v8 = vld [vmem:[%s12842_s10 + $0xe0] ss:$8 sps:$4 sm:$0xff]  }
  0xa1   : > { %3386 = vmatpush1.bf16.msra.mxu1 %v9289_v12  ;;  %v9374_v12 = vld [vmem:[%s10522_s29 + $0x3b0] ss:$8 sps:$4 sm:$0xff]  }
  0xa2   : > { %3387 = vmatprep.subr.bf16.mxu1 %v9294_v14  ;;  %v9479_v14 = vld [vmem:[%s12842_s10 + $0x30] ss:$8 sps:$4 sm:$0xff]  }
  0xa5   : > { %3388 = vmatpush1.bf16.msra.mxu1 %v9292_v15  ;;  %v9481_v15 = vld [vmem:[%s12842_s10 + $0x34] ss:$8 sps:$4 sm:$0xff]  }
  0xa6   : > { %3389 = vmatprep.subr.bf16.mxu1 %v9297_v17  ;;  %v9379_v17 = vld [vmem:[%s10522_s29 + $0x3c4] ss:$8 sps:$4 sm:$0xff]   ;;  %1614 = vmatprep.subr.bf16.mxu0 %v9481_v15  ;;  %v9413_v15 = vld [vmem:[%s10522_s29 + $0x480] ss:$8 sps:$4 sm:$0xff]  }
  0xa7   : > { %1615 = vmatpush1.bf16.msra.mxu0 %v9479_v14  ;;  %v9551_v14 = vld [vmem:[%s12842_s10 + $0xf0] ss:$8 sps:$4 sm:$0xff]  }
  0xa9   : > { %3390 = vmatpush1.bf16.msra.mxu1 %v9295_v18  ;;  %v9377_v18 = vld [vmem:[%s10522_s29 + $0x3c0] ss:$8 sps:$4 sm:$0xff]  }
  0xaa   : > { %3391 = vmatprep.subr.bf16.mxu1 %v9301_v19  ;;  %v9485_v19 = vld [vmem:[%s12842_s10 + $0x40] ss:$8 sps:$4 sm:$0xff]  }
  0xad   : > { %3392 = vmatpush1.bf16.msra.mxu1 %v9299_v20  ;;  %v9487_v20 = vld [vmem:[%s12842_s10 + $0x44] ss:$8 sps:$4 sm:$0xff]  }
  0xae   : > { %3393 = vmatprep.subr.bf16.mxu1 %v9307_v21  ;;  %v9382_v21 = vld [vmem:[%s10522_s29 + $0x3d4] ss:$8 sps:$4 sm:$0xff]   ;;  %1616 = vmatprep.subr.bf16.mxu0 %v9487_v20  ;;  %v9419_v20 = vld [vmem:[%s10522_s29 + $0x4a0] ss:$8 sps:$4 sm:$0xff]  }
  0xaf   : > { %1617 = vmatpush1.bf16.msra.mxu0 %v9485_v19  ;;  %v9421_v19 = vld [vmem:[%s10522_s29 + $0x4a4] ss:$8 sps:$4 sm:$0xff]  }
  0xb1   : > { %3394 = vmatpush1.bf16.msra.mxu1 %v9305_v22  ;;  %v9380_v22 = vld [vmem:[%s10522_s29 + $0x3d0] ss:$8 sps:$4 sm:$0xff]  }
  0xb2   : > { %3395 = vmatprep.subr.bf16.mxu1 %v9313_v23  ;;  %v9491_v23 = vld [vmem:[%s12842_s10 + $0x50] ss:$8 sps:$4 sm:$0xff]  }
  0xb5   : > { %3396 = vmatpush1.bf16.msra.mxu1 %v9311_v24  ;;  %v9493_v24 = vld [vmem:[%s12842_s10 + $0x54] ss:$8 sps:$4 sm:$0xff]  }
  0xb6   : > { %3397 = vmatprep.subr.bf16.mxu1 %v9319_v25  ;;  %v9385_v25 = vld [vmem:[%s10522_s29 + $0x3e4] ss:$8 sps:$4 sm:$0xff]   ;;  %1618 = vmatprep.subr.bf16.mxu0 %v9493_v24  ;;  %v9425_v24 = vld [vmem:[%s10522_s29 + $0x4c0] ss:$8 sps:$4 sm:$0xff]  }
  0xb7   : > { %1619 = vmatpush1.bf16.msra.mxu0 %v9491_v23  ;;  %v9427_v23 = vld [vmem:[%s10522_s29 + $0x4c4] ss:$8 sps:$4 sm:$0xff]  }
  0xb9   : > { %3398 = vmatpush1.bf16.msra.mxu1 %v9317_v26  ;;  %v1679_v26 = vsub.s32 6, %v10735_v10 }
  0xba   : > { %3399 = vmatprep.subr.bf16.mxu1 %v9325_v27  ;;  %v9383_v27 = vld [vmem:[%s10522_s29 + $0x3e0] ss:$8 sps:$4 sm:$0xff]  }
  0xbd   : > { %3400 = vmatpush1.bf16.msra.mxu1 %v9323_v28  ;;  %v9388_v28 = vld [vmem:[%s10522_s29 + $0x3f4] ss:$8 sps:$4 sm:$0xff]  }
  0xbe   : > { %3401 = vmatprep.subr.bf16.mxu1 %v9328_v29  ;;  %v10889_v29 = vsub.s32 1, %v10735_v10 }
  0xc1   : > { %3402 = vmatpush1.bf16.msra.mxu1 %v9326_v30  ;;  %v10892_v30 = vld [vmem:[%s10688_s15 + $0x8] sm:$0xff] }
  0xc2   : > { %3403 = vmatprep.subr.bf16.mxu1 %v9331_v31  ;;  %v9497_v31 = vld [vmem:[%s12842_s10 + $0x60] ss:$8 sps:$4 sm:$0xff]  }
  0xc5   : > { %3404 = vmatpush1.bf16.msra.mxu1 %v9329_v32  ;;  %v9499_v32 = vld [vmem:[%s12842_s10 + $0x64] ss:$8 sps:$4 sm:$0xff]  }
  0xc6   : > { %3405 = vmatprep.subr.bf16.mxu1 %v9334_v33  ;;  %v10897_v33 = vld [vmem:[%s10688_s15] sm:$0xff]  ;;  %1620 = vmatprep.subr.bf16.mxu0 %v9499_v32  ;;  %v10954_v32 = vsub.s32 0, %v10735_v10 }
  0xc7   : > { %1621 = vmatpush1.bf16.msra.mxu0 %v9497_v31  ;;  %v8242_v31 = vld [vmem:[%s12843_s28] ss:$0 sm:$0xff]  ;;  %s12850_s28 = sld [smem:[#allocation8_spill]] }
  0xc9   : > { %3406 = vmatpush1.bf16.msra.mxu1 %v9332_v34  ;;  %v1680_v34 = vrot.slane %v10897_v33, %v1679_v26 }
  0xca   : > { %3407 = vmatprep.subr.bf16.mxu1 %v9337_v35  ;;  %v9386_v35 = vld [vmem:[%s10522_s29 + $0x3f0] ss:$8 sps:$4 sm:$0xff]  }
  0xcd   : > { %3408 = vmatpush1.bf16.msra.mxu1 %v9335_v37  ;;  %v1692_v37 = vrot.slane %v10892_v30, %v10889_v29 }
  0xce   : > { %3409 = vmatprep.subr.bf16.mxu1 %v9340_v38  ;;  %v9391_v38 = vld [vmem:[%s10522_s29 + $0x404] ss:$8 sps:$4 sm:$0xff]  }
  0xd1   : > { %3410 = vmatpush1.bf16.msra.mxu1 %v9338_v41  ;;  %v9505_v41 = vld [vmem:[%s12842_s10 + $0x74] ss:$8 sps:$4 sm:$0xff]  }
  0xd2   : > { %3420 = vmatprep.subr.bf16.mxu1 %v9343_v42  ;;  %v1739_v42 = vpack.c.bf16 %v1680_v34, %v1680_v34  ;;  %1622 = vmatprep.subr.bf16.mxu0 %v9505_v41  ;;  %v9431_v34 = vld [vmem:[%s10522_s29 + $0x4e0] ss:$8 sps:$4 sm:$0xff]  }
  0xd3   : > { %1623 = vmatpush1.bf16.msra.mxu0 %v9503_v40 }
  0xd4   : > { %3412 = vmatmul.mubr.bf16.vlgmr.msra.gmra.mrb[0].mxu1 %v1737_v44  ;;  %v9394_v44 = vld [vmem:[%s10522_s29 + $0x414] ss:$8 sps:$4 sm:$0xff]  }
  0xd5   : > { %3421 = vmatpush1.bf16.msra.mxu1 %v9341_v45  ;;  %3452 = vmatprep.mubr.bf16.mxu1 %v1740_v47  ;;  %v1742_v45 = vpack.c.bf16 %v1692_v37, %v1692_v37  ;;  %v9509_v47 = vld [vmem:[%s12842_s10 + $0x80] ss:$8 sps:$4 sm:$0xff]   ;;  %v1259_v37 = vld [vmem:[%s12844_s1 + $0x10] sm:$0xff]  ;;  %s12851_s1 = sld [smem:[#allocation7_spill]] }
  0xd6   : > { %3422 = vmatprep.subr.bf16.mxu1 %v9346_v46  ;;  %v9511_v46 = vld [vmem:[%s12842_s10 + $0x84] ss:$8 sps:$4 sm:$0xff]  }
  0xd7   : > { %1624 = vmatprep.subr.bf16.mxu0 %v9511_v46  ;;  %v1688_v46 = vrot.slane %v10892_v30, %v10954_v32 }
  0xd8   : > { %1625 = vmatpush1.bf16.msra.mxu0 %v9509_v47 }
  0xd9   : > { %3423 = vmatpush1.bf16.msra.mxu1 %v9344_v48  ;;  %v9392_v48 = vld [vmem:[%s10522_s29 + $0x410] ss:$8 sps:$4 sm:$0xff]  }
  0xda   : > { %3424 = vmatprep.subr.bf16.mxu1 %v9349_v49  ;;  %v9397_v49 = vld [vmem:[%s10522_s29 + $0x424] ss:$8 sps:$4 sm:$0xff]  }
  0xdd   : > { %3425 = vmatpush1.bf16.msra.mxu1 %v9347_v16  ;;  %v9517_v16 = vld [vmem:[%s12842_s10 + $0x94] ss:$8 sps:$4 sm:$0xff]  }
  0xde   : > { %3426 = vmatprep.subr.bf16.mxu1 %v9352_v50  ;;  %v9515_v50 = vld [vmem:[%s12842_s10 + $0x90] ss:$8 sps:$4 sm:$0xff]   ;;  %1626 = vmatprep.subr.bf16.mxu0 %v9517_v16  ;;  %v1258_v16 = vld [vmem:[%s12845_s18 + $0x8] sm:$0xff] }
  0xdf   : > { %1627 = vmatpush1.bf16.msra.mxu0 %v9515_v50  ;;  %v9434_v50 = vld [vmem:[%s10522_s29 + $0x4f0] ss:$8 sps:$4 sm:$0xff]  }
  0xe1   : > { %3427 = vmatpush1.bf16.msra.mxu1 %v9350_v51  ;;  %v9395_v51 = vld [vmem:[%s10522_s29 + $0x420] ss:$8 sps:$4 sm:$0xff]  }
  0xe2   : > { %3428 = vmatprep.subr.bf16.mxu1 %v9355_v52  ;;  %v9400_v52 = vld [vmem:[%s10522_s29 + $0x434] ss:$8 sps:$4 sm:$0xff]  }
  0xe5   : > { %3429 = vmatpush1.bf16.msra.mxu1 %v9353_v53  ;;  %v9523_v53 = vld [vmem:[%s12842_s10 + $0xa4] ss:$8 sps:$4 sm:$0xff]  }
  0xe6   : > { %3430 = vmatprep.subr.bf16.mxu1 %v9358_v54  ;;  %v9521_v54 = vld [vmem:[%s12842_s10 + $0xa0] ss:$8 sps:$4 sm:$0xff]   ;;  %1628 = vmatprep.subr.bf16.mxu0 %v9523_v53  ;;  %v1700_v53 = vrot.slane %v10892_v30, %v10740_v13 }
  0xe7   : > { %1629 = vmatpush1.bf16.msra.mxu0 %v9521_v54  ;;  %v9580_v54 = vld [vmem:[%s10522_s29 + $0x4] ss:$8 sps:$4 sm:$0xff]  }
  0xe9   : > { %3431 = vmatpush1.bf16.msra.mxu1 %v9356_v55  ;;  %v9398_v55 = vld [vmem:[%s10522_s29 + $0x430] ss:$8 sps:$4 sm:$0xff]  }
  0xea   : > { %3432 = vmatprep.subr.bf16.mxu1 %v9361_v56  ;;  %v9403_v56 = vld [vmem:[%s10522_s29 + $0x444] ss:$8 sps:$4 sm:$0xff]  }
  0xed   : > { %3433 = vmatpush1.bf16.msra.mxu1 %v9359_v57  ;;  %v9529_v57 = vld [vmem:[%s12842_s10 + $0xb4] ss:$8 sps:$4 sm:$0xff]  }
  0xee   : > { %3434 = vmatprep.subr.bf16.mxu1 %v9364_v58  ;;  %v9527_v58 = vld [vmem:[%s12842_s10 + $0xb0] ss:$8 sps:$4 sm:$0xff]   ;;  %1630 = vmatprep.subr.bf16.mxu0 %v9529_v57 }
  0xef   : > { %1631 = vmatpush1.bf16.msra.mxu0 %v9527_v58  ;;  %v1741_v58 = vpack.c.bf16 %v1688_v46, %v1688_v46  ;;  %v9457_v46 = vld [vmem:[%s10522_s29 + $0x564] ss:$8 sps:$4 sm:$0xff]  }
  0xf1   : > { %3435 = vmatpush1.bf16.msra.mxu1 %v9362_v60  ;;  %v9401_v60 = vld [vmem:[%s10522_s29 + $0x440] ss:$8 sps:$4 sm:$0xff]  }
  0xf2   : > { %3436 = vmatprep.subr.bf16.mxu1 %v9367_v62  ;;  %v9406_v62 = vld [vmem:[%s10522_s29 + $0x454] ss:$8 sps:$4 sm:$0xff]  }
  0xf5   : > { %3437 = vmatpush1.bf16.msra.mxu1 %v9365_v63  ;;  %v9535_v63 = vld [vmem:[%s12842_s10 + $0xc4] ss:$8 sps:$4 sm:$0xff]  }
  0xf6   : > { %3438 = vmatprep.subr.bf16.mxu1 %v9370_v2  ;;  %1632 = vmatprep.subr.bf16.mxu0 %v9535_v63  ;;  %v9409_v2 = vld [vmem:[%s10522_s29 + $0x464] ss:$8 sps:$4 sm:$0xff]   ;;  %v1263_v63 = vld [vmem:[%s12845_s18 + $0x30] sm:$0xff] }
  0xf7   : > { %1633 = vmatpush1.bf16.msra.mxu0 %v9533_v0  ;;  %v1744_v0 = vpack.c.bf16 %v1700_v53, %v1700_v53  ;;  %v9466_v53 = vld [vmem:[%s10522_s29 + $0x584] ss:$8 sps:$4 sm:$0xff]  }
  0xf9   : > { %3439 = vmatpush1.bf16.msra.mxu1 %v9368_v3  ;;  %v9541_v3 = vld [vmem:[%s12842_s10 + $0xd4] ss:$8 sps:$4 sm:$0xff]  }
  0xfa   : > { %3440 = vmatprep.subr.bf16.mxu1 %v9373_v6  ;;  %1634 = vmatprep.subr.bf16.mxu0 %v9541_v3  ;;  %v9412_v6 = vld [vmem:[%s10522_s29 + $0x474] ss:$8 sps:$4 sm:$0xff]  }
  0xfb   : > { %1635 = vmatpush1.bf16.msra.mxu0 %v9539_v4  ;;  %v1261_v4 = vld [vmem:[%s12845_s18 + $0x20] sm:$0xff] }
  0xfd   : > { %3441 = vmatpush1.bf16.msra.mxu1 %v9371_v7  ;;  %v9547_v7 = vld [vmem:[%s12842_s10 + $0xe4] ss:$8 sps:$4 sm:$0xff]  }
  0xfe   : > { %3442 = vmatprep.subr.bf16.mxu1 %v9376_v11  ;;  %1636 = vmatprep.subr.bf16.mxu0 %v9547_v7  ;;  %v9415_v11 = vld [vmem:[%s10522_s29 + $0x484] ss:$8 sps:$4 sm:$0xff]   ;;  %v1264_v7 = vld [vmem:[%s12845_s18 + $0x38] sm:$0xff] }
  0xff   : > { %1637 = vmatpush1.bf16.msra.mxu0 %v9545_v8 }
 0x101   : > { %3443 = vmatpush1.bf16.msra.mxu1 %v9374_v12  ;;  %v9553_v12 = vld [vmem:[%s12842_s10 + $0xf4] ss:$8 sps:$4 sm:$0xff]  }
 0x102   : > { %3444 = vmatprep.subr.bf16.mxu1 %v9379_v17  ;;  %1638 = vmatprep.subr.bf16.mxu0 %v9553_v12  ;;  %v9418_v17 = vld [vmem:[%s10522_s29 + $0x494] ss:$8 sps:$4 sm:$0xff]   ;;  %v1262_v12 = vld [vmem:[%s12845_s18 + $0x28] sm:$0xff] }
 0x103   : > { %1639 = vmatpush1.bf16.msra.mxu0 %v9551_v14  ;;  %v1292_v14 = vld [vmem:[%s12846_s9] sm:$0x3]  ;;  %s12848_s9 = smov %s12847_s23 }
 0x104   : > { %3297 = vmatprep.subr.bf16.mxu0 %v9580_v54  ;;  %v9464_v54 = vld [vmem:[%s10522_s29 + $0x580] ss:$8 sps:$4 sm:$0xff]  }
 0x105   : > { %3445 = vmatpush1.bf16.msra.mxu1 %v9377_v18  ;;  %v9416_v18 = vld [vmem:[%s10522_s29 + $0x490] ss:$8 sps:$4 sm:$0xff]  }
 0x106   : > { %3446 = vmatprep.subr.bf16.mxu1 %v9382_v21  ;;  %v9424_v21 = vld [vmem:[%s10522_s29 + $0x4b4] ss:$8 sps:$4 sm:$0xff]  }
 0x109   : > { %3447 = vmatpush1.bf16.msra.mxu1 %v9380_v22  ;;  %v9422_v22 = vld [vmem:[%s10522_s29 + $0x4b0] ss:$8 sps:$4 sm:$0xff]  }
 0x10a   : > { %3448 = vmatprep.subr.bf16.mxu1 %v9385_v25  ;;  %v9430_v25 = vld [vmem:[%s10522_s29 + $0x4d4] ss:$8 sps:$4 sm:$0xff]  }
 0x10d   : > { %3449 = vmatpush1.bf16.msra.mxu1 %v9383_v27  ;;  %v9428_v27 = vld [vmem:[%s10522_s29 + $0x4d0] ss:$8 sps:$4 sm:$0xff]  }
 0x10e   : > { %3450 = vmatprep.subr.bf16.mxu1 %v9388_v28  ;;  %v9433_v28 = vld [vmem:[%s10522_s29 + $0x4e4] ss:$8 sps:$4 sm:$0xff]  }
 0x111   : > { %3451 = vmatpush1.bf16.msra.mxu1 %v9386_v35 }
 0x112   : > { %3461 = vmatprep.subr.bf16.mxu1 %v9391_v38  ;;  %v9436_v38 = vld [vmem:[%s10522_s29 + $0x4f4] ss:$8 sps:$4 sm:$0xff]  }
 0x114   : > { %3453 = vmatmul.mubr.bf16.vlgmr.msra.gmra.mrb[0].mxu1 %v1739_v42  ;;  %v1257_v42 = vld [vmem:[%s12845_s18] sm:$0xff] }
 0x115   : > { %3462 = vmatpush1.bf16.msra.mxu1 %v9389_v43  ;;  %3493 = vmatprep.mubr.bf16.mxu1 %v1742_v45  ;;  %v1260_v45 = vld [vmem:[%s12845_s18 + $0x18] sm:$0xff] }
 0x116   : > { %3463 = vmatprep.subr.bf16.mxu1 %v9394_v44 }
 0x119   : > { %3464 = vmatpush1.bf16.msra.mxu1 %v9392_v48 }
 0x11a   : > { %3465 = vmatprep.subr.bf16.mxu1 %v9397_v49 }
 0x11d   : > { %3466 = vmatpush1.bf16.msra.mxu1 %v9395_v51 }
 0x11e   : > { %3467 = vmatprep.subr.bf16.mxu1 %v9400_v52 }
 0x121   : > { %3468 = vmatpush1.bf16.msra.mxu1 %v9398_v55  ;;  %v9439_v55 = vld [vmem:[%s10522_s29 + $0x504] ss:$8 sps:$4 sm:$0xff]  }
 0x122   : > { %3469 = vmatprep.subr.bf16.mxu1 %v9403_v56 }
 0x125   : > { %3470 = vmatpush1.bf16.msra.mxu1 %v9401_v60  ;;  %v9437_v60 = vld [vmem:[%s10522_s29 + $0x500] ss:$8 sps:$4 sm:$0xff]  }
 0x126   : > { %3471 = vmatprep.subr.bf16.mxu1 %v9406_v62 }
 0x129   : > { %3472 = vmatpush1.bf16.msra.mxu1 %v9404_v1  ;;  %v9442_v1 = vld [vmem:[%s10522_s29 + $0x514] ss:$8 sps:$4 sm:$0xff]  }
 0x12a   : > { %3473 = vmatprep.subr.bf16.mxu1 %v9409_v2 }
 0x12d   : > { %3474 = vmatpush1.bf16.msra.mxu1 %v9407_v5 }
 0x12e   : > { %3475 = vmatprep.subr.bf16.mxu1 %v9412_v6 }
 0x131   : > { %3476 = vmatpush1.bf16.msra.mxu1 %v9410_v9 }
 0x132   : > { %3477 = vmatprep.subr.bf16.mxu1 %v9415_v11 }
 0x133   : > { %v8913_v35 = vpop.f32.mrb[0].mxu0 }
 0x134   : > { %v1235_v40 = vadd.f32 %v8913_v35, %v8242_v31  ;;  %v1226_v41 = vpop.f32.mrb[1].mxu0 }
 0x135   : > { %3478 = vmatpush1.bf16.msra.mxu1 %v9413_v15  ;;  %v1227_v43 = vadd.f32 %v8242_v31, %v1226_v41  ;;  %v8914_v44 = vpop.f32.mrb[2].mxu0  ;;  %v9440_v15 = vld [vmem:[%s10522_s29 + $0x510] ss:$8 sps:$4 sm:$0xff]   ;;  %v9451_v41 = vld [vmem:[%s10522_s29 + $0x544] ss:$8 sps:$4 sm:$0xff]  }
 0x136   : > { %3479 = vmatprep.subr.bf16.mxu1 %v9418_v17  ;;  %v1267_v47 = vadd.f32 %v1259_v37, %v1235_v40  ;;  %v1238_v48 = vadd.f32 %v8914_v44, %v8242_v31  ;;  %v1229_v49 = vpop.f32.mrb[3].mxu0  ;;  %v9446_v37 = vld [vmem:[%s10522_s29 + $0x530] ss:$8 sps:$4 sm:$0xff]   ;;  %v9454_v44 = vld [vmem:[%s10522_s29 + $0x554] ss:$8 sps:$4 sm:$0xff]  }
 0x137   : > { %v1265_v51 = vadd.f32 %v1257_v42, %v1227_v43  ;;  %v1230_v52 = vadd.f32 %v8242_v31, %v1229_v49  ;;  %v9449_v43 = vld [vmem:[%s10522_s29 + $0x540] ss:$8 sps:$4 sm:$0xff]  }
 0x138   : > { %1276 = vst.msk [vmem:[#allocation2 + $0x10] sm:$0xff] %vm1273_vm1, %v1267_v47  ;;  %v1268_v56 = vadd.f32 %v1260_v45, %v1238_v48  ;;  %v9452_v45 = vld [vmem:[%s10522_s29 + $0x550] ss:$8 sps:$4 sm:$0xff]   ;;  %v9455_v48 = vld [vmem:[%s10522_s29 + $0x560] ss:$8 sps:$4 sm:$0xff]  }
 0x139   : > { %3480 = vmatpush1.bf16.msra.mxu1 %v9416_v18  ;;  %1274 = vst.msk [vmem:[#allocation2] sm:$0xff] %vm1273_vm1, %v1265_v51  ;;  %v1266_v57 = vadd.f32 %v1258_v16, %v1230_v52  ;;  %v9460_v16 = vld [vmem:[%s10522_s29 + $0x574] ss:$8 sps:$4 sm:$0xff]   ;;  %v9458_v52 = vld [vmem:[%s10522_s29 + $0x570] ss:$8 sps:$4 sm:$0xff]  }
 0x13a   : > { %3481 = vmatprep.subr.bf16.mxu1 %v9421_v19  ;;  %1277 = vst.msk [vmem:[#allocation2 + $0x18] sm:$0xff] %vm1273_vm1, %v1268_v56  ;;  %v9445_v19 = vld [vmem:[%s10522_s29 + $0x524] ss:$8 sps:$4 sm:$0xff]   ;;  %v9470_v56 = vld [vmem:[%s10522_s29 + $0x590] ss:$8 sps:$4 sm:$0xff]  }
 0x13b   : > { %1275 = vst.msk [vmem:[#allocation2 + $0x8] sm:$0xff] %vm1273_vm1, %v1266_v57  ;;  %v8917_v62 = vpop.f32.mrb[4].mxu0 }
 0x13c   : > { %v1251_v2 = vadd.f32 %v8917_v62, %v8242_v31  ;;  %v1242_v3 = vpop.f32.mrb[5].mxu0 }
 0x13d   : > { %3482 = vmatpush1.bf16.msra.mxu1 %v9419_v20  ;;  %v1243_v5 = vadd.f32 %v8242_v31, %v1242_v3  ;;  %v8918_v6 = vpop.f32.mrb[6].mxu0 }
 0x13e   : > { %3483 = vmatprep.subr.bf16.mxu1 %v9424_v21  ;;  %v1271_v8 = vadd.f32 %v1263_v63, %v1251_v2  ;;  %v1254_v9 = vadd.f32 %v8918_v6, %v8242_v31  ;;  %v1245_v11 = vpop.f32.mrb[7].mxu0  ;;  %v9484_v2 = vld [vmem:[%s10522_s29 + $0x5b4] ss:$8 sps:$4 sm:$0xff]   ;;  %v9482_v6 = vld [vmem:[%s10522_s29 + $0x5b0] ss:$8 sps:$4 sm:$0xff]  }
 0x13f   : > { %v1269_v17 = vadd.f32 %v1261_v4, %v1243_v5  ;;  %v1246_v18 = vadd.f32 %v8242_v31, %v1245_v11  ;;  %v9578_v4 = vld [vmem:[%s10522_s29] ss:$8 sps:$4 sm:$0xff]   ;;  %v9586_v5 = vld [vmem:[%s10522_s29 + $0x14] ss:$8 sps:$4 sm:$0xff]  }
 0x140   : > { %1280 = vst.msk [vmem:[#allocation2 + $0x30] sm:$0xff] %vm1273_vm1, %v1271_v8  ;;  %v1272_v20 = vadd.f32 %v1264_v7, %v1254_v9  ;;  %v9490_v7 = vld [vmem:[%s10522_s29 + $0x5c4] ss:$8 sps:$4 sm:$0xff]   ;;  %v9584_v8 = vld [vmem:[%s10522_s29 + $0x10] ss:$8 sps:$4 sm:$0xff]  }
 0x141   : > { %3484 = vmatpush1.bf16.msra.mxu1 %v9422_v22  ;;  %1278 = vst.msk [vmem:[#allocation2 + $0x20] sm:$0xff] %vm1273_vm1, %v1269_v17  ;;  %v1270_v21 = vadd.f32 %v1262_v12, %v1246_v18  ;;  %v1337_v22 = vrot.slane %v1292_v14, %v10954_v32  ;;  %v9592_v9 = vld [vmem:[%s10522_s29 + $0x24] ss:$8 sps:$4 sm:$0xff]   ;;  %v9488_v11 = vld [vmem:[%s10522_s29 + $0x5c0] ss:$8 sps:$4 sm:$0xff]  }
 0x142   : > { %3485 = vmatprep.subr.bf16.mxu1 %v9427_v23  ;;  %1281 = vst.msk [vmem:[#allocation2 + $0x38] sm:$0xff] %vm1273_vm1, %v1272_v20  ;;  %v1341_v23 = vrot.slane %v1292_v14, %v10889_v29  ;;  %v9496_v12 = vld [vmem:[%s10522_s29 + $0x5d4] ss:$8 sps:$4 sm:$0xff]   ;;  %v9590_v14 = vld [vmem:[%s10522_s29 + $0x20] ss:$8 sps:$4 sm:$0xff]  }
 0x143   : > { %1279 = vst.msk [vmem:[#allocation2 + $0x28] sm:$0xff] %vm1273_vm1, %v1270_v21  ;;  %v9494_v17 = vld [vmem:[%s10522_s29 + $0x5d0] ss:$8 sps:$4 sm:$0xff]   ;;  %v9502_v18 = vld [vmem:[%s10522_s29 + $0x5e4] ss:$8 sps:$4 sm:$0xff]  }
 0x144   : > { %v9604_v20 = vld [vmem:[%s10522_s29 + $0x44] ss:$8 sps:$4 sm:$0xff]   ;;  %v9500_v21 = vld [vmem:[%s10522_s29 + $0x5e0] ss:$8 sps:$4 sm:$0xff]  }
 0x145   : > { %3486 = vmatpush1.bf16.msra.mxu1 %v9425_v24  ;;  %v9443_v24 = vld [vmem:[%s10522_s29 + $0x520] ss:$8 sps:$4 sm:$0xff]  }
 0x146   : > { %3487 = vmatprep.subr.bf16.mxu1 %v9430_v25  ;;  %v9448_v25 = vld [vmem:[%s10522_s29 + $0x534] ss:$8 sps:$4 sm:$0xff]  }
 0x149   : > { %3488 = vmatpush1.bf16.msra.mxu1 %v9428_v27  ;;  %v1381_v27 = vpop.f32.mrb[8].mxu0 }
 0x14a   : > { %3489 = vmatprep.subr.bf16.mxu1 %v9433_v28  ;;  %v1382_v28 = vadd.f32 %v1381_v27, %v1337_v22  ;;  %v1383_v31 = vpop.f32.mrb[9].mxu0  ;;  %v9508_v22 = vld [vmem:[%s10522_s29 + $0x5f4] ss:$8 sps:$4 sm:$0xff]   ;;  %v1696_v27 = vrot.slane %v10892_v30, %v10791_v59 }
 0x14b   : > { %v1385_v35 = vpop.f32.mrb[10].mxu0 }
 0x14c   : > { %v1386_v40 = vpop.f32.mrb[11].mxu0  ;;  %v9514_v35 = vld [vmem:[%s10522_s29 + $0x604] ss:$8 sps:$4 sm:$0xff]  }
 0x14d   : > { %3490 = vmatpush1.bf16.msra.mxu1 %v9431_v34  ;;  %v1384_v34 = vadd.f32 %v1383_v31, %v1341_v23  ;;  %v9602_v23 = vld [vmem:[%s10522_s29 + $0x40] ss:$8 sps:$4 sm:$0xff]   ;;  %v9506_v31 = vld [vmem:[%s10522_s29 + $0x5f0] ss:$8 sps:$4 sm:$0xff]   ;;  %v1743_v40 = vpack.c.bf16 %v1696_v27, %v1696_v27 }
 0x14e   : > { %3491 = vmatprep.subr.bf16.mxu1 %v9436_v38  ;;  %v8257_v38 = vmul.f32 -1.442695, %v1382_v28  ;;  %v9569_v27 = vld [vmem:[%s10522_s29 + $0x6c0] ss:$8 sps:$4 sm:$0xff]  }
 0x14f   : > { %v8258_v42 = vmul.f32 -1.442695, %v1384_v34 }
 0x150   : > { %9869 = vpow2.f32 %v8257_v38  ;;  %v9616_v38 = vld [vmem:[%s10522_s29 + $0x64] ss:$8 sps:$4 sm:$0xff]  }
 0x151   : > { %3492 = vmatpush1.bf16.msra.mxu1 %v9434_v50  ;;  %9871 = vpow2.f32 %v8258_v42 }
 0x152   : > { %3502 = vmatprep.subr.bf16.mxu1 %v9439_v55  ;;  %v9472_v55 = vld [vmem:[%s10522_s29 + $0x594] ss:$8 sps:$4 sm:$0xff]  }
 0x154   : > { %3494 = vmatmul.mubr.bf16.vlgmr.msra.gmra.mrb[0].mxu1 %v1741_v58  ;;  %v9478_v58 = vld [vmem:[%s10522_s29 + $0x5a4] ss:$8 sps:$4 sm:$0xff]  }
 0x155   : > { %3503 = vmatpush1.bf16.msra.mxu1 %v9437_v60  ;;  %3534 = vmatprep.mubr.bf16.mxu1 %v1744_v0  ;;  %v9476_v0 = vld [vmem:[%s10522_s29 + $0x5a0] ss:$8 sps:$4 sm:$0xff]  }
 0x156   : > { %3504 = vmatprep.subr.bf16.mxu1 %v9442_v1 }
 0x159   : > { %3505 = vmatpush1.bf16.msra.mxu1 %v9440_v15  ;;  %v9598_v15 = vld [vmem:[%s10522_s29 + $0x34] ss:$8 sps:$4 sm:$0xff]  }
 0x15a   : > { %3506 = vmatprep.subr.bf16.mxu1 %v9445_v19  ;;  %v9870_v47 = vpop.eup %9869  ;;  %v9596_v19 = vld [vmem:[%s10522_s29 + $0x30] ss:$8 sps:$4 sm:$0xff]  }
 0x15b   : > { %v9872_v49 = vpop.eup %9871  ;;  %v1394_v50 = vadd.f32 1.0, %v9870_v47  ;;  %v9526_v47 = vld [vmem:[%s10522_s29 + $0x624] ss:$8 sps:$4 sm:$0xff]  }
 0x15c   : > { %v1395_v51 = vadd.f32 1.0, %v9872_v49  ;;  %v9628_v49 = vld [vmem:[%s10522_s29 + $0x84] ss:$8 sps:$4 sm:$0xff]  }
 0x15d   : > { %3507 = vmatpush1.bf16.msra.mxu1 %v9443_v24  ;;  %9873 = vrcp.f32 %v1394_v50  ;;  %v1660_v24 = vrot.slane %v10897_v33, %v10889_v29  ;;  %v9532_v50 = vld [vmem:[%s10522_s29 + $0x634] ss:$8 sps:$4 sm:$0xff]  }
 0x15e   : > { %3508 = vmatprep.subr.bf16.mxu1 %v9448_v25  ;;  %9875 = vrcp.f32 %v1395_v51  ;;  %v9610_v25 = vld [vmem:[%s10522_s29 + $0x54] ss:$8 sps:$4 sm:$0xff]   ;;  %v9626_v51 = vld [vmem:[%s10522_s29 + $0x80] ss:$8 sps:$4 sm:$0xff]  }
 0x161   : > { %3509 = vmatpush1.bf16.msra.mxu1 %v9446_v37  ;;  %v9608_v37 = vld [vmem:[%s10522_s29 + $0x50] ss:$8 sps:$4 sm:$0xff]  }
 0x162   : > { %3510 = vmatprep.subr.bf16.mxu1 %v9451_v41  ;;  %v9512_v41 = vld [vmem:[%s10522_s29 + $0x600] ss:$8 sps:$4 sm:$0xff]  }
 0x165   : > { %3511 = vmatpush1.bf16.msra.mxu1 %v9449_v43  ;;  %v9520_v43 = vld [vmem:[%s10522_s29 + $0x614] ss:$8 sps:$4 sm:$0xff]  }
 0x166   : > { %3512 = vmatprep.subr.bf16.mxu1 %v9454_v44  ;;  %v9614_v44 = vld [vmem:[%s10522_s29 + $0x60] ss:$8 sps:$4 sm:$0xff]  }
 0x167   : > { %v9874_v57 = vpop.eup %9873 }
 0x168   : > { %v9876_v60 = vpop.eup %9875  ;;  %v1400_v62 = vmul.f32 %v9874_v57, %v1382_v28  ;;  %v1734_v28 = vpack.c.bf16 %v1660_v24, %v1660_v24  ;;  %v9536_v57 = vld [vmem:[%s10522_s29 + $0x640] ss:$8 sps:$4 sm:$0xff]   ;;  %v9568_v24 = vld [vmem:[%s10522_s29 + $0x6b4] ss:$8 sps:$4 sm:$0xff]  }
 0x169   : > { %3513 = vmatpush1.bf16.msra.mxu1 %v9452_v45  ;;  %v1401_v63 = vmul.f32 %v9876_v60, %v1384_v34  ;;  %v1708_v34 = vrot.slane %v10892_v30, %v10795_v61  ;;  %v9622_v45 = vld [vmem:[%s10522_s29 + $0x74] ss:$8 sps:$4 sm:$0xff]   ;;  %v9638_v60 = vld [vmem:[%s10522_s29 + $0xa0] ss:$8 sps:$4 sm:$0xff]  }
 0x16a   : > { %3514 = vmatprep.subr.bf16.mxu1 %v9457_v46  ;;  %v1402_v1 = vpack.c.bf16 %v1400_v62, %v1400_v62  ;;  %v9518_v46 = vld [vmem:[%s10522_s29 + $0x610] ss:$8 sps:$4 sm:$0xff]   ;;  %v9646_v62 = vld [vmem:[%s10522_s29 + $0xb4] ss:$8 sps:$4 sm:$0xff]  }
 0x16b   : > { %v1403_v3 = vpack.c.bf16 %v1401_v63, %v1401_v63  ;;  %v1746_v42 = vpack.c.bf16 %v1708_v34, %v1708_v34  ;;  %v9542_v63 = vld [vmem:[%s10522_s29 + $0x650] ss:$8 sps:$4 sm:$0xff]   ;;  %v9577_v34 = vld [vmem:[%s10522_s29 + $0x6e4] ss:$8 sps:$4 sm:$0xff]  }
 0x16d   : > { %3515 = vmatpush1.bf16.msra.mxu1 %v9455_v48  ;;  %1640 = vmatprep.mubr.bf16.mxu0 %v1403_v3  ;;  %v9620_v48 = vld [vmem:[%s10522_s29 + $0x70] ss:$8 sps:$4 sm:$0xff]   ;;  %v9548_v3 = vld [vmem:[%s10522_s29 + $0x660] ss:$8 sps:$4 sm:$0xff]  }
 0x16e   : > { %3516 = vmatprep.subr.bf16.mxu1 %v9460_v16  ;;  %1641 = vmatmul.mubr.bf16.vlgmr.msra.gmra.mrb[12].mxu0 %v1402_v1  ;;  %v9524_v16 = vld [vmem:[%s10522_s29 + $0x620] ss:$8 sps:$4 sm:$0xff]   ;;  %v9644_v1 = vld [vmem:[%s10522_s29 + $0xb0] ss:$8 sps:$4 sm:$0xff]  }
 0x16f   : > { %3298 = vmatpush1.bf16.msra.mxu0 %v9578_v4  ;;  %3329 = vmatprep.mubr.bf16.mxu0 %v1734_v28  ;;  %v9556_v4 = vld [vmem:[%s10522_s29 + $0x674] ss:$8 sps:$4 sm:$0xff]  }
 0x170   : > { %3299 = vmatprep.subr.bf16.mxu0 %v9586_v5  ;;  %v9650_v5 = vld [vmem:[%s10522_s29 + $0xc0] ss:$8 sps:$4 sm:$0xff]   ;;  %v9574_v28 = vld [vmem:[%s10522_s29 + $0x6d4] ss:$8 sps:$4 sm:$0xff]  }
 0x171   : > { %3517 = vmatpush1.bf16.msra.mxu1 %v9458_v52  ;;  %v9634_v52 = vld [vmem:[%s10522_s29 + $0x94] ss:$8 sps:$4 sm:$0xff]  }
 0x172   : > { %3518 = vmatprep.subr.bf16.mxu1 %v9466_v53  ;;  %v9530_v53 = vld [vmem:[%s10522_s29 + $0x630] ss:$8 sps:$4 sm:$0xff]  }
 0x173   : > { %3300 = vmatpush1.bf16.msra.mxu0 %v9584_v8  ;;  %v9559_v8 = vld [vmem:[%s10522_s29 + $0x684] ss:$8 sps:$4 sm:$0xff]  }
 0x174   : > { %3301 = vmatprep.subr.bf16.mxu0 %v9592_v9  ;;  %v9656_v9 = vld [vmem:[%s10522_s29 + $0xd0] ss:$8 sps:$4 sm:$0xff]  }
 0x175   : > { %3519 = vmatpush1.bf16.msra.mxu1 %v9464_v54  ;;  %v9538_v54 = vld [vmem:[%s10522_s29 + $0x644] ss:$8 sps:$4 sm:$0xff]  }
 0x176   : > { %3520 = vmatprep.subr.bf16.mxu1 %v9472_v55  ;;  %v9632_v55 = vld [vmem:[%s10522_s29 + $0x90] ss:$8 sps:$4 sm:$0xff]  }
 0x177   : > { %3302 = vmatpush1.bf16.msra.mxu0 %v9590_v14  ;;  %v9562_v14 = vld [vmem:[%s10522_s29 + $0x694] ss:$8 sps:$4 sm:$0xff]  }
 0x178   : > { %3303 = vmatprep.subr.bf16.mxu0 %v9598_v15  ;;  %v9662_v15 = vld [vmem:[%s10522_s29 + $0xe0] ss:$8 sps:$4 sm:$0xff]  }
 0x179   : > { %3521 = vmatpush1.bf16.msra.mxu1 %v9470_v56  ;;  %v9640_v56 = vld [vmem:[%s10522_s29 + $0xa4] ss:$8 sps:$4 sm:$0xff]  }
 0x17a   : > { %3522 = vmatprep.subr.bf16.mxu1 %v9478_v58  ;;  %v9544_v58 = vld [vmem:[%s10522_s29 + $0x654] ss:$8 sps:$4 sm:$0xff]  }
 0x17b   : > { %3304 = vmatpush1.bf16.msra.mxu0 %v9596_v19  ;;  %v1656_v19 = vrot.slane %v10897_v33, %v10954_v32  ;;  %v9566_v33 = vld [vmem:[%s10522_s29 + $0x6b0] ss:$8 sps:$4 sm:$0xff]  }
 0x17c   : > { %3305 = vmatprep.subr.bf16.mxu0 %v9604_v20  ;;  %v9565_v20 = vld [vmem:[%s10522_s29 + $0x6a4] ss:$8 sps:$4 sm:$0xff]  }
 0x17d   : > { %3523 = vmatpush1.bf16.msra.mxu1 %v9476_v0  ;;  %v9550_v0 = vld [vmem:[%s10522_s29 + $0x664] ss:$8 sps:$4 sm:$0xff]  }
 0x17e   : > { %3524 = vmatprep.subr.bf16.mxu1 %v9484_v2  ;;  %v9652_v2 = vld [vmem:[%s10522_s29 + $0xc4] ss:$8 sps:$4 sm:$0xff]  }
 0x17f   : > { %3306 = vmatpush1.bf16.msra.mxu0 %v9602_v23  ;;  %v1733_v23 = vpack.c.bf16 %v1656_v19, %v1656_v19  ;;  %v9659_v19 = vld [vmem:[%s10522_s29 + $0x7c0] ss:$8 sps:$4 sm:$0xff]  }
 0x180   : > { %3307 = vmatprep.subr.bf16.mxu0 %v9610_v25  ;;  %v9571_v25 = vld [vmem:[%s10522_s29 + $0x6c4] ss:$8 sps:$4 sm:$0xff]  }
 0x181   : > { %3525 = vmatpush1.bf16.msra.mxu1 %v9482_v6  ;;  %v9658_v6 = vld [vmem:[%s10522_s29 + $0xd4] ss:$8 sps:$4 sm:$0xff]  }
 0x182   : > { %3526 = vmatprep.subr.bf16.mxu1 %v9490_v7  ;;  %v9554_v7 = vld [vmem:[%s10522_s29 + $0x670] ss:$8 sps:$4 sm:$0xff]  }
 0x183   : > { %3308 = vmatpush1.bf16.msra.mxu0 %v9608_v37  ;;  %v9583_v37 = vld [vmem:[%s10522_s29 + $0x6f4] ss:$8 sps:$4 sm:$0xff]  }
 0x184   : > { %3309 = vmatprep.subr.bf16.mxu0 %v9616_v38  ;;  %v1704_v38 = vrot.slane %v10892_v30, %v10833_v36 }
 0x185   : > { %3527 = vmatpush1.bf16.msra.mxu1 %v9488_v11  ;;  %v9664_v11 = vld [vmem:[%s10522_s29 + $0xe4] ss:$8 sps:$4 sm:$0xff]  }
 0x186   : > { %3528 = vmatprep.subr.bf16.mxu1 %v9496_v12  ;;  %v9557_v12 = vld [vmem:[%s10522_s29 + $0x680] ss:$8 sps:$4 sm:$0xff]  }
 0x187   : > { %3310 = vmatpush1.bf16.msra.mxu0 %v9614_v44  ;;  %v9587_v44 = vld [vmem:[%s10522_s29 + $0x700] ss:$8 sps:$4 sm:$0xff]  }
 0x188   : > { %3311 = vmatprep.subr.bf16.mxu0 %v9622_v45 }
 0x189   : > { %3529 = vmatpush1.bf16.msra.mxu1 %v9494_v17  ;;  %v9670_v17 = vld [vmem:[%s10522_s29 + $0xf4] ss:$8 sps:$4 sm:$0xff]  }
 0x18a   : > { %3530 = vmatprep.subr.bf16.mxu1 %v9502_v18  ;;  %v9560_v18 = vld [vmem:[%s10522_s29 + $0x690] ss:$8 sps:$4 sm:$0xff]  }
 0x18b   : > { %3312 = vmatpush1.bf16.msra.mxu0 %v9620_v48  ;;  %v9679_v48 = vld [vmem:[%s12848_s9 + $0x4] ss:$8 sps:$4 sm:$0xff]  }
 0x18c   : > { %3313 = vmatprep.subr.bf16.mxu0 %v9628_v49  ;;  %v9682_v49 = vld [vmem:[%s12848_s9 + $0x14] ss:$8 sps:$4 sm:$0xff]  }
 0x18d   : > { %3531 = vmatpush1.bf16.msra.mxu1 %v9500_v21  ;;  %v9668_v21 = vld [vmem:[%s10522_s29 + $0xf0] ss:$8 sps:$4 sm:$0xff]  }
 0x18e   : > { %3532 = vmatprep.subr.bf16.mxu1 %v9508_v22  ;;  %v9563_v22 = vld [vmem:[%s10522_s29 + $0x6a0] ss:$8 sps:$4 sm:$0xff]  }
 0x18f   : > { %3314 = vmatpush1.bf16.msra.mxu0 %v9626_v51  ;;  %v9599_v51 = vld [vmem:[%s10522_s29 + $0x720] ss:$8 sps:$4 sm:$0xff]  }
 0x190   : > { %3315 = vmatprep.subr.bf16.mxu0 %v9634_v52  ;;  %v9607_v52 = vld [vmem:[%s10522_s29 + $0x734] ss:$8 sps:$4 sm:$0xff]  }
 0x191   : > { %3533 = vmatpush1.bf16.msra.mxu1 %v9506_v31  ;;  %v9572_v31 = vld [vmem:[%s10522_s29 + $0x6d0] ss:$8 sps:$4 sm:$0xff]  }
 0x192   : > { %3543 = vmatprep.subr.bf16.mxu1 %v9514_v35  ;;  %v9575_v35 = vld [vmem:[%s10522_s29 + $0x6e0] ss:$8 sps:$4 sm:$0xff]  }
 0x193   : > { %3316 = vmatpush1.bf16.msra.mxu0 %v9632_v55  ;;  %v9605_v55 = vld [vmem:[%s10522_s29 + $0x730] ss:$8 sps:$4 sm:$0xff]  }
 0x194   : > { %3535 = vmatmul.mubr.bf16.vlgmr.msra.gmra.mrb[0].mxu1 %v1743_v40  ;;  %3317 = vmatprep.subr.bf16.mxu0 %v9640_v56  ;;  %v9581_v40 = vld [vmem:[%s10522_s29 + $0x6f0] ss:$8 sps:$4 sm:$0xff]   ;;  %v9613_v56 = vld [vmem:[%s10522_s29 + $0x744] ss:$8 sps:$4 sm:$0xff]  }
 0x195   : > { %3544 = vmatpush1.bf16.msra.mxu1 %v9512_v41  ;;  %3575 = vmatprep.mubr.bf16.mxu1 %v1746_v42  ;;  %v1716_v41 = vrot.slane %v10892_v30, %v1683_v39  ;;  %v9589_v42 = vld [vmem:[%s10522_s29 + $0x704] ss:$8 sps:$4 sm:$0xff]   ;;  %v9593_v39 = vld [vmem:[%s10522_s29 + $0x710] ss:$8 sps:$4 sm:$0xff]  }
 0x196   : > { %3545 = vmatprep.subr.bf16.mxu1 %v9520_v43  ;;  %v1745_v43 = vpack.c.bf16 %v1704_v38, %v1704_v38  ;;  %v9601_v30 = vld [vmem:[%s10522_s29 + $0x724] ss:$8 sps:$4 sm:$0xff]  }
 0x197   : > { %3318 = vmatpush1.bf16.msra.mxu0 %v9638_v60  ;;  %v1748_v45 = vpack.c.bf16 %v1716_v41, %v1716_v41  ;;  %v9611_v60 = vld [vmem:[%s10522_s29 + $0x740] ss:$8 sps:$4 sm:$0xff]   ;;  %v9703_v41 = vld [vmem:[%s12848_s9 + $0x84] ss:$8 sps:$4 sm:$0xff]  }
 0x198   : > { %3319 = vmatprep.subr.bf16.mxu0 %v9646_v62  ;;  %v9619_v62 = vld [vmem:[%s10522_s29 + $0x754] ss:$8 sps:$4 sm:$0xff]  }
 0x199   : > { %3546 = vmatpush1.bf16.msra.mxu1 %v9518_v46  ;;  %v9595_v46 = vld [vmem:[%s10522_s29 + $0x714] ss:$8 sps:$4 sm:$0xff]  }
 0x19a   : > { %3547 = vmatprep.subr.bf16.mxu1 %v9526_v47  ;;  %v9677_v47 = vld [vmem:[%s12847_s23] ss:$8 sps:$4 sm:$0xff]   ;;  %s12852_s23 = sld [smem:[#allocation10_spill]] }
 0x19b   : > { %3320 = vmatpush1.bf16.msra.mxu0 %v9644_v1  ;;  %v9617_v1 = vld [vmem:[%s10522_s29 + $0x750] ss:$8 sps:$4 sm:$0xff]  }
 0x19c   : > { %3321 = vmatprep.subr.bf16.mxu0 %v9652_v2  ;;  %v9625_v2 = vld [vmem:[%s10522_s29 + $0x764] ss:$8 sps:$4 sm:$0xff]  }
 0x19d   : > { %3548 = vmatpush1.bf16.msra.mxu1 %v9524_v16  ;;  %v9680_v16 = vld [vmem:[%s12848_s9 + $0x10] ss:$8 sps:$4 sm:$0xff]  }
 0x19e   : > { %3549 = vmatprep.subr.bf16.mxu1 %v9532_v50  ;;  %v9685_v50 = vld [vmem:[%s12848_s9 + $0x24] ss:$8 sps:$4 sm:$0xff]  }
 0x19f   : > { %3322 = vmatpush1.bf16.msra.mxu0 %v9650_v5  ;;  %v9631_v5 = vld [vmem:[%s10522_s29 + $0x774] ss:$8 sps:$4 sm:$0xff]  }
 0x1a0   : > { %3323 = vmatprep.subr.bf16.mxu0 %v9658_v6  ;;  %v9629_v6 = vld [vmem:[%s10522_s29 + $0x770] ss:$8 sps:$4 sm:$0xff]  }
 0x1a1   : > { %3550 = vmatpush1.bf16.msra.mxu1 %v9530_v53  ;;  %v9683_v53 = vld [vmem:[%s12848_s9 + $0x20] ss:$8 sps:$4 sm:$0xff]  }
 0x1a2   : > { %3551 = vmatprep.subr.bf16.mxu1 %v9538_v54  ;;  %v9688_v54 = vld [vmem:[%s12848_s9 + $0x34] ss:$8 sps:$4 sm:$0xff]  }
 0x1a3   : > { %3324 = vmatpush1.bf16.msra.mxu0 %v9656_v9  ;;  %v9643_v9 = vld [vmem:[%s10522_s29 + $0x794] ss:$8 sps:$4 sm:$0xff]  }
 0x1a4   : > { %3325 = vmatprep.subr.bf16.mxu0 %v9664_v11  ;;  %v9641_v11 = vld [vmem:[%s10522_s29 + $0x790] ss:$8 sps:$4 sm:$0xff]  }
 0x1a5   : > { %3552 = vmatpush1.bf16.msra.mxu1 %v9536_v57  ;;  %v9686_v57 = vld [vmem:[%s12848_s9 + $0x30] ss:$8 sps:$4 sm:$0xff]  }
 0x1a6   : > { %3553 = vmatprep.subr.bf16.mxu1 %v9544_v58  ;;  %v9691_v58 = vld [vmem:[%s12848_s9 + $0x44] ss:$8 sps:$4 sm:$0xff]  }
 0x1a7   : > { %3326 = vmatpush1.bf16.msra.mxu0 %v9662_v15  ;;  %v9655_v15 = vld [vmem:[%s10522_s29 + $0x7b4] ss:$8 sps:$4 sm:$0xff]  }
 0x1a8   : > { %3327 = vmatprep.subr.bf16.mxu0 %v9670_v17  ;;  %v9653_v17 = vld [vmem:[%s10522_s29 + $0x7b0] ss:$8 sps:$4 sm:$0xff]  }
 0x1a9   : > { %3554 = vmatpush1.bf16.msra.mxu1 %v9542_v63  ;;  %v9689_v63 = vld [vmem:[%s12848_s9 + $0x40] ss:$8 sps:$4 sm:$0xff]  }
 0x1aa   : > { %3555 = vmatprep.subr.bf16.mxu1 %v9550_v0  ;;  %v9694_v0 = vld [vmem:[%s12848_s9 + $0x54] ss:$8 sps:$4 sm:$0xff]  }
 0x1ab   : > { %3328 = vmatpush1.bf16.msra.mxu0 %v9668_v21  ;;  %v9665_v21 = vld [vmem:[%s10522_s29 + $0x7d0] ss:$8 sps:$4 sm:$0xff]  }
 0x1ac   : > { %3833 = vmatprep.subr.bf16.mxu0 %v9679_v48  ;;  %v9710_v48 = vld [vmem:[%s12848_s9 + $0xb0] ss:$8 sps:$4 sm:$0xff]  }
 0x1ad   : > { %3556 = vmatpush1.bf16.msra.mxu1 %v9548_v3  ;;  %v9692_v3 = vld [vmem:[%s12848_s9 + $0x50] ss:$8 sps:$4 sm:$0xff]  }
 0x1ae   : > { %3557 = vmatprep.subr.bf16.mxu1 %v9556_v4  ;;  %3330 = vmatmul.mubr.bf16.vlgmr.msra.gmra.mrb[16].mxu0 %v1733_v23  ;;  %v9623_v4 = vld [vmem:[%s10522_s29 + $0x760] ss:$8 sps:$4 sm:$0xff]  }
 0x1af   : > { %3834 = vmatpush1.bf16.msra.mxu0 %v9677_v47  ;;  %v9671_v23 = vld [vmem:[%s10522_s29 + $0x7e0] ss:$8 sps:$4 sm:$0xff]   ;;  %v9712_v47 = vld [vmem:[%s12848_s9 + $0xb4] ss:$8 sps:$4 sm:$0xff]  }
 0x1b0   : > { %3835 = vmatprep.subr.bf16.mxu0 %v9682_v49  ;;  %v9715_v49 = vld [vmem:[%s12848_s9 + $0xc4] ss:$8 sps:$4 sm:$0xff]  }
 0x1b1   : > { %3558 = vmatpush1.bf16.msra.mxu1 %v9554_v7  ;;  %v9637_v7 = vld [vmem:[%s10522_s29 + $0x784] ss:$8 sps:$4 sm:$0xff]  }
 0x1b2   : > { %3559 = vmatprep.subr.bf16.mxu1 %v9559_v8  ;;  %v9635_v8 = vld [vmem:[%s10522_s29 + $0x780] ss:$8 sps:$4 sm:$0xff]  }
 0x1b3   : > { %3836 = vmatpush1.bf16.msra.mxu0 %v9680_v16  ;;  %v9716_v16 = vld [vmem:[%s12848_s9 + $0xd0] ss:$8 sps:$4 sm:$0xff]  }
 0x1b4   : > { %3837 = vmatprep.subr.bf16.mxu0 %v9685_v50  ;;  %v9721_v50 = vld [vmem:[%s12848_s9 + $0xe4] ss:$8 sps:$4 sm:$0xff]  }
 0x1b5   : > { %3560 = vmatpush1.bf16.msra.mxu1 %v9557_v12  ;;  %v9649_v12 = vld [vmem:[%s10522_s29 + $0x7a4] ss:$8 sps:$4 sm:$0xff]  }
 0x1b6   : > { %3561 = vmatprep.subr.bf16.mxu1 %v9562_v14  ;;  %v9647_v14 = vld [vmem:[%s10522_s29 + $0x7a0] ss:$8 sps:$4 sm:$0xff]  }
 0x1b7   : > { %3838 = vmatpush1.bf16.msra.mxu0 %v9683_v53  ;;  %v9722_v53 = vld [vmem:[%s12848_s9 + $0xf0] ss:$8 sps:$4 sm:$0xff]  }
 0x1b8   : > { %3839 = vmatprep.subr.bf16.mxu0 %v9688_v54 }
 0x1b9   : > { %3562 = vmatpush1.bf16.msra.mxu1 %v9560_v18  ;;  %v9661_v18 = vld [vmem:[%s10522_s29 + $0x7c4] ss:$8 sps:$4 sm:$0xff]  }
 0x1ba   : > { %3563 = vmatprep.subr.bf16.mxu1 %v9565_v20  ;;  %v9667_v20 = vld [vmem:[%s10522_s29 + $0x7d4] ss:$8 sps:$4 sm:$0xff]  }
 0x1bb   : > { %3840 = vmatpush1.bf16.msra.mxu0 %v9686_v57 }
 0x1bc   : > { %3841 = vmatprep.subr.bf16.mxu0 %v9691_v58 }
 0x1bd   : > { %3564 = vmatpush1.bf16.msra.mxu1 %v9563_v22  ;;  %v9673_v22 = vld [vmem:[%s10522_s29 + $0x7e4] ss:$8 sps:$4 sm:$0xff]  }
 0x1be   : > { %3565 = vmatprep.subr.bf16.mxu1 %v9568_v24  ;;  %v9676_v24 = vld [vmem:[%s10522_s29 + $0x7f4] ss:$8 sps:$4 sm:$0xff]  }
 0x1bf   : > { %3842 = vmatpush1.bf16.msra.mxu0 %v9689_v63 }
 0x1c0   : > { %3843 = vmatprep.subr.bf16.mxu0 %v9694_v0 }
 0x1c1   : > { %3566 = vmatpush1.bf16.msra.mxu1 %v9566_v33  ;;  %v9894_v33 = vld [vmem:[%s10688_s15 + $0x8] sm:$0xff]  ;;  %s12849_s15 = sld [smem:[#allocation11_spill]] }
 0x1c2   : > { %3567 = vmatprep.subr.bf16.mxu1 %v9571_v25  ;;  %v1712_v25 = vrot.slane %v9894_v33, %v1679_v26 }
 0x1c3   : > { %3844 = vmatpush1.bf16.msra.mxu0 %v9692_v3 }
 0x1c5   : > { %3568 = vmatpush1.bf16.msra.mxu1 %v9569_v27  ;;  %v9674_v27 = vld [vmem:[%s10522_s29 + $0x7f0] ss:$8 sps:$4 sm:$0xff]  }
 0x1c6   : > { %3569 = vmatprep.subr.bf16.mxu1 %v9574_v28  ;;  %v1747_v28 = vpack.c.bf16 %v1712_v25, %v1712_v25 }
 0x1c7   : > { %v9727_v54 = vld [vmem:[%s12849_s15 + $0x4] ss:$24 sps:$4 sm:$0xff]   ;;  %v9728_v33 = vld [vmem:[%s12849_s15 + $0x30] ss:$24 sps:$4 sm:$0xff]  }
 0x1c8   : > { %v9733_v25 = vld [vmem:[%s12849_s15 + $0x64] ss:$24 sps:$4 sm:$0xff]  }
 0x1c9   : > { %3570 = vmatpush1.bf16.msra.mxu1 %v9572_v31  ;;  %v9695_v31 = vld [vmem:[%s12848_s9 + $0x60] ss:$8 sps:$4 sm:$0xff]  }
 0x1ca   : > { %3571 = vmatprep.subr.bf16.mxu1 %v9577_v34  ;;  %v9697_v34 = vld [vmem:[%s12848_s9 + $0x64] ss:$8 sps:$4 sm:$0xff]  }
 0x1cb   : > { %3845 = vmatprep.subr.bf16.mxu0 %v9697_v34  ;;  %v9739_v34 = vld [vmem:[%s12849_s15 + $0xc4] ss:$24 sps:$4 sm:$0xff]  }
 0x1cc   : > { %3846 = vmatpush1.bf16.msra.mxu0 %v9695_v31  ;;  %v9734_v31 = vld [vmem:[%s12849_s15 + $0x90] ss:$24 sps:$4 sm:$0xff]  }
 0x1cd   : > { %3572 = vmatpush1.bf16.msra.mxu1 %v9575_v35  ;;  %v9700_v35 = vld [vmem:[%s12848_s9 + $0x74] ss:$8 sps:$4 sm:$0xff]  }
 0x1ce   : > { %3573 = vmatprep.subr.bf16.mxu1 %v9583_v37  ;;  %v9698_v37 = vld [vmem:[%s12848_s9 + $0x70] ss:$8 sps:$4 sm:$0xff]   ;;  %3847 = vmatprep.subr.bf16.mxu0 %v9700_v35 }
 0x1cf   : > { %v9737_v35 = vld [vmem:[%s12849_s15 + $0xc0] ss:$24 sps:$4 sm:$0xff]  }
 0x1d0   : > { %3848 = vmatpush1.bf16.msra.mxu0 %v9698_v37  ;;  %v9742_v37 = vld [vmem:[%s12849_s15 + $0xf4] ss:$24 sps:$4 sm:$0xff]  }
 0x1d1   : > { %3574 = vmatpush1.bf16.msra.mxu1 %v9581_v40  ;;  %3849 = vmatprep.subr.bf16.mxu0 %v9703_v41  ;;  %v9743_v41 = vld [vmem:[%s12849_s15 + $0x120] ss:$24 sps:$4 sm:$0xff]  }
 0x1d2   : > { %3584 = vmatprep.subr.bf16.mxu1 %v9589_v42  ;;  %v9701_v42 = vld [vmem:[%s12848_s9 + $0x80] ss:$8 sps:$4 sm:$0xff]  }
 0x1d4   : > { %3576 = vmatmul.mubr.bf16.vlgmr.msra.gmra.mrb[0].mxu1 %v1745_v43  ;;  %3850 = vmatpush1.bf16.msra.mxu0 %v9701_v42  ;;  %v9706_v43 = vld [vmem:[%s12848_s9 + $0x94] ss:$8 sps:$4 sm:$0xff]  }
 0x1d5   : > { %3585 = vmatpush1.bf16.msra.mxu1 %v9587_v44  ;;  %3616 = vmatprep.mubr.bf16.mxu1 %v1748_v45  ;;  %v9704_v44 = vld [vmem:[%s12848_s9 + $0x90] ss:$8 sps:$4 sm:$0xff]   ;;  %v9709_v45 = vld [vmem:[%s12848_s9 + $0xa4] ss:$8 sps:$4 sm:$0xff]  }
 0x1d6   : > { %3586 = vmatprep.subr.bf16.mxu1 %v9595_v46  ;;  %3851 = vmatprep.subr.bf16.mxu0 %v9706_v43  ;;  %v9707_v46 = vld [vmem:[%s12848_s9 + $0xa0] ss:$8 sps:$4 sm:$0xff]   ;;  %v9748_v42 = vld [vmem:[%s12849_s15 + $0x154] ss:$24 sps:$4 sm:$0xff]  }
 0x1d7   : > { %v9746_v43 = vld [vmem:[%s12849_s15 + $0x150] ss:$24 sps:$4 sm:$0xff]  }
 0x1d8   : > { %3852 = vmatpush1.bf16.msra.mxu0 %v9704_v44  ;;  %v9751_v44 = vld [vmem:[%s12849_s15 + $0x184] ss:$24 sps:$4 sm:$0xff]  }
 0x1d9   : > { %3587 = vmatpush1.bf16.msra.mxu1 %v9593_v39  ;;  %3853 = vmatprep.subr.bf16.mxu0 %v9709_v45  ;;  %v9713_v39 = vld [vmem:[%s12848_s9 + $0xc0] ss:$8 sps:$4 sm:$0xff]  }
 0x1da   : > { %3588 = vmatprep.subr.bf16.mxu1 %v9601_v30  ;;  %v9718_v30 = vld [vmem:[%s12848_s9 + $0xd4] ss:$8 sps:$4 sm:$0xff]   ;;  %v9749_v45 = vld [vmem:[%s12849_s15 + $0x180] ss:$24 sps:$4 sm:$0xff]  }
 0x1dc   : > { %3854 = vmatpush1.bf16.msra.mxu0 %v9707_v46  ;;  %v9754_v46 = vld [vmem:[%s12849_s15 + $0x1b4] ss:$24 sps:$4 sm:$0xff]  }
 0x1dd   : > { %3589 = vmatpush1.bf16.msra.mxu1 %v9599_v51  ;;  %3855 = vmatprep.subr.bf16.mxu0 %v9712_v47  ;;  %v9719_v51 = vld [vmem:[%s12848_s9 + $0xe0] ss:$8 sps:$4 sm:$0xff]  }
 0x1de   : > { %3590 = vmatprep.subr.bf16.mxu1 %v9607_v52  ;;  %v9724_v52 = vld [vmem:[%s12848_s9 + $0xf4] ss:$8 sps:$4 sm:$0xff]   ;;  %v9752_v47 = vld [vmem:[%s12849_s15 + $0x1b0] ss:$24 sps:$4 sm:$0xff]  }
 0x1e0   : > { %3856 = vmatpush1.bf16.msra.mxu0 %v9710_v48  ;;  %v9757_v48 = vld [vmem:[%s12849_s15 + $0x1e4] ss:$24 sps:$4 sm:$0xff]  }
 0x1e1   : > { %3591 = vmatpush1.bf16.msra.mxu1 %v9605_v55  ;;  %3857 = vmatprep.subr.bf16.mxu0 %v9715_v49  ;;  %v9755_v49 = vld [vmem:[%s12849_s15 + $0x1e0] ss:$24 sps:$4 sm:$0xff]  }
 0x1e2   : > { %3592 = vmatprep.subr.bf16.mxu1 %v9613_v56 }
 0x1e4   : > { %3858 = vmatpush1.bf16.msra.mxu0 %v9713_v39  ;;  %v9760_v39 = vld [vmem:[%s12849_s15 + $0x214] ss:$24 sps:$4 sm:$0xff]  }
 0x1e5   : > { %3593 = vmatpush1.bf16.msra.mxu1 %v9611_v60  ;;  %3859 = vmatprep.subr.bf16.mxu0 %v9718_v30  ;;  %v2005_v60 = vld [vmem:[%s12850_s28] sm:$0x3]  ;;  %v9758_v30 = vld [vmem:[%s12849_s15 + $0x210] ss:$24 sps:$4 sm:$0xff]   ;;  %s12853_s28 = sld [smem:[#allocation12_spill]] }
 0x1e6   : > { %3594 = vmatprep.subr.bf16.mxu1 %v9619_v62  ;;  %v3290_v62 = vrot.slane %v2005_v60, %v10954_v32  ;;  %v3294_v63 = vrot.slane %v2005_v60, %v10889_v29 }
 0x1e8   : > { %3860 = vmatpush1.bf16.msra.mxu0 %v9716_v16  ;;  %v9763_v16 = vld [vmem:[%s12849_s15 + $0x244] ss:$24 sps:$4 sm:$0xff]  }
 0x1e9   : > { %3595 = vmatpush1.bf16.msra.mxu1 %v9617_v1  ;;  %3861 = vmatprep.subr.bf16.mxu0 %v9721_v50  ;;  %v9761_v50 = vld [vmem:[%s12849_s15 + $0x240] ss:$24 sps:$4 sm:$0xff]  }
 0x1ea   : > { %3596 = vmatprep.subr.bf16.mxu1 %v9625_v2 }
 0x1ec   : > { %3862 = vmatpush1.bf16.msra.mxu0 %v9719_v51  ;;  %v9766_v51 = vld [vmem:[%s12849_s15 + $0x274] ss:$24 sps:$4 sm:$0xff]  }
 0x1ed   : > { %3597 = vmatpush1.bf16.msra.mxu1 %v9623_v4  ;;  %3863 = vmatprep.subr.bf16.mxu0 %v9724_v52  ;;  %v9764_v52 = vld [vmem:[%s12849_s15 + $0x270] ss:$24 sps:$4 sm:$0xff]  }
 0x1ee   : > { %3598 = vmatprep.subr.bf16.mxu1 %v9631_v5 }
 0x1f0   : > { %3864 = vmatpush1.bf16.msra.mxu0 %v9722_v53  ;;  %v9769_v53 = vld [vmem:[%s12849_s15 + $0x2a4] ss:$24 sps:$4 sm:$0xff]  }
 0x1f1   : > { %3599 = vmatpush1.bf16.msra.mxu1 %v9629_v6  ;;  %4514 = vmatprep.subr.bf16.mxu0 %v9727_v54  ;;  %v9767_v54 = vld [vmem:[%s12849_s15 + $0x2a0] ss:$24 sps:$4 sm:$0xff]  }
 0x1f2   : > { %3600 = vmatprep.subr.bf16.mxu1 %v9637_v7 }
 0x1f5   : > { %3601 = vmatpush1.bf16.msra.mxu1 %v9635_v8 }
 0x1f6   : > { %3602 = vmatprep.subr.bf16.mxu1 %v9643_v9 }
 0x1f9   : > { %3603 = vmatpush1.bf16.msra.mxu1 %v9641_v11 }
 0x1fa   : > { %3604 = vmatprep.subr.bf16.mxu1 %v9649_v12 }
 0x1fd   : > { %3605 = vmatpush1.bf16.msra.mxu1 %v9647_v14 }
 0x1fe   : > { %3606 = vmatprep.subr.bf16.mxu1 %v9655_v15 }
 0x201   : > { %3607 = vmatpush1.bf16.msra.mxu1 %v9653_v17 }
 0x202   : > { %3608 = vmatprep.subr.bf16.mxu1 %v9661_v18 }
 0x205   : > { %3609 = vmatpush1.bf16.msra.mxu1 %v9659_v19 }
 0x206   : > { %3610 = vmatprep.subr.bf16.mxu1 %v9667_v20 }
 0x209   : > { %3611 = vmatpush1.bf16.msra.mxu1 %v9665_v21 }
 0x20a   : > { %3612 = vmatprep.subr.bf16.mxu1 %v9673_v22  ;;  %v9725_v22 = vld [vmem:[%s12849_s15] ss:$24 sps:$4 sm:$0xff]  }
 0x20d   : > { %3613 = vmatpush1.bf16.msra.mxu1 %v9671_v23 }
 0x20e   : > { %3614 = vmatprep.subr.bf16.mxu1 %v9676_v24  ;;  %v9730_v24 = vld [vmem:[%s12849_s15 + $0x34] ss:$24 sps:$4 sm:$0xff]  }
 0x211   : > { %3615 = vmatpush1.bf16.msra.mxu1 %v9674_v27  ;;  %v9731_v27 = vld [vmem:[%s12849_s15 + $0x60] ss:$24 sps:$4 sm:$0xff]  }
 0x214   : > { %3617 = vmatmul.mubr.bf16.vlgmr.msra.gmra.mrb[0].mxu1 %v1747_v28  ;;  %v9736_v28 = vld [vmem:[%s12849_s15 + $0x94] ss:$24 sps:$4 sm:$0xff]  }
 0x241   : > { %v11142_v10 = vpop.f32.mrb[12].mxu0 }
 0x242   : > { %v11144_v26 = vpop.f32.mrb[13].mxu0 }
 0x243   : > { %v1646_v38 = vpop.f32.mrb[14].mxu0 }
 0x244   : > { %v1647_v40 = vpop.f32.mrb[15].mxu0  ;;  %v9740_v38 = vld [vmem:[%s12849_s15 + $0xf0] ss:$24 sps:$4 sm:$0xff]  }
 0x245   : > { %v9745_v40 = vld [vmem:[%s12849_s15 + $0x124] ss:$24 sps:$4 sm:$0xff]  }
 0x281   : > { %v3331_v55 = vpop.f32.mrb[16].mxu0 }
 0x282   : > { %v3333_v56 = vpop.f32.mrb[17].mxu0  ;;  %v3332_v0 = vadd.f32 %v3331_v55, %v3290_v62  ;;  %v9772_v55 = vld [vmem:[%s12849_s15 + $0x2d4] ss:$24 sps:$4 sm:$0xff]  }
 0x283   : > { %v3335_v57 = vpop.f32.mrb[18].mxu0  ;;  %v3334_v1 = vadd.f32 %v3333_v56, %v3294_v63  ;;  %v9770_v56 = vld [vmem:[%s12849_s15 + $0x2d0] ss:$24 sps:$4 sm:$0xff]   ;;  %v3876_v63 = vld [vmem:[%s12852_s23] sm:$0x3] }
 0x284   : > { %v3336_v58 = vpop.f32.mrb[19].mxu0  ;;  %v9775_v57 = vld [vmem:[%s12849_s15 + $0xc] ss:$24 sps:$4 sm:$0xff]  }
 0x285   : > { %v1436_v58 = vld [vmem:[%s12851_s1] sm:$0x3]  ;;  %s10471_s1 = smov 64  }
 0x286   : > { %v1601_v60 = vrot.slane %v1436_v58, %v10954_v32  ;;  %v1605_v62 = vrot.slane %v1436_v58, %v10889_v29  ;;  %v9818_v58 = vld [vmem:[%s12849_s15 + $0x2d8] ss:$24 sps:$4 sm:$0xff]  }
 0x2e7   : > { %v3618_v2 = vpop.f32.mrb[0].mxu1 }
 0x2e8   : > { %v9080_v3 = vadd.f32 %v3618_v2, %v3332_v0  ;;  %v3620_v4 = vpop.f32.mrb[1].mxu1  ;;  %v1643_v0 = vadd.f32 %v11142_v10, %v1601_v60  ;;  %v1645_v2 = vadd.f32 %v11144_v26, %v1605_v62  ;;  %v9823_v60 = vld [vmem:[%s12849_s15 + $0x14] ss:$24 sps:$4 sm:$0xff]   ;;  %v9821_v62 = vld [vmem:[%s12849_s15 + $0x10] ss:$24 sps:$4 sm:$0xff]  }
 0x2e9   : > { %v9082_v5 = vadd.f32 %v3620_v4, %v3334_v1  ;;  %v3622_v6 = vpop.f32.mrb[2].mxu1  ;;  %v3881_v1 = vrot.slane %v3876_v63, %v10954_v32  ;;  %v3885_v4 = vrot.slane %v3876_v63, %v10889_v29  ;;  %v9826_v63 = vld [vmem:[%s12849_s15 + $0x44] ss:$24 sps:$4 sm:$0xff]  }
 0x2ea   : > { %v8547_v7 = vmul.f32 -1.442695, %v9080_v3  ;;  %v3623_v8 = vpop.f32.mrb[3].mxu1 }
 0x2eb   : > { %v8548_v9 = vmul.f32 -1.442695, %v9082_v5 }
 0x2ec   : > { %9877 = vpow2.f32 %v8547_v7 }
 0x2ed   : > { %9879 = vpow2.f32 %v8548_v9 }
 0x2f6   : > { %v9878_v11 = vpop.eup %9877 }
 0x2f7   : > { %v9880_v12 = vpop.eup %9879  ;;  %v3631_v14 = vadd.f32 1.0, %v9878_v11 }
 0x2f8   : > { %v3632_v15 = vadd.f32 1.0, %v9880_v12 }
 0x2f9   : > { %9881 = vrcp.f32 %v3631_v14 }
 0x2fa   : > { %9883 = vrcp.f32 %v3632_v15 }
 0x303   : > { %v9882_v17 = vpop.eup %9881 }
 0x304   : > { %v9884_v18 = vpop.eup %9883  ;;  %v3637_v19 = vmul.f32 %v9882_v17, %v9080_v3 }
 0x305   : > { %v3638_v20 = vmul.f32 %v9884_v18, %v9082_v5 }
 0x306   : > { %v3639_v23 = vpack.c.bf16 %v3637_v19, %v3637_v19 }
 0x307   : > { %v3640_v21 = vpack.c.bf16 %v3638_v20, %v3638_v20 }
 0x309   : > { %3865 = vmatprep.mubr.bf16.mxu0 %v3640_v21 }
 0x30a   : > { %3866 = vmatmul.mubr.bf16.vlgmr.msra.gmra.mrb[20].mxu0 %v3639_v23 }
 0x30b   : > { %4515 = vmatpush1.bf16.msra.mxu0 %v9725_v22 }
 0x30c   : > { %4516 = vmatprep.subr.bf16.mxu0 %v9730_v24  ;;  %v9773_v24 = vld [vmem:[%s12849_s15 + $0x8] ss:$24 sps:$4 sm:$0xff]  }
 0x30f   : > { %4517 = vmatpush1.bf16.msra.mxu0 %v9728_v33 }
 0x310   : > { %4518 = vmatprep.subr.bf16.mxu0 %v9733_v25  ;;  %v9778_v25 = vld [vmem:[%s12849_s15 + $0x3c] ss:$24 sps:$4 sm:$0xff]  }
 0x313   : > { %4519 = vmatpush1.bf16.msra.mxu0 %v9731_v27  ;;  %v9776_v27 = vld [vmem:[%s12849_s15 + $0x38] ss:$24 sps:$4 sm:$0xff]  }
 0x314   : > { %4520 = vmatprep.subr.bf16.mxu0 %v9736_v28  ;;  %v9781_v28 = vld [vmem:[%s12849_s15 + $0x6c] ss:$24 sps:$4 sm:$0xff]  }
 0x317   : > { %4521 = vmatpush1.bf16.msra.mxu0 %v9734_v31  ;;  %v9779_v31 = vld [vmem:[%s12849_s15 + $0x68] ss:$24 sps:$4 sm:$0xff]  }
 0x318   : > { %4522 = vmatprep.subr.bf16.mxu0 %v9739_v34  ;;  %v9784_v34 = vld [vmem:[%s12849_s15 + $0x9c] ss:$24 sps:$4 sm:$0xff]  }
 0x31b   : > { %4523 = vmatpush1.bf16.msra.mxu0 %v9737_v35  ;;  %v9782_v35 = vld [vmem:[%s12849_s15 + $0x98] ss:$24 sps:$4 sm:$0xff]  }
 0x31c   : > { %4524 = vmatprep.subr.bf16.mxu0 %v9742_v37  ;;  %v9787_v37 = vld [vmem:[%s12849_s15 + $0xcc] ss:$24 sps:$4 sm:$0xff]  }
 0x31f   : > { %4525 = vmatpush1.bf16.msra.mxu0 %v9740_v38  ;;  %v9785_v38 = vld [vmem:[%s12849_s15 + $0xc8] ss:$24 sps:$4 sm:$0xff]  }
 0x320   : > { %4526 = vmatprep.subr.bf16.mxu0 %v9745_v40  ;;  %v9790_v40 = vld [vmem:[%s12849_s15 + $0xfc] ss:$24 sps:$4 sm:$0xff]  }
 0x323   : > { %4527 = vmatpush1.bf16.msra.mxu0 %v9743_v41  ;;  %v9788_v41 = vld [vmem:[%s12849_s15 + $0xf8] ss:$24 sps:$4 sm:$0xff]  }
 0x324   : > { %4528 = vmatprep.subr.bf16.mxu0 %v9748_v42  ;;  %v9793_v42 = vld [vmem:[%s12849_s15 + $0x12c] ss:$24 sps:$4 sm:$0xff]  }
 0x327   : > { %4529 = vmatpush1.bf16.msra.mxu0 %v9746_v43  ;;  %v9791_v43 = vld [vmem:[%s12849_s15 + $0x128] ss:$24 sps:$4 sm:$0xff]  }
 0x328   : > { %4530 = vmatprep.subr.bf16.mxu0 %v9751_v44  ;;  %v9796_v44 = vld [vmem:[%s12849_s15 + $0x15c] ss:$24 sps:$4 sm:$0xff]  }
 0x32b   : > { %4531 = vmatpush1.bf16.msra.mxu0 %v9749_v45  ;;  %v9794_v45 = vld [vmem:[%s12849_s15 + $0x158] ss:$24 sps:$4 sm:$0xff]  }
 0x32c   : > { %4532 = vmatprep.subr.bf16.mxu0 %v9754_v46  ;;  %v9799_v46 = vld [vmem:[%s12849_s15 + $0x18c] ss:$24 sps:$4 sm:$0xff]  }
 0x32f   : > { %4533 = vmatpush1.bf16.msra.mxu0 %v9752_v47  ;;  %v9797_v47 = vld [vmem:[%s12849_s15 + $0x188] ss:$24 sps:$4 sm:$0xff]  }
 0x330   : > { %4534 = vmatprep.subr.bf16.mxu0 %v9757_v48  ;;  %v9802_v48 = vld [vmem:[%s12849_s15 + $0x1bc] ss:$24 sps:$4 sm:$0xff]  }
 0x333   : > { %4535 = vmatpush1.bf16.msra.mxu0 %v9755_v49  ;;  %v9800_v49 = vld [vmem:[%s12849_s15 + $0x1b8] ss:$24 sps:$4 sm:$0xff]  }
 0x334   : > { %4536 = vmatprep.subr.bf16.mxu0 %v9760_v39  ;;  %v9805_v39 = vld [vmem:[%s12849_s15 + $0x1ec] ss:$24 sps:$4 sm:$0xff]  }
 0x337   : > { %4537 = vmatpush1.bf16.msra.mxu0 %v9758_v30  ;;  %v9803_v30 = vld [vmem:[%s12849_s15 + $0x1e8] ss:$24 sps:$4 sm:$0xff]  }
 0x338   : > { %4538 = vmatprep.subr.bf16.mxu0 %v9763_v16  ;;  %v9808_v16 = vld [vmem:[%s12849_s15 + $0x21c] ss:$24 sps:$4 sm:$0xff]  }
 0x33b   : > { %4539 = vmatpush1.bf16.msra.mxu0 %v9761_v50  ;;  %v9806_v50 = vld [vmem:[%s12849_s15 + $0x218] ss:$24 sps:$4 sm:$0xff]  }
 0x33c   : > { %4540 = vmatprep.subr.bf16.mxu0 %v9766_v51  ;;  %v9811_v51 = vld [vmem:[%s12849_s15 + $0x24c] ss:$24 sps:$4 sm:$0xff]  }
 0x33f   : > { %4541 = vmatpush1.bf16.msra.mxu0 %v9764_v52  ;;  %v9809_v52 = vld [vmem:[%s12849_s15 + $0x248] ss:$24 sps:$4 sm:$0xff]  }
 0x340   : > { %4542 = vmatprep.subr.bf16.mxu0 %v9769_v53  ;;  %v9814_v53 = vld [vmem:[%s12849_s15 + $0x27c] ss:$24 sps:$4 sm:$0xff]  }
 0x343   : > { %4543 = vmatpush1.bf16.msra.mxu0 %v9767_v54  ;;  %v9812_v54 = vld [vmem:[%s12849_s15 + $0x278] ss:$24 sps:$4 sm:$0xff]  }
 0x344   : > { %4544 = vmatprep.subr.bf16.mxu0 %v9772_v55  ;;  %v9817_v55 = vld [vmem:[%s12849_s15 + $0x2ac] ss:$24 sps:$4 sm:$0xff]  }
 0x347   : > { %4545 = vmatpush1.bf16.msra.mxu0 %v9770_v56  ;;  %v9815_v56 = vld [vmem:[%s12849_s15 + $0x2a8] ss:$24 sps:$4 sm:$0xff]  }
 0x348   : > { %4555 = vmatprep.subr.bf16.mxu0 %v9775_v57  ;;  %v9820_v57 = vld [vmem:[%s12849_s15 + $0x2dc] ss:$24 sps:$4 sm:$0xff]  }
 0x3dd   : > { %v3867_v3 = vpop.f32.mrb[20].mxu0 }
 0x3de   : > { %v3874_v5 = vadd.f32 %v3867_v3, %v1643_v0  ;;  %v3869_v6 = vpop.f32.mrb[21].mxu0  ;;  %v9824_v0 = vld [vmem:[%s12849_s15 + $0x40] ss:$24 sps:$4 sm:$0xff]   ;;  %v9832_v3 = vld [vmem:[%s12849_s15 + $0xa4] ss:$24 sps:$4 sm:$0xff]  }
 0x3df   : > { %v3875_v7 = vadd.f32 %v3869_v6, %v1645_v2  ;;  %v3871_v8 = vpop.f32.mrb[22].mxu0  ;;  %v9827_v2 = vld [vmem:[%s12849_s15 + $0x70] ss:$24 sps:$4 sm:$0xff]  }
 0x3e0   : > { %v3888_v9 = vadd.f32 %v3881_v1, %v3874_v5  ;;  %v3872_v11 = vpop.f32.mrb[23].mxu0  ;;  %v9829_v1 = vld [vmem:[%s12849_s15 + $0x74] ss:$24 sps:$4 sm:$0xff]   ;;  %v9833_v6 = vld [vmem:[%s12849_s15 + $0xd0] ss:$24 sps:$4 sm:$0xff]  }
 0x3e1   : > { %v3889_v12 = vadd.f32 %v3885_v4, %v3875_v7  ;;  %v9830_v4 = vld [vmem:[%s12849_s15 + $0xa0] ss:$24 sps:$4 sm:$0xff]   ;;  %v9835_v5 = vld [vmem:[%s12849_s15 + $0xd4] ss:$24 sps:$4 sm:$0xff]   ;;  %v9838_v7 = vld [vmem:[%s12849_s15 + $0x104] ss:$24 sps:$4 sm:$0xff]  }
 0x3e2   : > { %v8581_v14 = vmul.f32 -1.442695, %v3888_v9  ;;  %v9836_v8 = vld [vmem:[%s12849_s15 + $0x100] ss:$24 sps:$4 sm:$0xff]   ;;  %v9839_v11 = vld [vmem:[%s12849_s15 + $0x130] ss:$24 sps:$4 sm:$0xff]  }
 0x3e3   : > { %v8582_v15 = vmul.f32 -1.442695, %v3889_v12 }
 0x3e4   : > { %9885 = vpow2.f32 %v8581_v14  ;;  %v9842_v14 = vld [vmem:[%s12849_s15 + $0x160] ss:$24 sps:$4 sm:$0xff]  }
 0x3e5   : > { %9887 = vpow2.f32 %v8582_v15  ;;  %v9847_v15 = vld [vmem:[%s12849_s15 + $0x194] ss:$24 sps:$4 sm:$0xff]  }
 0x3ee   : > { %v9886_v10 = vpop.eup %9885 }
 0x3ef   : > { %v9888_v17 = vpop.eup %9887  ;;  %v3896_v18 = vadd.f32 1.0, %v9886_v10  ;;  %v9845_v10 = vld [vmem:[%s12849_s15 + $0x190] ss:$24 sps:$4 sm:$0xff]  }
 0x3f0   : > { %v3897_v26 = vadd.f32 1.0, %v9888_v17  ;;  %v9850_v17 = vld [vmem:[%s12849_s15 + $0x1c4] ss:$24 sps:$4 sm:$0xff]  }
 0x3f1   : > { %9889 = vrcp.f32 %v3896_v18  ;;  %v9848_v18 = vld [vmem:[%s12849_s15 + $0x1c0] ss:$24 sps:$4 sm:$0xff]  }
 0x3f2   : > { %9891 = vrcp.f32 %v3897_v26  ;;  %v9853_v26 = vld [vmem:[%s12849_s15 + $0x1f4] ss:$24 sps:$4 sm:$0xff]  }
 0x3fb   : > { %v9890_v19 = vpop.eup %9889 }
 0x3fc   : > { %v9892_v20 = vpop.eup %9891  ;;  %v3902_v21 = vmul.f32 %v9890_v19, %v3888_v9  ;;  %v9841_v9 = vld [vmem:[%s12849_s15 + $0x134] ss:$24 sps:$4 sm:$0xff]   ;;  %v9851_v19 = vld [vmem:[%s12849_s15 + $0x1f0] ss:$24 sps:$4 sm:$0xff]  }
 0x3fd   : > { %v3903_v22 = vmul.f32 %v9892_v20, %v3889_v12  ;;  %v9844_v12 = vld [vmem:[%s12849_s15 + $0x164] ss:$24 sps:$4 sm:$0xff]  }
 0x3fe   : > { %v11209_v33 = vpack.c.bf16 %v3902_v21, %v3902_v21  ;;  %v9856_v20 = vld [vmem:[%s12849_s15 + $0x224] ss:$24 sps:$4 sm:$0xff]   ;;  %v9854_v21 = vld [vmem:[%s12849_s15 + $0x220] ss:$24 sps:$4 sm:$0xff]  }
 0x3ff   : > { %v11206_v23 = vpack.c.bf16 %v3903_v22, %v3903_v22  ;;  %v9859_v22 = vld [vmem:[%s12849_s15 + $0x254] ss:$24 sps:$4 sm:$0xff]  }
 0x401   : > { %4546 = vmatprep.mubr.bf16.mxu0 %v11206_v23 }
 0x402   : > { %4547 = vmatmul.mubr.bf16.vlgmr.msra.gmra.mrb[24].mxu0 %v11209_v33 }
 0x403   : > { %4556 = vmatpush1.bf16.msra.mxu0 %v9773_v24  ;;  %4587 = vmatprep.mubr.bf16.mxu0 %v11206_v23  ;;  %v9862_v24 = vld [vmem:[%s12849_s15 + $0x284] ss:$24 sps:$4 sm:$0xff]  }
 0x404   : > { %4557 = vmatprep.subr.bf16.mxu0 %v9778_v25  ;;  %v9860_v25 = vld [vmem:[%s12849_s15 + $0x280] ss:$24 sps:$4 sm:$0xff]  }
 0x407   : > { %4558 = vmatpush1.bf16.msra.mxu0 %v9776_v27  ;;  %v9865_v27 = vld [vmem:[%s12849_s15 + $0x2b4] ss:$24 sps:$4 sm:$0xff]  }
 0x408   : > { %4559 = vmatprep.subr.bf16.mxu0 %v9781_v28  ;;  %v9863_v28 = vld [vmem:[%s12849_s15 + $0x2b0] ss:$24 sps:$4 sm:$0xff]  }
 0x40b   : > { %4560 = vmatpush1.bf16.msra.mxu0 %v9779_v31  ;;  %v9868_v31 = vld [vmem:[%s12849_s15 + $0x2e4] ss:$24 sps:$4 sm:$0xff]  }
 0x40c   : > { %4561 = vmatprep.subr.bf16.mxu0 %v9784_v34  ;;  %v9866_v34 = vld [vmem:[%s12849_s15 + $0x2e0] ss:$24 sps:$4 sm:$0xff]  }
 0x40f   : > { %4562 = vmatpush1.bf16.msra.mxu0 %v9782_v35  ;;  %v4002_v35 = vld [vmem:[%s12853_s28] sm:$0x3f] }
 0x410   : > { %4563 = vmatprep.subr.bf16.mxu0 %v9787_v37  ;;  %v4487_v37 = vrot.slane %v4002_v35, %v10954_v32  ;;  %v4495_v32 = vrot.slane %v4002_v35, %v10791_v59 }
 0x413   : > { %4564 = vmatpush1.bf16.msra.mxu0 %v9785_v38  ;;  %v4491_v38 = vrot.slane %v4002_v35, %v10889_v29  ;;  %v4499_v29 = vrot.slane %v4002_v35, %v10740_v13  ;;  %v4503_v13 = vrot.slane %v4002_v35, %v10833_v36 }
 0x414   : > { %4565 = vmatprep.subr.bf16.mxu0 %v9790_v40 }
 0x417   : > { %4566 = vmatpush1.bf16.msra.mxu0 %v9788_v41 }
 0x418   : > { %4567 = vmatprep.subr.bf16.mxu0 %v9793_v42 }
 0x41b   : > { %4568 = vmatpush1.bf16.msra.mxu0 %v9791_v43 }
 0x41c   : > { %4569 = vmatprep.subr.bf16.mxu0 %v9796_v44 }
 0x41f   : > { %4570 = vmatpush1.bf16.msra.mxu0 %v9794_v45 }
 0x420   : > { %4571 = vmatprep.subr.bf16.mxu0 %v9799_v46 }
 0x423   : > { %4572 = vmatpush1.bf16.msra.mxu0 %v9797_v47 }
 0x424   : > { %4573 = vmatprep.subr.bf16.mxu0 %v9802_v48 }
 0x427   : > { %4574 = vmatpush1.bf16.msra.mxu0 %v9800_v49 }
 0x428   : > { %4575 = vmatprep.subr.bf16.mxu0 %v9805_v39 }
 0x42b   : > { %4576 = vmatpush1.bf16.msra.mxu0 %v9803_v30 }
 0x42c   : > { %4577 = vmatprep.subr.bf16.mxu0 %v9808_v16  ;;  %v4507_v16 = vrot.slane %v4002_v35, %v10795_v61 }
 0x42f   : > { %4578 = vmatpush1.bf16.msra.mxu0 %v9806_v50 }
 0x430   : > { %4579 = vmatprep.subr.bf16.mxu0 %v9811_v51 }
 0x433   : > { %4580 = vmatpush1.bf16.msra.mxu0 %v9809_v52 }
 0x434   : > { %4581 = vmatprep.subr.bf16.mxu0 %v9814_v53 }
 0x437   : > { %4582 = vmatpush1.bf16.msra.mxu0 %v9812_v54 }
 0x438   : > { %4583 = vmatprep.subr.bf16.mxu0 %v9817_v55 }
 0x43b   : > { %4584 = vmatpush1.bf16.msra.mxu0 %v9815_v56 }
 0x43c   : > { %4585 = vmatprep.subr.bf16.mxu0 %v9820_v57 }
 0x43f   : > { %4586 = vmatpush1.bf16.msra.mxu0 %v9818_v58 }
 0x440   : > { %4596 = vmatprep.subr.bf16.mxu0 %v9823_v60 }
 0x442   : > { %4588 = vmatmul.mubr.bf16.vlgmr.msra.gmra.mrb[28].mxu0 %v11209_v33 }
 0x443   : > { %4597 = vmatpush1.bf16.msra.mxu0 %v9821_v62  ;;  %4628 = vmatprep.mubr.bf16.mxu0 %v11206_v23  ;;  %v9857_v23 = vld [vmem:[%s12849_s15 + $0x250] ss:$24 sps:$4 sm:$0xff]  }
 0x444   : > { %4598 = vmatprep.subr.bf16.mxu0 %v9826_v63 }
 0x447   : > { %4599 = vmatpush1.bf16.msra.mxu0 %v9824_v0 }
 0x448   : > { %4600 = vmatprep.subr.bf16.mxu0 %v9829_v1 }
 0x44b   : > { %4601 = vmatpush1.bf16.msra.mxu0 %v9827_v2 }
 0x44c   : > { %4602 = vmatprep.subr.bf16.mxu0 %v9832_v3 }
 0x44f   : > { %4603 = vmatpush1.bf16.msra.mxu0 %v9830_v4 }
 0x450   : > { %4604 = vmatprep.subr.bf16.mxu0 %v9835_v5 }
 0x453   : > { %4605 = vmatpush1.bf16.msra.mxu0 %v9833_v6 }
 0x454   : > { %4606 = vmatprep.subr.bf16.mxu0 %v9838_v7 }
 0x457   : > { %4607 = vmatpush1.bf16.msra.mxu0 %v9836_v8 }
 0x458   : > { %4608 = vmatprep.subr.bf16.mxu0 %v9841_v9 }
 0x45b   : > { %4609 = vmatpush1.bf16.msra.mxu0 %v9839_v11 }
 0x45c   : > { %4610 = vmatprep.subr.bf16.mxu0 %v9844_v12 }
 0x45f   : > { %4611 = vmatpush1.bf16.msra.mxu0 %v9842_v14 }
 0x460   : > { %4612 = vmatprep.subr.bf16.mxu0 %v9847_v15 }
 0x463   : > { %4613 = vmatpush1.bf16.msra.mxu0 %v9845_v10 }
 0x464   : > { %4614 = vmatprep.subr.bf16.mxu0 %v9850_v17 }
 0x467   : > { %4615 = vmatpush1.bf16.msra.mxu0 %v9848_v18 }
 0x468   : > { %4616 = vmatprep.subr.bf16.mxu0 %v9853_v26 }
 0x46b   : > { %4617 = vmatpush1.bf16.msra.mxu0 %v9851_v19 }
 0x46c   : > { %4618 = vmatprep.subr.bf16.mxu0 %v9856_v20 }
 0x46f   : > { %4619 = vmatpush1.bf16.msra.mxu0 %v9854_v21 }
 0x470   : > { %4620 = vmatprep.subr.bf16.mxu0 %v9859_v22 }
 0x473   : > { %4621 = vmatpush1.bf16.msra.mxu0 %v9857_v23 }
 0x474   : > { %4622 = vmatprep.subr.bf16.mxu0 %v9862_v24 }
 0x477   : > { %4623 = vmatpush1.bf16.msra.mxu0 %v9860_v25 }
 0x478   : > { %4624 = vmatprep.subr.bf16.mxu0 %v9865_v27 }
 0x47b   : > { %4625 = vmatpush1.bf16.msra.mxu0 %v9863_v28 }
 0x47c   : > { %4626 = vmatprep.subr.bf16.mxu0 %v9868_v31 }
 0x47f   : > { %4627 = vmatpush1.bf16.msra.mxu0 %v9866_v34 }
 0x482   : > { %4629 = vmatmul.mubr.bf16.vlgmr.msra.gmra.mrb[32].mxu0 %v11209_v33 }
 0x4d5   : > { %v4548_v40 = vpop.f32.mrb[24].mxu0 }
 0x4d6   : > { %v4549_v41 = vadd.f32 %v4548_v40, %v4487_v37  ;;  %v4550_v42 = vpop.f32.mrb[25].mxu0 }
 0x4d7   : > { %v4551_v43 = vadd.f32 %v4550_v42, %v4491_v38  ;;  %v4552_v44 = vpop.f32.mrb[26].mxu0 }
 0x4d8   : > { %4638 = vst.msk [vmem:[#allocation3] sm:$0x1] %vm4637_vm2, %v4549_v41  ;;  %v4553_v45 = vpop.f32.mrb[27].mxu0  ;;  %4640 = vrot.lane.b32.xlu0 %v4549_v41, %s10471_s1 }
 0x4d9   : > { %4646 = vst.msk [vmem:[#allocation3 + $0x2] sm:$0x1] %vm4637_vm2, %v4551_v43 }
 0x4dc   : > { %4648 = vrot.lane.b32.xlu0 %v4551_v43, %s10471_s1 }
 0x515   : > { %v4589_v33 = vpop.f32.mrb[28].mxu0 }
 0x516   : > { %v4590_v46 = vadd.f32 %v4589_v33, %v4495_v32  ;;  %v4591_v47 = vpop.f32.mrb[29].mxu0 }
 0x517   : > { %v4592_v48 = vadd.f32 %v4591_v47, %v4499_v29  ;;  %v4593_v49 = vpop.f32.mrb[30].mxu0 }
 0x518   : > { %4654 = vst.msk [vmem:[#allocation3 + $0x4] sm:$0x1] %vm4637_vm2, %v4590_v46  ;;  %v4594_v39 = vpop.f32.mrb[31].mxu0  ;;  %4656 = vrot.lane.b32.xlu1 %v4590_v46, %s10471_s1 }
 0x519   : > { %4662 = vst.msk [vmem:[#allocation3 + $0x6] sm:$0x1] %vm4637_vm2, %v4592_v48 }
 0x51c   : > { %4664 = vrot.lane.b32.xlu1 %v4592_v48, %s10471_s1 }
 0x54a   : > { %v4641_v30 = vpop.permute.xlu0 %4640 }
 0x54b   : > { %4644 = vst.msk [vmem:[#allocation3 + $0x1] sm:$0x1] %vm4637_vm2, %v4641_v30 }
 0x54e   : > { %v4649_v59 = vpop.permute.xlu0 %4648 }
 0x54f   : > { %4652 = vst.msk [vmem:[#allocation3 + $0x3] sm:$0x1] %vm4637_vm2, %v4649_v59 }
 0x555   : > { %v4630_v50 = vpop.f32.mrb[32].mxu0 }
 0x556   : > { %v4631_v51 = vadd.f32 %v4630_v50, %v4503_v13  ;;  %v4632_v52 = vpop.f32.mrb[33].mxu0 }
 0x557   : > { %v4633_v53 = vadd.f32 %v4632_v52, %v4507_v16  ;;  %v4634_v54 = vpop.f32.mrb[34].mxu0 }
 0x558   : > { %4670 = vst.msk [vmem:[#allocation3 + $0x8] sm:$0x1] %vm4637_vm2, %v4631_v51  ;;  %v4635_v55 = vpop.f32.mrb[35].mxu0  ;;  %4672 = vrot.lane.b32.xlu0 %v4631_v51, %s10471_s1 }
 0x559   : > { %4678 = vst.msk [vmem:[#allocation3 + $0xa] sm:$0x1] %vm4637_vm2, %v4633_v53  ;;  %4680 = vrot.lane.b32.xlu1 %v4633_v53, %s10471_s1 }
 0x58a   : > { %v4657_v56 = vpop.permute.xlu1 %4656 }
 0x58b   : > { %4660 = vst.msk [vmem:[#allocation3 + $0x5] sm:$0x1] %vm4637_vm2, %v4657_v56 }
 0x58e   : > { %v4665_v36 = vpop.permute.xlu1 %4664 }
 0x58f   : > { %4668 = vst.msk [vmem:[#allocation3 + $0x7] sm:$0x1] %vm4637_vm2, %v4665_v36 }
 0x5ca   : > { %v4673_v61 = vpop.permute.xlu0 %4672 }
 0x5cb   : > { %4676 = vst.msk [vmem:[#allocation3 + $0x9] sm:$0x1] %vm4637_vm2, %v4673_v61  ;;  %v4681_v57 = vpop.permute.xlu1 %4680 }
 0x5cc   : > { %4684 = vst.msk [vmem:[#allocation3 + $0xb] sm:$0x1] %vm4637_vm2, %v4681_v57 }
 0x5cd PF: > { %v4685_v58 = vld [vmem:[#allocation2] sm:$0xff]  ;;  %vm4701_vm3 = vcmask 523264   ;;  %v4687_v60 = vld [vmem:[#allocation2 + $0x10] sm:$0xff]  ;;  %v4686_v62 = vld [vmem:[#allocation2 + $0x8] sm:$0xff]  ;;  %s4693_s23 = smul.u32 6, %s10421_s22  ;;  %s12800_s28 = smov 64  }
 0x5ce   : > { %v4702_v63 = vsel %vm4701_vm3, %v4685_v58, 0.0  ;;  %v4708_v0 = vsel %vm4701_vm3, %v4687_v60, 0.0  ;;  %v4688_v1 = vld [vmem:[#allocation2 + $0x18] sm:$0xff]  ;;  %v4689_v2 = vld [vmem:[#allocation2 + $0x20] sm:$0xff]  ;;  %v4690_v3 = vld [vmem:[#allocation2 + $0x28] sm:$0xff]  ;;  %v4705_v4 = vsel %vm4701_vm3, %v4686_v62, 0.0 }
 0x5cf   : > { %4703 = vadd.xlane.f32.xlu0 %v4702_v63  ;;  %4709 = vadd.xlane.f32.xlu1 %v4708_v0  ;;  %v4711_v5 = vsel %vm4701_vm3, %v4688_v1, 0.0  ;;  %v4714_v6 = vsel %vm4701_vm3, %v4689_v2, 0.0  ;;  %v4717_v7 = vsel %vm4701_vm3, %v4690_v3, 0.0  ;;  %v4691_v8 = vld [vmem:[#allocation2 + $0x30] sm:$0xff]  ;;  %v4692_v9 = vld [vmem:[#allocation2 + $0x38] sm:$0xff]  ;;  %s12861_s1 = sld [smem:[#allocation18_spill]] }
 0x5d0   : > { %v4720_v11 = vsel %vm4701_vm3, %v4691_v8, 0.0  ;;  %v4723_v12 = vsel %vm4701_vm3, %v4692_v9, 0.0  ;;  %v10135_v52 = vld [vmem:[%s10702_s26 + $0x4] ss:$8 sps:$4 sm:$0xff]   ;;  %v10137_v53 = vld [vmem:[%s10702_s26] ss:$8 sps:$4 sm:$0xff]  }
 0x5d1   : > { %4912 = vmatprep.subr.bf16.mxu0 %v10135_v52  ;;  %v10138_v54 = vld [vmem:[%s10702_s26 + $0x14] ss:$8 sps:$4 sm:$0xff]   ;;  %v10140_v55 = vld [vmem:[%s10702_s26 + $0x10] ss:$8 sps:$4 sm:$0xff]   ;;  %v10141_v56 = vld [vmem:[%s10702_s26 + $0x24] ss:$8 sps:$4 sm:$0xff]  }
 0x5d2   : > { %4913 = vmatpush1.bf16.msra.mxu0 %v10137_v53  ;;  %v10143_v36 = vld [vmem:[%s10702_s26 + $0x20] ss:$8 sps:$4 sm:$0xff]   ;;  %v10144_v61 = vld [vmem:[%s10702_s26 + $0x34] ss:$8 sps:$4 sm:$0xff]   ;;  %v10146_v57 = vld [vmem:[%s10702_s26 + $0x30] ss:$8 sps:$4 sm:$0xff]  }
 0x5d3   : > { %4706 = vadd.xlane.f32.xlu0 %v4705_v4  ;;  %4712 = vadd.xlane.f32.xlu1 %v4711_v5  ;;  %s11364_s26 = scalar_lea.vmem [#allocation3], %s4693_s23  ;;  %s12788_s23 = smov 1   ;;  %vm5017_vm4 = vcmask 1048064   ;;  %vm5742_vm5 = vcmask 130048   ;;  %vm6915_vm6 = vcmask 261120   ;;  %vm6924_vm7 = vcmask 392192  }
 0x5d4   : > { %4914 = vmatprep.subr.bf16.mxu0 %v10138_v54  ;;  %s10475_s7 = smov 63   ;;  %s10480_s3 = smov 80  }
 0x5d5   : > { %s12862_s21 = smov %s12861_s1  ;;  %s12867_s4 = smov 64  }
 0x5d6   : > { %4915 = vmatpush1.bf16.msra.mxu0 %v10140_v55  ;;  %p8765_p9 = scmp.ge.s32.totalorder %s10421_s22, 1 }
 0x5d7   : > { %4715 = vadd.xlane.f32.xlu0 %v4714_v6  ;;  %4718 = vadd.xlane.f32.xlu1 %v4717_v7 }
 0x5d8   : > { %4916 = vmatprep.subr.bf16.mxu0 %v10141_v56 }
 0x5da   : > { %4917 = vmatpush1.bf16.msra.mxu0 %v10143_v36 }
 0x5db   : > { %4721 = vadd.xlane.f32.xlu0 %v4720_v11  ;;  %4724 = vadd.xlane.f32.xlu1 %v4723_v12  ;;  %v4696_v12 = vld [vmem:[%s11364_s26 + $0x1] sm:$0x1] }
 0x5dc   : > { %4918 = vmatprep.subr.bf16.mxu0 %v10144_v61 }
 0x5de   : > { %4919 = vmatpush1.bf16.msra.mxu0 %v10146_v57 }
 0x65c   : > { %v4704_v14 = vpop.xlane.xlu0 %4703  ;;  %v4710_v15 = vpop.xlane.xlu1 %4709 }
 0x65d   : > { %v4727_v10 = vmul.f32 0.015625, %v4704_v14  ;;  %v4729_v17 = vmul.f32 0.015625, %v4710_v15 }
 0x65f   : > { %v11312_v18 = vsub.f32 %v4685_v58, %v4727_v10  ;;  %v11314_v26 = vsub.f32 %v4687_v60, %v4729_v17  ;;  %v12791_v58 = vmov 0   ;;  %v4807_v17 = vadd.f32 1.0, %v4696_v12 }
 0x660   : > { %v4707_v19 = vpop.xlane.xlu0 %4706  ;;  %v4713_v20 = vpop.xlane.xlu1 %4712  ;;  %4944 = vmatprep.mubr.bf16.mxu0 %v12791_v58 }
 0x661   : > { %v4728_v21 = vmul.f32 0.015625, %v4707_v19  ;;  %v4730_v22 = vmul.f32 0.015625, %v4713_v20  ;;  %v4743_v23 = vmul.f32 %v11312_v18, %v11312_v18  ;;  %v4745_v24 = vmul.f32 %v11314_v26, %v11314_v26 }
 0x663   : > { %v11320_v25 = vsub.f32 %v4686_v62, %v4728_v21  ;;  %v11322_v27 = vsub.f32 %v4688_v1, %v4730_v22  ;;  %v4751_v28 = vsel %vm4701_vm3, %v4743_v23, 0.0  ;;  %v4757_v35 = vsel %vm4701_vm3, %v4745_v24, 0.0 }
 0x664   : > { %4752 = vadd.xlane.f32.xlu0 %v4751_v28  ;;  %v4716_v31 = vpop.xlane.xlu0 %4715  ;;  %v4719_v34 = vpop.xlane.xlu1 %4718 }
 0x665   : > { %v4731_v37 = vmul.f32 0.015625, %v4716_v31  ;;  %v4732_v38 = vmul.f32 0.015625, %v4719_v34  ;;  %v4744_v40 = vmul.f32 %v11320_v25, %v11320_v25  ;;  %v4746_v41 = vmul.f32 %v11322_v27, %v11322_v27 }
 0x667   : > { %v11330_v42 = vsub.f32 %v4689_v2, %v4731_v37  ;;  %v11332_v43 = vsub.f32 %v4690_v3, %v4732_v38  ;;  %v4754_v44 = vsel %vm4701_vm3, %v4744_v40, 0.0  ;;  %v4760_v29 = vsel %vm4701_vm3, %v4746_v41, 0.0 }
 0x668   : > { %4758 = vadd.xlane.f32.xlu0 %v4757_v35  ;;  %4755 = vadd.xlane.f32.xlu1 %v4754_v44  ;;  %v4722_v45 = vpop.xlane.xlu0 %4721  ;;  %v4725_v32 = vpop.xlane.xlu1 %4724  ;;  %v4809_v2 = vlaneseq }
 0x669   : > { %v4733_v33 = vmul.f32 0.015625, %v4722_v45  ;;  %v4734_v46 = vmul.f32 0.015625, %v4725_v32  ;;  %v4747_v47 = vmul.f32 %v11330_v42, %v11330_v42  ;;  %v4748_v48 = vmul.f32 %v11332_v43, %v11332_v43  ;;  %v8679_v32 = vld [vmem:[%s11364_s26] ss:$0 sm:$0xff] }
 0x66b   : > { %v11340_v49 = vsub.f32 %v4691_v8, %v4733_v33  ;;  %v11342_v39 = vsub.f32 %v4692_v9, %v4734_v46  ;;  %v4763_v30 = vsel %vm4701_vm3, %v4747_v47, 0.0  ;;  %v4766_v59 = vsel %vm4701_vm3, %v4748_v48, 0.0 }
 0x66c   : > { %4761 = vadd.xlane.f32.xlu1 %v4760_v29  ;;  %4764 = vadd.xlane.f32.xlu0 %v4763_v30  ;;  %v11362_v9 = vshrl.u32 %v4809_v2, 7 }
 0x66d   : > { %v4749_v13 = vmul.f32 %v11340_v49, %v11340_v49  ;;  %v4750_v16 = vmul.f32 %v11342_v39, %v11342_v39 }
 0x66e   : > { %12854 = vst [vmem:[#allocation30_spill] sm:$0xff] %v11362_v9  ;;  %v11368_v19 = vsub.s32 0, %v11362_v9 }
 0x66f   : > { %v4769_v50 = vsel %vm4701_vm3, %v4749_v13, 0.0  ;;  %v4772_v51 = vsel %vm4701_vm3, %v4750_v16, 0.0 }
 0x670   : > { %4767 = vadd.xlane.f32.xlu1 %v4766_v59  ;;  %4770 = vadd.xlane.f32.xlu0 %v4769_v50  ;;  %12855 = vst [vmem:[#allocation31_spill] sm:$0xff] %v11368_v19  ;;  %v4812_v34 = vrot.slane %v4807_v17, %v11368_v19 }
 0x674   : > { %4773 = vadd.xlane.f32.xlu1 %v4772_v51 }
 0x6f1   : > { %v4753_v60 = vpop.xlane.xlu0 %4752 }
 0x6f2   : > { %v4775_v62 = vmul.f32 0.015625, %v4753_v60 }
 0x6f4   : > { %v4783_v63 = vadd.f32 1e-05, %v4775_v62 }
 0x6f5   : > { %v4756_v0 = vpop.xlane.xlu1 %4755  ;;  %v4759_v1 = vpop.xlane.xlu0 %4758 }
 0x6f6   : > { %10179 = vrsqrt.f32 %v4783_v63  ;;  %v4776_v3 = vmul.f32 0.015625, %v4756_v0  ;;  %v4777_v4 = vmul.f32 0.015625, %v4759_v1 }
 0x6f8   : > { %v4784_v5 = vadd.f32 1e-05, %v4776_v3  ;;  %v4785_v6 = vadd.f32 1e-05, %v4777_v4  ;;  %v4848_v3 = vld [vmem:[%s10705_s11] sm:$0x3] }
 0x6f9   : > { %v4762_v7 = vpop.xlane.xlu1 %4761  ;;  %v4765_v8 = vpop.xlane.xlu0 %4764  ;;  %v12790_v4 = vsub.s32 1, %v11362_v9  ;;  %s12860_s11 = sld [smem:[#allocation17_spill]] }
 0x6fa   : > { %10181 = vrsqrt.f32 %v4784_v5  ;;  %v4778_v11 = vmul.f32 0.015625, %v4762_v7  ;;  %v4779_v15 = vmul.f32 0.015625, %v4765_v8 }
 0x6fb   : > { %10183 = vrsqrt.f32 %v4785_v6 }
 0x6fc   : > { %v4786_v14 = vadd.f32 1e-05, %v4778_v11  ;;  %v4787_v22 = vadd.f32 1e-05, %v4779_v15 }
 0x6fd   : > { %v4768_v10 = vpop.xlane.xlu1 %4767  ;;  %v4771_v24 = vpop.xlane.xlu0 %4770 }
 0x6fe   : > { %10185 = vrsqrt.f32 %v4786_v14  ;;  %v4780_v20 = vmul.f32 0.015625, %v4768_v10  ;;  %v4781_v38 = vmul.f32 0.015625, %v4771_v24 }
 0x700   : > { %v10180_v21 = vpop.eup %10179  ;;  %v4788_v23 = vadd.f32 1e-05, %v4780_v20  ;;  %v4789_v46 = vadd.f32 1e-05, %v4781_v38 }
 0x701   : > { %v4774_v28 = vpop.xlane.xlu1 %4773  ;;  %v4799_v31 = vmul.f32 %v10180_v21, %v11312_v18 }
 0x702   : > { %10187 = vrsqrt.f32 %v4788_v23  ;;  %v4782_v35 = vmul.f32 0.015625, %v4774_v28 }
 0x703   : > { %10189 = vrsqrt.f32 %v4787_v22  ;;  %v4814_v41 = vmul.f32 %v4812_v34, %v4799_v31 }
 0x704   : > { %v10182_v37 = vpop.eup %10181  ;;  %v4790_v45 = vadd.f32 1e-05, %v4782_v35 }
 0x705   : > { %v4800_v40 = vmul.f32 %v10182_v37, %v11320_v25  ;;  %v10184_v44 = vpop.eup %10183  ;;  %v4828_v47 = vadd.f32 %v8679_v32, %v4814_v41 }
 0x706   : > { %v4801_v18 = vmul.f32 %v10184_v44, %v11314_v26  ;;  %10191 = vrsqrt.f32 %v4790_v45 }
 0x707   : > { %v4815_v29 = vmul.f32 %v4812_v34, %v4800_v40  ;;  %10193 = vrsqrt.f32 %v4789_v46 }
 0x708   : > { %v10186_v33 = vpop.eup %10185  ;;  %v4816_v25 = vmul.f32 %v4812_v34, %v4801_v18 }
 0x709   : > { %v4829_v48 = vadd.f32 %v8679_v32, %v4815_v29  ;;  %v4802_v30 = vmul.f32 %v10186_v33, %v11322_v27 }
 0x70a   : > { %v4830_v53 = vadd.f32 %v8679_v32, %v4816_v25 }
 0x70b   : > { %v4836_v59 = vpack.c.bf16 %v4829_v48, %v4828_v47  ;;  %v4817_v13 = vmul.f32 %v4812_v34, %v4802_v30 }
 0x70c   : > { %v10188_v16 = vpop.eup %10187 }
 0x70d   : > { %8688 = vmatmul.mubr.msk.bf16.vlgmr.msra.gmra.mrb[0].mxu0 %vm4701_vm3, %v4836_v59  ;;  %v10190_v50 = vpop.eup %10189  ;;  %v4831_v51 = vadd.f32 %v8679_v32, %v4817_v13  ;;  %v4804_v52 = vmul.f32 %v10188_v16, %v11332_v43 }
 0x70e   : > { %4954 = vmatprep.mubr.bf16.mxu0 %v12791_v58  ;;  %v4803_v54 = vmul.f32 %v10190_v50, %v11330_v42 }
 0x70f   : > { %v4837_v26 = vpack.c.bf16 %v4831_v51, %v4830_v53  ;;  %v4819_v55 = vmul.f32 %v4812_v34, %v4804_v52 }
 0x710   : > { %v10192_v27 = vpop.eup %10191  ;;  %v4818_v56 = vmul.f32 %v4812_v34, %v4803_v54 }
 0x711   : > { %v10194_v36 = vpop.eup %10193  ;;  %v4833_v61 = vadd.f32 %v8679_v32, %v4819_v55  ;;  %v4806_v57 = vmul.f32 %v10192_v27, %v11342_v39  ;;  %v4853_v39 = vrot.slane %v4848_v3, %v11368_v19 }
 0x712   : > { %v4832_v60 = vadd.f32 %v8679_v32, %v4818_v56  ;;  %v4805_v62 = vmul.f32 %v10194_v36, %v11340_v49  ;;  %v4857_v49 = vrot.slane %v4848_v3, %v12790_v4  ;;  %v4998_v3 = vld [vmem:[%s12860_s11 + $0x28] sm:$0xff] }
 0x713   : > { %v4821_v63 = vmul.f32 %v4812_v34, %v4806_v57  ;;  %v4993_v57 = vld [vmem:[%s12860_s11] sm:$0xff] }
 0x714   : > { %v4838_v43 = vpack.c.bf16 %v4833_v61, %v4832_v60  ;;  %v4820_v42 = vmul.f32 %v4812_v34, %v4805_v62  ;;  %v4994_v60 = vld [vmem:[%s12860_s11 + $0x8] sm:$0xff]  ;;  %v5001_v62 = vld [vmem:[%s12861_s1] sm:$0xff]  ;;  %s12863_s1 = sld [smem:[#allocation16_spill]] }
 0x715   : > { %8689 = vmatmul.mubr.msk.bf16.gmra.mrb[4].mxu0 %vm4701_vm3, %v4837_v26  ;;  %v4835_v0 = vadd.f32 %v8679_v32, %v4821_v63  ;;  %v4995_v63 = vld [vmem:[%s12860_s11 + $0x10] sm:$0xff] }
 0x716   : > { %4964 = vmatprep.mubr.bf16.mxu0 %v12791_v58  ;;  %v4834_v1 = vadd.f32 %v8679_v32, %v4820_v42  ;;  %v4996_v42 = vld [vmem:[%s12860_s11 + $0x18] sm:$0xff] }
 0x718   : > { %v4839_v2 = vpack.c.bf16 %v4835_v0, %v4834_v1  ;;  %v5003_v0 = vld [vmem:[%s12862_s21 + $0x10] sm:$0xff]  ;;  %v5004_v1 = vld [vmem:[%s12862_s21 + $0x18] sm:$0xff] }
 0x71d   : > { %8690 = vmatmul.mubr.msk.bf16.gmra.mrb[8].mxu0 %vm4701_vm3, %v4838_v43  ;;  %v5002_v43 = vld [vmem:[%s12862_s21 + $0x8] sm:$0xff] }
 0x71e   : > { %4974 = vmatprep.mubr.bf16.mxu0 %v12791_v58 }
 0x725   : > { %8691 = vmatmul.mubr.msk.bf16.gmra.mrb[12].mxu0 %vm4701_vm3, %v4839_v2  ;;  %v4997_v2 = vld [vmem:[%s12860_s11 + $0x20] sm:$0xff] }
 0x7e0   : > { %v4946_v5 = vpop.f32.mrb[0].mxu0 }
 0x7e1   : > { %v11392_v6 = vadd.f32 %v4946_v5, %v4853_v39  ;;  %v4948_v7 = vpop.f32.mrb[1].mxu0  ;;  %v5006_v5 = vld [vmem:[%s12862_s21 + $0x28] sm:$0xff] }
 0x7e2   : > { %v4950_v8 = vpop.f32.mrb[2].mxu0  ;;  %v4949_v14 = vadd.f32 %v4948_v7, %v4857_v49 }
 0x7e3   : > { %v11394_v11 = vadd.f32 %v4950_v8, %v4853_v39  ;;  %v4952_v12 = vpop.f32.mrb[3].mxu0  ;;  %5274 = vrot.lane.b32.xlu0 %v11392_v6, %s12800_s28 }
 0x7e4   : > { %v4953_v15 = vadd.f32 %v4952_v12, %v4857_v49 }
 0x7e5   : > { %5276 = vrot.lane.b32.xlu1 %v11394_v11, %s12800_s28 }
 0x7e6   : > { %v11400_v10 = vpack.i.bf16 %v4953_v15, %v4949_v14  ;;  %v11402_v17 = vpack.c.bf16 %v4953_v15, %v4949_v14  ;;  %v4999_v14 = vld [vmem:[%s12860_s11 + $0x30] sm:$0xff]  ;;  %v5000_v15 = vld [vmem:[%s12860_s11 + $0x38] sm:$0xff] }
 0x7e8   : > { %12856 = vst [vmem:[#allocation32_spill] sm:$0xff] %v11402_v17  ;;  %v4956_v20 = vpop.f32.mrb[4].mxu0 }
 0x7e9   : > { %v11404_v21 = vadd.f32 %v4956_v20, %v4853_v39  ;;  %v4958_v22 = vpop.f32.mrb[5].mxu0 }
 0x7ea   : > { %v4960_v23 = vpop.f32.mrb[6].mxu0  ;;  %v4959_v28 = vadd.f32 %v4958_v22, %v4857_v49 }
 0x7eb   : > { %v4962_v24 = vpop.f32.mrb[7].mxu0  ;;  %5278 = vrot.lane.b32.xlu1 %v11404_v21, %s12800_s28  ;;  %v11408_v34 = vadd.f32 %v4960_v23, %v4853_v39  ;;  %v5007_v23 = vld [vmem:[%s12862_s21 + $0x30] sm:$0xff] }
 0x7ec   : > { %v4963_v31 = vadd.f32 %v4962_v24, %v4857_v49 }
 0x7ee   : > { %v11410_v35 = vpack.i.bf16 %v4963_v31, %v4959_v28  ;;  %v11412_v37 = vpack.c.bf16 %v4963_v31, %v4959_v28  ;;  %v5008_v31 = vld [vmem:[%s12862_s21 + $0x38] sm:$0xff] }
 0x7ef   : > { %5280 = vrot.lane.b32.xlu1 %v11408_v34, %s12800_s28 }
 0x7f0   : > { %12857 = vst [vmem:[#allocation33_spill] sm:$0xff] %v11412_v37  ;;  %v4966_v38 = vpop.f32.mrb[8].mxu0 }
 0x7f1   : > { %v11416_v40 = vadd.f32 %v4966_v38, %v4853_v39  ;;  %v4968_v41 = vpop.f32.mrb[9].mxu0 }
 0x7f2   : > { %v4970_v44 = vpop.f32.mrb[10].mxu0  ;;  %v4969_v29 = vadd.f32 %v4968_v41, %v4857_v49 }
 0x7f3   : > { %v11418_v45 = vadd.f32 %v4970_v44, %v4853_v39  ;;  %v4972_v32 = vpop.f32.mrb[11].mxu0  ;;  %5282 = vrot.lane.b32.xlu0 %v11416_v40, %s12800_s28 }
 0x7f4   : > { %v4973_v33 = vadd.f32 %v4972_v32, %v4857_v49 }
 0x7f5   : > { %5284 = vrot.lane.b32.xlu1 %v11418_v45, %s12800_s28 }
 0x7f6   : > { %v11424_v46 = vpack.i.bf16 %v4973_v33, %v4969_v29  ;;  %v11426_v47 = vpack.c.bf16 %v4973_v33, %v4969_v29 }
 0x7f8   : > { %12858 = vst [vmem:[#allocation34_spill] sm:$0xff] %v11426_v47  ;;  %v4976_v48 = vpop.f32.mrb[12].mxu0 }
 0x7f9   : > { %v11428_v18 = vadd.f32 %v4976_v48, %v4853_v39  ;;  %v4978_v30 = vpop.f32.mrb[13].mxu0 }
 0x7fa   : > { %v4980_v59 = vpop.f32.mrb[14].mxu0  ;;  %v4979_v25 = vadd.f32 %v4978_v30, %v4857_v49 }
 0x7fb   : > { %v11430_v13 = vadd.f32 %v4980_v59, %v4853_v39  ;;  %v4982_v16 = vpop.f32.mrb[15].mxu0  ;;  %5286 = vrot.lane.b32.xlu0 %v11428_v18, %s12800_s28  ;;  %v5005_v39 = vld [vmem:[%s12862_s21 + $0x20] sm:$0xff] }
 0x7fc   : > { %v4983_v50 = vadd.f32 %v4982_v16, %v4857_v49  ;;  %v11543_v59 = vld [vmem:[%s12863_s1] sm:$0xff] }
 0x7fd   : > { %5288 = vrot.lane.b32.xlu1 %v11430_v13, %s12800_s28 }
 0x7fe   : > { %v11436_v51 = vpack.i.bf16 %v4983_v50, %v4979_v25  ;;  %v11438_v52 = vpack.c.bf16 %v4983_v50, %v4979_v25 }
 0x800   : > { %12859 = vst [vmem:[#allocation35_spill] sm:$0xff] %v11438_v52 }
 0x855   : > { %v11440_v53 = vpop.permute.xlu0 %5274 }
 0x856   : > { %5298 = vrot.lane.b32.xlu0 %v11440_v53, %s12800_s28 }
 0x857   : > { %v11444_v54 = vpop.permute.xlu1 %5276 }
 0x858   : > { %5301 = vrot.lane.b32.xlu1 %v11444_v54, %s12800_s28 }
 0x85d   : > { %v11448_v26 = vpop.permute.xlu1 %5278 }
 0x85e   : > { %5304 = vrot.lane.b32.xlu0 %v11448_v26, %s12800_s28 }
 0x861   : > { %v11452_v55 = vpop.permute.xlu1 %5280 }
 0x862   : > { %5307 = vrot.lane.b32.xlu1 %v11452_v55, %s12800_s28 }
 0x865   : > { %v11456_v27 = vpop.permute.xlu0 %5282 }
 0x866   : > { %5310 = vrot.lane.b32.xlu0 %v11456_v27, %s12800_s28 }
 0x867   : > { %v11460_v56 = vpop.permute.xlu1 %5284 }
 0x868   : > { %5313 = vrot.lane.b32.xlu1 %v11460_v56, %s12800_s28 }
 0x86d   : > { %v11464_v36 = vpop.permute.xlu0 %5286 }
 0x86e   : > { %5316 = vrot.lane.b32.xlu0 %v11464_v36, %s12800_s28 }
 0x86f   : > { %v11468_v61 = vpop.permute.xlu1 %5288 }
 0x870   : > { %5319 = vrot.lane.b32.xlu1 %v11468_v61, %s12800_s28 }
 0x872   : > { %5074 = vrot.lane.b32.xlu0 %v4993_v57, %s12788_s23 }
 0x874   : > { %5076 = vrot.lane.b32.xlu1 %v4994_v60, %s12788_s23 }
 0x876   : > { %5154 = vrot.lane.b32.xlu0 %v5001_v62, %s10475_s7 }
 0x878   : > { %5156 = vrot.lane.b32.xlu1 %v5002_v43, %s10475_s7 }
 0x87a   : > { %5078 = vrot.lane.b32.xlu0 %v4995_v63, %s12788_s23 }
 0x87c   : > { %5080 = vrot.lane.b32.xlu1 %v4996_v42, %s12788_s23 }
 0x87e   : > { %5158 = vrot.lane.b32.xlu0 %v5003_v0, %s10475_s7 }
 0x880   : > { %5160 = vrot.lane.b32.xlu1 %v5004_v1, %s10475_s7 }
 0x882   : > { %5082 = vrot.lane.b32.xlu0 %v4997_v2, %s12788_s23 }
 0x884   : > { %5084 = vrot.lane.b32.xlu1 %v4998_v3, %s12788_s23 }
 0x886   : > { %5162 = vrot.lane.b32.xlu0 %v5005_v39, %s10475_s7 }
 0x888   : > { %5164 = vrot.lane.b32.xlu1 %v5006_v5, %s10475_s7 }
 0x8c8   : > { %v5299_v49 = vpop.permute.xlu0 %5298 }
 0x8c9   : > { %v5300_v7 = vsel %vm5017_vm4, %v5299_v49, %v11440_v53 }
 0x8ca   : > { %v5302_v8 = vpop.permute.xlu1 %5301  ;;  %5322 = vrot.lane.b32.xlu0 %v5300_v7, %s12800_s28 }
 0x8cb   : > { %v5303_v12 = vsel %vm5017_vm4, %v5302_v8, %v11444_v54 }
 0x8cc   : > { %5324 = vrot.lane.b32.xlu1 %v5303_v12, %s12800_s28 }
 0x8ce   : > { %5086 = vrot.lane.b32.xlu0 %v4999_v14, %s12788_s23 }
 0x8d0   : > { %v5305_v20 = vpop.permute.xlu0 %5304  ;;  %5088 = vrot.lane.b32.xlu1 %v5000_v15, %s12788_s23  ;;  %s12864_s23 = smov %s12863_s1  ;;  %s12865_s1 = smov 1  }
 0x8d1   : > { %v5306_v22 = vsel %vm5017_vm4, %v5305_v20, %v11448_v26  ;;  %v11550_v16 = vld [vmem:[%s12864_s23 + $0x8] sm:$0xff]  ;;  %v11553_v25 = vld [vmem:[%s12864_s23 + $0x10] sm:$0xff]  ;;  %v11560_v50 = vld [vmem:[%s12864_s23 + $0x18] sm:$0xff] }
 0x8d2   : > { %5326 = vrot.lane.b32.xlu0 %v5306_v22, %s12800_s28  ;;  %v11563_v57 = vld [vmem:[%s12864_s23 + $0x20] sm:$0xff]  ;;  %v11570_v60 = vld [vmem:[%s12864_s23 + $0x28] sm:$0xff]  ;;  %v11573_v62 = vld [vmem:[%s12864_s23 + $0x30] sm:$0xff] }
 0x8d3   : > { %v11580_v43 = vld [vmem:[%s12864_s23 + $0x38] sm:$0xff] }
 0x8d4   : > { %v5308_v24 = vpop.permute.xlu1 %5307 }
 0x8d5   : > { %v5309_v28 = vsel %vm5017_vm4, %v5308_v24, %v11452_v55 }
 0x8d6   : > { %5328 = vrot.lane.b32.xlu1 %v5309_v28, %s12800_s28  ;;  %5166 = vrot.lane.b32.xlu0 %v5007_v23, %s10475_s7 }
 0x8d8   : > { %v5311_v38 = vpop.permute.xlu0 %5310 }
 0x8d9   : > { %v5312_v41 = vsel %vm5017_vm4, %v5311_v38, %v11456_v27 }
 0x8da   : > { %5168 = vrot.lane.b32.xlu1 %v5008_v31, %s10475_s7  ;;  %v5314_v44 = vpop.permute.xlu1 %5313  ;;  %5330 = vrot.lane.b32.xlu0 %v5312_v41, %s12800_s28 }
 0x8db   : > { %v5315_v32 = vsel %vm5017_vm4, %v5314_v44, %v11460_v56 }
 0x8de   : > { %5332 = vrot.lane.b32.xlu1 %v5315_v32, %s12800_s28  ;;  %5018 = vrot.lane.b32.xlu0 %v11392_v6, %s12800_s28 }
 0x8e0   : > { %v5317_v29 = vpop.permute.xlu0 %5316 }
 0x8e1   : > { %v5318_v33 = vsel %vm5017_vm4, %v5317_v29, %v11464_v36 }
 0x8e2   : > { %5021 = vrot.lane.b32.xlu1 %v11394_v11, %s12800_s28  ;;  %v5320_v48 = vpop.permute.xlu1 %5319  ;;  %5334 = vrot.lane.b32.xlu0 %v5318_v33, %s12800_s28 }
 0x8e3   : > { %v5321_v30 = vsel %vm5017_vm4, %v5320_v48, %v11468_v61 }
 0x8e4   : > { %v11584_v63 = vpop.permute.xlu0 %5074 }
 0x8e6   : > { %5336 = vrot.lane.b32.xlu1 %v5321_v30, %s12800_s28  ;;  %5024 = vrot.lane.b32.xlu0 %v11404_v21, %s12800_s28  ;;  %v11586_v42 = vpop.permute.xlu1 %5076 }
 0x8e8   : > { %v11588_v0 = vpop.permute.xlu0 %5154 }
 0x8ea   : > { %5027 = vrot.lane.b32.xlu1 %v11408_v34, %s12800_s28  ;;  %5030 = vrot.lane.b32.xlu0 %v11416_v40, %s12800_s28  ;;  %v11590_v1 = vpop.permute.xlu1 %5156 }
 0x8ec   : > { %v11592_v2 = vpop.permute.xlu0 %5078 }
 0x8ee   : > { %5033 = vrot.lane.b32.xlu1 %v11418_v45, %s12800_s28  ;;  %5036 = vrot.lane.b32.xlu0 %v11428_v18, %s12800_s28  ;;  %v11594_v3 = vpop.permute.xlu1 %5080 }
 0x8f0   : > { %v11596_v39 = vpop.permute.xlu0 %5158 }
 0x8f2   : > { %5039 = vrot.lane.b32.xlu1 %v11430_v13, %s12800_s28  ;;  %5234 = vrot.lane.b32.xlu0 %v11543_v59, %s12800_s28  ;;  %v11598_v5 = vpop.permute.xlu1 %5160 }
 0x8f4   : > { %v11600_v49 = vpop.permute.xlu0 %5082 }
 0x8f6   : > { %5236 = vrot.lane.b32.xlu1 %v11550_v16, %s12800_s28  ;;  %5238 = vrot.lane.b32.xlu0 %v11553_v25, %s12800_s28  ;;  %v11602_v7 = vpop.permute.xlu1 %5084 }
 0x8f8   : > { %v11604_v8 = vpop.permute.xlu0 %5162 }
 0x8fa   : > { %5240 = vrot.lane.b32.xlu1 %v11560_v50, %s12800_s28  ;;  %5242 = vrot.lane.b32.xlu0 %v11563_v57, %s12800_s28  ;;  %v11606_v12 = vpop.permute.xlu1 %5164 }
 0x8fe   : > { %5244 = vrot.lane.b32.xlu1 %v11570_v60, %s12800_s28  ;;  %5246 = vrot.lane.b32.xlu0 %v11573_v62, %s12800_s28 }
 0x902   : > { %5248 = vrot.lane.b32.xlu1 %v11580_v43, %s12800_s28 }
 0x93c   : > { %v5323_v14 = vpop.permute.xlu0 %5322 }
 0x93d   : > { %v5338_v32 = vsel %vm5017_vm4, %v5323_v14, %v11440_v53 }
 0x93e   : > { %v5325_v15 = vpop.permute.xlu1 %5324  ;;  %v5346_v33 = vmul.f32 %v5338_v32, %v11584_v63  ;;  %v5394_v53 = vmul.f32 %v5338_v32, %v11588_v0 }
 0x93f   : > { %v5339_v30 = vsel %vm5017_vm4, %v5325_v15, %v11444_v54 }
 0x940   : > { %v11608_v20 = vpop.permute.xlu0 %5086  ;;  %v5347_v14 = vmul.f32 %v5339_v30, %v11586_v42  ;;  %v5395_v54 = vmul.f32 %v5339_v30, %v11590_v1 }
 0x942   : > { %v11610_v22 = vpop.permute.xlu1 %5088 }
 0x944   : > { %v5327_v23 = vpop.permute.xlu0 %5326 }
 0x948   : > { %v5329_v24 = vpop.permute.xlu1 %5328  ;;  %v11612_v28 = vpop.permute.xlu0 %5166 }
 0x94c   : > { %v11614_v31 = vpop.permute.xlu1 %5168  ;;  %v5331_v38 = vpop.permute.xlu0 %5330 }
 0x950   : > { %v5333_v41 = vpop.permute.xlu1 %5332  ;;  %v5019_v44 = vpop.permute.xlu0 %5018 }
 0x951   : > { %v5020_v29 = vsel %vm5017_vm4, %v5019_v44, %v11392_v6  ;;  %v5340_v44 = vsel %vm5017_vm4, %v5327_v23, %v11448_v26  ;;  %v5342_v26 = vsel %vm5017_vm4, %v5331_v38, %v11456_v27 }
 0x952   : > { %5042 = vrot.lane.b32.xlu0 %v5020_v29, %s12800_s28  ;;  %v5348_v15 = vmul.f32 %v5340_v44, %v11592_v2  ;;  %v5396_v32 = vmul.f32 %v5340_v44, %v11596_v39 }
 0x954   : > { %v5022_v48 = vpop.permute.xlu1 %5021 }
 0x955   : > { %v5023_v4 = vsel %vm5017_vm4, %v5022_v48, %v11394_v11  ;;  %v5398_v48 = vmul.f32 %v5342_v26, %v11604_v8 }
 0x956   : > { %5044 = vrot.lane.b32.xlu1 %v5023_v4, %s12800_s28  ;;  %5362 = vrot.lane.b32.xlu0 %v5346_v33, %s10475_s7  ;;  %v5341_v4 = vsel %vm5017_vm4, %v5329_v24, %v11452_v55  ;;  %v5350_v33 = vmul.f32 %v5342_v26, %v11600_v49  ;;  %v5343_v55 = vsel %vm5017_vm4, %v5333_v41, %v11460_v56  ;;  %v5335_v24 = vpop.permute.xlu0 %5334 }
 0x957   : > { %v5349_v29 = vmul.f32 %v5341_v4, %v11594_v3  ;;  %v5397_v23 = vmul.f32 %v5341_v4, %v11598_v5  ;;  %v5351_v27 = vmul.f32 %v5343_v55, %v11602_v7  ;;  %v5344_v38 = vsel %vm5017_vm4, %v5335_v24, %v11464_v36 }
 0x958   : > { %v5337_v30 = vpop.permute.xlu1 %5336  ;;  %v5352_v56 = vmul.f32 %v5344_v38, %v11608_v20  ;;  %v5400_v44 = vmul.f32 %v5344_v38, %v11612_v28 }
 0x959   : > { %v5345_v41 = vsel %vm5017_vm4, %v5337_v30, %v11468_v61 }
 0x95a   : > { %5364 = vrot.lane.b32.xlu1 %v5347_v14, %s10475_s7  ;;  %5410 = vrot.lane.b32.xlu0 %v5394_v53, %s12865_s1  ;;  %v5399_v53 = vmul.f32 %v5343_v55, %v11606_v12  ;;  %v5025_v14 = vpop.permute.xlu0 %5024  ;;  %v5353_v36 = vmul.f32 %v5345_v41, %v11610_v22 }
 0x95b   : > { %v5026_v61 = vsel %vm5017_vm4, %v5025_v14, %v11404_v21 }
 0x95e   : > { %5412 = vrot.lane.b32.xlu1 %v5395_v54, %s12865_s1  ;;  %5366 = vrot.lane.b32.xlu0 %v5348_v15, %s10475_s7  ;;  %v5028_v54 = vpop.permute.xlu1 %5027  ;;  %v5401_v15 = vmul.f32 %v5345_v41, %v11614_v31  ;;  %v5031_v4 = vpop.permute.xlu0 %5030 }
 0x95f   : > { %v5032_v26 = vsel %vm5017_vm4, %v5031_v4, %v11416_v40 }
 0x962   : > { %5368 = vrot.lane.b32.xlu1 %v5349_v29, %s10475_s7  ;;  %5414 = vrot.lane.b32.xlu0 %v5396_v32, %s12865_s1  ;;  %v5034_v32 = vpop.permute.xlu1 %5033  ;;  %v5029_v29 = vsel %vm5017_vm4, %v5028_v54, %v11408_v34 }
 0x966   : > { %5416 = vrot.lane.b32.xlu1 %v5397_v23, %s12865_s1  ;;  %5370 = vrot.lane.b32.xlu0 %v5350_v33, %s10475_s7  ;;  %v5037_v23 = vpop.permute.xlu0 %5036  ;;  %v5035_v33 = vsel %vm5017_vm4, %v5034_v32, %v11418_v45  ;;  %v5040_v24 = vpop.permute.xlu1 %5039 }
 0x967   : > { %v5038_v55 = vsel %vm5017_vm4, %v5037_v23, %v11428_v18 }
 0x96a   : > { %5372 = vrot.lane.b32.xlu1 %v5351_v27, %s10475_s7  ;;  %5418 = vrot.lane.b32.xlu0 %v5398_v48, %s12865_s1  ;;  %v5041_v48 = vsel %vm5017_vm4, %v5040_v24, %v11430_v13  ;;  %v5235_v27 = vpop.permute.xlu0 %5234  ;;  %v5237_v38 = vpop.permute.xlu1 %5236 }
 0x96b   : > { %v5259_v23 = vmul.f32 %v5237_v38, %v11394_v11 }
 0x96e   : > { %5420 = vrot.lane.b32.xlu1 %v5399_v53, %s12865_s1  ;;  %5374 = vrot.lane.b32.xlu0 %v5352_v56, %s10475_s7  ;;  %v5239_v30 = vpop.permute.xlu0 %5238  ;;  %v5241_v53 = vpop.permute.xlu1 %5240 }
 0x972   : > { %5376 = vrot.lane.b32.xlu1 %v5353_v36, %s10475_s7  ;;  %5422 = vrot.lane.b32.xlu0 %v5400_v44, %s12865_s1  ;;  %v5243_v56 = vpop.permute.xlu0 %5242  ;;  %v5245_v41 = vpop.permute.xlu1 %5244  ;;  %s12802_s7 = smov 127  }
 0x976   : > { %5424 = vrot.lane.b32.xlu1 %v5401_v15, %s12865_s1  ;;  %5046 = vrot.lane.b32.xlu0 %v5026_v61, %s12800_s28  ;;  %v11688_v14 = vpop.permute.xlu0 %5246  ;;  %v5249_v44 = vpop.permute.xlu1 %5248  ;;  %s12804_s1 = smov 112  }
 0x97a   : > { %5048 = vrot.lane.b32.xlu1 %v5029_v29, %s12800_s28  ;;  %5050 = vrot.lane.b32.xlu0 %v5032_v26, %s12800_s28  ;;  %v5258_v26 = vmul.f32 %v5235_v27, %v11392_v6 }
 0x97e   : > { %5052 = vrot.lane.b32.xlu1 %v5035_v33, %s12800_s28  ;;  %5054 = vrot.lane.b32.xlu0 %v5038_v55, %s12800_s28 }
 0x982   : > { %5056 = vrot.lane.b32.xlu1 %v5041_v48, %s12800_s28  ;;  %s10478_s28 = smov 65  }
 0x9c4   : > { %v5043_v36 = vpop.permute.xlu0 %5042 }
 0x9c5   : > { %v5058_v27 = vsel %vm5017_vm4, %v5043_v36, %v11392_v6 }
 0x9c8   : > { %v5045_v54 = vpop.permute.xlu1 %5044  ;;  %v5363_v15 = vpop.permute.xlu0 %5362 }
 0x9c9   : > { %v5059_v4 = vsel %vm5017_vm4, %v5045_v54, %v11394_v11  ;;  %v5386_v33 = vadd.f32 %v5363_v15, %v5258_v26  ;;  %v5260_v15 = vmul.f32 %v5239_v30, %v11404_v21 }
 0x9ca   : > { %v5099_v61 = vmul.f32 %v11586_v42, %v5059_v4 }
 0x9cc   : > { %5116 = vrot.lane.b32.xlu1 %v5099_v61, %s12802_s7  ;;  %v5365_v32 = vpop.permute.xlu1 %5364  ;;  %v5411_v29 = vpop.permute.xlu0 %5410 }
 0x9cd   : > { %v5387_v55 = vadd.f32 %v5365_v32, %v5259_v23  ;;  %v11696_v58 = vadd.f32 %v5411_v29, %v5386_v33  ;;  %v5261_v32 = vmul.f32 %v5241_v53, %v11408_v34  ;;  %v5098_v29 = vmul.f32 %v11584_v63, %v5058_v27 }
 0x9d0   : > { %v5413_v24 = vpop.permute.xlu1 %5412  ;;  %v5367_v48 = vpop.permute.xlu0 %5366 }
 0x9d1   : > { %v11698_v9 = vadd.f32 %v5413_v24, %v5387_v55  ;;  %v5388_v26 = vadd.f32 %v5367_v48, %v5260_v15 }
 0x9d3   : > { %v11702_v42 = vpack.i.bf16 %v11698_v9, %v11696_v58 }
 0x9d4   : > { %v5369_v61 = vpop.permute.xlu1 %5368  ;;  %v5415_v38 = vpop.permute.xlu0 %5414 }
 0x9d5   : > { %9896 = vrot.lane.b32.xlu0 %v11702_v42, %s12804_s1  ;;  %v5389_v23 = vadd.f32 %v5369_v61, %v5261_v32  ;;  %v11713_v24 = vadd.f32 %v5415_v38, %v5388_v26  ;;  %v5263_v38 = vmul.f32 %v5245_v41, %v11418_v45  ;;  %v5262_v32 = vmul.f32 %v5243_v56, %v11416_v40 }
 0x9d8   : > { %v5417_v33 = vpop.permute.xlu1 %5416  ;;  %v5371_v55 = vpop.permute.xlu0 %5370 }
 0x9d9   : > { %v11715_v54 = vadd.f32 %v5417_v33, %v5389_v23  ;;  %5114 = vrot.lane.b32.xlu0 %v5098_v29, %s12802_s7  ;;  %v5390_v52 = vadd.f32 %v5371_v55, %v5262_v32  ;;  %v5265_v55 = vmul.f32 %v5249_v44, %v11430_v13 }
 0x9db   : > { %v9900_v30 = vpack.i.bf16 %v11715_v54, %v11713_v24 }
 0x9dc   : > { %v5373_v36 = vpop.permute.xlu1 %5372  ;;  %v5419_v19 = vpop.permute.xlu0 %5418 }
 0x9dd   : > { %9901 = vrot.lane.b32.xlu1 %v9900_v30, %s12804_s1  ;;  %v5391_v26 = vadd.f32 %v5373_v36, %v5263_v38  ;;  %v5438_v37 = vadd.f32 %v5419_v19, %v5390_v52  ;;  %v5179_v19 = vmul.f32 %v11590_v1, %v5059_v4 }
 0x9e0   : > { %v5421_v63 = vpop.permute.xlu1 %5420  ;;  %v5375_v48 = vpop.permute.xlu0 %5374 }
 0x9e1   : > { %v11727_v53 = vadd.f32 %v5421_v63, %v5391_v26  ;;  %v5178_v63 = vmul.f32 %v11588_v0, %v5058_v27 }
 0x9e3   : > { %v9905_v36 = vpack.i.bf16 %v11727_v53, %v5438_v37 }
 0x9e4   : > { %v5377_v61 = vpop.permute.xlu1 %5376  ;;  %v5423_v15 = vpop.permute.xlu0 %5422 }
 0x9e5   : > { %v5393_v52 = vadd.f32 %v5377_v61, %v5265_v55  ;;  %v5009_v55 = vmul.f32 %v11543_v59, %v11392_v6  ;;  %v5012_v59 = vmul.f32 %v11560_v50, %v11408_v34 }
 0x9e8   : > { %v5425_v29 = vpop.permute.xlu1 %5424  ;;  %v5047_v23 = vpop.permute.xlu0 %5046 }
 0x9e9   : > { %v5060_v33 = vsel %vm5017_vm4, %v5047_v23, %v11404_v21 }
 0x9ea   : > { %v5100_v47 = vmul.f32 %v11592_v2, %v5060_v33  ;;  %v5441_v2 = vadd.f32 %v5425_v29, %v5393_v52 }
 0x9ec   : > { %v5049_v17 = vpop.permute.xlu1 %5048  ;;  %5118 = vrot.lane.b32.xlu0 %v5100_v47, %s12802_s7  ;;  %v5264_v47 = vmul.f32 %v11688_v14, %v11428_v18  ;;  %v5051_v1 = vpop.permute.xlu0 %5050 }
 0x9ed   : > { %v5061_v41 = vsel %vm5017_vm4, %v5049_v17, %v11408_v34 }
 0x9ee   : > { %v5101_v56 = vmul.f32 %v11594_v3, %v5061_v41  ;;  %v5392_v17 = vadd.f32 %v5375_v48, %v5264_v47  ;;  %v5180_v3 = vmul.f32 %v11596_v39, %v5060_v33  ;;  %v5181_v38 = vmul.f32 %v11598_v5, %v5061_v41 }
 0x9ef   : > { %v5062_v5 = vsel %vm5017_vm4, %v5051_v1, %v11416_v40 }
 0x9f0   : > { %5120 = vrot.lane.b32.xlu1 %v5101_v56, %s12802_s7  ;;  %9906 = vrot.lane.b32.xlu0 %v9905_v36, %s12804_s1  ;;  %v5440_v44 = vadd.f32 %v5423_v15, %v5392_v17  ;;  %s10479_s7 = smov 96   ;;  %v5053_v39 = vpop.permute.xlu1 %5052  ;;  %v5055_v14 = vpop.permute.xlu0 %5054  ;;  %v5102_v4 = vmul.f32 %v11600_v49, %v5062_v5  ;;  %v5182_v49 = vmul.f32 %v11604_v8, %v5062_v5 }
 0x9f1   : > { %v5063_v27 = vsel %vm5017_vm4, %v5053_v39, %v11418_v45  ;;  %v5064_v48 = vsel %vm5017_vm4, %v5055_v14, %v11428_v18  ;;  %v12868_v8 = vpack.c.bf16 %v11698_v9, %v11696_v58 }
 0x9f2   : > { %v9915_v0 = vpack.i.bf16 %v5441_v2, %v5440_v44  ;;  %v5103_v61 = vmul.f32 %v11602_v7, %v5063_v27  ;;  %v5104_v15 = vmul.f32 %v11608_v20, %v5064_v48  ;;  %v5183_v26 = vmul.f32 %v11606_v12, %v5063_v27 }
 0x9f3   : > { %v5184_v7 = vmul.f32 %v11612_v28, %v5064_v48  ;;  %v12869_v12 = vpack.c.bf16 %v11715_v54, %v11713_v24  ;;  %v5621_v28 = vpack.c.bf16 %v5441_v2, %v5440_v44 }
 0x9f4   : > { %5196 = vrot.lane.b32.xlu1 %v5179_v19, %s10478_s28  ;;  %5194 = vrot.lane.b32.xlu0 %v5178_v63, %s10478_s28  ;;  %v5010_v63 = vmul.f32 %v11550_v16, %v11394_v11  ;;  %v5011_v11 = vmul.f32 %v11553_v25, %v11404_v21 }
 0x9f8   : > { %5200 = vrot.lane.b32.xlu1 %v5181_v38, %s10478_s28  ;;  %5198 = vrot.lane.b32.xlu0 %v5180_v3, %s10478_s28 }
 0x9fc   : > { %9916 = vrot.lane.b32.xlu1 %v9915_v0, %s12804_s1  ;;  %9911 = vrot.lane.b32.xlu0 %v11702_v42, %s10479_s7  ;;  %s12866_s1 = smov 127  }
 0xa00   : > { %9921 = vrot.lane.b32.xlu1 %v11702_v42, %s10480_s3  ;;  %9926 = vrot.lane.b32.xlu0 %v9900_v30, %s10479_s7  ;;  %v5057_v42 = vpop.permute.xlu1 %5056 }
 0xa04   : > { %9931 = vrot.lane.b32.xlu1 %v9900_v30, %s10480_s3  ;;  %9936 = vrot.lane.b32.xlu0 %v9905_v36, %s10479_s7  ;;  %v5065_v30 = vsel %vm5017_vm4, %v5057_v42, %v11430_v13 }
 0xa05   : > { %v5105_v32 = vmul.f32 %v11610_v22, %v5065_v30  ;;  %v5185_v20 = vmul.f32 %v11614_v31, %v5065_v30  ;;  %v5620_v22 = vpack.c.bf16 %v11727_v53, %v5438_v37 }
 0xa08   : > { %9941 = vrot.lane.b32.xlu1 %v9905_v36, %s10480_s3  ;;  %5122 = vrot.lane.b32.xlu0 %v5102_v4, %s12866_s1 }
 0xa0c   : > { %5124 = vrot.lane.b32.xlu1 %v5103_v61, %s12866_s1  ;;  %5126 = vrot.lane.b32.xlu0 %v5104_v15, %s12866_s1 }
 0xa10   : > { %5128 = vrot.lane.b32.xlu1 %v5105_v32, %s12866_s1  ;;  %5202 = vrot.lane.b32.xlu0 %v5182_v49, %s10478_s28 }
 0xa14   : > { %5204 = vrot.lane.b32.xlu1 %v5183_v26, %s10478_s28  ;;  %5206 = vrot.lane.b32.xlu0 %v5184_v7, %s10478_s28 }
 0xa18   : > { %5208 = vrot.lane.b32.xlu1 %v5185_v20, %s10478_s28  ;;  %9946 = vrot.lane.b32.xlu0 %v9915_v0, %s10479_s7  ;;  %s12870_s28 = smov 112  }
 0xa1c   : > { %9951 = vrot.lane.b32.xlu1 %v9915_v0, %s10480_s3  ;;  %5734 = vrot.lane.b32.xlu0 %v12868_v8, %s12867_s4 }
 0xa20   : > { %5736 = vrot.lane.b32.xlu0 %v12869_v12, %s12867_s4 }
 0xa24   : > { %5738 = vrot.lane.b32.xlu0 %v5620_v22, %s12867_s4 }
 0xa28   : > { %5740 = vrot.lane.b32.xlu0 %v5621_v28, %s12867_s4 }
 0xa3e   : > { %v5117_v41 = vpop.permute.xlu1 %5116 }
 0xa3f   : > { %v5139_v52 = vadd.f32 %v5117_v41, %v5010_v63 }
 0xa47   : > { %v9897_v31 = vpop.permute.xlu0 %9896 }
 0xa48   : > { %v9899_v29 = vunpack.i.h.bf16 %v9897_v31  ;;  %v9898_v23 = vunpack.i.l.bf16 %v9897_v31 }
 0xa4a   : > { %v5622_v33 = vpack.c.bf16 %v9899_v29, %v9898_v23 }
 0xa4b   : > { %v5115_v54 = vpop.permute.xlu0 %5114 }
 0xa4c   : > { %5836 = vrot.lane.b32.xlu1 %v5622_v33, %s12867_s4  ;;  %v5138_v17 = vadd.f32 %v5115_v54, %v5009_v55 }
 0xa4f   : > { %v9902_v58 = vpop.permute.xlu1 %9901 }
 0xa50   : > { %v9904_v9 = vunpack.i.h.bf16 %v9902_v58  ;;  %v9903_v56 = vunpack.i.l.bf16 %v9902_v58 }
 0xa52   : > { %v5623_v36 = vpack.c.bf16 %v9904_v9, %v9903_v56 }
 0xa54   : > { %5838 = vrot.lane.b32.xlu1 %v5623_v36, %s12867_s4 }
 0xa5e   : > { %v5119_v37 = vpop.permute.xlu0 %5118 }
 0xa5f   : > { %v5140_v16 = vadd.f32 %v5119_v37, %v5011_v11 }
 0xa62   : > { %v5121_v24 = vpop.permute.xlu1 %5120  ;;  %v9907_v53 = vpop.permute.xlu0 %9906 }
 0xa63   : > { %v9909_v19 = vunpack.i.h.bf16 %v9907_v53  ;;  %v9908_v47 = vunpack.i.l.bf16 %v9907_v53  ;;  %v5141_v14 = vadd.f32 %v5121_v24, %v5012_v59 }
 0xa65   : > { %v5624_v2 = vpack.c.bf16 %v9909_v19, %v9908_v47  ;;  %v5013_v47 = vmul.f32 %v11563_v57, %v11416_v40 }
 0xa66   : > { %v5197_v3 = vpop.permute.xlu1 %5196  ;;  %v5195_v38 = vpop.permute.xlu0 %5194 }
 0xa67   : > { %v5219_v44 = vadd.f32 %v5197_v3, %v5139_v52  ;;  %v5218_v0 = vadd.f32 %v5195_v38, %v5138_v17  ;;  %5840 = vrot.lane.b32.xlu1 %v5624_v2, %s12867_s4  ;;  %v5014_v52 = vmul.f32 %v11570_v60, %v11418_v45 }
 0xa69   : > { %v11801_v1 = vpack.i.bf16 %v5219_v44, %v5218_v0  ;;  %v5522_v39 = vpack.c.bf16 %v5219_v44, %v5218_v0  ;;  %v5015_v44 = vmul.f32 %v11573_v62, %v11428_v18  ;;  %v5016_v0 = vmul.f32 %v11580_v43, %v11430_v13 }
 0xa6a   : > { %v5201_v5 = vpop.permute.xlu1 %5200  ;;  %v5199_v6 = vpop.permute.xlu0 %5198 }
 0xa6b   : > { %9956 = vrot.lane.b32.xlu0 %v11801_v1, %s12870_s28  ;;  %8927 = vmatprep.mubr.msk.bf16.mxu1 %vm5742_vm5, %v5522_v39  ;;  %v11810_v30 = vadd.f32 %v5201_v5, %v5141_v14  ;;  %v11812_v49 = vadd.f32 %v5199_v6, %v5140_v16 }
 0xa6d   : > { %v11818_v12 = vpack.i.bf16 %v11810_v30, %v11812_v49 }
 0xa6e   : > { %v9917_v4 = vpop.permute.xlu1 %9916  ;;  %v9912_v27 = vpop.permute.xlu0 %9911 }
 0xa6f   : > { %v9919_v48 = vunpack.i.h.bf16 %v9917_v4  ;;  %v9918_v42 = vunpack.i.l.bf16 %v9917_v4  ;;  %v9914_v61 = vunpack.i.h.bf16 %v9912_v27  ;;  %v9913_v15 = vunpack.i.l.bf16 %v9912_v27 }
 0xa71   : > { %v5625_v32 = vpack.c.bf16 %v9919_v48, %v9918_v42  ;;  %v5626_v26 = vpack.c.bf16 %v9914_v61, %v9913_v15 }
 0xa72   : > { %v9922_v7 = vpop.permute.xlu1 %9921  ;;  %v9927_v20 = vpop.permute.xlu0 %9926 }
 0xa73   : > { %v9929_v21 = vunpack.i.h.bf16 %v9927_v20  ;;  %v9928_v25 = vunpack.i.l.bf16 %v9927_v20  ;;  %5937 = vrot.lane.b32.xlu0 %v5626_v26, %s12867_s4  ;;  %5842 = vrot.lane.b32.xlu1 %v5625_v32, %s12867_s4  ;;  %v9924_v34 = vunpack.i.h.bf16 %v9922_v7  ;;  %v9923_v50 = vunpack.i.l.bf16 %v9922_v7 }
 0xa74   : > { %v5523_v20 = vpack.c.bf16 %v11810_v30, %v11812_v49 }
 0xa75   : > { %v5627_v8 = vpack.c.bf16 %v9929_v21, %v9928_v25  ;;  %v5630_v23 = vpack.c.bf16 %v9924_v34, %v9923_v50 }
 0xa76   : > { %v9932_v22 = vpop.permute.xlu1 %9931  ;;  %v9937_v28 = vpop.permute.xlu0 %9936 }
 0xa77   : > { %v9939_v31 = vunpack.i.h.bf16 %v9937_v28  ;;  %v9938_v29 = vunpack.i.l.bf16 %v9937_v28  ;;  %5939 = vrot.lane.b32.xlu0 %v5627_v8, %s12867_s4  ;;  %9961 = vrot.lane.b32.xlu1 %v11818_v12, %s12870_s28  ;;  %v9934_v33 = vunpack.i.h.bf16 %v9932_v22  ;;  %v9933_v41 = vunpack.i.l.bf16 %v9932_v22 }
 0xa79   : > { %v5628_v58 = vpack.c.bf16 %v9939_v31, %v9938_v29  ;;  %v5631_v36 = vpack.c.bf16 %v9934_v33, %v9933_v41 }
 0xa7a   : > { %v9942_v9 = vpop.permute.xlu1 %9941  ;;  %v5123_v56 = vpop.permute.xlu0 %5122 }
 0xa7b   : > { %5941 = vrot.lane.b32.xlu0 %v5628_v58, %s12867_s4  ;;  %6038 = vrot.lane.b32.xlu1 %v5630_v23, %s12867_s4  ;;  %v9944_v54 = vunpack.i.h.bf16 %v9942_v9  ;;  %v9943_v37 = vunpack.i.l.bf16 %v9942_v9  ;;  %v5142_v17 = vadd.f32 %v5123_v56, %v5013_v47 }
 0xa7d   : > { %v5632_v55 = vpack.c.bf16 %v9944_v54, %v9943_v37 }
 0xa7e   : > { %v5125_v24 = vpop.permute.xlu1 %5124  ;;  %v5127_v53 = vpop.permute.xlu0 %5126 }
 0xa7f   : > { %6040 = vrot.lane.b32.xlu1 %v5631_v36, %s12867_s4  ;;  %v5143_v2 = vadd.f32 %v5125_v24, %v5014_v52  ;;  %v5144_v6 = vadd.f32 %v5127_v53, %v5015_v44 }
 0xa82   : > { %v5129_v63 = vpop.permute.xlu1 %5128  ;;  %v5203_v19 = vpop.permute.xlu0 %5202 }
 0xa83   : > { %6042 = vrot.lane.b32.xlu1 %v5632_v55, %s12867_s4  ;;  %v5222_v39 = vadd.f32 %v5203_v19, %v5142_v17  ;;  %v5145_v11 = vadd.f32 %v5129_v63, %v5016_v0 }
 0xa86   : > { %v5205_v3 = vpop.permute.xlu1 %5204  ;;  %v5207_v38 = vpop.permute.xlu0 %5206 }
 0xa87   : > { %v5223_v5 = vadd.f32 %v5205_v3, %v5143_v2  ;;  %v5224_v45 = vadd.f32 %v5207_v38, %v5144_v6 }
 0xa89   : > { %v9965_v40 = vpack.i.bf16 %v5223_v5, %v5222_v39  ;;  %v5524_v21 = vpack.c.bf16 %v5223_v5, %v5222_v39 }
 0xa8a   : > { %v5209_v57 = vpop.permute.xlu1 %5208  ;;  %v9947_v59 = vpop.permute.xlu0 %9946 }
 0xa8b   : > { %v5225_v60 = vadd.f32 %v5209_v57, %v5145_v11  ;;  %v9949_v16 = vunpack.i.h.bf16 %v9947_v59  ;;  %v9948_v14 = vunpack.i.l.bf16 %v9947_v59  ;;  %9966 = vrot.lane.b32.xlu0 %v9965_v40, %s12870_s28 }
 0xa8d   : > { %v5629_v4 = vpack.c.bf16 %v9949_v16, %v9948_v14  ;;  %v9970_v27 = vpack.i.bf16 %v5225_v60, %v5224_v45  ;;  %v5525_v25 = vpack.c.bf16 %v5225_v60, %v5224_v45 }
 0xa8e   : > { %v9952_v48 = vpop.permute.xlu1 %9951  ;;  %v5735_v18 = vpop.permute.xlu0 %5734 }
 0xa8f   : > { %v9954_v62 = vunpack.i.h.bf16 %v9952_v48  ;;  %v9953_v42 = vunpack.i.l.bf16 %v9952_v48  ;;  %9131 = vmatprep.subr.msk.bf16.mxu1 %vm5742_vm5, %v5735_v18  ;;  %5943 = vrot.lane.b32.xlu0 %v5629_v4, %s12867_s4  ;;  %v5756_v13 = vsel %vm5742_vm5, %v5735_v18, 0 }
 0xa90   : > { %9971 = vrot.lane.b32.xlu1 %v9970_v27, %s12870_s28  ;;  %8920 = vmatpush3.bf16.xpose.msra.mxu1 %v5756_v13 }
 0xa91   : > { %v5633_v43 = vpack.c.bf16 %v9954_v62, %v9953_v42 }
 0xa92   : > { %v5737_v61 = vpop.permute.xlu0 %5736 }
 0xa93   : > { %9132 = vmatprep.subr.msk.bf16.mxu1 %vm5742_vm5, %v5737_v61  ;;  %9976 = vrot.lane.b32.xlu0 %v11801_v1, %s10479_s7  ;;  %v5759_v15 = vsel %vm5742_vm5, %v5737_v61, 0 }
 0xa94   : > { %6044 = vrot.lane.b32.xlu1 %v5633_v43, %s12867_s4  ;;  %s10482_s4 = smov 32  }
 0xa96   : > { %v5739_v32 = vpop.permute.xlu0 %5738 }
 0xa97   : > { %9986 = vrot.lane.b32.xlu0 %v11801_v1, %s10480_s3  ;;  %v5762_v26 = vsel %vm5742_vm5, %v5739_v32, 0 }
 0xa98   : > { %9981 = vrot.lane.b32.xlu1 %v11818_v12, %s10479_s7  ;;  %8922 = vmatpush3.bf16.xpose.msra.mxu1 %v5759_v15 }
 0xa99   : > { %9133 = vmatprep.subr.msk.bf16.mxu1 %vm5742_vm5, %v5739_v32 }
 0xa9a   : > { %v5741_v7 = vpop.permute.xlu0 %5740 }
 0xa9b   : > { %9996 = vrot.lane.b32.xlu0 %v9965_v40, %s10479_s7  ;;  %v5765_v1 = vsel %vm5742_vm5, %v5741_v7, 0 }
 0xa9c   : > { %9991 = vrot.lane.b32.xlu1 %v11818_v12, %s10480_s3 }
 0xa9f   : > { %10006 = vrot.lane.b32.xlu0 %v9965_v40, %s10480_s3  ;;  %v12871_v40 = vld [vmem:[#allocation32_spill] sm:$0xff] }
 0xaa0   : > { %10001 = vrot.lane.b32.xlu1 %v9970_v27, %s10479_s7  ;;  %8924 = vmatpush3.bf16.xpose.msra.mxu1 %v5762_v26 }
 0xaa1   : > { %9134 = vmatprep.subr.msk.bf16.mxu1 %vm5742_vm5, %v5741_v7 }
 0xaa3   : > { %10016 = vrot.lane.b32.xlu0 %v11400_v10, %s12870_s28 }
 0xaa4   : > { %10011 = vrot.lane.b32.xlu1 %v9970_v27, %s10480_s3 }
 0xaa7   : > { %10026 = vrot.lane.b32.xlu0 %v11424_v46, %s12870_s28 }
 0xaa8   : > { %10021 = vrot.lane.b32.xlu1 %v11410_v35, %s12870_s28  ;;  %8926 = vmatpush3.bf16.xpose.msra.mxu1 %v5765_v1 }
 0xaab   : > { %10046 = vrot.lane.b32.xlu0 %v11410_v35, %s10479_s7 }
 0xaac   : > { %10031 = vrot.lane.b32.xlu1 %v11436_v51, %s12870_s28 }
 0xaaf   : > { %8928 = vmatmul.mubr.msk.bf16.vlgmr.msra.gmra.mrb[0].mxu1 %vm5742_vm5, %v5523_v20 }
 0xab0   : > { %10036 = vrot.lane.b32.xlu1 %v11400_v10, %s10479_s7  ;;  %8931 = vmatprep.mubr.msk.bf16.mxu1 %vm5742_vm5, %v5524_v21 }
 0xab4   : > { %10041 = vrot.lane.b32.xlu1 %v11400_v10, %s10480_s3 }
 0xab7   : > { %8932 = vmatmul.mubr.msk.bf16.gmra.mrb[4].mxu1 %vm5742_vm5, %v5525_v25 }
 0xabe   : > { %v5837_v34 = vpop.permute.xlu1 %5836 }
 0xabf   : > { %9135 = vmatprep.subr.msk.bf16.mxu0 %vm5742_vm5, %v5837_v34  ;;  %v5857_v50 = vsel %vm5742_vm5, %v5837_v34, 0  ;;  %v12872_v34 = vld [vmem:[#allocation33_spill] sm:$0xff] }
 0xac0   : > { %8936 = vmatpush3.bf16.xpose.msra.mxu0 %v5857_v50 }
 0xac6   : > { %v5839_v30 = vpop.permute.xlu1 %5838 }
 0xac7   : > { %9136 = vmatprep.subr.msk.bf16.mxu0 %vm5742_vm5, %v5839_v30  ;;  %v5860_v49 = vsel %vm5742_vm5, %v5839_v30, 0 }
 0xac8   : > { %8938 = vmatpush3.bf16.xpose.msra.mxu0 %v5860_v49 }
 0xad9   : > { %v5841_v8 = vpop.permute.xlu1 %5840 }
 0xada   : > { %9137 = vmatprep.subr.msk.bf16.mxu0 %vm5742_vm5, %v5841_v8  ;;  %v5863_v10 = vsel %vm5742_vm5, %v5841_v8, 0 }
 0xadb   : > { %8940 = vmatpush3.bf16.xpose.msra.mxu0 %v5863_v10 }
 0xadd   : > { %v9957_v12 = vpop.permute.xlu0 %9956 }
 0xade   : > { %v9959_v22 = vunpack.i.h.bf16 %v9957_v12  ;;  %v9958_v28 = vunpack.i.l.bf16 %v9957_v12 }
 0xae0   : > { %v5526_v31 = vpack.c.bf16 %v9959_v22, %v9958_v28 }
 0xae2   : > { %8943 = vmatprep.mubr.msk.bf16.mxu0 %vm5742_vm5, %v5526_v31  ;;  %v12873_v31 = vld [vmem:[#allocation34_spill] sm:$0xff] }
 0xae5   : > { %v5938_v29 = vpop.permute.xlu0 %5937  ;;  %v5843_v23 = vpop.permute.xlu1 %5842 }
 0xae6   : > { %9138 = vmatprep.subr.msk.bf16.mxu0 %vm5742_vm5, %v5843_v23  ;;  %9139 = vmatprep.subr.msk.bf16.mxu1 %vm5742_vm5, %v5938_v29  ;;  %v5866_v33 = vsel %vm5742_vm5, %v5843_v23, 0  ;;  %v5958_v41 = vsel %vm5742_vm5, %v5938_v29, 0 }
 0xae7   : > { %8942 = vmatpush3.bf16.xpose.msra.mxu0 %v5866_v33  ;;  %8952 = vmatpush3.bf16.xpose.msra.mxu1 %v5958_v41 }
 0xae9   : > { %v5940_v58 = vpop.permute.xlu0 %5939  ;;  %v9962_v9 = vpop.permute.xlu1 %9961 }
 0xaea   : > { %v9964_v56 = vunpack.i.h.bf16 %v9962_v9  ;;  %v9963_v36 = vunpack.i.l.bf16 %v9962_v9  ;;  %9140 = vmatprep.subr.msk.bf16.mxu1 %vm5742_vm5, %v5940_v58  ;;  %v5961_v24 = vsel %vm5742_vm5, %v5940_v58, 0 }
 0xaec   : > { %v5527_v54 = vpack.c.bf16 %v9964_v56, %v9963_v36 }
 0xaed   : > { %v6039_v37 = vpop.permute.xlu1 %6038  ;;  %v5942_v55 = vpop.permute.xlu0 %5941 }
 0xaee   : > { %8944 = vmatmul.mubr.msk.bf16.vlgmr.msra.gmra.mrb[16].mxu0 %vm5742_vm5, %v5527_v54  ;;  %9143 = vmatprep.subr.msk.bf16.mxu0 %vm5742_vm5, %v6039_v37  ;;  %v6059_v53 = vsel %vm5742_vm5, %v6039_v37, 0  ;;  %v5964_v19 = vsel %vm5742_vm5, %v5942_v55, 0  ;;  %v12874_v54 = vld [vmem:[#allocation35_spill] sm:$0xff] }
 0xaef   : > { %8954 = vmatpush3.bf16.xpose.msra.mxu1 %v5961_v24  ;;  %8968 = vmatpush3.bf16.xpose.msra.mxu0 %v6059_v53 }
 0xaf0   : > { %9141 = vmatprep.subr.msk.bf16.mxu1 %vm5742_vm5, %v5942_v55 }
 0xaf1   : > { %v6041_v63 = vpop.permute.xlu1 %6040 }
 0xaf2   : > { %9144 = vmatprep.subr.msk.bf16.mxu0 %vm5742_vm5, %v6041_v63  ;;  %v6062_v47 = vsel %vm5742_vm5, %v6041_v63, 0 }
 0xaf5   : > { %v6043_v52 = vpop.permute.xlu1 %6042 }
 0xaf6   : > { %v6065_v38 = vsel %vm5742_vm5, %v6043_v52, 0 }
 0xaf7   : > { %8956 = vmatpush3.bf16.xpose.msra.mxu1 %v5964_v19  ;;  %8970 = vmatpush3.bf16.xpose.msra.mxu0 %v6062_v47 }
 0xaf8   : > { %9145 = vmatprep.subr.msk.bf16.mxu0 %vm5742_vm5, %v6043_v52 }
 0xafd   : > { %v9967_v17 = vpop.permute.xlu0 %9966 }
 0xafe   : > { %v9969_v2 = vunpack.i.h.bf16 %v9967_v17  ;;  %v9968_v3 = vunpack.i.l.bf16 %v9967_v17 }
 0xaff   : > { %8972 = vmatpush3.bf16.xpose.msra.mxu0 %v6065_v38 }
 0xb00   : > { %v5528_v44 = vpack.c.bf16 %v9969_v2, %v9968_v3 }
 0xb01   : > { %v5944_v0 = vpop.permute.xlu0 %5943 }
 0xb02   : > { %v9972_v39 = vpop.permute.xlu1 %9971  ;;  %8947 = vmatprep.mubr.msk.bf16.mxu0 %vm5742_vm5, %v5528_v44  ;;  %9142 = vmatprep.subr.msk.bf16.mxu1 %vm5742_vm5, %v5944_v0  ;;  %v5967_v5 = vsel %vm5742_vm5, %v5944_v0, 0 }
 0xb03   : > { %v9974_v6 = vunpack.i.h.bf16 %v9972_v39  ;;  %v9973_v11 = vunpack.i.l.bf16 %v9972_v39  ;;  %8958 = vmatpush3.bf16.xpose.msra.mxu1 %v5967_v5 }
 0xb04   : > { %8983 = vmatprep.subr.bf16.mxu1 %v12871_v40 }
 0xb05   : > { %v5529_v57 = vpack.c.bf16 %v9974_v6, %v9973_v11  ;;  %v9977_v59 = vpop.permute.xlu0 %9976 }
 0xb06   : > { %v9979_v45 = vunpack.i.h.bf16 %v9977_v59  ;;  %v9978_v60 = vunpack.i.l.bf16 %v9977_v59  ;;  %v6045_v16 = vpop.permute.xlu1 %6044 }
 0xb07   : > { %8948 = vmatmul.mubr.msk.bf16.gmra.mrb[20].mxu0 %vm5742_vm5, %v5529_v57  ;;  %9146 = vmatprep.subr.msk.bf16.mxu0 %vm5742_vm5, %v6045_v16  ;;  %v6068_v14 = vsel %vm5742_vm5, %v6045_v16, 0 }
 0xb08   : > { %v5530_v4 = vpack.c.bf16 %v9979_v45, %v9978_v60  ;;  %8974 = vmatpush3.bf16.xpose.msra.mxu0 %v6068_v14 }
 0xb09   : > { %v9987_v27 = vpop.permute.xlu0 %9986 }
 0xb0a   : > { %v9989_v48 = vunpack.i.h.bf16 %v9987_v27  ;;  %v9988_v18 = vunpack.i.l.bf16 %v9987_v27  ;;  %v9982_v62 = vpop.permute.xlu1 %9981  ;;  %8959 = vmatprep.mubr.msk.bf16.mxu1 %vm5742_vm5, %v5530_v4 }
 0xb0b   : > { %v9984_v42 = vunpack.i.h.bf16 %v9982_v62  ;;  %v9983_v13 = vunpack.i.l.bf16 %v9982_v62 }
 0xb0c   : > { %v5534_v43 = vpack.c.bf16 %v9989_v48, %v9988_v18 }
 0xb0d   : > { %v5531_v61 = vpack.c.bf16 %v9984_v42, %v9983_v13  ;;  %v9997_v15 = vpop.permute.xlu0 %9996 }
 0xb0e   : > { %v9999_v32 = vunpack.i.h.bf16 %v9997_v15  ;;  %v9998_v26 = vunpack.i.l.bf16 %v9997_v15  ;;  %v9992_v7 = vpop.permute.xlu1 %9991  ;;  %8975 = vmatprep.mubr.msk.bf16.mxu0 %vm5742_vm5, %v5534_v43 }
 0xb0f   : > { %v9994_v1 = vunpack.i.h.bf16 %v9992_v7  ;;  %v9993_v20 = vunpack.i.l.bf16 %v9992_v7  ;;  %8960 = vmatmul.mubr.msk.bf16.vlgmr.msra.gmra.mrb[8].mxu1 %vm5742_vm5, %v5531_v61 }
 0xb10   : > { %v5532_v21 = vpack.c.bf16 %v9999_v32, %v9998_v26  ;;  %8984 = vmatpush3.bf16.msra.mxu1 %v12871_v40 }
 0xb11   : > { %v5535_v25 = vpack.c.bf16 %v9994_v1, %v9993_v20  ;;  %8985 = vmatprep.subr.bf16.mxu1 %v12872_v34  ;;  %v10007_v50 = vpop.permute.xlu0 %10006 }
 0xb12   : > { %v10009_v30 = vunpack.i.h.bf16 %v10007_v50  ;;  %v10008_v49 = vunpack.i.l.bf16 %v10007_v50  ;;  %v10002_v8 = vpop.permute.xlu1 %10001  ;;  %8963 = vmatprep.mubr.msk.bf16.mxu1 %vm5742_vm5, %v5532_v21 }
 0xb13   : > { %v10004_v10 = vunpack.i.h.bf16 %v10002_v8  ;;  %v10003_v12 = vunpack.i.l.bf16 %v10002_v8  ;;  %8976 = vmatmul.mubr.msk.bf16.vlgmr.msra.gmra.mrb[24].mxu0 %vm5742_vm5, %v5535_v25 }
 0xb14   : > { %v5536_v22 = vpack.c.bf16 %v10009_v30, %v10008_v49  ;;  %8986 = vmatpush3.bf16.msra.mxu1 %v12872_v34 }
 0xb15   : > { %v5533_v28 = vpack.c.bf16 %v10004_v10, %v10003_v12  ;;  %8987 = vmatprep.subr.bf16.mxu1 %v12873_v31  ;;  %v10017_v29 = vpop.permute.xlu0 %10016 }
 0xb16   : > { %v10019_v23 = vunpack.i.h.bf16 %v10017_v29  ;;  %v10018_v33 = vunpack.i.l.bf16 %v10017_v29  ;;  %v10012_v41 = vpop.permute.xlu1 %10011  ;;  %8979 = vmatprep.mubr.msk.bf16.mxu0 %vm5742_vm5, %v5536_v22 }
 0xb17   : > { %v10014_v58 = vunpack.i.h.bf16 %v10012_v41  ;;  %v10013_v9 = vunpack.i.l.bf16 %v10012_v41  ;;  %8964 = vmatmul.mubr.msk.bf16.gmra.mrb[12].mxu1 %vm5742_vm5, %v5533_v28 }
 0xb18   : > { %v5718_v56 = vpack.c.bf16 %v10019_v23, %v10018_v33  ;;  %8988 = vmatpush3.bf16.msra.mxu1 %v12873_v31 }
 0xb19   : > { %v5537_v36 = vpack.c.bf16 %v10014_v58, %v10013_v9  ;;  %8989 = vmatprep.subr.bf16.mxu1 %v12874_v54  ;;  %v10027_v37 = vpop.permute.xlu0 %10026 }
 0xb1a   : > { %v10022_v24 = vpop.permute.xlu1 %10021  ;;  %8999 = vmatprep.subr.bf16.mxu0 %v5718_v56  ;;  %v10029_v53 = vunpack.i.h.bf16 %v10027_v37  ;;  %v10028_v55 = vunpack.i.l.bf16 %v10027_v37 }
 0xb1b   : > { %v10024_v63 = vunpack.i.h.bf16 %v10022_v24  ;;  %v10023_v19 = vunpack.i.l.bf16 %v10022_v24  ;;  %8980 = vmatmul.mubr.msk.bf16.gmra.mrb[28].mxu0 %vm5742_vm5, %v5537_v36 }
 0xb1c   : > { %8990 = vmatpush3.bf16.msra.mxu1 %v12874_v54  ;;  %9000 = vmatpush3.bf16.msra.mxu0 %v5718_v56  ;;  %v5720_v17 = vpack.c.bf16 %v10029_v53, %v10028_v55 }
 0xb1d   : > { %v5719_v47 = vpack.c.bf16 %v10024_v63, %v10023_v19 }
 0xb1e   : > { %v10032_v52 = vpop.permute.xlu1 %10031 }
 0xb1f   : > { %v10034_v2 = vunpack.i.h.bf16 %v10032_v52  ;;  %v10033_v3 = vunpack.i.l.bf16 %v10032_v52  ;;  %9001 = vmatprep.subr.bf16.mxu0 %v5719_v47 }
 0xb20   : > { %9002 = vmatpush3.bf16.msra.mxu0 %v5719_v47 }
 0xb21   : > { %9003 = vmatprep.subr.bf16.mxu0 %v5720_v17  ;;  %v5721_v39 = vpack.c.bf16 %v10034_v2, %v10033_v3 }
 0xb22   : > { %v10037_v38 = vpop.permute.xlu1 %10036 }
 0xb23   : > { %v10039_v44 = vunpack.i.h.bf16 %v10037_v38  ;;  %v10038_v0 = vunpack.i.l.bf16 %v10037_v38 }
 0xb24   : > { %9004 = vmatpush3.bf16.msra.mxu0 %v5720_v17 }
 0xb25   : > { %9005 = vmatprep.subr.bf16.mxu0 %v5721_v39  ;;  %v11922_v5 = vpack.c.bf16 %v10039_v44, %v10038_v0 }
 0xb26   : > { %v10042_v6 = vpop.permute.xlu1 %10041 }
 0xb27   : > { %v10044_v11 = vunpack.i.h.bf16 %v10042_v6  ;;  %v10043_v40 = vunpack.i.l.bf16 %v10042_v6  ;;  %9015 = vmatprep.subr.bf16.mxu1 %v11922_v5 }
 0xb28   : > { %9006 = vmatpush3.bf16.msra.mxu0 %v5721_v39 }
 0xb29   : > { %v11925_v57 = vpack.c.bf16 %v10044_v11, %v10043_v40 }
 0xb2b   : > { %9031 = vmatprep.subr.bf16.mxu0 %v11925_v57 }
 0xb82   : > { %v11928_v59 = vpop.f32.mrb[0].mxu1 }
 0xb83   : > { %v11930_v45 = vpop.f32.mrb[1].mxu1  ;;  %v6141_v60 = vsel %vm4701_vm3, %v11928_v59, -inf }
 0xb84   : > { %v11934_v16 = vpop.f32.mrb[2].mxu1  ;;  %6142 = vmax.xlane.f32.xlu0 %v6141_v60  ;;  %v6135_v27 = vsel %vm4701_vm3, %v11930_v45, -inf }
 0xb85   : > { %v11936_v14 = vpop.f32.mrb[3].mxu1  ;;  %v6144_v62 = vsel %vm4701_vm3, %v11934_v16, -inf }
 0xb86   : > { %v6138_v4 = vsel %vm4701_vm3, %v11936_v14, -inf }
 0xb87   : > { %6139 = vmax.xlane.f32.xlu1 %v6138_v4 }
 0xb88   : > { %6136 = vmax.xlane.f32.xlu0 %v6135_v27 }
 0xb8a   : > { %v11942_v48 = vpop.f32.mrb[4].mxu1 }
 0xb8b   : > { %v11944_v18 = vpop.f32.mrb[5].mxu1  ;;  %v6153_v61 = vsel %vm4701_vm3, %v11942_v48, -inf }
 0xb8c   : > { %v11948_v42 = vpop.f32.mrb[6].mxu1  ;;  %6145 = vmax.xlane.f32.xlu0 %v6144_v62  ;;  %v6147_v32 = vsel %vm4701_vm3, %v11944_v18, -inf }
 0xb8d   : > { %v11950_v13 = vpop.f32.mrb[7].mxu1  ;;  %v6156_v43 = vsel %vm4701_vm3, %v11948_v42, -inf }
 0xb8e   : > { %6157 = vmax.xlane.f32.xlu1 %v6156_v43  ;;  %v6150_v15 = vsel %vm4701_vm3, %v11950_v13, -inf  ;;  %v12054_v43 = vpop.permute.xlu0 %10046 }
 0xb90   : > { %6154 = vmax.xlane.f32.xlu0 %v6153_v61 }
 0xb92   : > { %6151 = vmax.xlane.f32.xlu1 %v6150_v15 }
 0xb94   : > { %6148 = vmax.xlane.f32.xlu0 %v6147_v32 }
 0xbc1   : > { %v11960_v26 = vpop.f32.mrb[16].mxu0 }
 0xbc2   : > { %v11962_v7 = vpop.f32.mrb[17].mxu0  ;;  %v6165_v1 = vsel %vm4701_vm3, %v11960_v26, -inf }
 0xbc3   : > { %6166 = vmax.xlane.f32.xlu0 %v6165_v1  ;;  %v11966_v20 = vpop.f32.mrb[18].mxu0  ;;  %v6159_v33 = vsel %vm4701_vm3, %v11962_v7, -inf }
 0xbc4   : > { %v11968_v21 = vpop.f32.mrb[19].mxu0  ;;  %v6168_v25 = vsel %vm4701_vm3, %v11966_v20, -inf }
 0xbc5   : > { %6169 = vmax.xlane.f32.xlu1 %v6168_v25  ;;  %v6162_v9 = vsel %vm4701_vm3, %v11968_v21, -inf }
 0xbda   : > { %v11972_v34 = vpop.f32.mrb[20].mxu0 }
 0xbdb   : > { %v11974_v50 = vpop.f32.mrb[21].mxu0  ;;  %v6177_v19 = vsel %vm4701_vm3, %v11972_v34, -inf }
 0xbdc   : > { %v11976_v30 = vpop.f32.mrb[22].mxu0  ;;  %v6171_v38 = vsel %vm4701_vm3, %v11974_v50, -inf }
 0xbdd   : > { %v11978_v49 = vpop.f32.mrb[23].mxu0  ;;  %v6180_v17 = vsel %vm4701_vm3, %v11976_v30, -inf }
 0xbde   : > { %v6174_v44 = vsel %vm4701_vm3, %v11978_v49, -inf }
 0xbe2   : > { %v11980_v8 = vpop.f32.mrb[8].mxu1 }
 0xbe3   : > { %v11982_v10 = vpop.f32.mrb[9].mxu1  ;;  %v6189_v12 = vsel %vm4701_vm3, %v11980_v8, -inf }
 0xbe4   : > { %v11986_v22 = vpop.f32.mrb[10].mxu1  ;;  %6190 = vmax.xlane.f32.xlu0 %v6189_v12  ;;  %v6183_v54 = vsel %vm4701_vm3, %v11982_v10, -inf }
 0xbe5   : > { %v11988_v28 = vpop.f32.mrb[11].mxu1  ;;  %v6192_v31 = vsel %vm4701_vm3, %v11986_v22, -inf }
 0xbe6   : > { %6193 = vmax.xlane.f32.xlu1 %v6192_v31  ;;  %v11992_v29 = vpop.f32.mrb[24].mxu0  ;;  %v6186_v53 = vsel %vm4701_vm3, %v11988_v28, -inf }
 0xbe7   : > { %v11994_v23 = vpop.f32.mrb[25].mxu0  ;;  %v6213_v6 = vsel %vm4701_vm3, %v11992_v29, -inf }
 0xbe8   : > { %6160 = vmax.xlane.f32.xlu0 %v6159_v33  ;;  %v11998_v41 = vpop.f32.mrb[26].mxu0  ;;  %v6207_v40 = vsel %vm4701_vm3, %v11994_v23, -inf }
 0xbe9   : > { %v12000_v58 = vpop.f32.mrb[27].mxu0  ;;  %v6216_v11 = vsel %vm4701_vm3, %v11998_v41, -inf }
 0xbea   : > { %v12004_v56 = vpop.f32.mrb[12].mxu1  ;;  %6163 = vmax.xlane.f32.xlu1 %v6162_v9  ;;  %v6210_v60 = vsel %vm4701_vm3, %v12000_v58, -inf }
 0xbeb   : > { %v12006_v36 = vpop.f32.mrb[13].mxu1  ;;  %v6201_v2 = vsel %vm4701_vm3, %v12004_v56, -inf }
 0xbec   : > { %v12010_v37 = vpop.f32.mrb[14].mxu1  ;;  %6184 = vmax.xlane.f32.xlu0 %v6183_v54  ;;  %v6195_v0 = vsel %vm4701_vm3, %v12006_v36, -inf }
 0xbed   : > { %v12012_v24 = vpop.f32.mrb[15].mxu1  ;;  %v6204_v3 = vsel %vm4701_vm3, %v12010_v37, -inf }
 0xbee   : > { %6187 = vmax.xlane.f32.xlu1 %v6186_v53  ;;  %v12016_v55 = vpop.f32.mrb[28].mxu0  ;;  %v6198_v39 = vsel %vm4701_vm3, %v12012_v24, -inf }
 0xbef   : > { %v12018_v63 = vpop.f32.mrb[29].mxu0  ;;  %v6225_v4 = vsel %vm4701_vm3, %v12016_v55, -inf }
 0xbf0   : > { %6178 = vmax.xlane.f32.xlu0 %v6177_v19  ;;  %v12022_v47 = vpop.f32.mrb[30].mxu0  ;;  %v6219_v62 = vsel %vm4701_vm3, %v12018_v63, -inf }
 0xbf1   : > { %v12024_v52 = vpop.f32.mrb[31].mxu0  ;;  %v6228_v27 = vsel %vm4701_vm3, %v12022_v47, -inf }
 0xbf2   : > { %6181 = vmax.xlane.f32.xlu1 %v6180_v17  ;;  %v6222_v61 = vsel %vm4701_vm3, %v12024_v52, -inf }
 0xbf4   : > { %6202 = vmax.xlane.f32.xlu0 %v6201_v2 }
 0xbf6   : > { %6205 = vmax.xlane.f32.xlu1 %v6204_v3 }
 0xbf8   : > { %6172 = vmax.xlane.f32.xlu0 %v6171_v38 }
 0xbfa   : > { %6175 = vmax.xlane.f32.xlu1 %v6174_v44 }
 0xbfc   : > { %6196 = vmax.xlane.f32.xlu0 %v6195_v0 }
 0xbfe   : > { %6199 = vmax.xlane.f32.xlu1 %v6198_v39 }
 0xc00   : > { %6214 = vmax.xlane.f32.xlu0 %v6213_v6 }
 0xc02   : > { %6217 = vmax.xlane.f32.xlu1 %v6216_v11 }
 0xc04   : > { %6208 = vmax.xlane.f32.xlu0 %v6207_v40 }
 0xc06   : > { %6211 = vmax.xlane.f32.xlu1 %v6210_v60 }
 0xc08   : > { %6226 = vmax.xlane.f32.xlu0 %v6225_v4 }
 0xc0a   : > { %6229 = vmax.xlane.f32.xlu1 %v6228_v27 }
 0xc0c   : > { %6220 = vmax.xlane.f32.xlu0 %v6219_v62 }
 0xc0e   : > { %6223 = vmax.xlane.f32.xlu1 %v6222_v61 }
 0xc11   : > { %v6143_v15 = vpop.xlane.xlu0 %6142 }
 0xc12   : > { %v6233_v32 = vsub.f32 %v11928_v59, %v6143_v15 }
 0xc14   : > { %v6267_v1 = vmul.f32 1.442695, %v6233_v32  ;;  %v6140_v25 = vpop.xlane.xlu1 %6139 }
 0xc15   : > { %v6137_v12 = vpop.xlane.xlu0 %6136  ;;  %v6232_v33 = vsub.f32 %v11936_v14, %v6140_v25 }
 0xc16   : > { %10195 = vpow2.f32 %v6267_v1  ;;  %v6231_v31 = vsub.f32 %v11930_v45, %v6137_v12 }
 0xc17   : > { %v6265_v17 = vmul.f32 1.442695, %v6232_v33 }
 0xc18   : > { %v6263_v9 = vmul.f32 1.442695, %v6231_v31 }
 0xc19   : > { %v6146_v54 = vpop.xlane.xlu0 %6145 }
 0xc1a   : > { %10197 = vpow2.f32 %v6263_v9  ;;  %v6234_v53 = vsub.f32 %v11934_v16, %v6146_v54 }
 0xc1b   : > { %v6158_v19 = vpop.xlane.xlu1 %6157 }
 0xc1c   : > { %v6269_v2 = vmul.f32 1.442695, %v6234_v53  ;;  %v6238_v3 = vsub.f32 %v11948_v42, %v6158_v19 }
 0xc1d   : > { %v6155_v38 = vpop.xlane.xlu0 %6154 }
 0xc1e   : > { %10199 = vpow2.f32 %v6269_v2  ;;  %v6237_v59 = vsub.f32 %v11942_v48, %v6155_v38  ;;  %v6277_v45 = vmul.f32 1.442695, %v6238_v3 }
 0xc1f   : > { %v6152_v44 = vpop.xlane.xlu1 %6151  ;;  %10201 = vpow2.f32 %v6265_v17 }
 0xc20   : > { %v12064_v0 = vpop.eup %10195  ;;  %v6275_v14 = vmul.f32 1.442695, %v6237_v59  ;;  %v6236_v39 = vsub.f32 %v11950_v13, %v6152_v44 }
 0xc21   : > { %v6149_v6 = vpop.xlane.xlu0 %6148  ;;  %v6333_v16 = vsel %vm4701_vm3, %v12064_v0, 0.0 }
 0xc22   : > { %10203 = vpow2.f32 %v6275_v14  ;;  %v6235_v11 = vsub.f32 %v11944_v18, %v6149_v6  ;;  %6334 = vadd.xlane.f32.xlu0 %v6333_v16  ;;  %v6273_v48 = vmul.f32 1.442695, %v6236_v39 }
 0xc23   : > { %10205 = vpow2.f32 %v6277_v45 }
 0xc24   : > { %v12070_v42 = vpop.eup %10197  ;;  %v6271_v40 = vmul.f32 1.442695, %v6235_v11 }
 0xc25   : > { %v6327_v60 = vsel %vm4701_vm3, %v12070_v42, 0.0 }
 0xc26   : > { %10207 = vpow2.f32 %v6271_v40  ;;  %6328 = vadd.xlane.f32.xlu0 %v6327_v60 }
 0xc27   : > { %10209 = vpow2.f32 %v6273_v48 }
 0xc28   : > { %v12074_v4 = vpop.eup %10199 }
 0xc29   : > { %v6336_v13 = vsel %vm4701_vm3, %v12074_v4, 0.0  ;;  %v12078_v27 = vpop.eup %10201 }
 0xc2a   : > { %6337 = vadd.xlane.f32.xlu1 %v6336_v13  ;;  %v6330_v61 = vsel %vm4701_vm3, %v12078_v27, 0.0 }
 0xc2c   : > { %v12080_v18 = vpop.eup %10203 }
 0xc2d   : > { %v6345_v62 = vsel %vm4701_vm3, %v12080_v18, 0.0  ;;  %v12086_v15 = vpop.eup %10205 }
 0xc2e   : > { %6346 = vadd.xlane.f32.xlu0 %v6345_v62  ;;  %6331 = vadd.xlane.f32.xlu1 %v6330_v61  ;;  %v6348_v25 = vsel %vm4701_vm3, %v12086_v15, 0.0 }
 0xc30   : > { %v12088_v32 = vpop.eup %10207 }
 0xc31   : > { %v6339_v1 = vsel %vm4701_vm3, %v12088_v32, 0.0  ;;  %v12094_v12 = vpop.eup %10209 }
 0xc32   : > { %6340 = vadd.xlane.f32.xlu0 %v6339_v1  ;;  %6349 = vadd.xlane.f32.xlu1 %v6348_v25  ;;  %v6342_v31 = vsel %vm4701_vm3, %v12094_v12, 0.0 }
 0xc36   : > { %6343 = vadd.xlane.f32.xlu1 %v6342_v31 }
 0xc50   : > { %v6167_v33 = vpop.xlane.xlu0 %6166 }
 0xc51   : > { %v6241_v9 = vsub.f32 %v11960_v26, %v6167_v33 }
 0xc52   : > { %v6170_v17 = vpop.xlane.xlu1 %6169 }
 0xc53   : > { %v6283_v54 = vmul.f32 1.442695, %v6241_v9  ;;  %v6242_v26 = vsub.f32 %v11966_v20, %v6170_v17 }
 0xc55   : > { %10211 = vpow2.f32 %v6283_v54  ;;  %v6285_v48 = vmul.f32 1.442695, %v6242_v26 }
 0xc5f   : > { %v12099_v53 = vpop.eup %10211 }
 0xc60   : > { %v6357_v19 = vsel %vm4701_vm3, %v12099_v53, 0.0 }
 0xc61   : > { %6358 = vadd.xlane.f32.xlu0 %v6357_v19 }
 0xc71   : > { %v6191_v2 = vpop.xlane.xlu0 %6190 }
 0xc72   : > { %v6249_v3 = vsub.f32 %v11980_v8, %v6191_v2 }
 0xc73   : > { %v6194_v38 = vpop.xlane.xlu1 %6193 }
 0xc74   : > { %v6299_v59 = vmul.f32 1.442695, %v6249_v3  ;;  %v6250_v40 = vsub.f32 %v11986_v22, %v6194_v38 }
 0xc75   : > { %v6161_v44 = vpop.xlane.xlu0 %6160 }
 0xc76   : > { %10213 = vpow2.f32 %v6299_v59  ;;  %v6239_v45 = vsub.f32 %v11962_v7, %v6161_v44  ;;  %v6301_v7 = vmul.f32 1.442695, %v6250_v40 }
 0xc77   : > { %v6164_v14 = vpop.xlane.xlu1 %6163 }
 0xc78   : > { %v6279_v39 = vmul.f32 1.442695, %v6239_v45  ;;  %v6240_v20 = vsub.f32 %v11968_v21, %v6164_v14 }
 0xc79   : > { %v6185_v6 = vpop.xlane.xlu0 %6184 }
 0xc7a   : > { %10215 = vpow2.f32 %v6279_v39  ;;  %v6247_v16 = vsub.f32 %v11982_v10, %v6185_v6 }
 0xc7b   : > { %v6188_v11 = vpop.xlane.xlu1 %6187 }
 0xc7c   : > { %v6295_v60 = vmul.f32 1.442695, %v6247_v16  ;;  %v6248_v33 = vsub.f32 %v11988_v28, %v6188_v11 }
 0xc7d   : > { %v6179_v8 = vpop.xlane.xlu0 %6178 }
 0xc7e   : > { %10217 = vpow2.f32 %v6295_v60  ;;  %v6245_v13 = vsub.f32 %v11972_v34, %v6179_v8  ;;  %v6281_v34 = vmul.f32 1.442695, %v6240_v20  ;;  %v6297_v2 = vmul.f32 1.442695, %v6248_v33 }
 0xc7f   : > { %v6182_v62 = vpop.xlane.xlu1 %6181  ;;  %10219 = vpow2.f32 %v6285_v48 }
 0xc80   : > { %v12109_v61 = vpop.eup %10213  ;;  %v6291_v1 = vmul.f32 1.442695, %v6245_v13  ;;  %v6246_v45 = vsub.f32 %v11976_v30, %v6182_v62 }
 0xc81   : > { %v12112_v25 = vpop.xlane.xlu0 %6202  ;;  %v6381_v10 = vsel %vm4701_vm3, %v12109_v61, 0.0 }
 0xc82   : > { %10221 = vpow2.f32 %v6291_v1  ;;  %6382 = vadd.xlane.f32.xlu0 %v6381_v10  ;;  %v6293_v30 = vmul.f32 1.442695, %v6246_v45 }
 0xc83   : > { %v12116_v22 = vpop.xlane.xlu1 %6205  ;;  %10223 = vpow2.f32 %v6301_v7 }
 0xc84   : > { %v12118_v31 = vpop.eup %10215  ;;  %10225 = vpow2.f32 %v6281_v34 }
 0xc85   : > { %v6173_v9 = vpop.xlane.xlu0 %6172  ;;  %v6351_v21 = vsel %vm4701_vm3, %v12118_v31, 0.0 }
 0xc86   : > { %v6243_v54 = vsub.f32 %v11974_v50, %v6173_v9  ;;  %6352 = vadd.xlane.f32.xlu0 %v6351_v21 }
 0xc87   : > { %v6176_v19 = vpop.xlane.xlu1 %6175 }
 0xc88   : > { %v12124_v17 = vpop.eup %10217  ;;  %v6287_v3 = vmul.f32 1.442695, %v6243_v54  ;;  %v6244_v8 = vsub.f32 %v11978_v49, %v6176_v19  ;;  %v6253_v19 = vsub.f32 %v12004_v56, %v12112_v25  ;;  %v6254_v56 = vsub.f32 %v12010_v37, %v12116_v22 }
 0xc89   : > { %v6197_v38 = vpop.xlane.xlu0 %6196  ;;  %v6375_v59 = vsel %vm4701_vm3, %v12124_v17, 0.0  ;;  %v12128_v44 = vpop.eup %10219 }
 0xc8a   : > { %10227 = vpow2.f32 %v6287_v3  ;;  %v6251_v28 = vsub.f32 %v12006_v36, %v6197_v38  ;;  %6376 = vadd.xlane.f32.xlu1 %v6375_v59  ;;  %v6360_v11 = vsel %vm4701_vm3, %v12128_v44, 0.0  ;;  %v6289_v10 = vmul.f32 1.442695, %v6244_v8 }
 0xc8b   : > { %v6200_v50 = vpop.xlane.xlu1 %6199  ;;  %10229 = vpow2.f32 %v6297_v2  ;;  %v6307_v45 = vmul.f32 1.442695, %v6253_v19 }
 0xc8c   : > { %v12132_v14 = vpop.eup %10221  ;;  %v6303_v26 = vmul.f32 1.442695, %v6251_v28  ;;  %v6252_v39 = vsub.f32 %v12012_v24, %v6200_v50 }
 0xc8d   : > { %v6215_v6 = vpop.xlane.xlu0 %6214  ;;  %v6369_v16 = vsel %vm4701_vm3, %v12132_v14, 0.0  ;;  %v12139_v48 = vpop.eup %10223 }
 0xc8e   : > { %v6305_v36 = vmul.f32 1.442695, %v6252_v39  ;;  %v6257_v40 = vsub.f32 %v11992_v29, %v6215_v6  ;;  %6370 = vadd.xlane.f32.xlu0 %v6369_v16  ;;  %6361 = vadd.xlane.f32.xlu1 %v6360_v11  ;;  %10231 = vpow2.f32 %v6303_v26  ;;  %v6384_v62 = vsel %vm4701_vm3, %v12139_v48, 0.0  ;;  %v12145_v7 = vpop.eup %10225 }
 0xc8f   : > { %v6218_v60 = vpop.xlane.xlu1 %6217  ;;  %v6354_v21 = vsel %vm4701_vm3, %v12145_v7, 0.0  ;;  %v6309_v6 = vmul.f32 1.442695, %v6254_v56 }
 0xc90   : > { %10233 = vpow2.f32 %v6305_v36  ;;  %v6315_v24 = vmul.f32 1.442695, %v6257_v40  ;;  %v6258_v34 = vsub.f32 %v11998_v41, %v6218_v60 }
 0xc91   : > { %v6209_v13 = vpop.xlane.xlu0 %6208 }
 0xc92   : > { %10235 = vpow2.f32 %v6315_v24  ;;  %v6255_v20 = vsub.f32 %v11994_v23, %v6209_v13  ;;  %6385 = vadd.xlane.f32.xlu1 %v6384_v62  ;;  %v6317_v41 = vmul.f32 1.442695, %v6258_v34 }
 0xc93   : > { %10237 = vpow2.f32 %v6293_v30  ;;  %v6212_v29 = vpop.xlane.xlu1 %6211 }
 0xc94   : > { %v12148_v1 = vpop.eup %10227  ;;  %v6311_v49 = vmul.f32 1.442695, %v6255_v20  ;;  %v6256_v33 = vsub.f32 %v12000_v58, %v6212_v29 }
 0xc95   : > { %v6363_v9 = vsel %vm4701_vm3, %v12148_v1, 0.0  ;;  %v12156_v54 = vpop.eup %10229  ;;  %v6227_v38 = vpop.xlane.xlu0 %6226 }
 0xc96   : > { %10239 = vpow2.f32 %v6311_v49  ;;  %v6313_v23 = vmul.f32 1.442695, %v6256_v33  ;;  %6364 = vadd.xlane.f32.xlu0 %v6363_v9  ;;  %6355 = vadd.xlane.f32.xlu1 %v6354_v21  ;;  %v6378_v58 = vsel %vm4701_vm3, %v12156_v54, 0.0  ;;  %v6261_v16 = vsub.f32 %v12016_v55, %v6227_v38 }
 0xc97   : > { %10241 = vpow2.f32 %v6289_v10 }
 0xc98   : > { %v12160_v2 = vpop.eup %10231  ;;  %10243 = vpow2.f32 %v6313_v23  ;;  %v6323_v30 = vmul.f32 1.442695, %v6261_v16 }
 0xc99   : > { %10245 = vpow2.f32 %v6317_v41  ;;  %v6387_v50 = vsel %vm4701_vm3, %v12160_v2, 0.0  ;;  %v6221_v11 = vpop.xlane.xlu0 %6220 }
 0xc9a   : > { %v12164_v3 = vpop.eup %10233  ;;  %6379 = vadd.xlane.f32.xlu1 %v6378_v58  ;;  %10247 = vpow2.f32 %v6307_v45  ;;  %v6259_v60 = vsub.f32 %v12018_v63, %v6221_v11  ;;  %v6230_v63 = vpop.xlane.xlu1 %6229 }
 0xc9b   : > { %v6390_v59 = vsel %vm4701_vm3, %v12164_v3, 0.0  ;;  %10249 = vpow2.f32 %v6309_v6 }
 0xc9c   : > { %v12168_v28 = vpop.eup %10235  ;;  %6391 = vadd.xlane.f32.xlu0 %v6390_v59  ;;  %10251 = vpow2.f32 %v6323_v30  ;;  %v6319_v13 = vmul.f32 1.442695, %v6259_v60 }
 0xc9d   : > { %v12172_v25 = vpop.eup %10237  ;;  %v6405_v26 = vsel %vm4701_vm3, %v12168_v28, 0.0 }
 0xc9e   : > { %6388 = vadd.xlane.f32.xlu1 %v6387_v50  ;;  %v6372_v37 = vsel %vm4701_vm3, %v12172_v25, 0.0  ;;  %10253 = vpow2.f32 %v6319_v13  ;;  %v6224_v9 = vpop.xlane.xlu1 %6223 }
 0xca0   : > { %v12178_v39 = vpop.eup %10239  ;;  %6406 = vadd.xlane.f32.xlu0 %v6405_v26 }
 0xca1   : > { %v12183_v22 = vpop.eup %10241  ;;  %v6399_v36 = vsel %vm4701_vm3, %v12178_v39, 0.0 }
 0xca2   : > { %6373 = vadd.xlane.f32.xlu1 %v6372_v37  ;;  %v12187_v40 = vpop.eup %10243  ;;  %v6366_v55 = vsel %vm4701_vm3, %v12183_v22, 0.0  ;;  %v6262_v37 = vsub.f32 %v12022_v47, %v6230_v63 }
 0xca3   : > { %v12192_v8 = vpop.eup %10245  ;;  %v6402_v24 = vsel %vm4701_vm3, %v12187_v40, 0.0 }
 0xca4   : > { %6400 = vadd.xlane.f32.xlu0 %v6399_v36  ;;  %v6408_v62 = vsel %vm4701_vm3, %v12192_v8, 0.0  ;;  %v12198_v20 = vpop.eup %10247 }
 0xca5   : > { %v6393_v29 = vsel %vm4701_vm3, %v12198_v20, 0.0  ;;  %v12202_v10 = vpop.eup %10249 }
 0xca6   : > { %6367 = vadd.xlane.f32.xlu1 %v6366_v55  ;;  %v6396_v49 = vsel %vm4701_vm3, %v12202_v10, 0.0  ;;  %v12206_v33 = vpop.eup %10251  ;;  %v10048_v55 = vunpack.i.l.bf16 %v12054_v43 }
 0xca7   : > { %v6417_v21 = vsel %vm4701_vm3, %v12206_v33, 0.0 }
 0xca8   : > { %6403 = vadd.xlane.f32.xlu0 %v6402_v24  ;;  %v12210_v23 = vpop.eup %10253 }
 0xca9   : > { %v6411_v58 = vsel %vm4701_vm3, %v12210_v23, 0.0 }
 0xcaa   : > { %6409 = vadd.xlane.f32.xlu1 %v6408_v62 }
 0xcae   : > { %6394 = vadd.xlane.f32.xlu1 %v6393_v29  ;;  %v6325_v29 = vmul.f32 1.442695, %v6262_v37 }
 0xcaf   : > { %v6335_v34 = vpop.xlane.xlu0 %6334 }
 0xcb2   : > { %6397 = vadd.xlane.f32.xlu1 %v6396_v49 }
 0xcb3   : > { %v6329_v19 = vpop.xlane.xlu0 %6328 }
 0xcb6   : > { %6418 = vadd.xlane.f32.xlu1 %v6417_v21 }
 0xcb7   : > { %v6338_v41 = vpop.xlane.xlu1 %6337 }
 0xcb8   : > { %10255 = vrcp.f32 %v6338_v41 }
 0xcb9   : > { %10257 = vrcp.f32 %v6329_v19 }
 0xcba   : > { %6412 = vadd.xlane.f32.xlu1 %v6411_v58  ;;  %10259 = vrcp.f32 %v6335_v34 }
 0xcbb   : > { %v6347_v38 = vpop.xlane.xlu0 %6346  ;;  %v6332_v59 = vpop.xlane.xlu1 %6331 }
 0xcbc   : > { %10261 = vrcp.f32 %v6332_v59 }
 0xcbe   : > { %10051 = vrot.lane.b32.xlu0 %v11410_v35, %s10480_s3  ;;  %v10049_v35 = vunpack.i.h.bf16 %v12054_v43 }
 0xcbf   : > { %v6341_v45 = vpop.xlane.xlu0 %6340  ;;  %v6350_v56 = vpop.xlane.xlu1 %6349 }
 0xcc0   : > { %10263 = vrcp.f32 %v6341_v45 }
 0xcc1   : > { %10265 = vrcp.f32 %v6350_v56 }
 0xcc2   : > { %10267 = vrcp.f32 %v6347_v38  ;;  %v10256_v26 = vpop.eup %10255 }
 0xcc3   : > { %v6344_v50 = vpop.xlane.xlu1 %6343  ;;  %v10258_v6 = vpop.eup %10257  ;;  %v6458_v36 = vmul.f32 %v10256_v26, %v12074_v4 }
 0xcc4   : > { %10269 = vrcp.f32 %v6344_v50  ;;  %v10260_v16 = vpop.eup %10259  ;;  %v6455_v30 = vmul.f32 %v10258_v6, %v12070_v42  ;;  %v5723_v42 = vpack.c.bf16 %v10049_v35, %v10048_v55 }
 0xcc5   : > { %v6457_v24 = vmul.f32 %v10260_v16, %v12064_v0  ;;  %10271 = vpow2.f32 %v6325_v29 }
 0xcc6   : > { %v10262_v11 = vpop.eup %10261 }
 0xcc7   : > { %v6456_v60 = vmul.f32 %v10262_v11, %v12078_v27  ;;  %v6488_v34 = vpack.c.bf16 %v6458_v36, %v6457_v24 }
 0xcc9   : > { %v6487_v13 = vpack.c.bf16 %v6456_v60, %v6455_v30 }
 0xcca   : > { %v10264_v62 = vpop.eup %10263 }
 0xccb   : > { %10056 = vrot.lane.b32.xlu1 %v11424_v46, %s10479_s7  ;;  %v10266_v47 = vpop.eup %10265  ;;  %8991 = vmatprep.mubr.msk.bf16.mxu1 %vm4701_vm3, %v6487_v13  ;;  %v6459_v43 = vmul.f32 %v10264_v62, %v12088_v32 }
 0xccc   : > { %v10268_v4 = vpop.eup %10267  ;;  %8992 = vmatmul.mubr.msk.bf16.vlgmr.msra.gmra.mrb[16].mxu1 %vm4701_vm3, %v6488_v34  ;;  %v6462_v63 = vmul.f32 %v10266_v47, %v12086_v15  ;;  %v6260_v15 = vsub.f32 %v12024_v52, %v6224_v9 }
 0xccd   : > { %9016 = vmatpush3.bf16.msra.mxu1 %v11922_v5  ;;  %v6461_v21 = vmul.f32 %v10268_v4, %v12080_v18 }
 0xcce   : > { %v10270_v27 = vpop.eup %10269  ;;  %9017 = vmatprep.subr.bf16.mxu1 %v5723_v42  ;;  %v6321_v32 = vmul.f32 1.442695, %v6260_v15 }
 0xccf   : > { %10061 = vrot.lane.b32.xlu1 %v11424_v46, %s10480_s3  ;;  %v6460_v0 = vmul.f32 %v10270_v27, %v12094_v12  ;;  %v6490_v5 = vpack.c.bf16 %v6462_v63, %v6461_v21  ;;  %v12238_v19 = vpop.eup %10271 }
 0xcd0   : > { %v6420_v46 = vsel %vm4701_vm3, %v12238_v19, 0.0  ;;  %10273 = vpow2.f32 %v6321_v32 }
 0xcd1   : > { %v6489_v49 = vpack.c.bf16 %v6460_v0, %v6459_v43  ;;  %9018 = vmatpush3.bf16.msra.mxu1 %v5723_v42 }
 0xcd3   : > { %10066 = vrot.lane.b32.xlu1 %v11436_v51, %s10479_s7  ;;  %8995 = vmatprep.mubr.msk.bf16.mxu1 %vm4701_vm3, %v6489_v49  ;;  %s10483_s7 = smov 48  }
 0xcd4   : > { %8996 = vmatmul.mubr.msk.bf16.gmra.mrb[20].mxu1 %vm4701_vm3, %v6490_v5 }
 0xcda   : > { %v12243_v18 = vpop.eup %10273 }
 0xcdb   : > { %v6414_v12 = vsel %vm4701_vm3, %v12243_v18, 0.0 }
 0xcdd   : > { %6421 = vadd.xlane.f32.xlu0 %v6420_v46 }
 0xcee   : > { %v6359_v41 = vpop.xlane.xlu0 %6358 }
 0xcf7   : > { %6415 = vadd.xlane.f32.xlu1 %v6414_v12 }
 0xd08   : > { %10071 = vrot.lane.b32.xlu1 %v11436_v51, %s10480_s3  ;;  %s10481_s3 = smov 16  }
 0xd0f   : > { %v12249_v58 = vpop.xlane.xlu0 %6382 }
 0xd13   : > { %v6353_v45 = vpop.xlane.xlu0 %6352 }
 0xd17   : > { %v6377_v38 = vpop.xlane.xlu1 %6376 }
 0xd1b   : > { %v6362_v59 = vpop.xlane.xlu1 %6361  ;;  %v6371_v52 = vpop.xlane.xlu0 %6370 }
 0xd1c   : > { %10275 = vrcp.f32 %v6362_v59 }
 0xd1d   : > { %10277 = vrcp.f32 %v6353_v45 }
 0xd1e   : > { %10279 = vrcp.f32 %v6359_v41 }
 0xd1f   : > { %v12251_v56 = vpop.xlane.xlu1 %6385 }
 0xd23   : > { %v6356_v9 = vpop.xlane.xlu1 %6355  ;;  %v6365_v50 = vpop.xlane.xlu0 %6364 }
 0xd24   : > { %10281 = vrcp.f32 %v6356_v9 }
 0xd25   : > { %10283 = vrcp.f32 %v6377_v38 }
 0xd26   : > { %v10276_v16 = vpop.eup %10275 }
 0xd27   : > { %v6380_v26 = vpop.xlane.xlu1 %6379  ;;  %v10278_v11 = vpop.eup %10277  ;;  %v6466_v60 = vmul.f32 %v10276_v16, %v12128_v44 }
 0xd28   : > { %10285 = vrcp.f32 %v6380_v26  ;;  %v10280_v36 = vpop.eup %10279  ;;  %v6463_v24 = vmul.f32 %v10278_v11, %v12118_v31 }
 0xd29   : > { %v12253_v6 = vpop.xlane.xlu0 %6391  ;;  %10287 = vrcp.f32 %v6371_v52  ;;  %v6465_v62 = vmul.f32 %v10280_v36, %v12099_v53 }
 0xd2b   : > { %v12255_v51 = vpop.xlane.xlu1 %6388  ;;  %v6492_v4 = vpack.c.bf16 %v6466_v60, %v6465_v62 }
 0xd2d   : > { %v6407_v37 = vpop.xlane.xlu0 %6406 }
 0xd2e   : > { %v10282_v30 = vpop.eup %10281 }
 0xd2f   : > { %v6374_v35 = vpop.xlane.xlu1 %6373  ;;  %v10284_v55 = vpop.eup %10283  ;;  %v6464_v13 = vmul.f32 %v10282_v30, %v12145_v7 }
 0xd30   : > { %10289 = vrcp.f32 %v6374_v35  ;;  %v6471_v27 = vmul.f32 %v10284_v55, %v12124_v17 }
 0xd31   : > { %v6401_v29 = vpop.xlane.xlu0 %6400  ;;  %10291 = vrcp.f32 %v6365_v50  ;;  %v6491_v47 = vpack.c.bf16 %v6464_v13, %v6463_v24 }
 0xd32   : > { %v10286_v34 = vpop.eup %10285  ;;  %10293 = vrcp.f32 %v6401_v29 }
 0xd33   : > { %v6368_v42 = vpop.xlane.xlu1 %6367  ;;  %v6472_v44 = vmul.f32 %v10286_v34, %v12156_v54  ;;  %9007 = vmatprep.mubr.msk.bf16.mxu0 %vm4701_vm3, %v6491_v47  ;;  %v10288_v0 = vpop.eup %10287 }
 0xd34   : > { %10295 = vrcp.f32 %v6368_v42  ;;  %9008 = vmatmul.mubr.msk.bf16.vlgmr.msra.gmra.mrb[32].mxu0 %vm4701_vm3, %v6492_v4  ;;  %v6469_v45 = vmul.f32 %v10288_v0, %v12132_v14 }
 0xd35   : > { %10297 = vrcp.f32 %v6407_v37  ;;  %v6404_v31 = vpop.xlane.xlu0 %6403  ;;  %v6495_v53 = vpack.c.bf16 %v6472_v44, %v6471_v27  ;;  %9032 = vmatpush3.bf16.msra.mxu0 %v11925_v57 }
 0xd36   : > { %10299 = vrcp.f32 %v6404_v31 }
 0xd37   : > { %9023 = vmatprep.mubr.msk.bf16.mxu1 %vm4701_vm3, %v6495_v53  ;;  %v6410_v7 = vpop.xlane.xlu1 %6409 }
 0xd38   : > { %10301 = vrcp.f32 %v6410_v7 }
 0xd39   : > { %v10052_v43 = vpop.permute.xlu0 %10051  ;;  %10303 = vrcp.f32 %v12251_v56 }
 0xd3a   : > { %v10054_v17 = vunpack.i.h.bf16 %v10052_v43  ;;  %v10053_v63 = vunpack.i.l.bf16 %v10052_v43  ;;  %v10290_v54 = vpop.eup %10289  ;;  %10305 = vrcp.f32 %v12255_v51 }
 0xd3b   : > { %v6395_v49 = vpop.xlane.xlu1 %6394  ;;  %v10292_v21 = vpop.eup %10291  ;;  %v6470_v32 = vmul.f32 %v10290_v54, %v12172_v25  ;;  %10307 = vrcp.f32 %v12249_v58 }
 0xd3c   : > { %v5727_v5 = vpack.c.bf16 %v10054_v17, %v10053_v63  ;;  %v10294_v46 = vpop.eup %10293  ;;  %v6467_v41 = vmul.f32 %v10292_v21, %v12148_v1  ;;  %10309 = vrcp.f32 %v12253_v6 }
 0xd3d   : > { %v6479_v9 = vmul.f32 %v10294_v46, %v12178_v39  ;;  %v6494_v16 = vpack.c.bf16 %v6470_v32, %v6469_v45 }
 0xd3e   : > { %v10296_v15 = vpop.eup %10295  ;;  %9033 = vmatprep.subr.bf16.mxu0 %v5727_v5 }
 0xd3f   : > { %v10298_v12 = vpop.eup %10297  ;;  %9034 = vmatpush3.bf16.msra.mxu0 %v5727_v5  ;;  %v6398_v57 = vpop.xlane.xlu1 %6397  ;;  %v6468_v38 = vmul.f32 %v10296_v15, %v12183_v22 }
 0xd40   : > { %v10300_v59 = vpop.eup %10299  ;;  %v12274_v11 = vmul.f32 %v10298_v12, %v12168_v28  ;;  %10311 = vrcp.f32 %v6398_v57  ;;  %v12875_v12 = vmov 0  }
 0xd41   : > { %v6493_v52 = vpack.c.bf16 %v6468_v38, %v6467_v41  ;;  %v6480_v50 = vmul.f32 %v10300_v59, %v12187_v40  ;;  %10313 = vrcp.f32 %v6395_v49 }
 0xd42   : > { %v10302_v26 = vpop.eup %10301 }
 0xd43   : > { %v12277_v25 = vmul.f32 %v10302_v26, %v12192_v8  ;;  %9011 = vmatprep.mubr.msk.bf16.mxu0 %vm4701_vm3, %v6493_v52  ;;  %v6419_v1 = vpop.xlane.xlu1 %6418  ;;  %v6499_v22 = vpack.c.bf16 %v6480_v50, %v6479_v9  ;;  %v10304_v55 = vpop.eup %10303 }
 0xd44   : > { %9012 = vmatmul.mubr.msk.bf16.gmra.mrb[36].mxu0 %vm4701_vm3, %v6494_v16  ;;  %v10306_v24 = vpop.eup %10305  ;;  %v6474_v62 = vmul.f32 %v10304_v55, %v12139_v48 }
 0xd45   : > { %v6500_v14 = vpack.c.bf16 %v12277_v25, %v12274_v11  ;;  %9039 = vmatprep.mubr.msk.bf16.mxu0 %vm4701_vm3, %v6499_v22  ;;  %v10308_v58 = vpop.eup %10307  ;;  %v6475_v34 = vmul.f32 %v10306_v24, %v12160_v2 }
 0xd46   : > { %v10310_v6 = vpop.eup %10309  ;;  %v6473_v47 = vmul.f32 %v10308_v58, %v12109_v61 }
 0xd47   : > { %v6413_v39 = vpop.xlane.xlu1 %6412  ;;  %v6476_v4 = vmul.f32 %v10310_v6, %v12164_v3  ;;  %v10149_v6 = vld [vmem:[%s10711_s30 + $0x10] sm:$0xff]  }
 0xd48   : > { %v6496_v42 = vpack.c.bf16 %v6474_v62, %v6473_v47  ;;  %10315 = vrcp.f32 %v6413_v39  ;;  %v10150_v62 = vld [vmem:[%s10711_s30 + $0x18] sm:$0xff]  }
 0xd49   : > { %v6497_v44 = vpack.c.bf16 %v6476_v4, %v6475_v34 }
 0xd4a   : > { %v10312_v27 = vpop.eup %10311 }
 0xd4b   : > { %v10057_v28 = vpop.permute.xlu1 %10056  ;;  %v10314_v31 = vpop.eup %10313  ;;  %v6478_v53 = vmul.f32 %v10312_v27, %v12202_v10 }
 0xd4c   : > { %v10059_v40 = vunpack.i.h.bf16 %v10057_v28  ;;  %v10058_v8 = vunpack.i.l.bf16 %v10057_v28  ;;  %v6477_v48 = vmul.f32 %v10314_v31, %v12198_v20 }
 0xd4e   : > { %v5724_v37 = vpack.c.bf16 %v10059_v40, %v10058_v8  ;;  %v6498_v7 = vpack.c.bf16 %v6478_v53, %v6477_v48 }
 0xd4f   : > { %v10062_v36 = vpop.permute.xlu1 %10061 }
 0xd50   : > { %v10064_v30 = vunpack.i.h.bf16 %v10062_v36  ;;  %v10063_v60 = vunpack.i.l.bf16 %v10062_v36  ;;  %9019 = vmatprep.subr.bf16.mxu1 %v5724_v37  ;;  %v10148_v36 = vld [vmem:[%s10711_s30 + $0x8] sm:$0xff]  }
 0xd51   : > { %9020 = vmatpush3.bf16.msra.mxu1 %v5724_v37  ;;  %v10147_v37 = vld [vmem:[%s10711_s30] sm:$0xff]   ;;  %s12876_s30 = scalar_lea.vmem %s10602_s24, %s10697_s0 }
 0xd52   : > { %v5728_v35 = vpack.c.bf16 %v10064_v30, %v10063_v60  ;;  %v10316_v63 = vpop.eup %10315 }
 0xd53   : > { %v10067_v56 = vpop.permute.xlu1 %10066  ;;  %v6483_v20 = vmul.f32 %v10316_v63, %v12210_v23 }
 0xd54   : > { %v10069_v51 = vunpack.i.h.bf16 %v10067_v56  ;;  %v10068_v13 = vunpack.i.l.bf16 %v10067_v56  ;;  %9035 = vmatprep.subr.bf16.mxu0 %v5728_v35 }
 0xd55   : > { %9036 = vmatpush3.bf16.msra.mxu0 %v5728_v35 }
 0xd56   : > { %v5725_v29 = vpack.c.bf16 %v10069_v51, %v10068_v13 }
 0xd58   : > { %9021 = vmatprep.subr.bf16.mxu1 %v5725_v29 }
 0xd59   : > { %9022 = vmatpush3.bf16.msra.mxu1 %v5725_v29 }
 0xd5a   : > { %9047 = vmatprep.subr.bf16.mxu1 %v10147_v37 }
 0xd5c   : > { %9024 = vmatmul.mubr.msk.bf16.vlgmr.msra.gmra.mrb[24].mxu1 %vm4701_vm3, %v6496_v42 }
 0xd5d   : > { %9027 = vmatprep.mubr.msk.bf16.mxu1 %vm4701_vm3, %v6497_v44  ;;  %9048 = vmatpush3.bf16.msra.mxu1 %v10147_v37 }
 0xd5e   : > { %9049 = vmatprep.subr.bf16.mxu1 %v10148_v36 }
 0xd61   : > { %9050 = vmatpush3.bf16.msra.mxu1 %v10148_v36 }
 0xd62   : > { %9051 = vmatprep.subr.bf16.mxu1 %v10149_v6 }
 0xd64   : > { %9028 = vmatmul.mubr.msk.bf16.gmra.mrb[28].mxu1 %vm4701_vm3, %v6498_v7 }
 0xd65   : > { %9052 = vmatpush3.bf16.msra.mxu1 %v10149_v6 }
 0xd66   : > { %9053 = vmatprep.subr.bf16.mxu1 %v10150_v62 }
 0xd69   : > { %9054 = vmatpush3.bf16.msra.mxu1 %v10150_v62 }
 0xd6a   : > { %v6422_v61 = vpop.xlane.xlu0 %6421 }
 0xd84   : > { %v6416_v2 = vpop.xlane.xlu1 %6415 }
 0xd85   : > { %10317 = vrcp.f32 %v6416_v2 }
 0xd86   : > { %10319 = vrcp.f32 %v6422_v61 }
 0xd87   : > { %10321 = vrcp.f32 %v6419_v1 }
 0xd88   : > { %v10072_v3 = vpop.permute.xlu1 %10071 }
 0xd89   : > { %v10074_v43 = vunpack.i.h.bf16 %v10072_v3  ;;  %v10073_v0 = vunpack.i.l.bf16 %v10072_v3 }
 0xd8b   : > { %v5729_v17 = vpack.c.bf16 %v10074_v43, %v10073_v0 }
 0xd8d   : > { %9037 = vmatprep.subr.bf16.mxu0 %v5729_v17 }
 0xd8e   : > { %9038 = vmatpush3.bf16.msra.mxu0 %v5729_v17 }
 0xd8f   : > { %v10318_v54 = vpop.eup %10317 }
 0xd90   : > { %v10320_v10 = vpop.eup %10319  ;;  %v6484_v49 = vmul.f32 %v10318_v54, %v12243_v18 }
 0xd91   : > { %9040 = vmatmul.mubr.msk.bf16.vlgmr.msra.gmra.mrb[40].mxu0 %vm4701_vm3, %v6500_v14  ;;  %v10322_v21 = vpop.eup %10321  ;;  %v6486_v46 = vmul.f32 %v10320_v10, %v12238_v19 }
 0xd92   : > { %v6501_v5 = vpack.c.bf16 %v6484_v49, %v6483_v20  ;;  %v6485_v15 = vmul.f32 %v10322_v21, %v12206_v33 }
 0xd94   : > { %9043 = vmatprep.mubr.msk.bf16.mxu0 %vm4701_vm3, %v6501_v5  ;;  %v6502_v32 = vpack.c.bf16 %v6486_v46, %v6485_v15 }
 0xd99   : > { %9044 = vmatmul.mubr.msk.bf16.gmra.mrb[44].mxu0 %vm4701_vm3, %v6502_v32 }
 0xd9a   : > { %7316 = vmatprep.mubr.bf16.mxu0 %v12875_v12 }
 0xd9f   : > { %v12305_v57 = vpop.f32.mrb[16].mxu1 }
 0xda0   : > { %v12307_v23 = vpop.f32.mrb[17].mxu1 }
 0xda1   : > { %v12309_v18 = vpop.f32.mrb[18].mxu1 }
 0xda2   : > { %v12311_v41 = vpop.f32.mrb[19].mxu1 }
 0xda7   : > { %v12313_v38 = vpop.f32.mrb[20].mxu1 }
 0xda8   : > { %v12315_v19 = vpop.f32.mrb[21].mxu1 }
 0xda9   : > { %v12317_v59 = vpop.f32.mrb[22].mxu1 }
 0xdaa   : > { %v12319_v33 = vpop.f32.mrb[23].mxu1 }
 0xe07   : > { %v9009_v45 = vpop.f32.mrb[32].mxu0 }
 0xe08   : > { %v6626_v52 = vpop.f32.mrb[33].mxu0 }
 0xe09   : > { %v9010_v9 = vpop.f32.mrb[34].mxu0 }
 0xe0a   : > { %v10080_v50 = vpack.i.bf16 %v9010_v9, %v9009_v45  ;;  %v6629_v26 = vpop.f32.mrb[35].mxu0 }
 0xe0b   : > { %v10075_v16 = vpack.i.bf16 %v6629_v26, %v6626_v52 }
 0xe0c   : > { %10081 = vrot.lane.b32.xlu1 %v10080_v50, %s10481_s3 }
 0xe0d   : > { %10076 = vrot.lane.b32.xlu0 %v10075_v16, %s10481_s3 }
 0xe17   : > { %v9013_v11 = vpop.f32.mrb[36].mxu0 }
 0xe18   : > { %v6642_v25 = vpop.f32.mrb[37].mxu0 }
 0xe19   : > { %v9014_v1 = vpop.f32.mrb[38].mxu0 }
 0xe1a   : > { %v10110_v22 = vpack.i.bf16 %v9014_v1, %v9013_v11  ;;  %v6645_v14 = vpop.f32.mrb[39].mxu0 }
 0xe1b   : > { %v10105_v39 = vpack.i.bf16 %v6645_v14, %v6642_v25 }
 0xe1c   : > { %10111 = vrot.lane.b32.xlu0 %v10110_v22, %s10481_s3 }
 0xe2f   : > { %v9025_v28 = vpop.f32.mrb[24].mxu1 }
 0xe30   : > { %v6703_v40 = vpop.f32.mrb[25].mxu1 }
 0xe31   : > { %v9026_v8 = vpop.f32.mrb[26].mxu1 }
 0xe32   : > { %v10085_v30 = vpack.i.bf16 %v9026_v8, %v9025_v28  ;;  %v6706_v60 = vpop.f32.mrb[27].mxu1 }
 0xe33   : > { %v10090_v35 = vpack.i.bf16 %v6706_v60, %v6703_v40 }
 0xe34   : > { %10086 = vrot.lane.b32.xlu1 %v10085_v30, %s10482_s4 }
 0xe37   : > { %v9029_v55 = vpop.f32.mrb[28].mxu1 }
 0xe38   : > { %10091 = vrot.lane.b32.xlu1 %v10090_v35, %s10482_s4  ;;  %v6719_v56 = vpop.f32.mrb[29].mxu1 }
 0xe39   : > { %v9030_v24 = vpop.f32.mrb[30].mxu1 }
 0xe3a   : > { %v10120_v51 = vpack.i.bf16 %v9030_v24, %v9029_v55  ;;  %v6722_v13 = vpop.f32.mrb[31].mxu1 }
 0xe3b   : > { %v10115_v58 = vpack.i.bf16 %v6722_v13, %v6719_v56 }
 0xe3c   : > { %10121 = vrot.lane.b32.xlu0 %v10120_v51, %s10482_s4 }
 0xe64   : > { %v9041_v29 = vpop.f32.mrb[40].mxu0 }
 0xe65   : > { %v6780_v34 = vpop.f32.mrb[41].mxu0 }
 0xe66   : > { %v9042_v47 = vpop.f32.mrb[42].mxu0 }
 0xe67   : > { %v10100_v4 = vpack.i.bf16 %v9042_v47, %v9041_v29  ;;  %v6783_v42 = vpop.f32.mrb[43].mxu0 }
 0xe68   : > { %v10095_v27 = vpack.i.bf16 %v6783_v42, %v6780_v34 }
 0xe6a   : > { %10096 = vrot.lane.b32.xlu1 %v10095_v27, %s10483_s7 }
 0xe6c   : > { %v9045_v44 = vpop.f32.mrb[44].mxu0 }
 0xe6d   : > { %v6796_v31 = vpop.f32.mrb[45].mxu0 }
 0xe6e   : > { %v9046_v53 = vpop.f32.mrb[46].mxu0  ;;  %10101 = vrot.lane.b32.xlu1 %v10100_v4, %s10483_s7 }
 0xe6f   : > { %v10130_v48 = vpack.i.bf16 %v9046_v53, %v9045_v44  ;;  %v6799_v7 = vpop.f32.mrb[47].mxu0 }
 0xe70   : > { %v10125_v61 = vpack.i.bf16 %v6799_v7, %v6796_v31 }
 0xe71   : > { %10131 = vrot.lane.b32.xlu0 %v10130_v48, %s10483_s7 }
 0xe72   : > { %10106 = vrot.lane.b32.xlu1 %v10105_v39, %s10481_s3 }
 0xe76   : > { %10116 = vrot.lane.b32.xlu1 %v10115_v58, %s10482_s4 }
 0xe7a   : > { %10126 = vrot.lane.b32.xlu1 %v10125_v61, %s10483_s7 }
 0xe7e   : > { %v10082_v2 = vpop.permute.xlu1 %10081 }
 0xe7f   : > { %v10077_v43 = vpop.permute.xlu0 %10076  ;;  %v10084_v49 = vunpack.i.h.bf16 %v10082_v2  ;;  %v10083_v21 = vunpack.i.l.bf16 %v10082_v2 }
 0xe80   : > { %v10079_v17 = vunpack.i.h.bf16 %v10077_v43  ;;  %v10078_v63 = vunpack.i.l.bf16 %v10077_v43 }
 0xe82   : > { %v6908_v46 = vsel %vm5742_vm5, %v12311_v41, %v10079_v17  ;;  %v6907_v15 = vsel %vm5742_vm5, %v12307_v23, %v10078_v63  ;;  %v6910_v41 = vsel %vm5742_vm5, %v12309_v18, %v10084_v49  ;;  %v6909_v23 = vsel %vm5742_vm5, %v12305_v57, %v10083_v21  ;;  %v8733_v17 = vld [vmem:[%s11364_s26 + $0x2] ss:$0 sm:$0xff] }
 0xe8e   : > { %v10112_v54 = vpop.permute.xlu0 %10111 }
 0xe8f   : > { %v10114_v11 = vunpack.i.h.bf16 %v10112_v54  ;;  %v10113_v22 = vunpack.i.l.bf16 %v10112_v54 }
 0xe91   : > { %v6914_v60 = vsel %vm5742_vm5, %v12317_v59, %v10114_v11  ;;  %v6913_v55 = vsel %vm5742_vm5, %v12313_v38, %v10113_v22 }
 0xea6   : > { %v10087_v3 = vpop.permute.xlu1 %10086 }
 0xea7   : > { %v10089_v52 = vunpack.i.h.bf16 %v10087_v3  ;;  %v10088_v9 = vunpack.i.l.bf16 %v10087_v3 }
 0xea9   : > { %v6919_v36 = vsel %vm6915_vm6, %v6910_v41, %v10089_v52  ;;  %v6918_v30 = vsel %vm6915_vm6, %v6909_v23, %v10088_v9  ;;  %v10372_v9 = vld [vmem:[#allocation2 + $0x18] sm:$0xff] }
 0xeaa   : > { %v10092_v0 = vpop.permute.xlu1 %10091 }
 0xeab   : > { %v10094_v10 = vunpack.i.h.bf16 %v10092_v0  ;;  %v10093_v20 = vunpack.i.l.bf16 %v10092_v0 }
 0xead   : > { %v6917_v50 = vsel %vm6915_vm6, %v6908_v46, %v10094_v10  ;;  %v6916_v26 = vsel %vm6915_vm6, %v6907_v15, %v10093_v20 }
 0xeae   : > { %v10122_v16 = vpop.permute.xlu0 %10121 }
 0xeaf   : > { %v10124_v28 = vunpack.i.h.bf16 %v10122_v16  ;;  %v10123_v40 = vunpack.i.l.bf16 %v10122_v16 }
 0xeb1   : > { %v6923_v58 = vsel %vm6915_vm6, %v6914_v60, %v10124_v28  ;;  %v6922_v6 = vsel %vm6915_vm6, %v6913_v55, %v10123_v40 }
 0xedc   : > { %v10097_v5 = vpop.permute.xlu1 %10096 }
 0xedd   : > { %v10099_v32 = vunpack.i.h.bf16 %v10097_v5  ;;  %v10098_v45 = vunpack.i.l.bf16 %v10097_v5 }
 0xedf   : > { %v6925_v25 = vsel %vm6924_vm7, %v6916_v26, %v10098_v45  ;;  %v6926_v1 = vsel %vm6924_vm7, %v6917_v50, %v10099_v32  ;;  %v10371_v32 = vld [vmem:[#allocation2] sm:$0xff]  ;;  %v10373_v26 = vld [vmem:[#allocation2 + $0x8] sm:$0xff] }
 0xee0   : > { %v6933_v14 = vpack.c.bf16 %v6926_v1, %v6925_v25  ;;  %v10102_v39 = vpop.permute.xlu1 %10101  ;;  %v10374_v25 = vld [vmem:[#allocation2 + $0x10] sm:$0xff] }
 0xee1   : > { %v10104_v8 = vunpack.i.h.bf16 %v10102_v39  ;;  %v10103_v37 = vunpack.i.l.bf16 %v10102_v39 }
 0xee2   : > { %9055 = vmatprep.mubr.msk.bf16.mxu1 %vm4701_vm3, %v6933_v14 }
 0xee3   : > { %v6928_v18 = vsel %vm6924_vm7, %v6919_v36, %v10104_v8  ;;  %v6927_v57 = vsel %vm6924_vm7, %v6918_v30, %v10103_v37  ;;  %v10132_v35 = vpop.permute.xlu0 %10131 }
 0xee4   : > { %v6934_v56 = vpack.c.bf16 %v6928_v18, %v6927_v57  ;;  %v10134_v24 = vunpack.i.h.bf16 %v10132_v35  ;;  %v10133_v51 = vunpack.i.l.bf16 %v10132_v35  ;;  %v10107_v13 = vpop.permute.xlu1 %10106  ;;  %v10375_v57 = vld [vmem:[#allocation2 + $0x20] sm:$0xff] }
 0xee5   : > { %v10109_v47 = vunpack.i.h.bf16 %v10107_v13  ;;  %v10108_v38 = vunpack.i.l.bf16 %v10107_v13  ;;  %v10377_v13 = vld [vmem:[#allocation2 + $0x28] sm:$0xff] }
 0xee6   : > { %v6931_v62 = vsel %vm6924_vm7, %v6922_v6, %v10133_v51  ;;  %v6932_v59 = vsel %vm6924_vm7, %v6923_v58, %v10134_v24  ;;  %9056 = vmatmul.mubr.msk.bf16.vlgmr.msra.gmra.mrb[32].mxu1 %vm4701_vm3, %v6934_v56  ;;  %v10376_v24 = vld [vmem:[#allocation2 + $0x30] sm:$0xff] }
 0xee7   : > { %v6936_v29 = vpack.c.bf16 %v6932_v59, %v6931_v62  ;;  %v6912_v44 = vsel %vm5742_vm5, %v12319_v33, %v10109_v47  ;;  %v6911_v31 = vsel %vm5742_vm5, %v12315_v19, %v10108_v38  ;;  %v8724_v33 = vld [vmem:[%s12876_s30] ss:$0 sm:$0xff]  ;;  %v10378_v62 = vld [vmem:[#allocation2 + $0x38] sm:$0xff] }
 0xee8   : > { %v10117_v34 = vpop.permute.xlu1 %10116 }
 0xee9   : > { %v10119_v4 = vunpack.i.h.bf16 %v10117_v34  ;;  %v10118_v42 = vunpack.i.l.bf16 %v10117_v34 }
 0xeeb   : > { %v6921_v7 = vsel %vm6915_vm6, %v6912_v44, %v10119_v4  ;;  %v6920_v61 = vsel %vm6915_vm6, %v6911_v31, %v10118_v42 }
 0xeec   : > { %v10127_v27 = vpop.permute.xlu1 %10126 }
 0xeed   : > { %v10129_v53 = vunpack.i.h.bf16 %v10127_v27  ;;  %v10128_v48 = vunpack.i.l.bf16 %v10127_v27 }
 0xeef   : > { %v6929_v2 = vsel %vm6924_vm7, %v6920_v61, %v10128_v48  ;;  %v6930_v3 = vsel %vm6924_vm7, %v6921_v7, %v10129_v53 }
 0xef0   : > { %v6935_v43 = vpack.c.bf16 %v6930_v3, %v6929_v2 }
 0xef2   : > { %9059 = vmatprep.mubr.msk.bf16.mxu1 %vm4701_vm3, %v6935_v43 }
 0xef3   : > { %9060 = vmatmul.mubr.msk.bf16.gmra.mrb[36].mxu1 %vm4701_vm3, %v6936_v29 }
 0xfb9   : > { %v9057_v0 = vpop.f32.mrb[32].mxu1 }
 0xfba   : > { %v7022_v19 = vpop.f32.mrb[33].mxu1  ;;  %v7031_v63 = vadd.f32 %v9057_v0, %v8724_v33 }
 0xfbb   : > { %v7023_v54 = vadd.f32 %v8724_v33, %v7022_v19  ;;  %v9058_v10 = vpop.f32.mrb[34].mxu1 }
 0xfbc   : > { %v7034_v20 = vadd.f32 %v9058_v10, %v8724_v33  ;;  %v7025_v49 = vpop.f32.mrb[35].mxu1  ;;  %v7061_v15 = vmul.f32 %v8733_v17, %v7031_v63 }
 0xfbd   : > { %v7059_v21 = vmul.f32 %v8733_v17, %v7023_v54  ;;  %v7026_v5 = vadd.f32 %v8724_v33, %v7025_v49 }
 0xfbe   : > { %v7062_v46 = vmul.f32 %v8733_v17, %v7034_v20  ;;  %v12381_v1 = vadd.f32 %v10374_v25, %v7061_v15 }
 0xfbf   : > { %v12373_v45 = vadd.f32 %v10371_v32, %v7059_v21  ;;  %v7060_v52 = vmul.f32 %v8733_v17, %v7026_v5 }
 0xfc0   : > { %v12375_v50 = vadd.f32 %v10372_v9, %v7062_v46  ;;  %v7081_v28 = vsel %vm4701_vm3, %v12381_v1, 0.0 }
 0xfc1   : > { %v12377_v16 = vadd.f32 %v10373_v26, %v7060_v52  ;;  %v7075_v11 = vsel %vm4701_vm3, %v12373_v45, 0.0 }
 0xfc2   : > { %7076 = vadd.xlane.f32.xlu1 %v7075_v11  ;;  %v7084_v23 = vsel %vm4701_vm3, %v12375_v50, 0.0 }
 0xfc3   : > { %v7078_v41 = vsel %vm4701_vm3, %v12377_v16, 0.0 }
 0xfc4   : > { %7079 = vadd.xlane.f32.xlu0 %v7078_v41 }
 0xfc6   : > { %v9061_v22 = vpop.f32.mrb[36].mxu1  ;;  %7085 = vadd.xlane.f32.xlu1 %v7084_v23 }
 0xfc7   : > { %v7047_v14 = vadd.f32 %v9061_v22, %v8724_v33  ;;  %v7038_v39 = vpop.f32.mrb[37].mxu1 }
 0xfc8   : > { %v7039_v40 = vadd.f32 %v8724_v33, %v7038_v39  ;;  %v9062_v8 = vpop.f32.mrb[38].mxu1  ;;  %7082 = vadd.xlane.f32.xlu0 %v7081_v28 }
 0xfc9   : > { %v7050_v37 = vadd.f32 %v9062_v8, %v8724_v33  ;;  %v7041_v36 = vpop.f32.mrb[39].mxu1  ;;  %v7065_v30 = vmul.f32 %v8733_v17, %v7047_v14 }
 0xfca   : > { %v7063_v60 = vmul.f32 %v8733_v17, %v7039_v40  ;;  %v7042_v18 = vadd.f32 %v8724_v33, %v7041_v36  ;;  %v10151_v36 = vld [vmem:[%s10714_s16] ss:$8 sps:$4 sm:$0xff]  }
 0xfcb   : > { %v7066_v55 = vmul.f32 %v8733_v17, %v7050_v37  ;;  %v12391_v51 = vadd.f32 %v10376_v24, %v7065_v30  ;;  %v10153_v37 = vld [vmem:[%s10714_s16 + $0x4] ss:$8 sps:$4 sm:$0xff]   ;;  %v10156_v30 = vld [vmem:[%s10714_s16 + $0x14] ss:$8 sps:$4 sm:$0xff]  }
 0xfcc   : > { %v12389_v35 = vadd.f32 %v10375_v57, %v7063_v60  ;;  %v7064_v56 = vmul.f32 %v8733_v17, %v7042_v18  ;;  %7284 = vmatprep.subr.bf16.mxu0 %v10153_v37  ;;  %v10154_v60 = vld [vmem:[%s10714_s16 + $0x10] ss:$8 sps:$4 sm:$0xff]   ;;  %v10159_v18 = vld [vmem:[%s10714_s16 + $0x24] ss:$8 sps:$4 sm:$0xff]   ;;  %v10157_v57 = vld [vmem:[%s10714_s16 + $0x20] ss:$8 sps:$4 sm:$0xff]  }
 0xfcd   : > { %v12397_v59 = vadd.f32 %v10378_v62, %v7066_v55  ;;  %v7093_v34 = vsel %vm4701_vm3, %v12391_v51, 0.0  ;;  %7285 = vmatpush1.bf16.msra.mxu0 %v10151_v36  ;;  %v10162_v55 = vld [vmem:[%s10714_s16 + $0x34] ss:$8 sps:$4 sm:$0xff]  }
 0xfce   : > { %v12393_v58 = vadd.f32 %v10377_v13, %v7064_v56  ;;  %v7087_v6 = vsel %vm4701_vm3, %v12389_v35, 0.0  ;;  %7286 = vmatprep.subr.bf16.mxu0 %v10156_v30  ;;  %v10160_v56 = vld [vmem:[%s10714_s16 + $0x30] ss:$8 sps:$4 sm:$0xff]  }
 0xfcf   : > { %7088 = vadd.xlane.f32.xlu0 %v7087_v6  ;;  %v7096_v47 = vsel %vm4701_vm3, %v12397_v59, 0.0 }
 0xfd0   : > { %v7090_v29 = vsel %vm4701_vm3, %v12393_v58, 0.0 }
 0xfd1   : > { %7091 = vadd.xlane.f32.xlu1 %v7090_v29  ;;  %7287 = vmatpush1.bf16.msra.mxu0 %v10154_v60 }
 0xfd2   : > { %7288 = vmatprep.subr.bf16.mxu0 %v10159_v18 }
 0xfd3   : > { %7094 = vadd.xlane.f32.xlu0 %v7093_v34 }
 0xfd5   : > { %7097 = vadd.xlane.f32.xlu1 %v7096_v47  ;;  %7289 = vmatpush1.bf16.msra.mxu0 %v10157_v57 }
 0xfd6   : > { %7290 = vmatprep.subr.bf16.mxu0 %v10162_v55 }
 0xfd9   : > { %7291 = vmatpush1.bf16.msra.mxu0 %v10160_v56 }
0x104f   : > { %v7077_v38 = vpop.xlane.xlu1 %7076 }
0x1050   : > { %v7099_v4 = vmul.f32 0.015625, %v7077_v38 }
0x1051   : > { %v7080_v42 = vpop.xlane.xlu0 %7079 }
0x1052   : > { %v12406_v27 = vsub.f32 %v12373_v45, %v7099_v4  ;;  %v7100_v44 = vmul.f32 0.015625, %v7080_v42  ;;  %v4699_v4 = vld [vmem:[%s11364_s26 + $0x4] sm:$0x1] }
0x1053   : > { %v7086_v31 = vpop.xlane.xlu1 %7085 }
0x1054   : > { %v12409_v53 = vsub.f32 %v12377_v16, %v7100_v44  ;;  %v7102_v48 = vmul.f32 0.015625, %v7086_v31  ;;  %v7115_v7 = vmul.f32 %v12406_v27, %v12406_v27 }
0x1055   : > { %v7083_v61 = vpop.xlane.xlu0 %7082 }
0x1056   : > { %v12414_v2 = vsub.f32 %v12375_v50, %v7102_v48  ;;  %v7101_v3 = vmul.f32 0.015625, %v7083_v61  ;;  %v7123_v43 = vsel %vm4701_vm3, %v7115_v7, 0.0  ;;  %v7116_v33 = vmul.f32 %v12409_v53, %v12409_v53 }
0x1057   : > { %7124 = vadd.xlane.f32.xlu0 %v7123_v43  ;;  %v7179_v7 = vadd.f32 1.0, %v4699_v4 }
0x1058   : > { %v12420_v0 = vsub.f32 %v12381_v1, %v7101_v3  ;;  %v7126_v17 = vsel %vm4701_vm3, %v7116_v33, 0.0  ;;  %v7118_v19 = vmul.f32 %v12414_v2, %v12414_v2  ;;  %v12877_v3 = vld [vmem:[#allocation31_spill] sm:$0xff] }
0x1059   : > { %7127 = vadd.xlane.f32.xlu1 %v7126_v17  ;;  %v7184_v43 = vrot.slane %v7179_v7, %v12877_v3  ;;  %v10166_v7 = vld [vmem:[%s10721_s2 + $0x8] sm:$0xff]  }
0x105a   : > { %v7117_v63 = vmul.f32 %v12420_v0, %v12420_v0  ;;  %v7132_v20 = vsel %vm4701_vm3, %v7118_v19, 0.0 }
0x105c   : > { %v7089_v54 = vpop.xlane.xlu0 %7088  ;;  %v7129_v10 = vsel %vm4701_vm3, %v7117_v63, 0.0 }
0x105d   : > { %v7103_v49 = vmul.f32 0.015625, %v7089_v54  ;;  %7130 = vadd.xlane.f32.xlu0 %v7129_v10  ;;  %7133 = vadd.xlane.f32.xlu1 %v7132_v20 }
0x105e   : > { %v7092_v21 = vpop.xlane.xlu1 %7091 }
0x105f   : > { %v12430_v5 = vsub.f32 %v12389_v35, %v7103_v49  ;;  %v7104_v46 = vmul.f32 0.015625, %v7092_v21 }
0x1060   : > { %v7095_v15 = vpop.xlane.xlu0 %7094 }
0x1061   : > { %v12433_v32 = vsub.f32 %v12393_v58, %v7104_v46  ;;  %v7105_v52 = vmul.f32 0.015625, %v7095_v15  ;;  %v7119_v9 = vmul.f32 %v12430_v5, %v12430_v5 }
0x1062   : > { %v7098_v26 = vpop.xlane.xlu1 %7097 }
0x1063   : > { %v12438_v11 = vsub.f32 %v12391_v51, %v7105_v52  ;;  %v7106_v25 = vmul.f32 0.015625, %v7098_v26  ;;  %v7135_v41 = vsel %vm4701_vm3, %v7119_v9, 0.0  ;;  %v7120_v23 = vmul.f32 %v12433_v32, %v12433_v32  ;;  %v8734_v52 = vld [vmem:[%s11364_s26 + $0x3] ss:$0 sm:$0xff] }
0x1064   : > { %7136 = vadd.xlane.f32.xlu0 %v7135_v41 }
0x1065   : > { %v12444_v22 = vsub.f32 %v12397_v59, %v7106_v25  ;;  %v7138_v14 = vsel %vm4701_vm3, %v7120_v23, 0.0  ;;  %v7121_v39 = vmul.f32 %v12438_v11, %v12438_v11 }
0x1066   : > { %7139 = vadd.xlane.f32.xlu1 %v7138_v14 }
0x1067   : > { %v7141_v28 = vsel %vm4701_vm3, %v7121_v39, 0.0  ;;  %v7122_v40 = vmul.f32 %v12444_v22, %v12444_v22 }
0x1068   : > { %7142 = vadd.xlane.f32.xlu0 %v7141_v28 }
0x1069   : > { %v7144_v8 = vsel %vm4701_vm3, %v7122_v40, 0.0 }
0x106a   : > { %7145 = vadd.xlane.f32.xlu1 %v7144_v8 }
0x10e4   : > { %v7125_v24 = vpop.xlane.xlu0 %7124 }
0x10e5   : > { %v7147_v13 = vmul.f32 0.015625, %v7125_v24 }
0x10e6   : > { %v7128_v6 = vpop.xlane.xlu1 %7127 }
0x10e7   : > { %v7155_v62 = vadd.f32 1e-05, %v7147_v13  ;;  %v7148_v29 = vmul.f32 0.015625, %v7128_v6 }
0x10e9   : > { %10323 = vrsqrt.f32 %v7155_v62  ;;  %v7156_v34 = vadd.f32 1e-05, %v7148_v29 }
0x10ea   : > { %v7131_v47 = vpop.xlane.xlu0 %7130  ;;  %v7134_v38 = vpop.xlane.xlu1 %7133 }
0x10eb   : > { %10325 = vrsqrt.f32 %v7156_v34  ;;  %v7149_v42 = vmul.f32 0.015625, %v7131_v47  ;;  %v7150_v44 = vmul.f32 0.015625, %v7134_v38 }
0x10ed   : > { %v7157_v31 = vadd.f32 1e-05, %v7149_v42  ;;  %v7158_v48 = vadd.f32 1e-05, %v7150_v44 }
0x10ef   : > { %10327 = vrsqrt.f32 %v7157_v31 }
0x10f0   : > { %10329 = vrsqrt.f32 %v7158_v48  ;;  %v10164_v48 = vld [vmem:[%s10721_s2] sm:$0xff]  }
0x10f1   : > { %v7137_v61 = vpop.xlane.xlu0 %7136 }
0x10f2   : > { %v7151_v33 = vmul.f32 0.015625, %v7137_v61  ;;  %v10168_v61 = vld [vmem:[%s10721_s2 + $0x10] sm:$0xff]  }
0x10f3   : > { %v10324_v17 = vpop.eup %10323  ;;  %v7140_v19 = vpop.xlane.xlu1 %7139 }
0x10f4   : > { %v7171_v63 = vmul.f32 %v10324_v17, %v12406_v27  ;;  %v7159_v54 = vadd.f32 1e-05, %v7151_v33  ;;  %v7152_v10 = vmul.f32 0.015625, %v7140_v19  ;;  %v10170_v33 = vld [vmem:[%s10721_s2 + $0x18] sm:$0xff]   ;;  %v10171_v17 = vld [vmem:[%s10721_s2 + $0x60] sm:$0xff]  }
0x10f5   : > { %v10326_v20 = vpop.eup %10325  ;;  %v7143_v49 = vpop.xlane.xlu0 %7142  ;;  %v10172_v19 = vld [vmem:[%s10721_s2 + $0x20] sm:$0xff]  }
0x10f6   : > { %v7186_v21 = vmul.f32 %v7184_v43, %v7171_v63  ;;  %v7172_v46 = vmul.f32 %v10326_v20, %v12409_v53  ;;  %10331 = vrsqrt.f32 %v7159_v54  ;;  %v7160_v15 = vadd.f32 1e-05, %v7152_v10  ;;  %v10173_v63 = vld [vmem:[%s10721_s2 + $0x68] sm:$0xff]   ;;  %v10175_v10 = vld [vmem:[%s10721_s2 + $0x70] sm:$0xff]  }
0x10f7   : > { %v7153_v9 = vmul.f32 0.015625, %v7143_v49  ;;  %v7146_v26 = vpop.xlane.xlu1 %7145  ;;  %v10174_v54 = vld [vmem:[%s10721_s2 + $0x28] sm:$0xff]   ;;  %v10176_v20 = vld [vmem:[%s10721_s2 + $0x30] sm:$0xff]   ;;  %v10177_v49 = vld [vmem:[%s10721_s2 + $0x78] sm:$0xff]  }
0x10f8   : > { %v7187_v25 = vmul.f32 %v7184_v43, %v7172_v46  ;;  %10333 = vrsqrt.f32 %v7160_v15  ;;  %v7154_v41 = vmul.f32 0.015625, %v7146_v26  ;;  %v7200_v28 = vadd.f32 %v8734_v52, %v7186_v21  ;;  %v10178_v21 = vld [vmem:[%s10721_s2 + $0x38] sm:$0xff]   ;;  %v7220_v46 = vld [vmem:[%s10717_s17] sm:$0x3]  ;;  %s12880_s17 = scalar_lea.vmem %s10622_s8, %s10697_s0 }
0x10f9   : > { %v10328_v23 = vpop.eup %10327  ;;  %v7161_v14 = vadd.f32 1e-05, %v7153_v9  ;;  %v12497_v15 = vrot.slane %v7220_v46, %v12877_v3 }
0x10fa   : > { %v10330_v39 = vpop.eup %10329  ;;  %v7201_v27 = vadd.f32 %v8734_v52, %v7187_v25  ;;  %v7173_v40 = vmul.f32 %v10328_v23, %v12420_v0  ;;  %v7162_v8 = vadd.f32 1e-05, %v7154_v41 }
0x10fb   : > { %v7174_v37 = vmul.f32 %v10330_v39, %v12414_v2 }
0x10fc   : > { %10335 = vrsqrt.f32 %v7162_v8  ;;  %v7208_v53 = vpack.c.bf16 %v7201_v27, %v7200_v28  ;;  %v7188_v36 = vmul.f32 %v7184_v43, %v7173_v40 }
0x10fd   : > { %10337 = vrsqrt.f32 %v7161_v14  ;;  %v7189_v30 = vmul.f32 %v7184_v43, %v7174_v37 }
0x10fe   : > { %8743 = vmatmul.mubr.msk.bf16.vlgmr.msra.gmra.mrb[48].mxu0 %vm4701_vm3, %v7208_v53  ;;  %v7202_v18 = vadd.f32 %v8734_v52, %v7188_v36 }
0x10ff   : > { %7326 = vmatprep.mubr.bf16.mxu0 %v12875_v12  ;;  %v7203_v57 = vadd.f32 %v8734_v52, %v7189_v30 }
0x1100   : > { %v10332_v60 = vpop.eup %10331 }
0x1101   : > { %v7175_v56 = vmul.f32 %v10332_v60, %v12430_v5  ;;  %v7209_v24 = vpack.c.bf16 %v7203_v57, %v7202_v18 }
0x1102   : > { %v10334_v55 = vpop.eup %10333 }
0x1103   : > { %v7176_v0 = vmul.f32 %v10334_v55, %v12433_v32  ;;  %v7190_v6 = vmul.f32 %v7184_v43, %v7175_v56 }
0x1105   : > { %v7191_v13 = vmul.f32 %v7184_v43, %v7176_v0  ;;  %v7204_v38 = vadd.f32 %v8734_v52, %v7190_v6 }
0x1106   : > { %v10336_v2 = vpop.eup %10335  ;;  %8744 = vmatmul.mubr.msk.bf16.gmra.mrb[52].mxu0 %vm4701_vm3, %v7209_v24 }
0x1107   : > { %v10338_v62 = vpop.eup %10337  ;;  %7336 = vmatprep.mubr.bf16.mxu0 %v12875_v12  ;;  %v7178_v29 = vmul.f32 %v10336_v2, %v12444_v22  ;;  %v7205_v34 = vadd.f32 %v8734_v52, %v7191_v13  ;;  %v10163_v22 = vld [vmem:[%s10721_s2 + $0x40] sm:$0xff]  }
0x1108   : > { %v7177_v47 = vmul.f32 %v10338_v62, %v12438_v11  ;;  %8861 = vmatprep.subr.bf16.mxu0 %v10163_v22  ;;  %9107 = vmatprep.subr.bf16.mxu1 %v10163_v22  ;;  %v10165_v11 = vld [vmem:[%s10721_s2 + $0x48] sm:$0xff]  }
0x1109   : > { %v7210_v5 = vpack.c.bf16 %v7205_v34, %v7204_v38  ;;  %v7193_v32 = vmul.f32 %v7184_v43, %v7178_v29  ;;  %8862 = vmatpush3.bf16.msra.mxu0 %v10164_v48  ;;  %9115 = vmatpush3.bf16.msra.mxu1 %v10164_v48 }
0x110a   : > { %v7192_v4 = vmul.f32 %v7184_v43, %v7177_v47  ;;  %8863 = vmatprep.subr.bf16.mxu0 %v10165_v11  ;;  %9108 = vmatprep.subr.bf16.mxu1 %v10165_v11  ;;  %v10169_v43 = vld [vmem:[%s10721_s2 + $0x58] sm:$0xff]  }
0x110b   : > { %v7207_v42 = vadd.f32 %v8734_v52, %v7193_v32 }
0x110c   : > { %v7206_v44 = vadd.f32 %v8734_v52, %v7192_v4  ;;  %v12878_v52 = vld [vmem:[#allocation30_spill] sm:$0xff] }
0x110d   : > { %8864 = vmatpush3.bf16.msra.mxu0 %v10166_v7  ;;  %9116 = vmatpush3.bf16.msra.mxu1 %v10166_v7  ;;  %v12879_v9 = vsub.s32 1, %v12878_v52 }
0x110e   : > { %8745 = vmatmul.mubr.msk.bf16.gmra.mrb[56].mxu0 %vm4701_vm3, %v7210_v5  ;;  %v7211_v31 = vpack.c.bf16 %v7207_v42, %v7206_v44 }
0x110f   : > { %7346 = vmatprep.mubr.bf16.mxu0 %v12875_v12  ;;  %v10167_v12 = vld [vmem:[%s10721_s2 + $0x50] sm:$0xff]   ;;  %v12501_v26 = vrot.slane %v7220_v46, %v12879_v9 }
0x1110   : > { %8865 = vmatprep.subr.bf16.mxu0 %v10167_v12  ;;  %9109 = vmatprep.subr.bf16.mxu1 %v10167_v12 }
0x1111   : > { %8866 = vmatpush3.bf16.msra.mxu0 %v10168_v61  ;;  %9117 = vmatpush3.bf16.msra.mxu1 %v10168_v61 }
0x1112   : > { %8867 = vmatprep.subr.bf16.mxu0 %v10169_v43  ;;  %9110 = vmatprep.subr.bf16.mxu1 %v10169_v43 }
0x1115   : > { %8868 = vmatpush3.bf16.msra.mxu0 %v10170_v33  ;;  %9118 = vmatpush3.bf16.msra.mxu1 %v10170_v33 }
0x1116   : > { %8746 = vmatmul.mubr.msk.bf16.gmra.mrb[60].mxu0 %vm4701_vm3, %v7211_v31  ;;  %8869 = vmatprep.subr.bf16.mxu0 %v10171_v17 }
0x1117   : > { %9111 = vmatprep.subr.bf16.mxu1 %v10171_v17 }
0x1119   : > { %8870 = vmatpush3.bf16.msra.mxu0 %v10172_v19  ;;  %9119 = vmatpush3.bf16.msra.mxu1 %v10172_v19 }
0x111a   : > { %8871 = vmatprep.subr.bf16.mxu0 %v10173_v63  ;;  %9112 = vmatprep.subr.bf16.mxu1 %v10173_v63 }
0x111d   : > { %8872 = vmatpush3.bf16.msra.mxu0 %v10174_v54  ;;  %9120 = vmatpush3.bf16.msra.mxu1 %v10174_v54 }
0x111e   : > { %8873 = vmatprep.subr.bf16.mxu0 %v10175_v10  ;;  %9113 = vmatprep.subr.bf16.mxu1 %v10175_v10 }
0x1121   : > { %8874 = vmatpush3.bf16.msra.mxu0 %v10176_v20  ;;  %9121 = vmatpush3.bf16.msra.mxu1 %v10176_v20 }
0x1122   : > { %8875 = vmatprep.subr.bf16.mxu0 %v10177_v49  ;;  %9114 = vmatprep.subr.bf16.mxu1 %v10177_v49 }
0x1125   : > { %8876 = vmatpush3.bf16.msra.mxu0 %v10178_v21  ;;  %9122 = vmatpush3.bf16.msra.mxu1 %v10178_v21 }
0x11d1   : > { %v7318_v25 = vpop.f32.mrb[48].mxu0 }
0x11d2   : > { %v12504_v41 = vadd.f32 %v7318_v25, %v12497_v15  ;;  %v7320_v23 = vpop.f32.mrb[49].mxu0 }
0x11d3   : > { %v12507_v14 = vadd.f32 %v7320_v23, %v12501_v26  ;;  %v7322_v39 = vpop.f32.mrb[50].mxu0 }
0x11d4   : > { %v7357_v28 = vmul.f32 %v12504_v41, %v12504_v41  ;;  %v12512_v27 = vadd.f32 %v7322_v39, %v12497_v15  ;;  %v7324_v3 = vpop.f32.mrb[51].mxu0 }
0x11d5   : > { %v7358_v40 = vmul.f32 %v12507_v14, %v12507_v14  ;;  %v12517_v8 = vadd.f32 %v7324_v3, %v12501_v26 }
0x11d6   : > { %v7373_v37 = vmul.f32 %v7357_v28, %v12504_v41  ;;  %v7359_v53 = vmul.f32 %v12512_v27, %v12512_v27 }
0x11d7   : > { %v7374_v36 = vmul.f32 %v7358_v40, %v12507_v14  ;;  %v7360_v30 = vmul.f32 %v12517_v8, %v12517_v8 }
0x11d8   : > { %v7389_v60 = vmul.f32 0.044715, %v7373_v37  ;;  %v7375_v18 = vmul.f32 %v7359_v53, %v12512_v27 }
0x11d9   : > { %v7390_v57 = vmul.f32 0.044715, %v7374_v36  ;;  %v7376_v55 = vmul.f32 %v7360_v30, %v12517_v8  ;;  %v7328_v56 = vpop.f32.mrb[52].mxu0 }
0x11da   : > { %v7405_v0 = vadd.f32 %v7389_v60, %v12504_v41  ;;  %v7391_v24 = vmul.f32 0.044715, %v7375_v18  ;;  %v12529_v13 = vadd.f32 %v7328_v56, %v12497_v15  ;;  %v7330_v2 = vpop.f32.mrb[53].mxu0 }
0x11db   : > { %v7406_v6 = vadd.f32 %v7390_v57, %v12507_v14  ;;  %v7392_v62 = vmul.f32 0.044715, %v7376_v55  ;;  %v12533_v29 = vadd.f32 %v7330_v2, %v12501_v26  ;;  %v7332_v34 = vpop.f32.mrb[54].mxu0 }
0x11dc   : > { %v7421_v47 = vmul.f32 0.7978846, %v7405_v0  ;;  %v7407_v38 = vadd.f32 %v7391_v24, %v12512_v27  ;;  %v7361_v5 = vmul.f32 %v12529_v13, %v12529_v13  ;;  %v12539_v32 = vadd.f32 %v7332_v34, %v12497_v15  ;;  %v7334_v4 = vpop.f32.mrb[55].mxu0 }
0x11dd   : > { %v7422_v42 = vmul.f32 0.7978846, %v7406_v6  ;;  %v7408_v44 = vadd.f32 %v7392_v62, %v12517_v8  ;;  %v7362_v31 = vmul.f32 %v12533_v29, %v12533_v29  ;;  %v12545_v22 = vadd.f32 %v7334_v4, %v12501_v26 }
0x11de   : > { %10339 = vtanh.f32 %v7421_v47  ;;  %v7423_v48 = vmul.f32 0.7978846, %v7407_v38  ;;  %v7377_v11 = vmul.f32 %v7361_v5, %v12529_v13  ;;  %v7363_v7 = vmul.f32 %v12539_v32, %v12539_v32 }
0x11df   : > { %10341 = vtanh.f32 %v7422_v42  ;;  %v7424_v12 = vmul.f32 0.7978846, %v7408_v44  ;;  %v7378_v61 = vmul.f32 %v7362_v31, %v12533_v29  ;;  %v7364_v43 = vmul.f32 %v12545_v22, %v12545_v22 }
0x11e0   : > { %10343 = vtanh.f32 %v7423_v48  ;;  %v7393_v33 = vmul.f32 0.044715, %v7377_v11  ;;  %v7379_v17 = vmul.f32 %v7363_v7, %v12539_v32 }
0x11e1   : > { %v7394_v19 = vmul.f32 0.044715, %v7378_v61  ;;  %v7380_v63 = vmul.f32 %v7364_v43, %v12545_v22  ;;  %v7338_v54 = vpop.f32.mrb[56].mxu0  ;;  %10345 = vtanh.f32 %v7424_v12 }
0x11e2   : > { %v7409_v10 = vadd.f32 %v7393_v33, %v12529_v13  ;;  %v7395_v20 = vmul.f32 0.044715, %v7379_v17  ;;  %v12557_v49 = vadd.f32 %v7338_v54, %v12497_v15  ;;  %v7340_v21 = vpop.f32.mrb[57].mxu0 }
0x11e3   : > { %v7410_v46 = vadd.f32 %v7394_v19, %v12533_v29  ;;  %v7396_v52 = vmul.f32 0.044715, %v7380_v63  ;;  %v12561_v9 = vadd.f32 %v7340_v21, %v12501_v26  ;;  %v7342_v25 = vpop.f32.mrb[58].mxu0 }
0x11e4   : > { %v7425_v23 = vmul.f32 0.7978846, %v7409_v10  ;;  %v7411_v39 = vadd.f32 %v7395_v20, %v12539_v32  ;;  %v7365_v28 = vmul.f32 %v12557_v49, %v12557_v49  ;;  %v12567_v3 = vadd.f32 %v7342_v25, %v12497_v15  ;;  %v7344_v40 = vpop.f32.mrb[59].mxu0 }
0x11e5   : > { %v7426_v37 = vmul.f32 0.7978846, %v7410_v46  ;;  %v7412_v53 = vadd.f32 %v7396_v52, %v12545_v22  ;;  %v7366_v36 = vmul.f32 %v12561_v9, %v12561_v9  ;;  %v12573_v30 = vadd.f32 %v7344_v40, %v12501_v26 }
0x11e6   : > { %10347 = vtanh.f32 %v7425_v23  ;;  %v7427_v60 = vmul.f32 0.7978846, %v7411_v39  ;;  %v7381_v18 = vmul.f32 %v7365_v28, %v12557_v49  ;;  %v7367_v57 = vmul.f32 %v12567_v3, %v12567_v3 }
0x11e7   : > { %10349 = vtanh.f32 %v7426_v37  ;;  %v7428_v55 = vmul.f32 0.7978846, %v7412_v53  ;;  %v7382_v56 = vmul.f32 %v7366_v36, %v12561_v9  ;;  %v7368_v0 = vmul.f32 %v12573_v30, %v12573_v30 }
0x11e8   : > { %v10340_v24 = vpop.eup %10339  ;;  %10351 = vtanh.f32 %v7427_v60  ;;  %v7397_v2 = vmul.f32 0.044715, %v7381_v18  ;;  %v7383_v6 = vmul.f32 %v7367_v57, %v12567_v3 }
0x11e9   : > { %v10342_v62 = vpop.eup %10341  ;;  %v7453_v34 = vadd.f32 1.0, %v10340_v24  ;;  %10353 = vtanh.f32 %v7428_v55  ;;  %v7398_v47 = vmul.f32 0.044715, %v7382_v56  ;;  %v7384_v38 = vmul.f32 %v7368_v0, %v12573_v30  ;;  %v7348_v5 = vpop.f32.mrb[60].mxu0 }
0x11ea   : > { %v10344_v4 = vpop.eup %10343  ;;  %v7413_v42 = vadd.f32 %v7397_v2, %v12557_v49  ;;  %v7399_v44 = vmul.f32 0.044715, %v7383_v6  ;;  %v12585_v31 = vadd.f32 %v7348_v5, %v12497_v15  ;;  %v7350_v48 = vpop.f32.mrb[61].mxu0  ;;  %v7454_v11 = vadd.f32 1.0, %v10342_v62 }
0x11eb   : > { %v7469_v7 = vmul.f32 0.5, %v7453_v34  ;;  %v7455_v12 = vadd.f32 1.0, %v10344_v4  ;;  %v7414_v61 = vadd.f32 %v7398_v47, %v12561_v9  ;;  %v7400_v43 = vmul.f32 0.044715, %v7384_v38  ;;  %v7352_v33 = vpop.f32.mrb[62].mxu0  ;;  %v10346_v20 = vpop.eup %10345 }
0x11ec   : > { %v7429_v17 = vmul.f32 0.7978846, %v7413_v42  ;;  %v7415_v19 = vadd.f32 %v7399_v44, %v12567_v3  ;;  %v7369_v63 = vmul.f32 %v12585_v31, %v12585_v31  ;;  %v12592_v54 = vadd.f32 %v7350_v48, %v12501_v26  ;;  %v7354_v10 = vpop.f32.mrb[63].mxu0 }
0x11ed   : > { %v12595_v21 = vmul.f32 %v7469_v7, %v12504_v41  ;;  %v7471_v46 = vmul.f32 0.5, %v7455_v12  ;;  %v7430_v52 = vmul.f32 0.7978846, %v7414_v61  ;;  %v7416_v25 = vadd.f32 %v7400_v43, %v12573_v30 }
0x11ee   : > { %10355 = vtanh.f32 %v7429_v17  ;;  %v7431_v23 = vmul.f32 0.7978846, %v7415_v19  ;;  %v7385_v39 = vmul.f32 %v7369_v63, %v12585_v31  ;;  %v7370_v28 = vmul.f32 %v12592_v54, %v12592_v54 }
0x11ef   : > { %v7487_v40 = vmul.f32 %v7471_v46, %v12512_v27  ;;  %10357 = vtanh.f32 %v7430_v52  ;;  %v7432_v37 = vmul.f32 0.7978846, %v7416_v25  ;;  %v12603_v53 = vadd.f32 %v7352_v33, %v12497_v15 }
0x11f0   : > { %v10348_v41 = vpop.eup %10347  ;;  %10359 = vtanh.f32 %v7431_v23  ;;  %v7401_v36 = vmul.f32 0.044715, %v7385_v39  ;;  %v7386_v60 = vmul.f32 %v7370_v28, %v12592_v54  ;;  %v12607_v18 = vadd.f32 %v7354_v10, %v12501_v26 }
0x11f1   : > { %v10350_v57 = vpop.eup %10349  ;;  %v7501_v55 = vpack.c.bf16 %v7487_v40, %v12595_v21  ;;  %v7457_v56 = vadd.f32 1.0, %v10348_v41  ;;  %10361 = vtanh.f32 %v7432_v37  ;;  %v7371_v27 = vmul.f32 %v12603_v53, %v12603_v53 }
0x11f2   : > { %v10352_v0 = vpop.eup %10351  ;;  %v7417_v15 = vadd.f32 %v7401_v36, %v12585_v31  ;;  %v7402_v24 = vmul.f32 0.044715, %v7386_v60  ;;  %v7372_v2 = vmul.f32 %v12607_v18, %v12607_v18  ;;  %v7456_v6 = vadd.f32 1.0, %v10346_v20 }
0x11f3   : > { %v10354_v62 = vpop.eup %10353  ;;  %v7473_v34 = vmul.f32 0.5, %v7457_v56  ;;  %v7459_v26 = vadd.f32 1.0, %v10352_v0  ;;  %v7387_v47 = vmul.f32 %v7371_v27, %v12603_v53  ;;  %v7470_v38 = vmul.f32 0.5, %v7454_v11 }
0x11f4   : > { %v7433_v5 = vmul.f32 0.7978846, %v7417_v15  ;;  %v7418_v4 = vadd.f32 %v7402_v24, %v12592_v54  ;;  %v7388_v42 = vmul.f32 %v7372_v2, %v12607_v18  ;;  %v7472_v44 = vmul.f32 0.5, %v7456_v6 }
0x11f5   : > { %v7489_v48 = vmul.f32 %v7473_v34, %v12529_v13  ;;  %v7475_v7 = vmul.f32 0.5, %v7459_v26  ;;  %v7403_v12 = vmul.f32 0.044715, %v7387_v47  ;;  %v7486_v61 = vmul.f32 %v7470_v38, %v12507_v14 }
0x11f6   : > { %10363 = vtanh.f32 %v7433_v5  ;;  %v7434_v43 = vmul.f32 0.7978846, %v7418_v4  ;;  %v7404_v33 = vmul.f32 0.044715, %v7388_v42  ;;  %v7488_v17 = vmul.f32 %v7472_v44, %v12517_v8 }
0x11f7   : > { %v7491_v19 = vmul.f32 %v7475_v7, %v12539_v32  ;;  %v7419_v11 = vadd.f32 %v7403_v12, %v12603_v53  ;;  %v7458_v63 = vadd.f32 1.0, %v10350_v57  ;;  %v7460_v10 = vadd.f32 1.0, %v10354_v62 }
0x11f8   : > { %v10356_v20 = vpop.eup %10355  ;;  %10365 = vtanh.f32 %v7434_v43  ;;  %v7420_v21 = vadd.f32 %v7404_v33, %v12607_v18  ;;  %v7502_v13 = vpack.c.bf16 %v7488_v17, %v7486_v61  ;;  %v8747_v17 = vld [vmem:[%s12880_s17] ss:$0 sm:$0xff] }
0x11f9   : > { %v10358_v46 = vpop.eup %10357  ;;  %v7503_v52 = vpack.c.bf16 %v7491_v19, %v7489_v48  ;;  %v7435_v25 = vmul.f32 0.7978846, %v7419_v11  ;;  %v7474_v14 = vmul.f32 0.5, %v7458_v63  ;;  %v7476_v23 = vmul.f32 0.5, %v7460_v10  ;;  %v8764_v10 = vld [vmem:[%s11364_s26 + $0x5] ss:$0 sm:$0xff] }
0x11fa   : > { %v10360_v39 = vpop.eup %10359  ;;  %v7436_v28 = vmul.f32 0.7978846, %v7420_v21  ;;  %7676 = vmatprep.mubr.bf16.mxu0 %v7502_v13  ;;  %v7462_v8 = vadd.f32 1.0, %v10358_v46  ;;  %v7461_v40 = vadd.f32 1.0, %v10356_v20 }
0x11fb   : > { %v10362_v32 = vpop.eup %10361  ;;  %10367 = vtanh.f32 %v7435_v25  ;;  %7677 = vmatmul.mubr.bf16.vlgmr.msra.gmra.mrb[64].mxu0 %v7501_v55  ;;  %v7490_v37 = vmul.f32 %v7474_v14, %v12533_v29  ;;  %v7492_v41 = vmul.f32 %v7476_v23, %v12545_v22  ;;  %v7463_v36 = vadd.f32 1.0, %v10360_v39 }
0x11fc   : > { %10369 = vtanh.f32 %v7436_v28  ;;  %v7464_v60 = vadd.f32 1.0, %v10362_v32  ;;  %v7478_v57 = vmul.f32 0.5, %v7462_v8  ;;  %v7477_v56 = vmul.f32 0.5, %v7461_v40 }
0x11fd   : > { %v7504_v27 = vpack.c.bf16 %v7492_v41, %v7490_v37  ;;  %v7479_v0 = vmul.f32 0.5, %v7463_v36 }
0x11fe   : > { %v7480_v15 = vmul.f32 0.5, %v7464_v60  ;;  %v7493_v24 = vmul.f32 %v7477_v56, %v12557_v49  ;;  %v7494_v55 = vmul.f32 %v7478_v57, %v12561_v9 }
0x11ff   : > { %7684 = vmatprep.mubr.bf16.mxu1 %v7504_v27  ;;  %v7495_v2 = vmul.f32 %v7479_v0, %v12567_v3 }
0x1200   : > { %v10364_v6 = vpop.eup %10363  ;;  %7685 = vmatmul.mubr.bf16.vlgmr.msra.gmra.mrb[40].mxu1 %v7503_v52  ;;  %v7496_v29 = vmul.f32 %v7480_v15, %v12573_v30 }
0x1201   : > { %v7505_v22 = vpack.c.bf16 %v7495_v2, %v7493_v24  ;;  %v7465_v26 = vadd.f32 1.0, %v10364_v6 }
0x1202   : > { %v10366_v62 = vpop.eup %10365  ;;  %v7506_v34 = vpack.c.bf16 %v7496_v29, %v7494_v55 }
0x1203   : > { %v7466_v47 = vadd.f32 1.0, %v10366_v62  ;;  %v7481_v49 = vmul.f32 0.5, %v7465_v26 }
0x1204   : > { %7692 = vmatprep.mubr.bf16.mxu1 %v7506_v34 }
0x1205   : > { %v10368_v38 = vpop.eup %10367  ;;  %v7482_v3 = vmul.f32 0.5, %v7466_v47  ;;  %v7497_v30 = vmul.f32 %v7481_v49, %v12585_v31 }
0x1206   : > { %v10370_v5 = vpop.eup %10369  ;;  %v7467_v4 = vadd.f32 1.0, %v10368_v38 }
0x1207   : > { %v7468_v42 = vadd.f32 1.0, %v10370_v5  ;;  %v7498_v7 = vmul.f32 %v7482_v3, %v12592_v54 }
0x1208   : > { %7693 = vmatmul.mubr.bf16.gmra.mrb[44].mxu1 %v7505_v22  ;;  %v7483_v44 = vmul.f32 0.5, %v7467_v4 }
0x1209   : > { %v7484_v9 = vmul.f32 0.5, %v7468_v42 }
0x120a   : > { %v7499_v48 = vmul.f32 %v7483_v44, %v12603_v53 }
0x120b   : > { %v7500_v12 = vmul.f32 %v7484_v9, %v12607_v18 }
0x120c   : > { %v7507_v61 = vpack.c.bf16 %v7499_v48, %v7497_v30 }
0x120d   : > { %v7508_v43 = vpack.c.bf16 %v7500_v12, %v7498_v7 }
0x120f   : > { %7700 = vmatprep.mubr.bf16.mxu1 %v7508_v43 }
0x1210   : > { %7701 = vmatmul.mubr.bf16.gmra.mrb[48].mxu1 %v7507_v61 }
0x12ce   : > { %v8877_v33 = vpop.f32.mrb[64].mxu0 }
0x12cf   : > { %v8878_v19 = vpop.f32.mrb[65].mxu0 }
0x12d0   : > { %v8879_v11 = vadd.f32 %v8878_v19, %v8877_v33  ;;  %v8880_v63 = vpop.f32.mrb[66].mxu0 }
0x12d1   : > { %v8881_v20 = vpop.f32.mrb[67].mxu0 }
0x12d2   : > { %v7679_v21 = vadd.f32 %v8879_v11, %v8747_v17  ;;  %v8882_v31 = vadd.f32 %v8881_v20, %v8880_v63 }
0x12d3   : > { %v8883_v13 = vpop.f32.mrb[40].mxu1 }
0x12d4   : > { %v7715_v53 = vmul.f32 %v8764_v10, %v7679_v21  ;;  %v7682_v46 = vadd.f32 %v8882_v31, %v8747_v17  ;;  %v8884_v54 = vpop.f32.mrb[41].mxu1 }
0x12d5   : > { %v8885_v52 = vadd.f32 %v8884_v54, %v8883_v13  ;;  %v8886_v18 = vpop.f32.mrb[42].mxu1 }
0x12d6   : > { %v12639_v25 = vadd.f32 %v7715_v53, %v12373_v45  ;;  %v7716_v14 = vmul.f32 %v8764_v10, %v7682_v46  ;;  %v8887_v23 = vpop.f32.mrb[43].mxu1 }
0x12d7   : > { %v7687_v39 = vadd.f32 %v8885_v52, %v8747_v17  ;;  %v8888_v28 = vadd.f32 %v8887_v23, %v8886_v18 }
0x12d8   : > { %v12642_v8 = vadd.f32 %v7716_v14, %v12377_v16  ;;  %7735 = vst.msk [vmem:[#allocation2] sm:$0xff] (!%p8765_p9), %vm4701_vm3, %v12639_v25 }
0x12d9   : > { %v7717_v40 = vmul.f32 %v8764_v10, %v7687_v39  ;;  %v7690_v32 = vadd.f32 %v8888_v28, %v8747_v17 }
0x12da   : > { %7736 = vst.msk [vmem:[#allocation2 + $0x8] sm:$0xff] (!%p8765_p9), %vm4701_vm3, %v12642_v8 }
0x12db   : > { %v12645_v37 = vadd.f32 %v7717_v40, %v12381_v1  ;;  %v7718_v41 = vmul.f32 %v8764_v10, %v7690_v32  ;;  %v8889_v36 = vpop.f32.mrb[44].mxu1 }
0x12dc   : > { %v8890_v60 = vpop.f32.mrb[45].mxu1 }
0x12dd   : > { %v12648_v57 = vadd.f32 %v7718_v41, %v12375_v50  ;;  %v8891_v45 = vadd.f32 %v8890_v60, %v8889_v36  ;;  %v8892_v56 = vpop.f32.mrb[46].mxu1  ;;  %7737 = vst.msk [vmem:[#allocation2 + $0x10] sm:$0xff] (!%p8765_p9), %vm4701_vm3, %v12645_v37 }
0x12de   : > { %v8893_v27 = vpop.f32.mrb[47].mxu1 }
0x12df   : > { %v7695_v0 = vadd.f32 %v8891_v45, %v8747_v17  ;;  %v8894_v15 = vadd.f32 %v8893_v27, %v8892_v56  ;;  %7738 = vst.msk [vmem:[#allocation2 + $0x18] sm:$0xff] (!%p8765_p9), %vm4701_vm3, %v12648_v57 }
0x12e1   : > { %v7719_v24 = vmul.f32 %v8764_v10, %v7695_v0  ;;  %v7698_v2 = vadd.f32 %v8894_v15, %v8747_v17 }
0x12e3   : > { %v7727_v16 = vadd.f32 %v7719_v24, %v12389_v35  ;;  %v7720_v6 = vmul.f32 %v8764_v10, %v7698_v2  ;;  %v8895_v55 = vpop.f32.mrb[48].mxu1 }
0x12e4   : > { %v8896_v29 = vpop.f32.mrb[49].mxu1 }
0x12e5   : > { %v7728_v1 = vadd.f32 %v7720_v6, %v12393_v58  ;;  %v8897_v22 = vadd.f32 %v8896_v29, %v8895_v55  ;;  %v8898_v62 = vpop.f32.mrb[50].mxu1  ;;  %7739 = vst.msk [vmem:[#allocation2 + $0x20] sm:$0xff] (!%p8765_p9), %vm4701_vm3, %v7727_v16 }
0x12e6   : > { %v8899_v34 = vpop.f32.mrb[51].mxu1 }
0x12e7   : > { %v7703_v26 = vadd.f32 %v8897_v22, %v8747_v17  ;;  %v8900_v50 = vadd.f32 %v8899_v34, %v8898_v62  ;;  %7734 = sbr.rel (%p8765_p9) target bundleno = 4848 (0x12f0), region = 152  ;;  %7740 = vst.msk [vmem:[#allocation2 + $0x28] sm:$0xff] (!%p8765_p9), %vm4701_vm3, %v7728_v1 }
0x12e9   : > { %v7721_v47 = vmul.f32 %v8764_v10, %v7703_v26  ;;  %v7706_v38 = vadd.f32 %v8900_v50, %v8747_v17 }
0x12eb   : > { %v12653_v5 = vadd.f32 %v7721_v47, %v12391_v51  ;;  %v7722_v4 = vmul.f32 %v8764_v10, %v7706_v38 }
0x12ed   : > { %v12656_v49 = vadd.f32 %v7722_v4, %v12397_v59  ;;  %7741 = vst.msk [vmem:[#allocation2 + $0x30] sm:$0xff] (!%p8765_p9), %vm4701_vm3, %v12653_v5 }
0x12ef   : > { %7742 = vst.msk [vmem:[#allocation2 + $0x38] sm:$0xff] %vm4701_vm3, %v12656_v49 }
0x12f0 PF: > { %p8766_p10 = scmp.ne.s32.totalorder %s10421_s22, 1 }
0x12f1   : > { %v7747_v35 = vsel (!%p8766_p10), %vm4701_vm3, %v12639_v25, 0.0  ;;  %v7759_v51 = vsel (!%p8766_p10), %vm4701_vm3, %v7727_v16, 0.0  ;;  %v7750_v58 = vsel (!%p8766_p10), %vm4701_vm3, %v12642_v8, 0.0  ;;  %v7762_v59 = vsel (!%p8766_p10), %vm4701_vm3, %v7728_v1, 0.0  ;;  %v10379_v2 = vld [vmem:[%s10637_s12] sm:$0xff] (!%p8766_p10)   ;;  %v10381_v6 = vld [vmem:[%s10637_s12 + $0x10] sm:$0xff] (!%p8766_p10)  }
0x12f2   : > { %7746 = sbr.rel (%p8766_p10) target bundleno = 5398 (0x1516), region = 156  ;;  %7748 = vadd.xlane.f32.xlu0 (!%p8766_p10), %v7747_v35  ;;  %7760 = vadd.xlane.f32.xlu1 (!%p8766_p10), %v7759_v51  ;;  %v7753_v42 = vsel (!%p8766_p10), %vm4701_vm3, %v12645_v37, 0.0  ;;  %v7756_v3 = vsel (!%p8766_p10), %vm4701_vm3, %v12648_v57, 0.0  ;;  %v7765_v44 = vsel (!%p8766_p10), %vm4701_vm3, %v12653_v5, 0.0  ;;  %v7768_v9 = vsel (!%p8766_p10), %vm4701_vm3, %v12656_v49, 0.0  ;;  %v10382_v55 = vld [vmem:[%s10637_s12 + $0x18] sm:$0xff] (!%p8766_p10)  }
0x12f3   : > { %9063 = vmatprep.subr.bf16.mxu0 (!%p8766_p10), %v10379_v2  ;;  %9123 = vmatprep.subr.bf16.mxu1 (!%p8766_p10), %v10379_v2  ;;  %s12881_s22 = sld [smem:[#allocation21_spill]] (!%p8766_p10)  ;;  %s12882_s0 = sld [smem:[#allocation22_spill]] (!%p8766_p10) }
0x12f4   : > { %9064 = vmatpush3.bf16.msra.mxu0 (!%p8766_p10), %v10379_v2  ;;  %9127 = vmatpush3.bf16.msra.mxu1 (!%p8766_p10), %v10379_v2  ;;  %s12883_s2 = sld [smem:[#allocation29_spill]] (!%p8766_p10) }
0x12f6   : > { %7751 = vadd.xlane.f32.xlu0 (!%p8766_p10), %v7750_v58  ;;  %7763 = vadd.xlane.f32.xlu1 (!%p8766_p10), %v7762_v59 }
0x12fa   : > { %7754 = vadd.xlane.f32.xlu0 %v7753_v42  ;;  %7757 = vadd.xlane.f32.xlu1 %v7756_v3 }
0x12fe   : > { %7766 = vadd.xlane.f32.xlu0 %v7765_v44  ;;  %7769 = vadd.xlane.f32.xlu1 %v7768_v9 }
0x137f   : > { %v7749_v30 = vpop.xlane.xlu0 %7748  ;;  %v7761_v48 = vpop.xlane.xlu1 %7760 }
0x1380   : > { %v7771_v7 = vmul.f32 0.015625, %v7749_v30  ;;  %v7775_v12 = vmul.f32 0.015625, %v7761_v48 }
0x1382   : > { %v12689_v61 = vsub.f32 %v12639_v25, %v7771_v7  ;;  %v12691_v43 = vsub.f32 %v7727_v16, %v7775_v12  ;;  %v10380_v16 = vld [vmem:[%s10637_s12 + $0x8] sm:$0xff]  }
0x1383   : > { %v7752_v33 = vpop.xlane.xlu0 %7751  ;;  %v7764_v17 = vpop.xlane.xlu1 %7763  ;;  %9065 = vmatprep.subr.bf16.mxu0 %v10380_v16  ;;  %9124 = vmatprep.subr.bf16.mxu1 %v10380_v16 }
0x1384   : > { %v7772_v19 = vmul.f32 0.015625, %v7752_v33  ;;  %v7776_v11 = vmul.f32 0.015625, %v7764_v17  ;;  %v7787_v63 = vmul.f32 %v12689_v61, %v12689_v61  ;;  %v7791_v10 = vmul.f32 %v12691_v43, %v12691_v43  ;;  %9066 = vmatpush3.bf16.msra.mxu0 %v10380_v16  ;;  %9128 = vmatpush3.bf16.msra.mxu1 %v10380_v16  ;;  %v8767_v17 = vld [vmem:[%s12881_s22] ss:$0 sm:$0xff] }
0x1385   : > { %9067 = vmatprep.subr.bf16.mxu0 %v10381_v6  ;;  %9125 = vmatprep.subr.bf16.mxu1 %v10381_v6 }
0x1386   : > { %v12698_v20 = vsub.f32 %v12642_v8, %v7772_v19  ;;  %v12700_v21 = vsub.f32 %v7728_v1, %v7776_v11  ;;  %v7795_v31 = vsel %vm4701_vm3, %v7787_v63, 0.0  ;;  %v7807_v46 = vsel %vm4701_vm3, %v7791_v10, 0.0 }
0x1387   : > { %7796 = vadd.xlane.f32.xlu0 %v7795_v31  ;;  %v7755_v13 = vpop.xlane.xlu0 %7754  ;;  %v7758_v53 = vpop.xlane.xlu1 %7757 }
0x1388   : > { %v7773_v54 = vmul.f32 0.015625, %v7755_v13  ;;  %v7774_v52 = vmul.f32 0.015625, %v7758_v53  ;;  %v7788_v18 = vmul.f32 %v12698_v20, %v12698_v20  ;;  %v7792_v25 = vmul.f32 %v12700_v21, %v12700_v21  ;;  %9068 = vmatpush3.bf16.msra.mxu0 %v10381_v6  ;;  %9129 = vmatpush3.bf16.msra.mxu1 %v10381_v6  ;;  %v8768_v13 = vld [vmem:[%s10632_s20] ss:$0 sm:$0xff] }
0x1389   : > { %9069 = vmatprep.subr.bf16.mxu0 %v10382_v55  ;;  %9126 = vmatprep.subr.bf16.mxu1 %v10382_v55 }
0x138a   : > { %v12709_v14 = vsub.f32 %v12645_v37, %v7773_v54  ;;  %v12712_v23 = vsub.f32 %v12648_v57, %v7774_v52  ;;  %v7798_v39 = vsel %vm4701_vm3, %v7788_v18, 0.0  ;;  %v7810_v40 = vsel %vm4701_vm3, %v7792_v25, 0.0 }
0x138b   : > { %7808 = vadd.xlane.f32.xlu0 %v7807_v46  ;;  %7799 = vadd.xlane.f32.xlu1 %v7798_v39  ;;  %v7767_v28 = vpop.xlane.xlu0 %7766  ;;  %v7770_v8 = vpop.xlane.xlu1 %7769 }
0x138c   : > { %v7777_v32 = vmul.f32 0.015625, %v7767_v28  ;;  %v7778_v41 = vmul.f32 0.015625, %v7770_v8  ;;  %v7789_v36 = vmul.f32 %v12709_v14, %v12709_v14  ;;  %v7790_v37 = vmul.f32 %v12712_v23, %v12712_v23  ;;  %9070 = vmatpush3.bf16.msra.mxu0 %v10382_v55  ;;  %9130 = vmatpush3.bf16.msra.mxu1 %v10382_v55  ;;  %v8769_v55 = vld [vmem:[%s12882_s0] ss:$0 sm:$0xff] }
0x138e   : > { %v12721_v60 = vsub.f32 %v12653_v5, %v7777_v32  ;;  %v12724_v57 = vsub.f32 %v12656_v49, %v7778_v41  ;;  %v7801_v45 = vsel %vm4701_vm3, %v7789_v36, 0.0  ;;  %v7804_v56 = vsel %vm4701_vm3, %v7790_v37, 0.0 }
0x138f   : > { %7811 = vadd.xlane.f32.xlu1 %v7810_v40  ;;  %7802 = vadd.xlane.f32.xlu0 %v7801_v45 }
0x1390   : > { %v7793_v27 = vmul.f32 %v12721_v60, %v12721_v60  ;;  %v7794_v0 = vmul.f32 %v12724_v57, %v12724_v57 }
0x1392   : > { %v7813_v15 = vsel %vm4701_vm3, %v7793_v27, 0.0  ;;  %v7816_v24 = vsel %vm4701_vm3, %v7794_v0, 0.0 }
0x1393   : > { %7805 = vadd.xlane.f32.xlu1 %v7804_v56  ;;  %7814 = vadd.xlane.f32.xlu0 %v7813_v15 }
0x1397   : > { %7817 = vadd.xlane.f32.xlu1 %v7816_v24 }
0x1414   : > { %v7797_v29 = vpop.xlane.xlu0 %7796 }
0x1415   : > { %v7819_v1 = vmul.f32 0.015625, %v7797_v29 }
0x1417   : > { %v7827_v22 = vadd.f32 1e-05, %v7819_v1 }
0x1418   : > { %v7800_v62 = vpop.xlane.xlu1 %7799  ;;  %v7809_v34 = vpop.xlane.xlu0 %7808 }
0x1419   : > { %10383 = vrsqrt.f32 %v7827_v22  ;;  %v7820_v26 = vmul.f32 0.015625, %v7800_v62  ;;  %v7823_v50 = vmul.f32 0.015625, %v7809_v34 }
0x141b   : > { %v7828_v47 = vadd.f32 1e-05, %v7820_v26  ;;  %v7831_v38 = vadd.f32 1e-05, %v7823_v50 }
0x141c   : > { %v7812_v5 = vpop.xlane.xlu1 %7811  ;;  %v7803_v4 = vpop.xlane.xlu0 %7802 }
0x141d   : > { %10385 = vrsqrt.f32 %v7828_v47  ;;  %v7824_v49 = vmul.f32 0.015625, %v7812_v5  ;;  %v7821_v35 = vmul.f32 0.015625, %v7803_v4 }
0x141e   : > { %10387 = vrsqrt.f32 %v7831_v38 }
0x141f   : > { %v7832_v51 = vadd.f32 1e-05, %v7824_v49  ;;  %v7829_v58 = vadd.f32 1e-05, %v7821_v35 }
0x1420   : > { %v7806_v59 = vpop.xlane.xlu1 %7805  ;;  %v7815_v42 = vpop.xlane.xlu0 %7814 }
0x1421   : > { %10389 = vrsqrt.f32 %v7832_v51  ;;  %v7822_v3 = vmul.f32 0.015625, %v7806_v59  ;;  %v7825_v44 = vmul.f32 0.015625, %v7815_v42 }
0x1422   : > { %10391 = vrsqrt.f32 %v7829_v58 }
0x1423   : > { %v10384_v9 = vpop.eup %10383  ;;  %v7830_v30 = vadd.f32 1e-05, %v7822_v3  ;;  %v7833_v48 = vadd.f32 1e-05, %v7825_v44 }
0x1424   : > { %v7818_v7 = vpop.xlane.xlu1 %7817  ;;  %v7843_v12 = vmul.f32 %v10384_v9, %v12689_v61 }
0x1425   : > { %10393 = vrsqrt.f32 %v7830_v30  ;;  %v7826_v33 = vmul.f32 0.015625, %v7818_v7 }
0x1426   : > { %10395 = vrsqrt.f32 %v7833_v48  ;;  %v7858_v31 = vmul.f32 %v8767_v17, %v7843_v12 }
0x1427   : > { %v10386_v19 = vpop.eup %10385  ;;  %v7834_v11 = vadd.f32 1e-05, %v7826_v33 }
0x1428   : > { %v10388_v63 = vpop.eup %10387  ;;  %v7844_v10 = vmul.f32 %v10386_v19, %v12698_v20  ;;  %v7873_v18 = vadd.f32 %v8768_v13, %v7858_v31 }
0x1429   : > { %10397 = vrsqrt.f32 %v7834_v11  ;;  %v7847_v53 = vmul.f32 %v10388_v63, %v12691_v43 }
0x142a   : > { %v7859_v46 = vmul.f32 %v8767_v17, %v7844_v10 }
0x142b   : > { %v10390_v54 = vpop.eup %10389  ;;  %v7862_v39 = vmul.f32 %v8767_v17, %v7847_v53 }
0x142c   : > { %v10392_v52 = vpop.eup %10391  ;;  %v7874_v25 = vadd.f32 %v8768_v13, %v7859_v46  ;;  %v7848_v61 = vmul.f32 %v10390_v54, %v12700_v21 }
0x142d   : > { %v7845_v28 = vmul.f32 %v10392_v52, %v12709_v14  ;;  %v7877_v20 = vadd.f32 %v8768_v13, %v7862_v39 }
0x142e   : > { %v7881_v8 = vpack.c.bf16 %v7874_v25, %v7873_v18  ;;  %v7863_v40 = vmul.f32 %v8767_v17, %v7848_v61 }
0x142f   : > { %v10394_v32 = vpop.eup %10393  ;;  %v7860_v37 = vmul.f32 %v8767_v17, %v7845_v28 }
0x1430   : > { %v10396_v41 = vpop.eup %10395  ;;  %9071 = vmatprep.mubr.msk.bf16.mxu0 %vm4701_vm3, %v7881_v8  ;;  %v7878_v36 = vadd.f32 %v8768_v13, %v7863_v40  ;;  %v7846_v43 = vmul.f32 %v10394_v32, %v12712_v23 }
0x1431   : > { %v7849_v45 = vmul.f32 %v10396_v41, %v12721_v60  ;;  %v7875_v14 = vadd.f32 %v8768_v13, %v7860_v37 }
0x1432   : > { %v7883_v56 = vpack.c.bf16 %v7878_v36, %v7877_v20  ;;  %v7861_v27 = vmul.f32 %v8767_v17, %v7846_v43 }
0x1433   : > { %v10398_v21 = vpop.eup %10397  ;;  %v7864_v24 = vmul.f32 %v8767_v17, %v7849_v45 }
0x1434   : > { %9075 = vmatprep.mubr.msk.bf16.mxu1 %vm4701_vm3, %v7883_v56  ;;  %v7876_v0 = vadd.f32 %v8768_v13, %v7861_v27  ;;  %v7850_v15 = vmul.f32 %v10398_v21, %v12724_v57 }
0x1435   : > { %v7879_v23 = vadd.f32 %v8768_v13, %v7864_v24 }
0x1436   : > { %v7882_v2 = vpack.c.bf16 %v7876_v0, %v7875_v14  ;;  %v7865_v16 = vmul.f32 %v8767_v17, %v7850_v15 }
0x1438   : > { %9072 = vmatmul.mubr.msk.bf16.vlgmr.msra.gmra.mrb[0].mxu0 %vm4701_vm3, %v7882_v2  ;;  %v7880_v60 = vadd.f32 %v8768_v13, %v7865_v16 }
0x143a   : > { %v7884_v6 = vpack.c.bf16 %v7880_v60, %v7879_v23 }
0x143c   : > { %9076 = vmatmul.mubr.msk.bf16.vlgmr.msra.gmra.mrb[0].mxu1 %vm4701_vm3, %v7884_v6 }
0x150b   : > { %v9073_v29 = vpop.f32.mrb[0].mxu0 }
0x150c   : > { %v7979_v1 = vadd.f32 %v9073_v29, %v8769_v55  ;;  %v7970_v22 = vpop.f32.mrb[1].mxu0 }
0x150d   : > { %v7971_v62 = vadd.f32 %v8769_v55, %v7970_v22  ;;  %v9074_v57 = vpop.f32.mrb[2].mxu0 }
0x150e   : > { %8003 = vst [vmem:[%s12883_s2 + $0x10] sm:$0xff] %v7979_v1  ;;  %v7982_v34 = vadd.f32 %v9074_v57, %v8769_v55  ;;  %v7973_v26 = vpop.f32.mrb[3].mxu0 }
0x150f   : > { %8001 = vst [vmem:[%s12883_s2] sm:$0xff] %v7971_v62  ;;  %v7974_v50 = vadd.f32 %v8769_v55, %v7973_v26  ;;  %v9077_v47 = vpop.f32.mrb[0].mxu1 }
0x1510   : > { %8004 = vst [vmem:[%s12883_s2 + $0x18] sm:$0xff] %v7982_v34  ;;  %v7995_v38 = vadd.f32 %v9077_v47, %v8769_v55  ;;  %v7986_v5 = vpop.f32.mrb[1].mxu1 }
0x1511   : > { %8002 = vst [vmem:[%s12883_s2 + $0x8] sm:$0xff] %v7974_v50  ;;  %v7987_v4 = vadd.f32 %v8769_v55, %v7986_v5  ;;  %v9078_v49 = vpop.f32.mrb[2].mxu1 }
0x1512   : > { %8007 = vst [vmem:[%s12883_s2 + $0x30] sm:$0xff] %v7995_v38  ;;  %v7998_v35 = vadd.f32 %v9078_v49, %v8769_v55  ;;  %v7989_v51 = vpop.f32.mrb[3].mxu1 }
0x1513   : > { %8005 = vst [vmem:[%s12883_s2 + $0x20] sm:$0xff] %v7987_v4  ;;  %v7990_v58 = vadd.f32 %v8769_v55, %v7989_v51 }
0x1514   : > { %8008 = vst [vmem:[%s12883_s2 + $0x38] sm:$0xff] %v7998_v35 }
0x1515   : > { %8006 = vst [vmem:[%s12883_s2 + $0x28] sm:$0xff] %v7990_v58 }
0x1516 PF: > { %s12884_s16 = sld [smem:[#allocation26_spill]]  ;;  %s12885_s22 = sld [smem:[#allocation24_spill]] }
0x1517   : > { %s12886_s26 = sld [smem:[#allocation25_spill]]  ;;  %s12887_s28 = sld [smem:[#allocation27_spill]] }
0x1518   : > { %s12888_s3 = sld [smem:[#allocation28_spill]] }
0x151c   : > { %s73_s1 = sadd.s32 1, %s12884_s16  }
0x151d   : > { %p70_p11 = scmp.ge.s32.totalorder %s73_s1, 6   ;;  %12889 = sst [smem:[#allocation24_spill]] %s12886_s26 }
0x151e   : > { %s12890_s26 = smov %s12887_s28  ;;  %s12891_s28 = smov %s12888_s3 }
0x151f   :  { %72 = sbr.rel (!%p70_p11) target bundleno = 58 (0x3a), region = 259 }

</bundles_post_ra>
